<compile_context>
chip_gen: v5e
topology: v5e:2x2
jax: 0.10.0
libtpu: 0.0.40
codegen_flags: <defaults>
</compile_context>

<pallas_src>
import functools
import math

import numpy as np
import jax
import jax.numpy as jnp
from jax import lax
from jax.experimental import pallas as pl
from jax.experimental.pallas import tpu as pltpu


# ----------------------------------------------------------------------------
# Row-tile selection: largest multiple of J that divides N, capped at `target`
# rows, and (when possible) leaving >=2 grid steps so both v7x TensorCores are
# fed via dimension_semantics=("parallel",).
# ----------------------------------------------------------------------------
def _choose_tm(n_rows, j, target=1024):
    target = min(target, max(j, n_rows // 2))
    q = n_rows // j
    best = j
    for d in range(1, q + 1):
        if q % d == 0 and d * j <= target:
            best = max(best, d * j)
    return best


# ----------------------------------------------------------------------------
# Exact-erf GELU (torch.nn.GELU default).  Abramowitz & Stegun 7.1.26
# polynomial, |abs err| < 1.5e-7, built only from ops with guaranteed Mosaic
# lowerings (mul/add/div/exp/abs/select).
# ----------------------------------------------------------------------------
def _erf_approx(z):
    a1, a2, a3, a4, a5 = (0.254829592, -0.284496736, 1.421413741,
                          -1.453152027, 1.061405429)
    p = 0.3275911
    sign = jnp.where(z >= 0.0, 1.0, -1.0)
    za = jnp.abs(z)
    t = 1.0 / (1.0 + p * za)
    poly = ((((a5 * t + a4) * t + a3) * t + a2) * t + a1) * t
    return sign * (1.0 - poly * jnp.exp(-za * za))


def _gelu_erf(x):
    return 0.5 * x * (1.0 + _erf_approx(x * 0.7071067811865476))


# ----------------------------------------------------------------------------
# Fused forward kernel (one row tile of TM rows per grid step).
# ----------------------------------------------------------------------------
def _fused_kernel(xm_ref, pos_ref, wemb_ref, bemb_ref, memb_ref,
                  ng_ref, nb_ref, lg_ref, lb_ref, w1_ref, b1_ref, w2_ref,
                  b2_ref, loss_ref, *, c_in, n_layers, top_k, scale):
    eps = 1e-5

    def ln(z, g, b):
        mu = jnp.mean(z, axis=-1, keepdims=True)
        zc = z - mu
        var = jnp.mean(zc * zc, axis=-1, keepdims=True)
        return zc * lax.rsqrt(var + eps) * g + b

    # TODO(synk): `create_layers` (MotionAGFormer spatio-temporal graph/attn
    # blocks) is defined outside the given module; a row-wise pre-LN MLP(GELU)
    # residual block with the configured mlp_ratio is used as a stand-in.
    def block(z, l):
        h = ln(z, lg_ref[l:l + 1, :], lb_ref[l:l + 1, :])
        h = jnp.dot(h.astype(jnp.bfloat16), w1_ref[l],
                    preferred_element_type=jnp.float32) + b1_ref[l:l + 1, :]
        h = _gelu_erf(h)                          # torch nn.GELU (exact erf)
        h = jnp.dot(h.astype(jnp.bfloat16), w2_ref[l],
                    preferred_element_type=jnp.float32) + b2_ref[l:l + 1, :]
        return z + h

    # ---- packed input tile: columns [0, c_in) are the pose channels,
    #      column c_in is the {0,1} mask (single DMA stream per step).
    xm = xm_ref[...]                              # (TM, c_in+1) f32
    x = xm[:, :c_in]
    m = xm[:, c_in:c_in + 1]                      # (TM, 1) float {0,1}

    # ---- joints_embed + pos_embed: K = c_in (==3) is tiny, so run it as
    #      broadcast FMAs on the VPU instead of a (TM,3)x(3,D) MXU matmul.
    h = bemb_ref[...] + pos_ref[...]              # (1,D) + (TM,D)
    for k in range(c_in):
        h = h + x[:, k:k + 1] * wemb_ref[k:k + 1, :]

    pre = h                                       # pre_encoder_features
    hs = m * memb_ref[...] + (1.0 - m) * h        # index_put(mask, mask_emb)

    # ---- student encoder + final LayerNorm (self.norm) --------------------
    for l in range(n_layers):
        hs = block(hs, l)
    xs = ln(hs, ng_ref[...], nb_ref[...])

    # ---- EMA teacher on un-masked features; top-k layer targets ----------
    # TODO(synk): EMA decay update is training state, not forward compute;
    # the teacher runs an identical parameter copy (ema_encoder_only=True).
    ht = pre
    tgt = jnp.zeros_like(pre)
    for l in range(n_layers):
        ht = block(ht, l)
        if l >= n_layers - top_k:                 # layer_norm_target_layer
            tgt = tgt + ln(ht, 1.0, 0.0)
    y = tgt * (1.0 / top_k)

    # ---- masked d2v regression loss, reduced over the feature dim ---------
    d = xs - y
    loss_ref[...] = jnp.sum(d * d, axis=-1, keepdims=True) * scale * m


def pose2vec_fused(xm_flat, pos_tile, params, *, tm, n_layers, top_k, scale):
    n, c_in_p1 = xm_flat.shape
    c_in = c_in_p1 - 1
    d = params['w_embed'].shape[1]
    hidden = params['w1'].shape[-1]
    L = n_layers
    assert n % tm == 0

    def const2(shape):
        return pl.BlockSpec(shape, lambda i: (0, 0))

    def const3(shape):
        return pl.BlockSpec(shape, lambda i: (0, 0, 0))

    kernel = functools.partial(_fused_kernel, c_in=c_in, n_layers=n_layers,
                               top_k=top_k, scale=scale)
    # Note (v7x, large configs): constant-index weight specs could additionally
    # use pipeline_mode=pl.Buffered(...) to trim their double-buffered VMEM.
    return pl.pallas_call(
        kernel,
        out_shape=jax.ShapeDtypeStruct((n, 1), jnp.float32),
        grid=(n // tm,),
        in_specs=[
            pl.BlockSpec((tm, c_in_p1), lambda i: (i, 0)),  # x rows + mask col
            const2((tm, d)),                              # pos tile (resident)
            const2((c_in, d)),                            # w_embed
            const2((1, d)),                               # b_embed
            const2((1, d)),                               # mask_emb
            const2((1, d)),                               # final-norm gamma
            const2((1, d)),                               # final-norm beta
            const2((L, d)),                               # per-layer LN gamma
            const2((L, d)),                               # per-layer LN beta
            const3((L, d, hidden)),                       # W1 (bf16)
            const2((L, hidden)),                          # b1
            const3((L, hidden, d)),                       # W2 (bf16)
            const2((L, d)),                               # b2
        ],
        out_specs=pl.BlockSpec((tm, 1), lambda i: (i, 0)),
        compiler_params=pltpu.CompilerParams(
            dimension_semantics=("parallel",),
            # above the 16/32 MiB scoped defaults, below v7x's 64 MiB physical
            vmem_limit_bytes=48 * 1024 * 1024),
    )(xm_flat, pos_tile,
      params['w_embed'], params['b_embed'], params['mask_emb'],
      params['norm_g'], params['norm_b'],
      params['ln_g'], params['ln_b'],
      params['w1'], params['b1'], params['w2'], params['b2'])


# ----------------------------------------------------------------------------
# Host glue: span-mask generation (numpy, like compute_mask_indices with
# mask_type='static', num_mask_ver=2, require_same_masks=True).
# TODO(synk): no_overlap / mask_dropout / add_masks branches omitted.
# ----------------------------------------------------------------------------
def compute_mask_indices_np(bsz, frame_sz, jsz, mask_prob, mask_length,
                            min_masks=1, seed=0):
    rng = np.random.default_rng(seed)
    masks = np.zeros((bsz, frame_sz, jsz), dtype=bool)
    for b in range(bsz):
        idcs = []
        for _ in range(frame_sz):
            num_mask = int(mask_prob * jsz / float(mask_length) + rng.random())
            num_mask = max(min_masks, num_mask)
            min_len = mask_length
            if jsz - min_len <= num_mask:
                min_len = jsz - num_mask - 1
            starts = rng.choice(jsz - min_len, num_mask, replace=False)
            idc = np.asarray([s + off for s in starts for off in range(mask_length)])
            idc = np.unique(idc[idc < jsz])
            idcs.append(idc)
        target_len = min(len(m) for m in idcs)       # require_same_masks
        for t, idc in enumerate(idcs):
            if len(idc) > target_len:
                idc = rng.choice(idc, target_len, replace=False)
            masks[b, t, idc] = True
    return masks


# ----------------------------------------------------------------------------
# Parameter init (deterministic, torch-like uniform fan-in init).
# Layer weights are stacked along a leading layer axis and stored in bf16 so
# the fused kernel holds them resident with half the HBM/VMEM footprint.
# ----------------------------------------------------------------------------
def init_params(key, dim_in, dim_feat, num_joints, n_layers, mlp_ratio):
    hidden = dim_feat * mlp_ratio
    keys = iter(jax.random.split(key, 3 + 4 * n_layers))

    def lin(k, fan_in, shape):
        bound = 1.0 / math.sqrt(fan_in)
        return jax.random.uniform(k, shape, jnp.float32, -bound, bound)

    params = {
        # nn.Parameter(torch.FloatTensor(dim_feat).uniform_())  ->  U(0, 1)
        'mask_emb': jax.random.uniform(next(keys), (1, dim_feat), jnp.float32),
        'w_embed': lin(next(keys), dim_in, (dim_in, dim_feat)),
        'b_embed': lin(next(keys), dim_in, (1, dim_feat)),
        'pos_embed': jnp.zeros((num_joints, dim_feat), jnp.float32),  # zeros
        'norm_g': jnp.ones((1, dim_feat), jnp.float32),
        'norm_b': jnp.zeros((1, dim_feat), jnp.float32),
        'ln_g': jnp.ones((n_layers, dim_feat), jnp.float32),
        'ln_b': jnp.zeros((n_layers, dim_feat), jnp.float32),
    }
    w1 = jnp.stack([lin(next(keys), dim_feat, (dim_feat, hidden))
                    for _ in range(n_layers)])
    b1 = jnp.stack([lin(next(keys), dim_feat, (hidden,))
                    for _ in range(n_layers)])
    w2 = jnp.stack([lin(next(keys), hidden, (hidden, dim_feat))
                    for _ in range(n_layers)])
    b2 = jnp.stack([lin(next(keys), hidden, (dim_feat,))
                    for _ in range(n_layers)])
    params['w1'] = w1.astype(jnp.bfloat16)
    params['b1'] = b1
    params['w2'] = w2.astype(jnp.bfloat16)
    params['b2'] = b2
    return params


# ----------------------------------------------------------------------------
# Full forward.
# Assumed config (Motion2VecConfig / M2vPoseConfig not provided in-source):
# clone_batch=1, num_extra_tokens=0, dropout_input=0 (eval), loss_beta=0,
# loss_scale=None, d2v_loss=1.0, ema_encoder_only=True,
# layer_norm_target_layer=True, other target-norm flags False.
# ----------------------------------------------------------------------------
def pose2vec_forward(x, params, mask_np, average_top_k_layers=2,
                     loss_scale=None):
    B, T, J, c_in = x.shape
    D = params['w_embed'].shape[1]
    n_layers = params['w1'].shape[0]
    N = B * T * J

    tm = _choose_tm(N, J)
    x_flat = x.reshape(N, c_in).astype(jnp.float32)
    mask_flat = jnp.asarray(mask_np.reshape(N, 1), jnp.float32)
    # Pack the mask as an extra input channel so each grid step needs only a
    # single small input DMA: [TM, c_in + 1].
    xm_flat = jnp.concatenate([x_flat, mask_flat], axis=1)
    # (J, D) positional table repeated to one TM-row tile; tm % J == 0, so
    # tile row r always maps to joint r % J (no [N, D] pos slab in HBM).
    pos_tile = jnp.tile(params['pos_embed'], (tm // J, 1))

    scale = float(loss_scale) if loss_scale is not None else 1.0 / math.sqrt(D)
    top_k = min(average_top_k_layers, n_layers)

    loss_rows = pose2vec_fused(xm_flat, pos_tile, params,
                               tm=tm, n_layers=n_layers, top_k=top_k,
                               scale=scale)

    # TODO(synk): the torch module returns the unreduced per-element masked
    # loss; the d2v criterion consumes loss.sum()/sample_size, which this
    # in-kernel-reduced sum reproduces exactly without an [N, D] HBM slab.
    reg_loss = jnp.sum(loss_rows)                       # * cfg.d2v_loss (=1.0)
    sample_size = jnp.sum(mask_flat).astype(jnp.int32)

    return {'losses': {'pose_regression': reg_loss},
            'sample_size': sample_size}


if __name__ == "__main__":
    # Small shapes consistent with the module's [B, T, J, C] convention.
    B, T, J, C_IN = 2, 8, 16, 3
    DIM_FEAT, N_LAYERS, MLP_RATIO = 32, 2, 4

    key = jax.random.PRNGKey(0)
    k_x, k_p = jax.random.split(key)
    x = jax.random.normal(k_x, (B, T, J, C_IN), jnp.float32)
    params = init_params(k_p, C_IN, DIM_FEAT, J, N_LAYERS, MLP_RATIO)

    mask = compute_mask_indices_np(B, T, J, mask_prob=0.5, mask_length=2,
                                   min_masks=1, seed=0)

    out = pose2vec_forward(x, params, mask, average_top_k_layers=2,
                           loss_scale=None)
    jax.block_until_ready(out['losses']['pose_regression'])
    jax.block_until_ready(out['sample_size'])
    print("KERNEL_OK")
</pallas_src>

<mosaic_0001>
module attributes {stable_mosaic.version = 11 : i64} {
  func.func @_fused_kernel(%arg0: i32, %arg1: memref<128x4xf32, #tpu.memory_space<vmem>>, %arg2: memref<128x32xf32, #tpu.memory_space<vmem>>, %arg3: memref<3x32xf32, #tpu.memory_space<vmem>>, %arg4: memref<1x32xf32, #tpu.memory_space<vmem>>, %arg5: memref<1x32xf32, #tpu.memory_space<vmem>>, %arg6: memref<1x32xf32, #tpu.memory_space<vmem>>, %arg7: memref<1x32xf32, #tpu.memory_space<vmem>>, %arg8: memref<2x32xf32, #tpu.memory_space<vmem>>, %arg9: memref<2x32xf32, #tpu.memory_space<vmem>>, %arg10: memref<2x32x128xbf16, #tpu.memory_space<vmem>>, %arg11: memref<2x128xf32, #tpu.memory_space<vmem>>, %arg12: memref<2x128x32xbf16, #tpu.memory_space<vmem>>, %arg13: memref<2x32xf32, #tpu.memory_space<vmem>>, %arg14: memref<128x1xf32, #tpu.memory_space<vmem>>) attributes {dimension_semantics = [#tpu.dimension_semantics<parallel>], iteration_bounds = array<i64: 2>, scalar_prefetch = 0 : i64, scratch_operands = 0 : i64, tpu.core_type = #tpu.core_type<tc>, window_params = [{transform_indices = @transform_0, window_bounds = array<i64: 128, 4>}, {pipeline_mode = #tpu.pipeline_mode<synchronous>, transform_indices = @transform_1, window_bounds = array<i64: 128, 32>}, {pipeline_mode = #tpu.pipeline_mode<synchronous>, transform_indices = @transform_2, window_bounds = array<i64: 3, 32>}, {pipeline_mode = #tpu.pipeline_mode<synchronous>, transform_indices = @transform_3, window_bounds = array<i64: 1, 32>}, {pipeline_mode = #tpu.pipeline_mode<synchronous>, transform_indices = @transform_4, window_bounds = array<i64: 1, 32>}, {pipeline_mode = #tpu.pipeline_mode<synchronous>, transform_indices = @transform_5, window_bounds = array<i64: 1, 32>}, {pipeline_mode = #tpu.pipeline_mode<synchronous>, transform_indices = @transform_6, window_bounds = array<i64: 1, 32>}, {pipeline_mode = #tpu.pipeline_mode<synchronous>, transform_indices = @transform_7, window_bounds = array<i64: 2, 32>}, {pipeline_mode = #tpu.pipeline_mode<synchronous>, transform_indices = @transform_8, window_bounds = array<i64: 2, 32>}, {pipeline_mode = #tpu.pipeline_mode<synchronous>, transform_indices = @transform_9, window_bounds = array<i64: 2, 32, 128>}, {pipeline_mode = #tpu.pipeline_mode<synchronous>, transform_indices = @transform_10, window_bounds = array<i64: 2, 128>}, {pipeline_mode = #tpu.pipeline_mode<synchronous>, transform_indices = @transform_11, window_bounds = array<i64: 2, 128, 32>}, {pipeline_mode = #tpu.pipeline_mode<synchronous>, transform_indices = @transform_12, window_bounds = array<i64: 2, 32>}, {transform_indices = @transform_13, window_bounds = array<i64: 128, 1>}]} {
    %c0 = arith.constant 0 : index
    %c0_0 = arith.constant 0 : index
    %0 = vector.load %arg1[%c0, %c0_0] : memref<128x4xf32, #tpu.memory_space<vmem>>, vector<128x4xf32>
    %1 = vector.extract_strided_slice %0 {offsets = [0, 0], sizes = [128, 3], strides = [1, 1]} : vector<128x4xf32> to vector<128x3xf32>
    %2 = vector.extract_strided_slice %0 {offsets = [0, 3], sizes = [128, 1], strides = [1, 1]} : vector<128x4xf32> to vector<128x1xf32>
    %c0_1 = arith.constant 0 : index
    %c0_2 = arith.constant 0 : index
    %3 = vector.load %arg4[%c0_1, %c0_2] : memref<1x32xf32, #tpu.memory_space<vmem>>, vector<1x32xf32>
    %c0_3 = arith.constant 0 : index
    %c0_4 = arith.constant 0 : index
    %4 = vector.load %arg2[%c0_3, %c0_4] : memref<128x32xf32, #tpu.memory_space<vmem>>, vector<128x32xf32>
    %5 = vector.broadcast %3 : vector<1x32xf32> to vector<128x32xf32>
    %6 = arith.addf %5, %4 : vector<128x32xf32>
    %7 = vector.extract_strided_slice %1 {offsets = [0, 0], sizes = [128, 1], strides = [1, 1]} : vector<128x3xf32> to vector<128x1xf32>
    %c0_5 = arith.constant 0 : index
    %c0_6 = arith.constant 0 : index
    %8 = vector.load %arg3[%c0_5, %c0_6] : memref<3x32xf32, #tpu.memory_space<vmem>>, vector<1x32xf32>
    %9 = vector.broadcast %7 : vector<128x1xf32> to vector<128x32xf32>
    %10 = vector.broadcast %8 : vector<1x32xf32> to vector<128x32xf32>
    %11 = arith.mulf %9, %10 : vector<128x32xf32>
    %12 = arith.addf %6, %11 : vector<128x32xf32>
    %13 = vector.extract_strided_slice %1 {offsets = [0, 1], sizes = [128, 1], strides = [1, 1]} : vector<128x3xf32> to vector<128x1xf32>
    %c1 = arith.constant 1 : index
    %c0_7 = arith.constant 0 : index
    %14 = vector.load %arg3[%c1, %c0_7] : memref<3x32xf32, #tpu.memory_space<vmem>>, vector<1x32xf32>
    %15 = vector.broadcast %13 : vector<128x1xf32> to vector<128x32xf32>
    %16 = vector.broadcast %14 : vector<1x32xf32> to vector<128x32xf32>
    %17 = arith.mulf %15, %16 : vector<128x32xf32>
    %18 = arith.addf %12, %17 : vector<128x32xf32>
    %19 = vector.extract_strided_slice %1 {offsets = [0, 2], sizes = [128, 1], strides = [1, 1]} : vector<128x3xf32> to vector<128x1xf32>
    %c2 = arith.constant 2 : index
    %c0_8 = arith.constant 0 : index
    %20 = vector.load %arg3[%c2, %c0_8] : memref<3x32xf32, #tpu.memory_space<vmem>>, vector<1x32xf32>
    %21 = vector.broadcast %19 : vector<128x1xf32> to vector<128x32xf32>
    %22 = vector.broadcast %20 : vector<1x32xf32> to vector<128x32xf32>
    %23 = arith.mulf %21, %22 : vector<128x32xf32>
    %24 = arith.addf %18, %23 : vector<128x32xf32>
    %c0_9 = arith.constant 0 : index
    %c0_10 = arith.constant 0 : index
    %25 = vector.load %arg5[%c0_9, %c0_10] : memref<1x32xf32, #tpu.memory_space<vmem>>, vector<1x32xf32>
    %26 = vector.broadcast %2 : vector<128x1xf32> to vector<128x32xf32>
    %27 = vector.broadcast %25 : vector<1x32xf32> to vector<128x32xf32>
    %28 = arith.mulf %26, %27 : vector<128x32xf32>
    %cst = arith.constant 1.000000e+00 : f32
    %29 = vector.broadcast %cst : f32 to vector<128x1xf32>
    %30 = arith.subf %29, %2 : vector<128x1xf32>
    %31 = vector.broadcast %30 : vector<128x1xf32> to vector<128x32xf32>
    %32 = arith.mulf %31, %24 : vector<128x32xf32>
    %33 = arith.addf %28, %32 : vector<128x32xf32>
    %c0_11 = arith.constant 0 : index
    %c0_12 = arith.constant 0 : index
    %34 = vector.load %arg8[%c0_11, %c0_12] : memref<2x32xf32, #tpu.memory_space<vmem>>, vector<1x32xf32>
    %c0_13 = arith.constant 0 : index
    %c0_14 = arith.constant 0 : index
    %35 = vector.load %arg9[%c0_13, %c0_14] : memref<2x32xf32, #tpu.memory_space<vmem>>, vector<1x32xf32>
    %cst_15 = arith.constant dense<0.000000e+00> : vector<128xf32>
    %36 = vector.multi_reduction <add>, %33, %cst_15 [1] : vector<128x32xf32> to vector<128xf32>
    %37 = vector.shape_cast %36 : vector<128xf32> to vector<128x1xf32>
    %cst_16 = arith.constant 3.200000e+01 : f32
    %38 = vector.broadcast %cst_16 : f32 to vector<128x1xf32>
    %39 = arith.divf %37, %38 : vector<128x1xf32>
    %40 = vector.broadcast %39 : vector<128x1xf32> to vector<128x32xf32>
    %41 = arith.subf %33, %40 : vector<128x32xf32>
    %42 = arith.mulf %41, %41 : vector<128x32xf32>
    %cst_17 = arith.constant dense<0.000000e+00> : vector<128xf32>
    %43 = vector.multi_reduction <add>, %42, %cst_17 [1] : vector<128x32xf32> to vector<128xf32>
    %44 = vector.shape_cast %43 : vector<128xf32> to vector<128x1xf32>
    %cst_18 = arith.constant 3.200000e+01 : f32
    %45 = vector.broadcast %cst_18 : f32 to vector<128x1xf32>
    %46 = arith.divf %44, %45 : vector<128x1xf32>
    %cst_19 = arith.constant 9.99999974E-6 : f32
    %47 = vector.broadcast %cst_19 : f32 to vector<128x1xf32>
    %48 = arith.addf %46, %47 : vector<128x1xf32>
    %49 = math.rsqrt %48 : vector<128x1xf32>
    %50 = vector.broadcast %49 : vector<128x1xf32> to vector<128x32xf32>
    %51 = arith.mulf %41, %50 : vector<128x32xf32>
    %52 = vector.broadcast %34 : vector<1x32xf32> to vector<128x32xf32>
    %53 = arith.mulf %51, %52 : vector<128x32xf32>
    %54 = vector.broadcast %35 : vector<1x32xf32> to vector<128x32xf32>
    %55 = arith.addf %53, %54 : vector<128x32xf32>
    %56 = arith.truncf %55 : vector<128x32xf32> to vector<128x32xbf16>
    %c0_20 = arith.constant 0 : index
    %c0_21 = arith.constant 0 : index
    %c0_22 = arith.constant 0 : index
    %57 = vector.load %arg10[%c0_20, %c0_21, %c0_22] : memref<2x32x128xbf16, #tpu.memory_space<vmem>>, vector<1x32x128xbf16>
    %58 = vector.shape_cast %57 : vector<1x32x128xbf16> to vector<32x128xbf16>
    %cst_23 = arith.constant dense<0.000000e+00> : vector<128x128xf32>
    %59 = tpu.matmul %56, %58, %cst_23 {dimension_numbers = #tpu.dot_dimension_numbers<[1], [0], [0], [1], [0, 0, 1, 1], [], []>} : vector<128x32xbf16>, vector<32x128xbf16>, vector<128x128xf32> -> vector<128x128xf32>
    %c0_24 = arith.constant 0 : index
    %c0_25 = arith.constant 0 : index
    %60 = vector.load %arg11[%c0_24, %c0_25] : memref<2x128xf32, #tpu.memory_space<vmem>>, vector<1x128xf32>
    %61 = vector.broadcast %60 : vector<1x128xf32> to vector<128x128xf32>
    %62 = arith.addf %59, %61 : vector<128x128xf32>
    %cst_26 = arith.constant 5.000000e-01 : f32
    %63 = vector.broadcast %cst_26 : f32 to vector<128x128xf32>
    %64 = arith.mulf %63, %62 : vector<128x128xf32>
    %cst_27 = arith.constant 0.707106769 : f32
    %65 = vector.broadcast %cst_27 : f32 to vector<128x128xf32>
    %66 = arith.mulf %62, %65 : vector<128x128xf32>
    %cst_28 = arith.constant 0.000000e+00 : f32
    %67 = vector.broadcast %cst_28 : f32 to vector<128x128xf32>
    %68 = arith.cmpf oge, %66, %67 : vector<128x128xf32>
    %cst_29 = arith.constant 1.000000e+00 : f32
    %cst_30 = arith.constant -1.000000e+00 : f32
    %69 = vector.broadcast %cst_29 : f32 to vector<128x128xf32>
    %70 = vector.broadcast %cst_30 : f32 to vector<128x128xf32>
    %71 = arith.select %68, %69, %70 : vector<128x128xi1>, vector<128x128xf32>
    %72 = math.absf %66 : vector<128x128xf32>
    %cst_31 = arith.constant 0.327591091 : f32
    %73 = vector.broadcast %cst_31 : f32 to vector<128x128xf32>
    %74 = arith.mulf %73, %72 : vector<128x128xf32>
    %cst_32 = arith.constant 1.000000e+00 : f32
    %75 = vector.broadcast %cst_32 : f32 to vector<128x128xf32>
    %76 = arith.addf %75, %74 : vector<128x128xf32>
    %cst_33 = arith.constant 1.000000e+00 : f32
    %77 = vector.broadcast %cst_33 : f32 to vector<128x128xf32>
    %78 = arith.divf %77, %76 : vector<128x128xf32>
    %cst_34 = arith.constant 1.06140542 : f32
    %79 = vector.broadcast %cst_34 : f32 to vector<128x128xf32>
    %80 = arith.mulf %79, %78 : vector<128x128xf32>
    %cst_35 = arith.constant -1.45315206 : f32
    %81 = vector.broadcast %cst_35 : f32 to vector<128x128xf32>
    %82 = arith.addf %80, %81 : vector<128x128xf32>
    %83 = arith.mulf %82, %78 : vector<128x128xf32>
    %cst_36 = arith.constant 1.42141378 : f32
    %84 = vector.broadcast %cst_36 : f32 to vector<128x128xf32>
    %85 = arith.addf %83, %84 : vector<128x128xf32>
    %86 = arith.mulf %85, %78 : vector<128x128xf32>
    %cst_37 = arith.constant -0.284496725 : f32
    %87 = vector.broadcast %cst_37 : f32 to vector<128x128xf32>
    %88 = arith.addf %86, %87 : vector<128x128xf32>
    %89 = arith.mulf %88, %78 : vector<128x128xf32>
    %cst_38 = arith.constant 0.254829586 : f32
    %90 = vector.broadcast %cst_38 : f32 to vector<128x128xf32>
    %91 = arith.addf %89, %90 : vector<128x128xf32>
    %92 = arith.mulf %91, %78 : vector<128x128xf32>
    %cst_39 = arith.constant 0.000000e+00 : f32
    %93 = vector.broadcast %cst_39 : f32 to vector<128x128xf32>
    %94 = arith.subf %93, %72 : vector<128x128xf32>
    %95 = arith.mulf %94, %72 : vector<128x128xf32>
    %96 = math.exp %95 : vector<128x128xf32>
    %97 = arith.mulf %92, %96 : vector<128x128xf32>
    %cst_40 = arith.constant 1.000000e+00 : f32
    %98 = vector.broadcast %cst_40 : f32 to vector<128x128xf32>
    %99 = arith.subf %98, %97 : vector<128x128xf32>
    %100 = arith.mulf %71, %99 : vector<128x128xf32>
    %cst_41 = arith.constant 1.000000e+00 : f32
    %101 = vector.broadcast %cst_41 : f32 to vector<128x128xf32>
    %102 = arith.addf %101, %100 : vector<128x128xf32>
    %103 = arith.mulf %64, %102 : vector<128x128xf32>
    %104 = arith.truncf %103 : vector<128x128xf32> to vector<128x128xbf16>
    %c0_42 = arith.constant 0 : index
    %c0_43 = arith.constant 0 : index
    %c0_44 = arith.constant 0 : index
    %105 = vector.load %arg12[%c0_42, %c0_43, %c0_44] : memref<2x128x32xbf16, #tpu.memory_space<vmem>>, vector<1x128x32xbf16>
    %106 = vector.shape_cast %105 : vector<1x128x32xbf16> to vector<128x32xbf16>
    %cst_45 = arith.constant dense<0.000000e+00> : vector<128x32xf32>
    %107 = tpu.matmul %104, %106, %cst_45 {dimension_numbers = #tpu.dot_dimension_numbers<[1], [0], [0], [1], [0, 0, 1, 1], [], []>} : vector<128x128xbf16>, vector<128x32xbf16>, vector<128x32xf32> -> vector<128x32xf32>
    %c0_46 = arith.constant 0 : index
    %c0_47 = arith.constant 0 : index
    %108 = vector.load %arg13[%c0_46, %c0_47] : memref<2x32xf32, #tpu.memory_space<vmem>>, vector<1x32xf32>
    %109 = vector.broadcast %108 : vector<1x32xf32> to vector<128x32xf32>
    %110 = arith.addf %107, %109 : vector<128x32xf32>
    %111 = arith.addf %33, %110 : vector<128x32xf32>
    %c1_48 = arith.constant 1 : index
    %c0_49 = arith.constant 0 : index
    %112 = vector.load %arg8[%c1_48, %c0_49] : memref<2x32xf32, #tpu.memory_space<vmem>>, vector<1x32xf32>
    %c1_50 = arith.constant 1 : index
    %c0_51 = arith.constant 0 : index
    %113 = vector.load %arg9[%c1_50, %c0_51] : memref<2x32xf32, #tpu.memory_space<vmem>>, vector<1x32xf32>
    %cst_52 = arith.constant dense<0.000000e+00> : vector<128xf32>
    %114 = vector.multi_reduction <add>, %111, %cst_52 [1] : vector<128x32xf32> to vector<128xf32>
    %115 = vector.shape_cast %114 : vector<128xf32> to vector<128x1xf32>
    %cst_53 = arith.constant 3.200000e+01 : f32
    %116 = vector.broadcast %cst_53 : f32 to vector<128x1xf32>
    %117 = arith.divf %115, %116 : vector<128x1xf32>
    %118 = vector.broadcast %117 : vector<128x1xf32> to vector<128x32xf32>
    %119 = arith.subf %111, %118 : vector<128x32xf32>
    %120 = arith.mulf %119, %119 : vector<128x32xf32>
    %cst_54 = arith.constant dense<0.000000e+00> : vector<128xf32>
    %121 = vector.multi_reduction <add>, %120, %cst_54 [1] : vector<128x32xf32> to vector<128xf32>
    %122 = vector.shape_cast %121 : vector<128xf32> to vector<128x1xf32>
    %cst_55 = arith.constant 3.200000e+01 : f32
    %123 = vector.broadcast %cst_55 : f32 to vector<128x1xf32>
    %124 = arith.divf %122, %123 : vector<128x1xf32>
    %cst_56 = arith.constant 9.99999974E-6 : f32
    %125 = vector.broadcast %cst_56 : f32 to vector<128x1xf32>
    %126 = arith.addf %124, %125 : vector<128x1xf32>
    %127 = math.rsqrt %126 : vector<128x1xf32>
    %128 = vector.broadcast %127 : vector<128x1xf32> to vector<128x32xf32>
    %129 = arith.mulf %119, %128 : vector<128x32xf32>
    %130 = vector.broadcast %112 : vector<1x32xf32> to vector<128x32xf32>
    %131 = arith.mulf %129, %130 : vector<128x32xf32>
    %132 = vector.broadcast %113 : vector<1x32xf32> to vector<128x32xf32>
    %133 = arith.addf %131, %132 : vector<128x32xf32>
    %134 = arith.truncf %133 : vector<128x32xf32> to vector<128x32xbf16>
    %c1_57 = arith.constant 1 : index
    %c0_58 = arith.constant 0 : index
    %c0_59 = arith.constant 0 : index
    %135 = vector.load %arg10[%c1_57, %c0_58, %c0_59] : memref<2x32x128xbf16, #tpu.memory_space<vmem>>, vector<1x32x128xbf16>
    %136 = vector.shape_cast %135 : vector<1x32x128xbf16> to vector<32x128xbf16>
    %cst_60 = arith.constant dense<0.000000e+00> : vector<128x128xf32>
    %137 = tpu.matmul %134, %136, %cst_60 {dimension_numbers = #tpu.dot_dimension_numbers<[1], [0], [0], [1], [0, 0, 1, 1], [], []>} : vector<128x32xbf16>, vector<32x128xbf16>, vector<128x128xf32> -> vector<128x128xf32>
    %c1_61 = arith.constant 1 : index
    %c0_62 = arith.constant 0 : index
    %138 = vector.load %arg11[%c1_61, %c0_62] : memref<2x128xf32, #tpu.memory_space<vmem>>, vector<1x128xf32>
    %139 = vector.broadcast %138 : vector<1x128xf32> to vector<128x128xf32>
    %140 = arith.addf %137, %139 : vector<128x128xf32>
    %cst_63 = arith.constant 5.000000e-01 : f32
    %141 = vector.broadcast %cst_63 : f32 to vector<128x128xf32>
    %142 = arith.mulf %141, %140 : vector<128x128xf32>
    %cst_64 = arith.constant 0.707106769 : f32
    %143 = vector.broadcast %cst_64 : f32 to vector<128x128xf32>
    %144 = arith.mulf %140, %143 : vector<128x128xf32>
    %cst_65 = arith.constant 0.000000e+00 : f32
    %145 = vector.broadcast %cst_65 : f32 to vector<128x128xf32>
    %146 = arith.cmpf oge, %144, %145 : vector<128x128xf32>
    %cst_66 = arith.constant 1.000000e+00 : f32
    %cst_67 = arith.constant -1.000000e+00 : f32
    %147 = vector.broadcast %cst_66 : f32 to vector<128x128xf32>
    %148 = vector.broadcast %cst_67 : f32 to vector<128x128xf32>
    %149 = arith.select %146, %147, %148 : vector<128x128xi1>, vector<128x128xf32>
    %150 = math.absf %144 : vector<128x128xf32>
    %cst_68 = arith.constant 0.327591091 : f32
    %151 = vector.broadcast %cst_68 : f32 to vector<128x128xf32>
    %152 = arith.mulf %151, %150 : vector<128x128xf32>
    %cst_69 = arith.constant 1.000000e+00 : f32
    %153 = vector.broadcast %cst_69 : f32 to vector<128x128xf32>
    %154 = arith.addf %153, %152 : vector<128x128xf32>
    %cst_70 = arith.constant 1.000000e+00 : f32
    %155 = vector.broadcast %cst_70 : f32 to vector<128x128xf32>
    %156 = arith.divf %155, %154 : vector<128x128xf32>
    %cst_71 = arith.constant 1.06140542 : f32
    %157 = vector.broadcast %cst_71 : f32 to vector<128x128xf32>
    %158 = arith.mulf %157, %156 : vector<128x128xf32>
    %cst_72 = arith.constant -1.45315206 : f32
    %159 = vector.broadcast %cst_72 : f32 to vector<128x128xf32>
    %160 = arith.addf %158, %159 : vector<128x128xf32>
    %161 = arith.mulf %160, %156 : vector<128x128xf32>
    %cst_73 = arith.constant 1.42141378 : f32
    %162 = vector.broadcast %cst_73 : f32 to vector<128x128xf32>
    %163 = arith.addf %161, %162 : vector<128x128xf32>
    %164 = arith.mulf %163, %156 : vector<128x128xf32>
    %cst_74 = arith.constant -0.284496725 : f32
    %165 = vector.broadcast %cst_74 : f32 to vector<128x128xf32>
    %166 = arith.addf %164, %165 : vector<128x128xf32>
    %167 = arith.mulf %166, %156 : vector<128x128xf32>
    %cst_75 = arith.constant 0.254829586 : f32
    %168 = vector.broadcast %cst_75 : f32 to vector<128x128xf32>
    %169 = arith.addf %167, %168 : vector<128x128xf32>
    %170 = arith.mulf %169, %156 : vector<128x128xf32>
    %cst_76 = arith.constant 0.000000e+00 : f32
    %171 = vector.broadcast %cst_76 : f32 to vector<128x128xf32>
    %172 = arith.subf %171, %150 : vector<128x128xf32>
    %173 = arith.mulf %172, %150 : vector<128x128xf32>
    %174 = math.exp %173 : vector<128x128xf32>
    %175 = arith.mulf %170, %174 : vector<128x128xf32>
    %cst_77 = arith.constant 1.000000e+00 : f32
    %176 = vector.broadcast %cst_77 : f32 to vector<128x128xf32>
    %177 = arith.subf %176, %175 : vector<128x128xf32>
    %178 = arith.mulf %149, %177 : vector<128x128xf32>
    %cst_78 = arith.constant 1.000000e+00 : f32
    %179 = vector.broadcast %cst_78 : f32 to vector<128x128xf32>
    %180 = arith.addf %179, %178 : vector<128x128xf32>
    %181 = arith.mulf %142, %180 : vector<128x128xf32>
    %182 = arith.truncf %181 : vector<128x128xf32> to vector<128x128xbf16>
    %c1_79 = arith.constant 1 : index
    %c0_80 = arith.constant 0 : index
    %c0_81 = arith.constant 0 : index
    %183 = vector.load %arg12[%c1_79, %c0_80, %c0_81] : memref<2x128x32xbf16, #tpu.memory_space<vmem>>, vector<1x128x32xbf16>
    %184 = vector.shape_cast %183 : vector<1x128x32xbf16> to vector<128x32xbf16>
    %cst_82 = arith.constant dense<0.000000e+00> : vector<128x32xf32>
    %185 = tpu.matmul %182, %184, %cst_82 {dimension_numbers = #tpu.dot_dimension_numbers<[1], [0], [0], [1], [0, 0, 1, 1], [], []>} : vector<128x128xbf16>, vector<128x32xbf16>, vector<128x32xf32> -> vector<128x32xf32>
    %c1_83 = arith.constant 1 : index
    %c0_84 = arith.constant 0 : index
    %186 = vector.load %arg13[%c1_83, %c0_84] : memref<2x32xf32, #tpu.memory_space<vmem>>, vector<1x32xf32>
    %187 = vector.broadcast %186 : vector<1x32xf32> to vector<128x32xf32>
    %188 = arith.addf %185, %187 : vector<128x32xf32>
    %189 = arith.addf %111, %188 : vector<128x32xf32>
    %c0_85 = arith.constant 0 : index
    %c0_86 = arith.constant 0 : index
    %190 = vector.load %arg6[%c0_85, %c0_86] : memref<1x32xf32, #tpu.memory_space<vmem>>, vector<1x32xf32>
    %c0_87 = arith.constant 0 : index
    %c0_88 = arith.constant 0 : index
    %191 = vector.load %arg7[%c0_87, %c0_88] : memref<1x32xf32, #tpu.memory_space<vmem>>, vector<1x32xf32>
    %cst_89 = arith.constant dense<0.000000e+00> : vector<128xf32>
    %192 = vector.multi_reduction <add>, %189, %cst_89 [1] : vector<128x32xf32> to vector<128xf32>
    %193 = vector.shape_cast %192 : vector<128xf32> to vector<128x1xf32>
    %cst_90 = arith.constant 3.200000e+01 : f32
    %194 = vector.broadcast %cst_90 : f32 to vector<128x1xf32>
    %195 = arith.divf %193, %194 : vector<128x1xf32>
    %196 = vector.broadcast %195 : vector<128x1xf32> to vector<128x32xf32>
    %197 = arith.subf %189, %196 : vector<128x32xf32>
    %198 = arith.mulf %197, %197 : vector<128x32xf32>
    %cst_91 = arith.constant dense<0.000000e+00> : vector<128xf32>
    %199 = vector.multi_reduction <add>, %198, %cst_91 [1] : vector<128x32xf32> to vector<128xf32>
    %200 = vector.shape_cast %199 : vector<128xf32> to vector<128x1xf32>
    %cst_92 = arith.constant 3.200000e+01 : f32
    %201 = vector.broadcast %cst_92 : f32 to vector<128x1xf32>
    %202 = arith.divf %200, %201 : vector<128x1xf32>
    %cst_93 = arith.constant 9.99999974E-6 : f32
    %203 = vector.broadcast %cst_93 : f32 to vector<128x1xf32>
    %204 = arith.addf %202, %203 : vector<128x1xf32>
    %205 = math.rsqrt %204 : vector<128x1xf32>
    %206 = vector.broadcast %205 : vector<128x1xf32> to vector<128x32xf32>
    %207 = arith.mulf %197, %206 : vector<128x32xf32>
    %208 = vector.broadcast %190 : vector<1x32xf32> to vector<128x32xf32>
    %209 = arith.mulf %207, %208 : vector<128x32xf32>
    %210 = vector.broadcast %191 : vector<1x32xf32> to vector<128x32xf32>
    %211 = arith.addf %209, %210 : vector<128x32xf32>
    %cst_94 = arith.constant 0.000000e+00 : f32
    %212 = vector.broadcast %cst_94 : f32 to vector<128x32xf32>
    %c0_95 = arith.constant 0 : index
    %c0_96 = arith.constant 0 : index
    %213 = vector.load %arg8[%c0_95, %c0_96] : memref<2x32xf32, #tpu.memory_space<vmem>>, vector<1x32xf32>
    %c0_97 = arith.constant 0 : index
    %c0_98 = arith.constant 0 : index
    %214 = vector.load %arg9[%c0_97, %c0_98] : memref<2x32xf32, #tpu.memory_space<vmem>>, vector<1x32xf32>
    %cst_99 = arith.constant dense<0.000000e+00> : vector<128xf32>
    %215 = vector.multi_reduction <add>, %24, %cst_99 [1] : vector<128x32xf32> to vector<128xf32>
    %216 = vector.shape_cast %215 : vector<128xf32> to vector<128x1xf32>
    %cst_100 = arith.constant 3.200000e+01 : f32
    %217 = vector.broadcast %cst_100 : f32 to vector<128x1xf32>
    %218 = arith.divf %216, %217 : vector<128x1xf32>
    %219 = vector.broadcast %218 : vector<128x1xf32> to vector<128x32xf32>
    %220 = arith.subf %24, %219 : vector<128x32xf32>
    %221 = arith.mulf %220, %220 : vector<128x32xf32>
    %cst_101 = arith.constant dense<0.000000e+00> : vector<128xf32>
    %222 = vector.multi_reduction <add>, %221, %cst_101 [1] : vector<128x32xf32> to vector<128xf32>
    %223 = vector.shape_cast %222 : vector<128xf32> to vector<128x1xf32>
    %cst_102 = arith.constant 3.200000e+01 : f32
    %224 = vector.broadcast %cst_102 : f32 to vector<128x1xf32>
    %225 = arith.divf %223, %224 : vector<128x1xf32>
    %cst_103 = arith.constant 9.99999974E-6 : f32
    %226 = vector.broadcast %cst_103 : f32 to vector<128x1xf32>
    %227 = arith.addf %225, %226 : vector<128x1xf32>
    %228 = math.rsqrt %227 : vector<128x1xf32>
    %229 = vector.broadcast %228 : vector<128x1xf32> to vector<128x32xf32>
    %230 = arith.mulf %220, %229 : vector<128x32xf32>
    %231 = vector.broadcast %213 : vector<1x32xf32> to vector<128x32xf32>
    %232 = arith.mulf %230, %231 : vector<128x32xf32>
    %233 = vector.broadcast %214 : vector<1x32xf32> to vector<128x32xf32>
    %234 = arith.addf %232, %233 : vector<128x32xf32>
    %235 = arith.truncf %234 : vector<128x32xf32> to vector<128x32xbf16>
    %c0_104 = arith.constant 0 : index
    %c0_105 = arith.constant 0 : index
    %c0_106 = arith.constant 0 : index
    %236 = vector.load %arg10[%c0_104, %c0_105, %c0_106] : memref<2x32x128xbf16, #tpu.memory_space<vmem>>, vector<1x32x128xbf16>
    %237 = vector.shape_cast %236 : vector<1x32x128xbf16> to vector<32x128xbf16>
    %cst_107 = arith.constant dense<0.000000e+00> : vector<128x128xf32>
    %238 = tpu.matmul %235, %237, %cst_107 {dimension_numbers = #tpu.dot_dimension_numbers<[1], [0], [0], [1], [0, 0, 1, 1], [], []>} : vector<128x32xbf16>, vector<32x128xbf16>, vector<128x128xf32> -> vector<128x128xf32>
    %c0_108 = arith.constant 0 : index
    %c0_109 = arith.constant 0 : index
    %239 = vector.load %arg11[%c0_108, %c0_109] : memref<2x128xf32, #tpu.memory_space<vmem>>, vector<1x128xf32>
    %240 = vector.broadcast %239 : vector<1x128xf32> to vector<128x128xf32>
    %241 = arith.addf %238, %240 : vector<128x128xf32>
    %cst_110 = arith.constant 5.000000e-01 : f32
    %242 = vector.broadcast %cst_110 : f32 to vector<128x128xf32>
    %243 = arith.mulf %242, %241 : vector<128x128xf32>
    %cst_111 = arith.constant 0.707106769 : f32
    %244 = vector.broadcast %cst_111 : f32 to vector<128x128xf32>
    %245 = arith.mulf %241, %244 : vector<128x128xf32>
    %cst_112 = arith.constant 0.000000e+00 : f32
    %246 = vector.broadcast %cst_112 : f32 to vector<128x128xf32>
    %247 = arith.cmpf oge, %245, %246 : vector<128x128xf32>
    %cst_113 = arith.constant 1.000000e+00 : f32
    %cst_114 = arith.constant -1.000000e+00 : f32
    %248 = vector.broadcast %cst_113 : f32 to vector<128x128xf32>
    %249 = vector.broadcast %cst_114 : f32 to vector<128x128xf32>
    %250 = arith.select %247, %248, %249 : vector<128x128xi1>, vector<128x128xf32>
    %251 = math.absf %245 : vector<128x128xf32>
    %cst_115 = arith.constant 0.327591091 : f32
    %252 = vector.broadcast %cst_115 : f32 to vector<128x128xf32>
    %253 = arith.mulf %252, %251 : vector<128x128xf32>
    %cst_116 = arith.constant 1.000000e+00 : f32
    %254 = vector.broadcast %cst_116 : f32 to vector<128x128xf32>
    %255 = arith.addf %254, %253 : vector<128x128xf32>
    %cst_117 = arith.constant 1.000000e+00 : f32
    %256 = vector.broadcast %cst_117 : f32 to vector<128x128xf32>
    %257 = arith.divf %256, %255 : vector<128x128xf32>
    %cst_118 = arith.constant 1.06140542 : f32
    %258 = vector.broadcast %cst_118 : f32 to vector<128x128xf32>
    %259 = arith.mulf %258, %257 : vector<128x128xf32>
    %cst_119 = arith.constant -1.45315206 : f32
    %260 = vector.broadcast %cst_119 : f32 to vector<128x128xf32>
    %261 = arith.addf %259, %260 : vector<128x128xf32>
    %262 = arith.mulf %261, %257 : vector<128x128xf32>
    %cst_120 = arith.constant 1.42141378 : f32
    %263 = vector.broadcast %cst_120 : f32 to vector<128x128xf32>
    %264 = arith.addf %262, %263 : vector<128x128xf32>
    %265 = arith.mulf %264, %257 : vector<128x128xf32>
    %cst_121 = arith.constant -0.284496725 : f32
    %266 = vector.broadcast %cst_121 : f32 to vector<128x128xf32>
    %267 = arith.addf %265, %266 : vector<128x128xf32>
    %268 = arith.mulf %267, %257 : vector<128x128xf32>
    %cst_122 = arith.constant 0.254829586 : f32
    %269 = vector.broadcast %cst_122 : f32 to vector<128x128xf32>
    %270 = arith.addf %268, %269 : vector<128x128xf32>
    %271 = arith.mulf %270, %257 : vector<128x128xf32>
    %cst_123 = arith.constant 0.000000e+00 : f32
    %272 = vector.broadcast %cst_123 : f32 to vector<128x128xf32>
    %273 = arith.subf %272, %251 : vector<128x128xf32>
    %274 = arith.mulf %273, %251 : vector<128x128xf32>
    %275 = math.exp %274 : vector<128x128xf32>
    %276 = arith.mulf %271, %275 : vector<128x128xf32>
    %cst_124 = arith.constant 1.000000e+00 : f32
    %277 = vector.broadcast %cst_124 : f32 to vector<128x128xf32>
    %278 = arith.subf %277, %276 : vector<128x128xf32>
    %279 = arith.mulf %250, %278 : vector<128x128xf32>
    %cst_125 = arith.constant 1.000000e+00 : f32
    %280 = vector.broadcast %cst_125 : f32 to vector<128x128xf32>
    %281 = arith.addf %280, %279 : vector<128x128xf32>
    %282 = arith.mulf %243, %281 : vector<128x128xf32>
    %283 = arith.truncf %282 : vector<128x128xf32> to vector<128x128xbf16>
    %c0_126 = arith.constant 0 : index
    %c0_127 = arith.constant 0 : index
    %c0_128 = arith.constant 0 : index
    %284 = vector.load %arg12[%c0_126, %c0_127, %c0_128] : memref<2x128x32xbf16, #tpu.memory_space<vmem>>, vector<1x128x32xbf16>
    %285 = vector.shape_cast %284 : vector<1x128x32xbf16> to vector<128x32xbf16>
    %cst_129 = arith.constant dense<0.000000e+00> : vector<128x32xf32>
    %286 = tpu.matmul %283, %285, %cst_129 {dimension_numbers = #tpu.dot_dimension_numbers<[1], [0], [0], [1], [0, 0, 1, 1], [], []>} : vector<128x128xbf16>, vector<128x32xbf16>, vector<128x32xf32> -> vector<128x32xf32>
    %c0_130 = arith.constant 0 : index
    %c0_131 = arith.constant 0 : index
    %287 = vector.load %arg13[%c0_130, %c0_131] : memref<2x32xf32, #tpu.memory_space<vmem>>, vector<1x32xf32>
    %288 = vector.broadcast %287 : vector<1x32xf32> to vector<128x32xf32>
    %289 = arith.addf %286, %288 : vector<128x32xf32>
    %290 = arith.addf %24, %289 : vector<128x32xf32>
    %cst_132 = arith.constant dense<0.000000e+00> : vector<128xf32>
    %291 = vector.multi_reduction <add>, %290, %cst_132 [1] : vector<128x32xf32> to vector<128xf32>
    %292 = vector.shape_cast %291 : vector<128xf32> to vector<128x1xf32>
    %cst_133 = arith.constant 3.200000e+01 : f32
    %293 = vector.broadcast %cst_133 : f32 to vector<128x1xf32>
    %294 = arith.divf %292, %293 : vector<128x1xf32>
    %295 = vector.broadcast %294 : vector<128x1xf32> to vector<128x32xf32>
    %296 = arith.subf %290, %295 : vector<128x32xf32>
    %297 = arith.mulf %296, %296 : vector<128x32xf32>
    %cst_134 = arith.constant dense<0.000000e+00> : vector<128xf32>
    %298 = vector.multi_reduction <add>, %297, %cst_134 [1] : vector<128x32xf32> to vector<128xf32>
    %299 = vector.shape_cast %298 : vector<128xf32> to vector<128x1xf32>
    %cst_135 = arith.constant 3.200000e+01 : f32
    %300 = vector.broadcast %cst_135 : f32 to vector<128x1xf32>
    %301 = arith.divf %299, %300 : vector<128x1xf32>
    %cst_136 = arith.constant 9.99999974E-6 : f32
    %302 = vector.broadcast %cst_136 : f32 to vector<128x1xf32>
    %303 = arith.addf %301, %302 : vector<128x1xf32>
    %304 = math.rsqrt %303 : vector<128x1xf32>
    %305 = vector.broadcast %304 : vector<128x1xf32> to vector<128x32xf32>
    %306 = arith.mulf %296, %305 : vector<128x32xf32>
    %cst_137 = arith.constant 1.000000e+00 : f32
    %307 = vector.broadcast %cst_137 : f32 to vector<128x32xf32>
    %308 = arith.mulf %306, %307 : vector<128x32xf32>
    %cst_138 = arith.constant 0.000000e+00 : f32
    %309 = vector.broadcast %cst_138 : f32 to vector<128x32xf32>
    %310 = arith.addf %308, %309 : vector<128x32xf32>
    %311 = arith.addf %212, %310 : vector<128x32xf32>
    %c1_139 = arith.constant 1 : index
    %c0_140 = arith.constant 0 : index
    %312 = vector.load %arg8[%c1_139, %c0_140] : memref<2x32xf32, #tpu.memory_space<vmem>>, vector<1x32xf32>
    %c1_141 = arith.constant 1 : index
    %c0_142 = arith.constant 0 : index
    %313 = vector.load %arg9[%c1_141, %c0_142] : memref<2x32xf32, #tpu.memory_space<vmem>>, vector<1x32xf32>
    %cst_143 = arith.constant dense<0.000000e+00> : vector<128xf32>
    %314 = vector.multi_reduction <add>, %290, %cst_143 [1] : vector<128x32xf32> to vector<128xf32>
    %315 = vector.shape_cast %314 : vector<128xf32> to vector<128x1xf32>
    %cst_144 = arith.constant 3.200000e+01 : f32
    %316 = vector.broadcast %cst_144 : f32 to vector<128x1xf32>
    %317 = arith.divf %315, %316 : vector<128x1xf32>
    %318 = vector.broadcast %317 : vector<128x1xf32> to vector<128x32xf32>
    %319 = arith.subf %290, %318 : vector<128x32xf32>
    %320 = arith.mulf %319, %319 : vector<128x32xf32>
    %cst_145 = arith.constant dense<0.000000e+00> : vector<128xf32>
    %321 = vector.multi_reduction <add>, %320, %cst_145 [1] : vector<128x32xf32> to vector<128xf32>
    %322 = vector.shape_cast %321 : vector<128xf32> to vector<128x1xf32>
    %cst_146 = arith.constant 3.200000e+01 : f32
    %323 = vector.broadcast %cst_146 : f32 to vector<128x1xf32>
    %324 = arith.divf %322, %323 : vector<128x1xf32>
    %cst_147 = arith.constant 9.99999974E-6 : f32
    %325 = vector.broadcast %cst_147 : f32 to vector<128x1xf32>
    %326 = arith.addf %324, %325 : vector<128x1xf32>
    %327 = math.rsqrt %326 : vector<128x1xf32>
    %328 = vector.broadcast %327 : vector<128x1xf32> to vector<128x32xf32>
    %329 = arith.mulf %319, %328 : vector<128x32xf32>
    %330 = vector.broadcast %312 : vector<1x32xf32> to vector<128x32xf32>
    %331 = arith.mulf %329, %330 : vector<128x32xf32>
    %332 = vector.broadcast %313 : vector<1x32xf32> to vector<128x32xf32>
    %333 = arith.addf %331, %332 : vector<128x32xf32>
    %334 = arith.truncf %333 : vector<128x32xf32> to vector<128x32xbf16>
    %c1_148 = arith.constant 1 : index
    %c0_149 = arith.constant 0 : index
    %c0_150 = arith.constant 0 : index
    %335 = vector.load %arg10[%c1_148, %c0_149, %c0_150] : memref<2x32x128xbf16, #tpu.memory_space<vmem>>, vector<1x32x128xbf16>
    %336 = vector.shape_cast %335 : vector<1x32x128xbf16> to vector<32x128xbf16>
    %cst_151 = arith.constant dense<0.000000e+00> : vector<128x128xf32>
    %337 = tpu.matmul %334, %336, %cst_151 {dimension_numbers = #tpu.dot_dimension_numbers<[1], [0], [0], [1], [0, 0, 1, 1], [], []>} : vector<128x32xbf16>, vector<32x128xbf16>, vector<128x128xf32> -> vector<128x128xf32>
    %c1_152 = arith.constant 1 : index
    %c0_153 = arith.constant 0 : index
    %338 = vector.load %arg11[%c1_152, %c0_153] : memref<2x128xf32, #tpu.memory_space<vmem>>, vector<1x128xf32>
    %339 = vector.broadcast %338 : vector<1x128xf32> to vector<128x128xf32>
    %340 = arith.addf %337, %339 : vector<128x128xf32>
    %cst_154 = arith.constant 5.000000e-01 : f32
    %341 = vector.broadcast %cst_154 : f32 to vector<128x128xf32>
    %342 = arith.mulf %341, %340 : vector<128x128xf32>
    %cst_155 = arith.constant 0.707106769 : f32
    %343 = vector.broadcast %cst_155 : f32 to vector<128x128xf32>
    %344 = arith.mulf %340, %343 : vector<128x128xf32>
    %cst_156 = arith.constant 0.000000e+00 : f32
    %345 = vector.broadcast %cst_156 : f32 to vector<128x128xf32>
    %346 = arith.cmpf oge, %344, %345 : vector<128x128xf32>
    %cst_157 = arith.constant 1.000000e+00 : f32
    %cst_158 = arith.constant -1.000000e+00 : f32
    %347 = vector.broadcast %cst_157 : f32 to vector<128x128xf32>
    %348 = vector.broadcast %cst_158 : f32 to vector<128x128xf32>
    %349 = arith.select %346, %347, %348 : vector<128x128xi1>, vector<128x128xf32>
    %350 = math.absf %344 : vector<128x128xf32>
    %cst_159 = arith.constant 0.327591091 : f32
    %351 = vector.broadcast %cst_159 : f32 to vector<128x128xf32>
    %352 = arith.mulf %351, %350 : vector<128x128xf32>
    %cst_160 = arith.constant 1.000000e+00 : f32
    %353 = vector.broadcast %cst_160 : f32 to vector<128x128xf32>
    %354 = arith.addf %353, %352 : vector<128x128xf32>
    %cst_161 = arith.constant 1.000000e+00 : f32
    %355 = vector.broadcast %cst_161 : f32 to vector<128x128xf32>
    %356 = arith.divf %355, %354 : vector<128x128xf32>
    %cst_162 = arith.constant 1.06140542 : f32
    %357 = vector.broadcast %cst_162 : f32 to vector<128x128xf32>
    %358 = arith.mulf %357, %356 : vector<128x128xf32>
    %cst_163 = arith.constant -1.45315206 : f32
    %359 = vector.broadcast %cst_163 : f32 to vector<128x128xf32>
    %360 = arith.addf %358, %359 : vector<128x128xf32>
    %361 = arith.mulf %360, %356 : vector<128x128xf32>
    %cst_164 = arith.constant 1.42141378 : f32
    %362 = vector.broadcast %cst_164 : f32 to vector<128x128xf32>
    %363 = arith.addf %361, %362 : vector<128x128xf32>
    %364 = arith.mulf %363, %356 : vector<128x128xf32>
    %cst_165 = arith.constant -0.284496725 : f32
    %365 = vector.broadcast %cst_165 : f32 to vector<128x128xf32>
    %366 = arith.addf %364, %365 : vector<128x128xf32>
    %367 = arith.mulf %366, %356 : vector<128x128xf32>
    %cst_166 = arith.constant 0.254829586 : f32
    %368 = vector.broadcast %cst_166 : f32 to vector<128x128xf32>
    %369 = arith.addf %367, %368 : vector<128x128xf32>
    %370 = arith.mulf %369, %356 : vector<128x128xf32>
    %cst_167 = arith.constant 0.000000e+00 : f32
    %371 = vector.broadcast %cst_167 : f32 to vector<128x128xf32>
    %372 = arith.subf %371, %350 : vector<128x128xf32>
    %373 = arith.mulf %372, %350 : vector<128x128xf32>
    %374 = math.exp %373 : vector<128x128xf32>
    %375 = arith.mulf %370, %374 : vector<128x128xf32>
    %cst_168 = arith.constant 1.000000e+00 : f32
    %376 = vector.broadcast %cst_168 : f32 to vector<128x128xf32>
    %377 = arith.subf %376, %375 : vector<128x128xf32>
    %378 = arith.mulf %349, %377 : vector<128x128xf32>
    %cst_169 = arith.constant 1.000000e+00 : f32
    %379 = vector.broadcast %cst_169 : f32 to vector<128x128xf32>
    %380 = arith.addf %379, %378 : vector<128x128xf32>
    %381 = arith.mulf %342, %380 : vector<128x128xf32>
    %382 = arith.truncf %381 : vector<128x128xf32> to vector<128x128xbf16>
    %c1_170 = arith.constant 1 : index
    %c0_171 = arith.constant 0 : index
    %c0_172 = arith.constant 0 : index
    %383 = vector.load %arg12[%c1_170, %c0_171, %c0_172] : memref<2x128x32xbf16, #tpu.memory_space<vmem>>, vector<1x128x32xbf16>
    %384 = vector.shape_cast %383 : vector<1x128x32xbf16> to vector<128x32xbf16>
    %cst_173 = arith.constant dense<0.000000e+00> : vector<128x32xf32>
    %385 = tpu.matmul %382, %384, %cst_173 {dimension_numbers = #tpu.dot_dimension_numbers<[1], [0], [0], [1], [0, 0, 1, 1], [], []>} : vector<128x128xbf16>, vector<128x32xbf16>, vector<128x32xf32> -> vector<128x32xf32>
    %c1_174 = arith.constant 1 : index
    %c0_175 = arith.constant 0 : index
    %386 = vector.load %arg13[%c1_174, %c0_175] : memref<2x32xf32, #tpu.memory_space<vmem>>, vector<1x32xf32>
    %387 = vector.broadcast %386 : vector<1x32xf32> to vector<128x32xf32>
    %388 = arith.addf %385, %387 : vector<128x32xf32>
    %389 = arith.addf %290, %388 : vector<128x32xf32>
    %cst_176 = arith.constant dense<0.000000e+00> : vector<128xf32>
    %390 = vector.multi_reduction <add>, %389, %cst_176 [1] : vector<128x32xf32> to vector<128xf32>
    %391 = vector.shape_cast %390 : vector<128xf32> to vector<128x1xf32>
    %cst_177 = arith.constant 3.200000e+01 : f32
    %392 = vector.broadcast %cst_177 : f32 to vector<128x1xf32>
    %393 = arith.divf %391, %392 : vector<128x1xf32>
    %394 = vector.broadcast %393 : vector<128x1xf32> to vector<128x32xf32>
    %395 = arith.subf %389, %394 : vector<128x32xf32>
    %396 = arith.mulf %395, %395 : vector<128x32xf32>
    %cst_178 = arith.constant dense<0.000000e+00> : vector<128xf32>
    %397 = vector.multi_reduction <add>, %396, %cst_178 [1] : vector<128x32xf32> to vector<128xf32>
    %398 = vector.shape_cast %397 : vector<128xf32> to vector<128x1xf32>
    %cst_179 = arith.constant 3.200000e+01 : f32
    %399 = vector.broadcast %cst_179 : f32 to vector<128x1xf32>
    %400 = arith.divf %398, %399 : vector<128x1xf32>
    %cst_180 = arith.constant 9.99999974E-6 : f32
    %401 = vector.broadcast %cst_180 : f32 to vector<128x1xf32>
    %402 = arith.addf %400, %401 : vector<128x1xf32>
    %403 = math.rsqrt %402 : vector<128x1xf32>
    %404 = vector.broadcast %403 : vector<128x1xf32> to vector<128x32xf32>
    %405 = arith.mulf %395, %404 : vector<128x32xf32>
    %cst_181 = arith.constant 1.000000e+00 : f32
    %406 = vector.broadcast %cst_181 : f32 to vector<128x32xf32>
    %407 = arith.mulf %405, %406 : vector<128x32xf32>
    %cst_182 = arith.constant 0.000000e+00 : f32
    %408 = vector.broadcast %cst_182 : f32 to vector<128x32xf32>
    %409 = arith.addf %407, %408 : vector<128x32xf32>
    %410 = arith.addf %311, %409 : vector<128x32xf32>
    %cst_183 = arith.constant 5.000000e-01 : f32
    %411 = vector.broadcast %cst_183 : f32 to vector<128x32xf32>
    %412 = arith.mulf %410, %411 : vector<128x32xf32>
    %413 = arith.subf %211, %412 : vector<128x32xf32>
    %414 = arith.mulf %413, %413 : vector<128x32xf32>
    %cst_184 = arith.constant dense<0.000000e+00> : vector<128xf32>
    %415 = vector.multi_reduction <add>, %414, %cst_184 [1] : vector<128x32xf32> to vector<128xf32>
    %416 = vector.shape_cast %415 : vector<128xf32> to vector<128x1xf32>
    %cst_185 = arith.constant 0.176776692 : f32
    %417 = vector.broadcast %cst_185 : f32 to vector<128x1xf32>
    %418 = arith.mulf %416, %417 : vector<128x1xf32>
    %419 = arith.mulf %418, %2 : vector<128x1xf32>
    %c0_186 = arith.constant 0 : index
    %c0_187 = arith.constant 0 : index
    %420 = vector.load %arg14[%c0_186, %c0_187] : memref<128x1xf32, #tpu.memory_space<vmem>>, vector<128x1xf32>
    tpu.vector_store %arg14[%c0_186, %c0_187], %419 {strides = array<i32>} : memref<128x1xf32, #tpu.memory_space<vmem>>, vector<128x1xf32>,
    return
  }
  func.func @transform_0(%arg0: i32) -> (i32, i32) {
    %c0_i32 = arith.constant 0 : i32
    %c0_i32_0 = arith.constant 0 : i32
    return %arg0, %c0_i32 : i32, i32
  }
  func.func @transform_1(%arg0: i32) -> (i32, i32) {
    %c0_i32 = arith.constant 0 : i32
    %c0_i32_0 = arith.constant 0 : i32
    %c0_i32_1 = arith.constant 0 : i32
    return %c0_i32, %c0_i32_0 : i32, i32
  }
  func.func @transform_2(%arg0: i32) -> (i32, i32) {
    %c0_i32 = arith.constant 0 : i32
    %c0_i32_0 = arith.constant 0 : i32
    %c0_i32_1 = arith.constant 0 : i32
    return %c0_i32, %c0_i32_0 : i32, i32
  }
  func.func @transform_3(%arg0: i32) -> (i32, i32) {
    %c0_i32 = arith.constant 0 : i32
    %c0_i32_0 = arith.constant 0 : i32
    %c0_i32_1 = arith.constant 0 : i32
    return %c0_i32, %c0_i32_0 : i32, i32
  }
  func.func @transform_4(%arg0: i32) -> (i32, i32) {
    %c0_i32 = arith.constant 0 : i32
    %c0_i32_0 = arith.constant 0 : i32
    %c0_i32_1 = arith.constant 0 : i32
    return %c0_i32, %c0_i32_0 : i32, i32
  }
  func.func @transform_5(%arg0: i32) -> (i32, i32) {
    %c0_i32 = arith.constant 0 : i32
    %c0_i32_0 = arith.constant 0 : i32
    %c0_i32_1 = arith.constant 0 : i32
    return %c0_i32, %c0_i32_0 : i32, i32
  }
  func.func @transform_6(%arg0: i32) -> (i32, i32) {
    %c0_i32 = arith.constant 0 : i32
    %c0_i32_0 = arith.constant 0 : i32
    %c0_i32_1 = arith.constant 0 : i32
    return %c0_i32, %c0_i32_0 : i32, i32
  }
  func.func @transform_7(%arg0: i32) -> (i32, i32) {
    %c0_i32 = arith.constant 0 : i32
    %c0_i32_0 = arith.constant 0 : i32
    %c0_i32_1 = arith.constant 0 : i32
    return %c0_i32, %c0_i32_0 : i32, i32
  }
  func.func @transform_8(%arg0: i32) -> (i32, i32) {
    %c0_i32 = arith.constant 0 : i32
    %c0_i32_0 = arith.constant 0 : i32
    %c0_i32_1 = arith.constant 0 : i32
    return %c0_i32, %c0_i32_0 : i32, i32
  }
  func.func @transform_9(%arg0: i32) -> (i32, i32, i32) {
    %c0_i32 = arith.constant 0 : i32
    %c0_i32_0 = arith.constant 0 : i32
    %c0_i32_1 = arith.constant 0 : i32
    %c0_i32_2 = arith.constant 0 : i32
    return %c0_i32, %c0_i32_0, %c0_i32_1 : i32, i32, i32
  }
  func.func @transform_10(%arg0: i32) -> (i32, i32) {
    %c0_i32 = arith.constant 0 : i32
    %c0_i32_0 = arith.constant 0 : i32
    %c0_i32_1 = arith.constant 0 : i32
    return %c0_i32, %c0_i32_0 : i32, i32
  }
  func.func @transform_11(%arg0: i32) -> (i32, i32, i32) {
    %c0_i32 = arith.constant 0 : i32
    %c0_i32_0 = arith.constant 0 : i32
    %c0_i32_1 = arith.constant 0 : i32
    %c0_i32_2 = arith.constant 0 : i32
    return %c0_i32, %c0_i32_0, %c0_i32_1 : i32, i32, i32
  }
  func.func @transform_12(%arg0: i32) -> (i32, i32) {
    %c0_i32 = arith.constant 0 : i32
    %c0_i32_0 = arith.constant 0 : i32
    %c0_i32_1 = arith.constant 0 : i32
    return %c0_i32, %c0_i32_0 : i32, i32
  }
  func.func @transform_13(%arg0: i32) -> (i32, i32) {
    %c0_i32 = arith.constant 0 : i32
    %c0_i32_0 = arith.constant 0 : i32
    return %arg0, %c0_i32 : i32, i32
  }
}

</mosaic_0001>

<bundles_post_ra>
// kernel: tpu_custom_call.1
= control target key start
LH: loop header
LB: loop body
LE: loop exit
PB: predicated region body
PF: predicated region fallthrough
CT: control target
= control target key end

     0   :  { %s7807_s25 = smov 0   ;;  %s13775_s0 = inlined_call_operand.vmem [shape: f32[256,4], index: 0, kind: input, shape index: {}]   ;;  %s13776_s1 = inlined_call_operand.vmem [shape: f32[128,32], index: 1, kind: input, shape index: {}]   ;;  %s13777_s2 = inlined_call_operand.vmem [shape: f32[3,32], index: 2, kind: input, shape index: {}]   ;;  %s13778_s3 = inlined_call_operand.vmem [shape: f32[1,32], index: 3, kind: input, shape index: {}]   ;;  %s13779_s4 = inlined_call_operand.vmem [shape: f32[1,32], index: 4, kind: input, shape index: {}]   ;;  %s13780_s5 = inlined_call_operand.vmem [shape: f32[1,32], index: 5, kind: input, shape index: {}]   ;;  %s13781_s6 = inlined_call_operand.vmem [shape: f32[1,32], index: 6, kind: input, shape index: {}]   ;;  %s13782_s7 = inlined_call_operand.vmem [shape: f32[2,32], index: 7, kind: input, shape index: {}]   ;;  %s13783_s8 = inlined_call_operand.vmem [shape: f32[2,32], index: 8, kind: input, shape index: {}]   ;;  %s13784_s9 = inlined_call_operand.vmem [shape: bf16[2,32,128], index: 9, kind: input, shape index: {}]   ;;  %s13785_s10 = inlined_call_operand.vmem [shape: f32[2,128], index: 10, kind: input, shape index: {}]   ;;  %s13786_s11 = inlined_call_operand.vmem [shape: bf16[2,128,32], index: 11, kind: input, shape index: {}]   ;;  %s13787_s12 = inlined_call_operand.vmem [shape: f32[2,32], index: 12, kind: input, shape index: {}]   ;;  %s13788_s13 = inlined_call_operand.vmem [shape: f32[256,1], index: 13, kind: output, shape index: {}]  }
   0x1 LB: > { %s6990_s26 = sadd.s32 4294967295, %s7728_s25   ;;  %p6994_p0 = scmp.ge.s32.totalorder %s7728_s25, 1  ;;  %s7728_s25 = sphi %s7807_s25, %s23_s25  }
   0x2   : > { %p388_p1 = scmp.lt.s32.totalorder %s7728_s25, 3 }
   0x4   : > { %p389_p2 = pnand %p6994_p0, %p388_p1 }
   0x6   : > { %392 = sbr.rel (%p389_p2) target bundleno = 3212 (0xc8c), region = 72 }
   0xb   : > { %s6995_s27 = sshll.u32 %s6990_s26, 4  ;;  %v7730_v0 = vmov 2   ;;  %v7731_v1 = vmov 1   ;;  %v7732_v2 = vmov 0   ;;  %v13789_v7 = vmov 3   ;;  %v463_v24 = vld [vmem:[%s13776_s1 + $0x8] sm:$0xff] }
   0xc   : > { %7170 = vset.pattern.permute.xlu2 %v7730_v0  ;;  %7169 = vset.pattern.permute.xlu1 %v7731_v1  ;;  %p433_p3 = scmp.lt.s32.totalorder %s6995_s27, 31  ;;  %v7882_v26 = vld [vmem:[%s13778_s3] ss:$0 sm:$0xff]  ;;  %v7896_v31 = vld [vmem:[%s13777_s2 + $0x1] ss:$0 sm:$0xff]  ;;  %vm1021_vm0 = vcmask 261120  }
   0xd   : > { %7168 = vset.pattern.permute.xlu0 %v7732_v2  ;;  %v7887_v27 = vld [vmem:[%s13777_s2] ss:$0 sm:$0xff]  ;;  %v482_v29 = vadd.f32 %v7882_v26, %v463_v24  ;;  %v7904_v36 = vld [vmem:[%s13777_s2 + $0x2] ss:$0 sm:$0xff]  ;;  %v464_v56 = vld [vmem:[%s13776_s1 + $0x10] sm:$0xff]  ;;  %s7736_s24 = smov 125  }
   0xe   : > { %s14409_s27 = smov (!%p433_p3, %s6995_s27), 31  ;;  %v462_v32 = vld [vmem:[%s13776_s1] sm:$0xff]  ;;  %v483_v60 = vadd.f32 %v7882_v26, %v464_v56  ;;  %v465_v24 = vld [vmem:[%s13776_s1 + $0x18] sm:$0xff] }
   0xf   : > { %s6996_s28 = sshll.u32 %s14409_s27, 3  ;;  %v481_v38 = vadd.f32 %v7882_v26, %v462_v32  ;;  %v7914_v43 = vld [vmem:[%s13779_s4] ss:$0 sm:$0xff] }
  0x10   : > { %s7826_s14 = scalar_lea.vmem %s13775_s0, %s6996_s28  ;;  %s13736_s30 = scalar_lea.vmem %s13788_s13, %s6996_s28 }
  0x11   : > { %v445_v3 = vld [vmem:[%s7826_s14] sm:$0xff]  ;;  %v446_v4 = vld [vmem:[%s7826_s14 + $0x8] sm:$0xff]  ;;  %v448_v5 = vld [vmem:[%s7826_s14 + $0x18] sm:$0xff] }
  0x12   : > { %711 = vperm.xlu2 %7170, %v445_v3   ;;  %613 = vperm.xlu1 %7169, %v445_v3   ;;  %v891_v6 = vsub.f32 1.0, %v445_v3  ;;  %v892_v8 = vsub.f32 1.0, %v446_v4  ;;  %v450_v9 = vld [vmem:[%s7826_s14 + $0x28] sm:$0xff]  ;;  %v447_v10 = vld [vmem:[%s7826_s14 + $0x10] sm:$0xff]  ;;  %v7842_v11 = vld [vmem:[%s7826_s14 + $0x20] sm:$0xff]  ;;  %v894_v13 = vsub.f32 1.0, %v448_v5 }
  0x13   : > { %500 = vperm.xlu0 %7168, %v445_v3   ;;  %v893_v12 = vsub.f32 1.0, %v447_v10  ;;  %v896_v14 = vsub.f32 1.0, %v450_v9  ;;  %v7856_v15 = vld [vmem:[%s7826_s14 + $0x30] sm:$0xff]  ;;  %v7863_v16 = vld [vmem:[%s7826_s14 + $0x38] sm:$0xff]  ;;  %v7868_v17 = vld [vmem:[%s7826_s14 + $0x40] sm:$0xff] }
  0x14   : > { %v7873_v19 = vld [vmem:[%s7826_s14 + $0x48] sm:$0xff] }
  0x1a   : > { %715 = vperm.xlu2 %7170, %v446_v4   ;;  %617 = vperm.xlu1 %7169, %v446_v4  }
  0x1b   : > { %505 = vperm.xlu0 %7168, %v446_v4  }
  0x22   : > { %7172 = vset.pattern.permute.xlu2 %v13789_v7  ;;  %7171 = vset.pattern.permute.xlu1 %v13789_v7 }
  0x23   : > { %515 = vperm.xlu0 %7168, %v448_v5   ;;  %813 = vperm.xlu1 %7171, %v446_v4  }
  0x24   : > { %909 = vperm.xlu2 %7172, %v891_v6  }
  0x2b   : > { %525 = vperm.xlu0 %7168, %v450_v9   ;;  %914 = vperm.xlu1 %7171, %v892_v8  }
  0x2c   : > { %7173 = vset.pattern.permute.xlu2 %v7732_v2 }
  0x2d   : > { %510 = vperm.xlu2 %7173, %v447_v10  }
  0x33   : > { %7181 = vset.pattern.permute.xlu0 %v13789_v7  ;;  %7174 = vset.pattern.permute.xlu1 %v7731_v1 }
  0x34   : > { %809 = vperm.xlu0 %7181, %v445_v3   ;;  %621 = vperm.xlu1 %7174, %v447_v10  }
  0x35   : > { %7175 = vset.pattern.permute.xlu2 %v7731_v1 }
  0x36   : > { %625 = vperm.xlu2 %7175, %v448_v5  }
  0x3c   : > { %7176 = vset.pattern.permute.xlu1 %v7730_v0  ;;  %817 = vperm.xlu0 %7181, %v447_v10  }
  0x3d   : > { %719 = vperm.xlu1 %7176, %v447_v10  }
  0x3e   : > { %7177 = vset.pattern.permute.xlu2 %v7730_v0 }
  0x3f   : > { %723 = vperm.xlu2 %7177, %v448_v5  }
  0x44   : > { %825 = vperm.xlu0 %7181, %v7842_v11  }
  0x45   : > { %7178 = vset.pattern.permute.xlu1 %v13789_v7 }
  0x46   : > { %821 = vperm.xlu1 %7178, %v448_v5  }
  0x47   : > { %7179 = vset.pattern.permute.xlu2 %v13789_v7 }
  0x48   : > { %919 = vperm.xlu2 %7179, %v893_v12  }
  0x4c   : > { %7190 = vset.pattern.permute.xlu0 %v7731_v1 }
  0x4e   : > { %924 = vperm.xlu1 %7178, %v894_v13  }
  0x50   : > { %7180 = vset.pattern.permute.xlu2 %v7732_v2 }
  0x51   : > { %520 = vperm.xlu2 %7180, %v7842_v11  }
  0x56   : > { %7182 = vset.pattern.permute.xlu1 %v7731_v1 }
  0x57   : > { %629 = vperm.xlu1 %7182, %v7842_v11  }
  0x59   : > { %7183 = vset.pattern.permute.xlu2 %v7731_v1 }
  0x5a   : > { %633 = vperm.xlu2 %7183, %v450_v9  }
  0x5f   : > { %7185 = vset.pattern.permute.xlu1 %v13789_v7 }
  0x60   : > { %829 = vperm.xlu1 %7185, %v450_v9  }
  0x62   : > { %7184 = vset.pattern.permute.xlu2 %v7730_v0 }
  0x63   : > { %731 = vperm.xlu2 %7184, %v450_v9  }
  0x68   : > { %934 = vperm.xlu1 %7185, %v896_v14  }
  0x6b   : > { %7186 = vset.pattern.permute.xlu2 %v7732_v2 }
  0x6c   : > { %530 = vperm.xlu2 %7186, %v7856_v15   ;;  %v712_v18 = vpop.permute.xlu2 %711 }
  0x6d   : > { %v775_v51 = vmul.f32 %v7904_v36, %v712_v18 }
  0x70   : > { %7187 = vset.pattern.permute.xlu1 %v7731_v1 }
  0x71   : > { %637 = vperm.xlu1 %7187, %v7856_v15  }
  0x74   : > { %7188 = vset.pattern.permute.xlu2 %v7730_v0  ;;  %v716_v22 = vpop.permute.xlu2 %715 }
  0x75   : > { %739 = vperm.xlu2 %7188, %v7863_v16   ;;  %v776_v40 = vmul.f32 %v7904_v36, %v716_v22 }
  0x7d   : > { %7189 = vset.pattern.permute.xlu2 %v7732_v2 }
  0x7e   : > { %540 = vperm.xlu2 %7189, %v7868_v17   ;;  %v910_v28 = vpop.permute.xlu2 %909 }
  0x84   : > { %v614_v20 = vpop.permute.xlu1 %613 }
  0x85   : > { %v501_v21 = vpop.permute.xlu0 %500  ;;  %v677_v46 = vmul.f32 %v7896_v31, %v614_v20 }
  0x86   : > { %545 = vperm.xlu2 %7189, %v7873_v19   ;;  %v579_v39 = vmul.f32 %v7887_v27, %v501_v21 }
  0x87   : > { %v511_v42 = vpop.permute.xlu2 %510 }
  0x88   : > { %v595_v44 = vadd.f32 %v579_v39, %v481_v38  ;;  %v581_v61 = vmul.f32 %v7887_v27, %v511_v42 }
  0x8a   : > { %v693_v52 = vadd.f32 %v677_v46, %v595_v44  ;;  %v597_v4 = vadd.f32 %v581_v61, %v483_v60  ;;  %v7974_v44 = vld [vmem:[%s7826_s14 + $0x58] sm:$0xff]  ;;  %v897_v46 = vsub.f32 1.0, %v7856_v15  ;;  %v467_v61 = vld [vmem:[%s13776_s1 + $0x28] sm:$0xff] }
  0x8c   : > { %v618_v23 = vpop.permute.xlu1 %617  ;;  %v7929_v55 = vadd.f32 %v775_v51, %v693_v52 }
  0x8d   : > { %v506_v25 = vpop.permute.xlu0 %505  ;;  %v678_v37 = vmul.f32 %v7896_v31, %v618_v23 }
  0x8e   : > { %7191 = vset.pattern.permute.xlu2 %v7730_v0  ;;  %v580_v30 = vmul.f32 %v7887_v27, %v506_v25  ;;  %13953 = vst [vmem:[#allocation4_spill] sm:$0xff] %v7929_v55  ;;  %v987_v63 = vmul.f32 %v910_v28, %v7929_v55  ;;  %v484_v25 = vadd.f32 %v7882_v26, %v465_v24 }
  0x8f   : > { %743 = vperm.xlu2 %7191, %v7868_v17  }
  0x90   : > { %v596_v33 = vadd.f32 %v580_v30, %v482_v29  ;;  %v626_v57 = vpop.permute.xlu2 %625 }
  0x91   : > { %v680_v30 = vmul.f32 %v7896_v31, %v626_v57  ;;  %v7734_v57 = vmov 32.0  }
  0x92   : > { %v694_v41 = vadd.f32 %v678_v37, %v596_v33  ;;  %v895_v33 = vsub.f32 1.0, %v7842_v11  ;;  %7218 = vrcp.f32 %v7734_v57 }
  0x94   : > { %v7916_v45 = vadd.f32 %v776_v40, %v694_v41 }
  0x95   : > { %v516_v34 = vpop.permute.xlu0 %515  ;;  %v814_v35 = vpop.permute.xlu1 %813 }
  0x96   : > { %13951 = vst [vmem:[#allocation2_spill] sm:$0xff] %v7916_v45  ;;  %v876_v49 = vmul.f32 %v7914_v43, %v814_v35  ;;  %v582_v28 = vmul.f32 %v7887_v27, %v516_v34 }
  0x97   : > { %747 = vperm.xlu2 %7191, %v7873_v19  }
  0x98   : > { %v598_v32 = vadd.f32 %v582_v28, %v484_v25 }
  0x99   : > { %v724_v8 = vpop.permute.xlu2 %723 }
  0x9a   : > { %v696_v35 = vadd.f32 %v680_v30, %v598_v32  ;;  %v778_v37 = vmul.f32 %v7904_v36, %v724_v8 }
  0x9c   : > { %v7963_v39 = vadd.f32 %v778_v37, %v696_v35 }
  0x9d   : > { %v7919_v47 = vpop.permute.xlu0 %525  ;;  %v915_v48 = vpop.permute.xlu1 %914 }
  0x9e   : > { %v988_v50 = vmul.f32 %v915_v48, %v7916_v45  ;;  %13957 = vst [vmem:[#allocation8_spill] sm:$0xff] %v7963_v39  ;;  %v898_v48 = vsub.f32 1.0, %v7863_v16 }
  0x9f   : > { %7192 = vset.pattern.permute.xlu2 %v13789_v7 }
  0xa0   : > { %v7925_v53 = vadd.f32 %v988_v50, %v876_v49  ;;  %v899_v49 = vsub.f32 1.0, %v7868_v17 }
  0xa2   : > { %13952 = vst [vmem:[#allocation3_spill] sm:$0xff] %v7925_v53  ;;  %v1025_v54 = vsel %vm1021_vm0, %v7925_v53, 0.0  ;;  %v920_v18 = vpop.permute.xlu2 %919 }
  0xa3   : > { %1026 = vadd.xlane.f32.xlu1 %v1025_v54  ;;  %v7989_v54 = vld [vmem:[%s7826_s14 + $0x50] sm:$0xff] }
  0xa6   : > { %v810_v58 = vpop.permute.xlu0 %809  ;;  %v622_v59 = vpop.permute.xlu1 %621 }
  0xa7   : > { %v875_v62 = vmul.f32 %v7914_v43, %v810_v58  ;;  %v679_v5 = vmul.f32 %v7896_v31, %v622_v59  ;;  %v7219_v58 = vpop.eup %7218 }
  0xa8   : > { %v1071_v59 = vmul.f32 32.0, %v7219_v58  ;;  %vm1075_vm1 = vweird.f32 %v7219_v58 }
  0xa9   : > { %v7938_v3 = vadd.f32 %v987_v63, %v875_v62  ;;  %v695_v9 = vadd.f32 %v679_v5, %v597_v4  ;;  %v486_v63 = vadd.f32 %v7882_v26, %v467_v61  ;;  %v584_v4 = vmul.f32 %v7887_v27, %v7919_v47 }
  0xaa   : > { %v1072_v62 = vsub.f32 1.0, %v1071_v59 }
  0xab   : > { %13954 = vst [vmem:[#allocation5_spill] sm:$0xff] %v7938_v3  ;;  %v1022_v6 = vsel %vm1021_vm0, %v7938_v3, 0.0  ;;  %v7980_v50 = vpop.permute.xlu2 %520 }
  0xac   : > { %1023 = vadd.xlane.f32.xlu0 %v1022_v6  ;;  %v1073_v8 = vmul.f32 %v7219_v58, %v1072_v62  ;;  %v468_v62 = vld [vmem:[%s13776_s1 + $0x30] sm:$0xff] }
  0xae   : > { %v818_v14 = vpop.permute.xlu0 %817 }
  0xaf   : > { %v720_v10 = vpop.permute.xlu1 %719  ;;  %v877_v20 = vmul.f32 %v7914_v43, %v818_v14 }
  0xb0   : > { %v777_v12 = vmul.f32 %v7904_v36, %v720_v10 }
  0xb2   : > { %v7944_v13 = vadd.f32 %v777_v12, %v695_v9  ;;  %v600_v9 = vadd.f32 %v584_v4, %v486_v63  ;;  %v8003_v12 = vld [vmem:[%s7826_s14 + $0x68] sm:$0xff] }
  0xb4   : > { %13955 = vst [vmem:[#allocation6_spill] sm:$0xff] %v7944_v13  ;;  %v989_v21 = vmul.f32 %v920_v18, %v7944_v13  ;;  %v634_v52 = vpop.permute.xlu2 %633 }
  0xb5   : > { %v682_v5 = vmul.f32 %v7896_v31, %v634_v52  ;;  %v8046_v52 = vld [vmem:[%s7826_s14 + $0x70] sm:$0xff] }
  0xb6   : > { %v7948_v22 = vadd.f32 %v989_v21, %v877_v20  ;;  %v1074_v20 = vadd.f32 %v7219_v58, %v1073_v8 }
  0xb7   : > { %v698_v14 = vadd.f32 %v682_v5, %v600_v9  ;;  %v487_v5 = vadd.f32 %v7882_v26, %v468_v62 }
  0xb8   : > { %13956 = vst [vmem:[#allocation7_spill] sm:$0xff] %v7948_v22  ;;  %v1028_v23 = vsel %vm1021_vm0, %v7948_v22, 0.0  ;;  %v822_v29 = vpop.permute.xlu1 %821  ;;  %v8012_v24 = vsel %vm1075_vm1, %v7219_v58, %v1074_v20  ;;  %v583_v58 = vmul.f32 %v7887_v27, %v7980_v50 }
  0xb9   : > { %v878_v40 = vmul.f32 %v7914_v43, %v822_v29 }
  0xbc   : > { %649 = vperm.xlu1 %7187, %v7873_v19  }
  0xc0   : > { %645 = vperm.xlu0 %7190, %v7868_v17   ;;  %1029 = vadd.xlane.f32.xlu2 %v1028_v23  ;;  %v925_v38 = vpop.permute.xlu1 %924 }
  0xc1   : > { %v990_v41 = vmul.f32 %v925_v38, %v7963_v39 }
  0xc3   : > { %v7968_v34 = vadd.f32 %v990_v41, %v878_v40 }
  0xc4   : > { %7193 = vset.pattern.permute.xlu1 %v7730_v0 }
  0xc5   : > { %13958 = vst [vmem:[#allocation9_spill] sm:$0xff] %v7968_v34  ;;  %v1031_v42 = vsel %vm1021_vm0, %v7968_v34, 0.0 }
  0xc8   : > { %657 = vperm.xlu0 %7190, %v7974_v44  }
  0xc9   : > { %v7983_v51 = vpop.permute.xlu1 %629 }
  0xca   : > { %v681_v61 = vmul.f32 %v7896_v31, %v7983_v51 }
  0xd0   : > { %665 = vperm.xlu0 %7190, %v8003_v12  }
  0xd2   : > { %v830_v56 = vpop.permute.xlu1 %829 }
  0xd3   : > { %v880_v47 = vmul.f32 %v7914_v43, %v830_v56 }
  0xd8   : > { %929 = vperm.xlu2 %7192, %v895_v33   ;;  %7196 = vset.pattern.permute.xlu0 %v7732_v2 }
  0xe0   : > { %833 = vperm.xlu2 %7192, %v7856_v15  }
  0xe6   : > { %1032 = vadd.xlane.f32.xlu1 %v1031_v42 }
  0xe8   : > { %837 = vperm.xlu2 %7192, %v7863_v16  }
  0xf0   : > { %939 = vperm.xlu2 %7192, %v897_v46   ;;  %v8037_v46 = vld [vmem:[%s7826_s14 + $0x60] sm:$0xff] }
  0xf8   : > { %944 = vperm.xlu2 %7192, %v898_v48  }
  0xff   : > { %727 = vperm.xlu1 %7193, %v7842_v11   ;;  %v732_v11 = vpop.permute.xlu2 %731 }
 0x100   : > { %949 = vperm.xlu2 %7192, %v899_v49   ;;  %v780_v10 = vmul.f32 %v7904_v36, %v732_v11  ;;  %v466_v49 = vld [vmem:[%s13776_s1 + $0x20] sm:$0xff] }
 0x101   : > { %v485_v11 = vadd.f32 %v7882_v26, %v466_v49 }
 0x102   : > { %v8008_v21 = vadd.f32 %v780_v10, %v698_v14 }
 0x103   : > { %v599_v59 = vadd.f32 %v583_v58, %v485_v11 }
 0x104   : > { %13959 = vst [vmem:[#allocation10_spill] sm:$0xff] %v8008_v21 }
 0x105   : > { %v697_v4 = vadd.f32 %v681_v61, %v599_v59 }
 0x107   : > { %735 = vperm.xlu1 %7193, %v7856_v15   ;;  %v935_v15 = vpop.permute.xlu1 %934  ;;  %v531_v60 = vpop.permute.xlu2 %530 }
 0x108   : > { %7194 = vset.pattern.permute.xlu2 %v7730_v0  ;;  %v992_v23 = vmul.f32 %v935_v15, %v8008_v21  ;;  %v826_v15 = vpop.permute.xlu0 %825  ;;  %v585_v8 = vmul.f32 %v7887_v27, %v531_v60 }
 0x109   : > { %755 = vperm.xlu2 %7194, %v7974_v44   ;;  %v879_v51 = vmul.f32 %v7914_v43, %v826_v15 }
 0x10a   : > { %v8014_v28 = vadd.f32 %v992_v23, %v880_v47  ;;  %v601_v20 = vadd.f32 %v585_v8, %v487_v5 }
 0x10c   : > { %13960 = vst [vmem:[#allocation11_spill] sm:$0xff] %v8014_v28  ;;  %v1037_v33 = vsel %vm1021_vm0, %v8014_v28, 0.0 }
 0x10f   : > { %751 = vperm.xlu1 %7193, %v7989_v54   ;;  %v638_v6 = vpop.permute.xlu1 %637  ;;  %v8005_v18 = vpop.permute.xlu2 %739 }
 0x110   : > { %v683_v47 = vmul.f32 %v7896_v31, %v638_v6 }
 0x111   : > { %7195 = vset.pattern.permute.xlu2 %v7731_v1 }
 0x117   : > { %7197 = vset.pattern.permute.xlu1 %v7732_v2  ;;  %v1027_v25 = vpop.xlane.xlu1 %1026  ;;  %v8018_v30 = vpop.permute.xlu2 %540 }
 0x118   : > { %v1078_v29 = vmul.f32 %v8012_v24, %v1027_v25 }
 0x11a   : > { %v8021_v32 = vsub.f32 %v7925_v53, %v1078_v29 }
 0x11c   : > { %v1110_v35 = vmul.f32 %v8021_v32, %v8021_v32 }
 0x11e   : > { %v1128_v38 = vsel %vm1021_vm0, %v1110_v35, 0.0 }
 0x11f   : > { %v8027_v37 = vpop.permute.xlu2 %545  ;;  %v1024_v50 = vpop.xlane.xlu0 %1023 }
 0x120   : > { %v1077_v23 = vmul.f32 %v8012_v24, %v1024_v50 }
 0x122   : > { %v8074_v35 = vsub.f32 %v7938_v3, %v1077_v23 }
 0x127   : > { %v8030_v40 = vpop.permute.xlu2 %743 }
 0x12e   : > { %v8039_v48 = vpop.permute.xlu1 %649 }
 0x12f   : > { %v8032_v2 = vpop.permute.xlu2 %747 }
 0x132   : > { %1038 = vadd.xlane.f32.xlu2 %v1037_v33  ;;  %v699_v33 = vadd.f32 %v683_v47, %v601_v20  ;;  %v900_v47 = vsub.f32 1.0, %v7873_v19 }
 0x137   : > { %v1030_v41 = vpop.xlane.xlu2 %1029 }
 0x13a   : > { %1129 = vadd.xlane.f32.xlu2 %v1128_v38 }
 0x13f   : > { %v930_v42 = vpop.permute.xlu2 %929 }
 0x147   : > { %v834_v56 = vpop.permute.xlu2 %833 }
 0x148   : > { %v881_v58 = vmul.f32 %v7914_v43, %v834_v56 }
 0x14f   : > { %v8063_v10 = vpop.permute.xlu2 %837 }
 0x152   : > { %641 = vperm.xlu2 %7195, %v7863_v16  }
 0x157   : > { %v940_v6 = vpop.permute.xlu2 %939 }
 0x159   : > { %v8048_v57 = vpop.xlane.xlu1 %1032 }
 0x15a   : > { %653 = vperm.xlu2 %7195, %v7989_v54  }
 0x162   : > { %661 = vperm.xlu2 %7195, %v8037_v46  }
 0x16a   : > { %669 = vperm.xlu2 %7195, %v8046_v52  }
 0x171   : > { %v728_v63 = vpop.permute.xlu1 %727 }
 0x172   : > { %v779_v9 = vmul.f32 %v7904_v36, %v728_v63  ;;  %7201 = vset.pattern.permute.xlu2 %v13789_v7  ;;  %v1079_v63 = vmul.f32 %v8012_v24, %v1030_v41  ;;  %v8102_v41 = vpop.permute.xlu2 %944 }
 0x174   : > { %v8065_v14 = vadd.f32 %v779_v9, %v697_v4  ;;  %v8092_v4 = vsub.f32 %v7948_v22, %v1079_v63  ;;  %v901_v63 = vsub.f32 1.0, %v7989_v54 }
 0x176   : > { %13961 = vst [vmem:[#allocation12_spill] sm:$0xff] %v8065_v14  ;;  %v991_v25 = vmul.f32 %v930_v42, %v8065_v14  ;;  %v1109_v42 = vmul.f32 %v8074_v35, %v8074_v35  ;;  %v1111_v56 = vmul.f32 %v8092_v4, %v8092_v4 }
 0x178   : > { %v8071_v29 = vadd.f32 %v991_v25, %v879_v51  ;;  %v1125_v61 = vsel %vm1021_vm0, %v1109_v42, 0.0  ;;  %v1131_v5 = vsel %vm1021_vm0, %v1111_v56, 0.0  ;;  %v8124_v25 = vpop.permute.xlu0 %645 }
 0x179   : > { %v736_v60 = vpop.permute.xlu1 %735 }
 0x17a   : > { %13962 = vst [vmem:[#allocation13_spill] sm:$0xff] %v8071_v29  ;;  %v781_v38 = vmul.f32 %v7904_v36, %v736_v60  ;;  %v1034_v49 = vsel %vm1021_vm0, %v8071_v29, 0.0  ;;  %v8106_v8 = vpop.permute.xlu2 %949  ;;  %v7134_v60 = vld [vmem:[%s13784_s9 + $0x8] sm:$0xff] }
 0x17b   : > { %1035 = vadd.xlane.f32.xlu1 %v1034_v49  ;;  %1471 = vmatpush.bf16.msra.mxu0 %v7134_v60 }
 0x17c   : > { %v8079_v11 = vadd.f32 %v781_v38, %v699_v33 }
 0x17e   : > { %13963 = vst [vmem:[#allocation14_spill] sm:$0xff] %v8079_v11  ;;  %v993_v15 = vmul.f32 %v940_v6, %v8079_v11 }
 0x180   : > { %v8085_v59 = vadd.f32 %v993_v15, %v881_v58  ;;  %v8131_v38 = vpop.permute.xlu0 %657 }
 0x181   : > { %v8122_v23 = vpop.permute.xlu1 %751 }
 0x182   : > { %13964 = vst [vmem:[#allocation15_spill] sm:$0xff] %v8085_v59  ;;  %v1040_v62 = vsel %vm1021_vm0, %v8085_v59, 0.0  ;;  %v8109_v9 = vpop.permute.xlu2 %755 }
 0x183   : > { %1126 = vadd.xlane.f32.xlu1 %v1125_v61  ;;  %1041 = vadd.xlane.f32.xlu0 %v1040_v62 }
 0x188   : > { %v8138_v15 = vpop.permute.xlu0 %665 }
 0x193   : > { %1132 = vadd.xlane.f32.xlu2 %v1131_v5 }
 0x197   : > { %535 = vperm.xlu0 %7196, %v7863_v16   ;;  %v8112_v16 = vld [vmem:[%s7826_s14 + $0x78] sm:$0xff] }
 0x19f   : > { %555 = vperm.xlu0 %7196, %v7974_v44  }
 0x1a5   : > { %v8115_v50 = vpop.xlane.xlu2 %1038 }
 0x1a7   : > { %565 = vperm.xlu0 %7196, %v8003_v12  }
 0x1af   : > { %570 = vperm.xlu0 %7196, %v8046_v52  }
 0x1b7   : > { %7198 = vset.pattern.permute.xlu0 %v7730_v0  ;;  %v1130_v0 = vpop.xlane.xlu2 %1129 }
 0x1b8   : > { %759 = vperm.xlu0 %7198, %v8037_v46   ;;  %v1174_v51 = vmul.f32 %v1130_v0, %v8012_v24 }
 0x1ba   : > { %v1190_v20 = vadd.f32 1e-05, %v1174_v51 }
 0x1bc   : > { %7220 = vrsqrt.f32 %v1190_v20  ;;  %vm1221_vm3 = vweird.f32 %v1190_v20 }
 0x1c0   : > { %763 = vperm.xlu0 %7198, %v8003_v12  }
 0x1c8   : > { %767 = vperm.xlu0 %7198, %v8046_v52  }
 0x1d0   : > { %771 = vperm.xlu0 %7198, %v8112_v16  }
 0x1d8   : > { %7200 = vset.pattern.permute.xlu0 %v13789_v7  ;;  %v642_v7 = vpop.permute.xlu2 %641 }
 0x1d9   : > { %841 = vperm.xlu0 %7200, %v7868_v17   ;;  %v7221_v17 = vpop.eup %7220 }
 0x1da   : > { %v1216_v49 = vmul.f32 %v7221_v17, %v1190_v20  ;;  %vm1222_vm2 = vweird.f32 %v7221_v17  ;;  %v8151_v20 = vld [vmem:[%s13782_s7] ss:$0 sm:$0xff] }
 0x1db   : > { %vm1223_vm4 = vmor %vm1221_vm3, %vm1222_vm2 }
 0x1dc   : > { %v1217_v6 = vmul.f32 %v7221_v17, %v1216_v49  ;;  %v469_v49 = vld [vmem:[%s13776_s1 + $0x38] sm:$0xff] }
 0x1de   : > { %v1218_v62 = vmul.f32 0.5, %v1217_v6 }
 0x1e0   : > { %v1219_v56 = vsub.f32 1.5, %v1218_v62  ;;  %v488_v62 = vadd.f32 %v7882_v26, %v469_v49 }
 0x1e1   : > { %845 = vperm.xlu0 %7200, %v7873_v19   ;;  %v7133_v19 = vld [vmem:[%s13784_s9] sm:$0xff] }
 0x1e2   : > { %1472 = vmatpush.bf16.msra.mxu0 %v7133_v19  ;;  %v1220_v51 = vmul.f32 %v7221_v17, %v1219_v56 }
 0x1e4   : > { %v1224_v6 = vsel %vm1223_vm4, %v7221_v17, %v1220_v51 }
 0x1e5   : > { %v1366_v56 = vmul.f32 %v1224_v6, %v8021_v32  ;;  %v8160_v32 = vld [vmem:[%s13783_s8] ss:$0 sm:$0xff]  ;;  %v782_v6 = vmul.f32 %v7904_v36, %v8005_v18 }
 0x1e6   : > { %4375 = vmatpush.bf16.msrb.mxu0 %v7134_v60 }
 0x1e9   : > { %954 = vperm.xlu0 %7200, %v900_v47  }
 0x1ea   : > { %4376 = vmatpush.bf16.msrb.mxu0 %v7133_v19  ;;  %v902_v19 = vsub.f32 1.0, %v7974_v44 }
 0x1ee   : > { %v8129_v33 = vpop.xlane.xlu1 %1035 }
 0x1f1   : > { %849 = vperm.xlu0 %7200, %v7989_v54  }
 0x1f6   : > { %v1127_v58 = vpop.xlane.xlu1 %1126  ;;  %v1042_v0 = vpop.xlane.xlu0 %1041 }
 0x1f7   : > { %v1173_v42 = vmul.f32 %v1127_v58, %v8012_v24 }
 0x1f9   : > { %v1189_v61 = vadd.f32 1e-05, %v1173_v42  ;;  %853 = vperm.xlu0 %7200, %v7974_v44   ;;  %v684_v44 = vmul.f32 %v7896_v31, %v642_v7 }
 0x1fb   : > { %7222 = vrsqrt.f32 %v1189_v61  ;;  %vm1211_vm6 = vweird.f32 %v1189_v61 }
 0x201   : > { %v7223_v5 = vpop.eup %7222  ;;  %959 = vperm.xlu0 %7200, %v901_v63  }
 0x202   : > { %v1206_v47 = vmul.f32 %v7223_v5, %v1189_v61  ;;  %vm1212_vm5 = vweird.f32 %v7223_v5 }
 0x203   : > { %vm1213_vm7 = vmor %vm1211_vm6, %vm1212_vm5 }
 0x204   : > { %v1207_v60 = vmul.f32 %v7223_v5, %v1206_v47 }
 0x206   : > { %v1208_v58 = vmul.f32 0.5, %v1207_v60 }
 0x208   : > { %v1209_v42 = vsub.f32 1.5, %v1208_v58 }
 0x209   : > { %964 = vperm.xlu0 %7200, %v902_v19   ;;  %v536_v63 = vpop.permute.xlu0 %535  ;;  %v1383_v19 = vmul.f32 %v8151_v20, %v1366_v56 }
 0x20a   : > { %v1210_v47 = vmul.f32 %v7223_v5, %v1209_v42  ;;  %v586_v17 = vmul.f32 %v7887_v27, %v536_v63 }
 0x20b   : > { %v1400_v42 = vadd.f32 %v8160_v32, %v1383_v19 }
 0x20c   : > { %v1214_v51 = vsel %vm1213_vm7, %v7223_v5, %v1210_v47  ;;  %v602_v60 = vadd.f32 %v586_v17, %v488_v62  ;;  %v882_v62 = vmul.f32 %v7914_v43, %v8063_v10 }
 0x20d   : > { %v1365_v49 = vmul.f32 %v1214_v51, %v8074_v35 }
 0x20e   : > { %v700_v7 = vadd.f32 %v684_v44, %v602_v60  ;;  %v906_v44 = vsub.f32 1.0, %v8112_v16  ;;  %v1081_v60 = vmul.f32 %v8012_v24, %v8129_v33  ;;  %v587_v33 = vmul.f32 %v7887_v27, %v8018_v30 }
 0x20f   : > { %v1382_v61 = vmul.f32 %v8151_v20, %v1365_v49  ;;  %v783_v30 = vmul.f32 %v7904_v36, %v8030_v40 }
 0x210   : > { %v8165_v58 = vadd.f32 %v782_v6, %v700_v7  ;;  %v8195_v49 = vsub.f32 %v8071_v29, %v1081_v60  ;;  %v470_v6 = vld [vmem:[%s13776_s1 + $0x40] sm:$0xff]  ;;  %v1083_v7 = vmul.f32 %v8012_v24, %v1042_v0  ;;  %v7138_v29 = vld [vmem:[%s13786_s11 + $0x18] sm:$0xff] }
 0x211   : > { %865 = vperm.xlu0 %7200, %v8046_v52   ;;  %v8168_v5 = vpop.permute.xlu0 %555  ;;  %v1399_v35 = vadd.f32 %v8160_v32, %v1382_v61  ;;  %v489_v61 = vadd.f32 %v7882_v26, %v470_v6 }
 0x212   : > { %13965 = vst [vmem:[#allocation16_spill] sm:$0xff] %v8165_v58  ;;  %v994_v63 = vmul.f32 %v8102_v41, %v8165_v58 }
 0x213   : > { %v1415_v18 = vpack.c.bf16 %v1400_v42, %v1399_v35  ;;  %v685_v35 = vmul.f32 %v7896_v31, %v8124_v25  ;;  %v8212_v42 = vsub.f32 %v8085_v59, %v1083_v7  ;;  %v603_v0 = vadd.f32 %v587_v33, %v489_v61  ;;  %v471_v61 = vld [vmem:[%s13776_s1 + $0x48] sm:$0xff] }
 0x214   : > { %v8176_v56 = vadd.f32 %v994_v63, %v882_v62 }
 0x215   : > { %7007 = vmatmul.msk.bf16.vlgmr.msra.gmra.mxu0 %vm1021_vm0, %v1415_v18  ;;  %v701_v18 = vadd.f32 %v685_v35, %v603_v0  ;;  %v490_v35 = vadd.f32 %v7882_v26, %v471_v61  ;;  %v686_v0 = vmul.f32 %v7896_v31, %v8039_v48 }
 0x216   : > { %v1043_v47 = vsel %vm1021_vm0, %v8176_v56, 0.0 }
 0x217   : > { %1044 = vadd.xlane.f32.xlu1 %v1043_v47  ;;  %v8223_v25 = vadd.f32 %v783_v30, %v701_v18 }
 0x219   : > { %984 = vperm.xlu0 %7200, %v906_v44   ;;  %v8182_v17 = vpop.permute.xlu0 %565  ;;  %v1115_v44 = vmul.f32 %v8212_v42, %v8212_v42  ;;  %13966 = vst [vmem:[#allocation17_spill] sm:$0xff] %v8223_v25  ;;  %v995_v6 = vmul.f32 %v8106_v8, %v8223_v25  ;;  %v588_v8 = vmul.f32 %v7887_v27, %v8027_v37 }
 0x21b   : > { %v1143_v47 = vsel %vm1021_vm0, %v1115_v44, 0.0  ;;  %v604_v18 = vadd.f32 %v588_v8, %v490_v35 }
 0x21d   : > { %v702_v30 = vadd.f32 %v686_v0, %v604_v18  ;;  %v7142_v0 = vld [vmem:[%s13786_s11 + $0x38] sm:$0xff] }
 0x21e   : > { %2228 = vmatpush.bf16.msra.mxu1 %v7142_v0  ;;  %v473_v18 = vld [vmem:[%s13776_s1 + $0x58] sm:$0xff] }
 0x221   : > { %v8184_v51 = vpop.permute.xlu0 %570 }
 0x22a   : > { %v8186_v10 = vpop.permute.xlu0 %759 }
 0x230   : > { %550 = vperm.xlu1 %7197, %v7989_v54   ;;  %v1113_v54 = vmul.f32 %v8195_v49, %v8195_v49 }
 0x232   : > { %v8189_v41 = vpop.permute.xlu0 %763  ;;  %v1137_v62 = vsel %vm1021_vm0, %v1113_v54, 0.0 }
 0x238   : > { %560 = vperm.xlu1 %7197, %v8037_v46  }
 0x23a   : > { %v8197_v19 = vpop.permute.xlu0 %767 }
 0x240   : > { %575 = vperm.xlu1 %7197, %v8112_v16  }
 0x242   : > { %v8215_v63 = vpop.permute.xlu0 %771 }
 0x243   : > { %1138 = vadd.xlane.f32.xlu0 %v1137_v62  ;;  %v1080_v62 = vmul.f32 %v8012_v24, %v8048_v57 }
 0x245   : > { %v8246_v44 = vsub.f32 %v7968_v34, %v1080_v62 }
 0x247   : > { %v1112_v37 = vmul.f32 %v8246_v44, %v8246_v44 }
 0x248   : > { %7199 = vset.pattern.permute.xlu1 %v7731_v1  ;;  %v13967_v1 = vmov 3  }
 0x249   : > { %673 = vperm.xlu1 %7199, %v8112_v16  }
 0x24b   : > { %1144 = vadd.xlane.f32.xlu0 %v1143_v47  ;;  %v842_v60 = vpop.permute.xlu0 %841  ;;  %v903_v47 = vsub.f32 1.0, %v8037_v46 }
 0x24c   : > { %v883_v7 = vmul.f32 %v7914_v43, %v842_v60  ;;  %v784_v60 = vmul.f32 %v7904_v36, %v8032_v2 }
 0x24e   : > { %v8229_v54 = vadd.f32 %v995_v6, %v883_v7  ;;  %v8253_v57 = vadd.f32 %v784_v60, %v702_v30 }
 0x250   : > { %v1046_v40 = vsel %vm1021_vm0, %v8229_v54, 0.0  ;;  %13968 = vst [vmem:[#allocation18_spill] sm:$0xff] %v8253_v57 }
 0x251   : > { %1047 = vadd.xlane.f32.xlu2 %v1046_v40  ;;  %7202 = vset.pattern.permute.xlu1 %v13967_v1  ;;  %v1134_v40 = vsel %vm1021_vm0, %v1112_v37, 0.0  ;;  %v904_v1 = vsub.f32 1.0, %v8003_v12  ;;  %v492_v37 = vadd.f32 %v7882_v26, %v473_v18  ;;  %v688_v18 = vmul.f32 %v7896_v31, %v8131_v38 }
 0x252   : > { %v786_v38 = vmul.f32 %v7904_v36, %v8109_v9 }
 0x253   : > { %v846_v33 = vpop.permute.xlu0 %845 }
 0x254   : > { %v884_v48 = vmul.f32 %v7914_v43, %v846_v33  ;;  %v8269_v33 = vld [vmem:[%s13785_s10] ss:$0 sm:$0xff] }
 0x25b   : > { %v955_v6 = vpop.permute.xlu0 %954 }
 0x25c   : > { %v996_v7 = vmul.f32 %v955_v6, %v8253_v57  ;;  %v590_v6 = vmul.f32 %v7887_v27, %v8168_v5 }
 0x25e   : > { %v606_v5 = vadd.f32 %v590_v6, %v492_v37 }
 0x263   : > { %v8264_v61 = vpop.permute.xlu0 %849 }
 0x269   : > { %857 = vperm.xlu2 %7201, %v8037_v46   ;;  %v8259_v46 = vadd.f32 %v996_v7, %v884_v48 }
 0x26b   : > { %13969 = vst [vmem:[#allocation19_spill] sm:$0xff] %v8259_v46  ;;  %v1049_v2 = vsel %vm1021_vm0, %v8259_v46, 0.0  ;;  %v854_v35 = vpop.permute.xlu0 %853 }
 0x271   : > { %969 = vperm.xlu2 %7201, %v903_v47   ;;  %v905_v47 = vsub.f32 1.0, %v8046_v52  ;;  %v7140_v52 = vld [vmem:[%s13786_s11 + $0x28] sm:$0xff] }
 0x273   : > { %1135 = vadd.xlane.f32.xlu1 %v1134_v40  ;;  %v8295_v7 = vpop.permute.xlu0 %959 }
 0x279   : > { %974 = vperm.xlu2 %7201, %v904_v1  }
 0x27b   : > { %1050 = vadd.xlane.f32.xlu1 %v1049_v2  ;;  %v1082_v2 = vmul.f32 %v8012_v24, %v8115_v50  ;;  %v965_v22 = vpop.permute.xlu0 %964 }
 0x27d   : > { %v8319_v50 = vsub.f32 %v8014_v28, %v1082_v2 }
 0x27f   : > { %v1114_v2 = vmul.f32 %v8319_v50, %v8319_v50 }
 0x281   : > { %869 = vperm.xlu2 %7201, %v8112_v16   ;;  %v1140_v58 = vsel %vm1021_vm0, %v1114_v2, 0.0  ;;  %v7136_v2 = vld [vmem:[%s13786_s11 + $0x8] sm:$0xff] }
 0x292   : > { %v1474_v8 = vpop.f32.mrf.mxu0 }
 0x293   : > { %v8272_v62 = vadd.f32 %v8269_v33, %v1474_v8  ;;  %v8305_v8 = vpop.permute.xlu2 %653 }
 0x294   : > { %861 = vperm.xlu1 %7202, %v8003_v12   ;;  %v7141_v12 = vld [vmem:[%s13786_s11 + $0x30] sm:$0xff] }
 0x295   : > { %v8279_v16 = vmul.f32 0.70710677, %v8272_v62  ;;  %2229 = vmatpush.bf16.msra.mxu1 %v7141_v12  ;;  %v7139_v12 = vld [vmem:[%s13786_s11 + $0x20] sm:$0xff] }
 0x297   : > { %v8285_v30 = vand.u32 2147483647, %v8279_v16  ;;  %vm1546_vm1 = vcmp.ge.f32.partialorder %v8279_v16, 0.0 }
 0x299   : > { %v1594_v60 = vmul.f32 0.3275911, %v8285_v30  ;;  %2230 = vmatpush.bf16.msra.mxu1 %v7140_v52 }
 0x29a   : > { %v1476_v48 = vpop.f32.mrf.mxu0 }
 0x29b   : > { %v1610_v40 = vadd.f32 1.0, %v1594_v60  ;;  %v8298_v1 = vadd.f32 %v8269_v33, %v1476_v48  ;;  %v704_v60 = vadd.f32 %v688_v18, %v606_v5  ;;  %v8321_v48 = vpop.xlane.xlu1 %1044  ;;  %v8333_v28 = vpop.permute.xlu2 %661 }
 0x29c   : > { %979 = vperm.xlu1 %7202, %v905_v47  }
 0x29d   : > { %7224 = vrcp.f32 %v1610_v40  ;;  %v8308_v0 = vmul.f32 0.70710677, %v8298_v1  ;;  %2231 = vmatpush.bf16.msra.mxu1 %v7139_v12  ;;  %v8331_v5 = vadd.f32 %v786_v38, %v704_v60  ;;  %v1637_v12 = vand.u32 2147483648, %v1610_v40 }
 0x29e   : > { %v1635_v3 = vand.u32 2147483647, %v1610_v40  ;;  %v886_v60 = vmul.f32 %v7914_v43, %v854_v35  ;;  %vm1631_vm9 = vweird.f32 %v1610_v40 }
 0x29f   : > { %v8313_v47 = vand.u32 2147483647, %v8308_v0  ;;  %13970 = vst [vmem:[#allocation20_spill] sm:$0xff] %v8331_v5  ;;  %v998_v9 = vmul.f32 %v965_v22, %v8331_v5  ;;  %vm1547_vm2 = vcmp.ge.f32.partialorder %v8308_v0, 0.0 }
 0x2a0   : > { %vm1636_vm11 = vcmp.eq.f32.partialorder %v1635_v3, 8.507059e+37 }
 0x2a1   : > { %v1595_v37 = vmul.f32 0.3275911, %v8313_v47  ;;  %2232 = vmatpush.bf16.msra.mxu1 %v7138_v29  ;;  %v472_v29 = vld [vmem:[%s13776_s1 + $0x50] sm:$0xff]  ;;  %v8344_v5 = vadd.f32 %v998_v9, %v886_v60 }
 0x2a3   : > { %v7225_v6 = vpop.eup %7224  ;;  %v1611_v59 = vadd.f32 1.0, %v1595_v37  ;;  %v7137_v37 = vld [vmem:[%s13786_s11 + $0x10] sm:$0xff]  ;;  %v551_v38 = vpop.permute.xlu1 %550  ;;  %13971 = vst [vmem:[#allocation21_spill] sm:$0xff] %v8344_v5  ;;  %v1055_v9 = vsel %vm1021_vm0, %v8344_v5, 0.0 }
 0x2a4   : > { %v1627_v52 = vmul.f32 %v7225_v6, %v1610_v40  ;;  %vm1632_vm8 = vweird.f32 %v7225_v6  ;;  %v491_v40 = vadd.f32 %v7882_v26, %v472_v29  ;;  %v589_v14 = vmul.f32 %v7887_v27, %v551_v38  ;;  %v8357_v38 = vpop.permute.xlu2 %669 }
 0x2a5   : > { %7226 = vrcp.f32 %v1611_v59  ;;  %2233 = vmatpush.bf16.msra.mxu1 %v7137_v37  ;;  %vm1633_vm10 = vmor %vm1631_vm9, %vm1632_vm8  ;;  %v7135_v37 = vld [vmem:[%s13786_s11] sm:$0xff]  ;;  %v1650_v29 = vand.u32 2147483647, %v1611_v59  ;;  %vm1646_vm13 = vweird.f32 %v1611_v59 }
 0x2a6   : > { %v1628_v18 = vsub.f32 1.0, %v1627_v52  ;;  %v1638_v52 = vor.u32 1.1754944e-38, %v1637_v12  ;;  %v605_v60 = vadd.f32 %v589_v14, %v491_v40 }
 0x2a7   : > { %vm1651_vm15 = vcmp.eq.f32.partialorder %v1650_v29, 8.507059e+37 }
 0x2a8   : > { %v1629_v34 = vmul.f32 %v7225_v6, %v1628_v18 }
 0x2a9   : > { %2234 = vmatpush.bf16.msra.mxu1 %v7136_v2  ;;  %v687_v2 = vmul.f32 %v7896_v31, %v8305_v8 }
 0x2aa   : > { %1141 = vadd.xlane.f32.xlu2 %v1140_v58  ;;  %v1630_v22 = vadd.f32 %v7225_v6, %v1629_v34  ;;  %v2010_v58 = vsub.f32 0.0, %v8285_v30 }
 0x2ab   : > { %v7227_v18 = vpop.eup %7226 }
 0x2ac   : > { %v1634_v57 = vsel %vm1633_vm10, %v7225_v6, %v1630_v22  ;;  %v1642_v35 = vmul.f32 %v7227_v18, %v1611_v59  ;;  %v1652_v6 = vand.u32 2147483648, %v1611_v59  ;;  %vm1647_vm12 = vweird.f32 %v7227_v18 }
 0x2ad   : > { %v1639_v45 = vsel %vm1636_vm11, %v1638_v52, %v1634_v57  ;;  %v2026_v57 = vmul.f32 %v2010_v58, %v8285_v30  ;;  %2235 = vmatpush.bf16.msra.mxu1 %v7135_v37  ;;  %vm1648_vm14 = vmor %vm1646_vm13, %vm1647_vm12  ;;  %v785_v30 = vmul.f32 %v7904_v36, %v8122_v23  ;;  %v885_v23 = vmul.f32 %v7914_v43, %v8264_v61 }
 0x2ae   : > { %v1866_v34 = vmul.f32 1.0614054, %v1639_v45  ;;  %v1643_v12 = vsub.f32 1.0, %v1642_v35  ;;  %v1653_v39 = vor.u32 1.1754944e-38, %v1652_v6 }
 0x2af   : > { %v2042_v40 = vmul.f32 1.442695, %v2026_v57 }
 0x2b0   : > { %v1882_v3 = vadd.f32 -1.4531521, %v1866_v34  ;;  %v1644_v22 = vmul.f32 %v7227_v18, %v1643_v12  ;;  %v703_v34 = vadd.f32 %v687_v2, %v605_v60  ;;  %v2011_v12 = vsub.f32 0.0, %v8313_v47 }
 0x2b1   : > { %7228 = vpow2.f32 %v2042_v40 }
 0x2b2   : > { %1056 = vadd.xlane.f32.xlu2 %v1055_v9  ;;  %v1898_v52 = vmul.f32 %v1882_v3, %v1639_v45  ;;  %v1645_v35 = vadd.f32 %v7227_v18, %v1644_v22  ;;  %v8365_v37 = vadd.f32 %v785_v30, %v703_v34  ;;  %v2027_v59 = vmul.f32 %v2011_v12, %v8313_v47  ;;  %v561_v34 = vpop.permute.xlu1 %560 }
 0x2b4   : > { %v1914_v53 = vadd.f32 1.4214138, %v1898_v52  ;;  %v1649_v14 = vsel %vm1648_vm14, %v7227_v18, %v1645_v35  ;;  %13972 = vst [vmem:[#allocation22_spill] sm:$0xff] %v8365_v37  ;;  %v1133_v18 = vpop.xlane.xlu2 %1132  ;;  %v997_v22 = vmul.f32 %v8295_v7, %v8365_v37  ;;  %v1084_v52 = vmul.f32 %v8012_v24, %v8321_v48 }
 0x2b5   : > { %v1654_v55 = vsel %vm1651_vm15, %v1653_v39, %v1649_v14 }
 0x2b6   : > { %v1930_v25 = vmul.f32 %v1914_v53, %v1639_v45  ;;  %v1867_v58 = vmul.f32 1.0614054, %v1654_v55  ;;  %v2044_v53 = vmul.f32 1.442695, %v2027_v59  ;;  %v8374_v2 = vadd.f32 %v997_v22, %v885_v23 }
 0x2b7   : > { %v7229_v57 = vpop.eup %7228  ;;  %v8377_v7 = vsub.f32 %v8176_v56, %v1084_v52  ;;  %v13818_v59 = vmov -1.0   ;;  %v1514_v52 = vmul.f32 0.5, %v8272_v62  ;;  %v477_v62 = vld [vmem:[%s13776_s1 + $0x78] sm:$0xff] }
 0x2b8   : > { %v1946_v9 = vadd.f32 -0.28449672, %v1930_v25  ;;  %v1883_v8 = vadd.f32 -1.4531521, %v1867_v58  ;;  %13973 = vst [vmem:[#allocation23_spill] sm:$0xff] %v8374_v2  ;;  %7230 = vpow2.f32 %v2044_v53  ;;  %v1052_v48 = vsel %vm1021_vm0, %v8374_v2, 0.0 }
 0x2b9   : > { %v591_v58 = vmul.f32 %v7887_v27, %v561_v34  ;;  %v1563_v27 = vsel %vm1547_vm2, 1.0, %v13818_v59 }
 0x2ba   : > { %v1962_v6 = vmul.f32 %v1946_v9, %v1639_v45  ;;  %v1899_v3 = vmul.f32 %v1883_v8, %v1654_v55 }
 0x2bc   : > { %v1978_v60 = vadd.f32 0.2548296, %v1962_v6  ;;  %v1915_v39 = vadd.f32 1.4214138, %v1899_v3  ;;  %v1562_v6 = vsel %vm1546_vm1, 1.0, %v13818_v59  ;;  %v1116_v3 = vmul.f32 %v8377_v7, %v8377_v7 }
 0x2be   : > { %v1994_v29 = vmul.f32 %v1978_v60, %v1639_v45  ;;  %v1931_v25 = vmul.f32 %v1915_v39, %v1654_v55  ;;  %v474_v45 = vld [vmem:[%s13776_s1 + $0x60] sm:$0xff]  ;;  %v7231_v8 = vpop.eup %7230 }
 0x2bf   : > { %v493_v30 = vadd.f32 %v7882_v26, %v474_v45  ;;  %v689_v26 = vmul.f32 %v7896_v31, %v8333_v28  ;;  %v1175_v31 = vmul.f32 %v1133_v18, %v8012_v24  ;;  %v787_v28 = vmul.f32 %v7904_v36, %v8186_v10 }
 0x2c0   : > { %v1947_v47 = vadd.f32 -0.28449672, %v1931_v25  ;;  %v2074_v35 = vmul.f32 %v7229_v57, %v1994_v29  ;;  %v1146_v25 = vsel %vm1021_vm0, %v1116_v3, 0.0  ;;  %v8431_v3 = vld [vmem:[%s13777_s2 + $0x1] ss:$0 sm:$0xff] }
 0x2c1   : > { %v607_v39 = vadd.f32 %v591_v58, %v493_v30  ;;  %v1191_v30 = vadd.f32 1e-05, %v1175_v31  ;;  %v8417_v58 = vld [vmem:[%s13778_s3] ss:$0 sm:$0xff] }
 0x2c2   : > { %v1963_v14 = vmul.f32 %v1947_v47, %v1654_v55  ;;  %v2090_v12 = vsub.f32 1.0, %v2074_v35  ;;  %v1515_v47 = vmul.f32 0.5, %v8298_v1 }
 0x2c3   : > { %v705_v35 = vadd.f32 %v689_v26, %v607_v39  ;;  %7232 = vrsqrt.f32 %v1191_v30  ;;  %vm1231_vm4 = vweird.f32 %v1191_v30 }
 0x2c4   : > { %v1048_v61 = vpop.xlane.xlu2 %1047  ;;  %v1979_v40 = vadd.f32 0.2548296, %v1963_v14  ;;  %v2106_v22 = vmul.f32 %v2090_v12, %v1562_v6 }
 0x2c5   : > { %v1085_v16 = vmul.f32 %v8012_v24, %v1048_v61 }
 0x2c6   : > { %1053 = vadd.xlane.f32.xlu1 %v1052_v48  ;;  %v1995_v9 = vmul.f32 %v1979_v40, %v1654_v55  ;;  %v576_v55 = vpop.permute.xlu1 %575  ;;  %v2122_v0 = vadd.f32 1.0, %v2106_v22  ;;  %v8406_v48 = vadd.f32 %v787_v28, %v705_v35  ;;  %v8436_v22 = vpop.permute.xlu0 %865  ;;  %v8453_v35 = vld [vmem:[%s13779_s4] ss:$0 sm:$0xff] }
 0x2c7   : > { %v8396_v23 = vsub.f32 %v8229_v54, %v1085_v16 }
 0x2c8   : > { %v2075_v60 = vmul.f32 %v7231_v8, %v1995_v9  ;;  %v2138_v14 = vmul.f32 %v2122_v0, %v1514_v52  ;;  %13974 = vst [vmem:[#allocation24_spill] sm:$0xff] %v8406_v48  ;;  %v8423_v9 = vld [vmem:[%s13777_s2] ss:$0 sm:$0xff] }
 0x2c9   : > { %v1117_v61 = vmul.f32 %v8396_v23, %v8396_v23  ;;  %v594_v8 = vmul.f32 %v8423_v9, %v576_v55  ;;  %v8443_v55 = vld [vmem:[%s13777_s2 + $0x2] ss:$0 sm:$0xff] }
 0x2ca   : > { %v2091_v53 = vsub.f32 1.0, %v2075_v60 }
 0x2cb   : > { %v1149_v36 = vsel %vm1021_vm0, %v1117_v61, 0.0 }
 0x2cc   : > { %v858_v29 = vpop.permute.xlu2 %857  ;;  %v2107_v57 = vmul.f32 %v2091_v53, %v1563_v27  ;;  %v7233_v27 = vpop.eup %7232 }
 0x2cd   : > { %v887_v40 = vmul.f32 %v7914_v43, %v858_v29  ;;  %v496_v43 = vadd.f32 %v8417_v58, %v477_v62  ;;  %v790_v29 = vmul.f32 %v8443_v55, %v8215_v63  ;;  %vm1232_vm3 = vweird.f32 %v7233_v27 }
 0x2ce   : > { %1147 = vadd.xlane.f32.xlu1 %v1146_v25  ;;  %v2123_v34 = vadd.f32 1.0, %v2107_v57  ;;  %v674_v10 = vpop.permute.xlu1 %673  ;;  %v1226_v57 = vmul.f32 %v7233_v27, %v1191_v30  ;;  %v985_v0 = vpop.permute.xlu0 %984  ;;  %vm1233_vm5 = vmor %vm1231_vm4, %vm1232_vm3  ;;  %v592_v30 = vmul.f32 %v8423_v9, %v8182_v17 }
 0x2cf   : > { %v692_v16 = vmul.f32 %v8431_v3, %v674_v10  ;;  %v610_v39 = vadd.f32 %v594_v8, %v496_v43 }
 0x2d0   : > { %v2139_v45 = vmul.f32 %v2123_v34, %v1515_v47  ;;  %v1227_v31 = vmul.f32 %v7233_v27, %v1226_v57 }
 0x2d1   : > { %v708_v26 = vadd.f32 %v692_v16, %v610_v39 }
 0x2d2   : > { %v2154_v12 = vpack.c.bf16 %v2139_v45, %v2138_v14 }
 0x2d3   : > { %v8447_v25 = vadd.f32 %v790_v29, %v708_v26  ;;  %v475_v29 = vld [vmem:[%s13776_s1 + $0x68] sm:$0xff] }
 0x2d4   : > { %v970_v1 = vpop.permute.xlu2 %969  ;;  %2236 = vmatmul.bf16.vlgmr.msra.gmra.mxu1 %v2154_v12 }
 0x2d5   : > { %v999_v18 = vmul.f32 %v970_v1, %v8406_v48  ;;  %13976 = vst [vmem:[#allocation26_spill] sm:$0xff] %v8447_v25  ;;  %v1002_v47 = vmul.f32 %v985_v0, %v8447_v25 }
 0x2d6   : > { %1150 = vadd.xlane.f32.xlu1 %v1149_v36 }
 0x2d7   : > { %v8426_v6 = vadd.f32 %v999_v18, %v887_v40  ;;  %v1228_v40 = vmul.f32 0.5, %v1227_v31 }
 0x2d9   : > { %13975 = vst [vmem:[#allocation25_spill] sm:$0xff] %v8426_v6  ;;  %v1058_v60 = vsel %vm1021_vm0, %v8426_v6, 0.0  ;;  %v1229_v12 = vsub.f32 1.5, %v1228_v40 }
 0x2da   : > { %1059 = vadd.xlane.f32.xlu2 %v1058_v60 }
 0x2db   : > { %v1230_v10 = vmul.f32 %v7233_v27, %v1229_v12  ;;  %v593_v12 = vmul.f32 %v8423_v9, %v8184_v51  ;;  %v789_v51 = vmul.f32 %v8443_v55, %v8197_v19 }
 0x2dc   : > { %v8438_v53 = vpop.permute.xlu2 %974 }
 0x2dd   : > { %v1234_v39 = vsel %vm1233_vm5, %v7233_v27, %v1230_v10  ;;  %v1139_v10 = vpop.xlane.xlu0 %1138 }
 0x2de   : > { %v1367_v0 = vmul.f32 %v1234_v39, %v8092_v4  ;;  %v476_v4 = vld [vmem:[%s13776_s1 + $0x70] sm:$0xff] }
 0x2e0   : > { %v1384_v31 = vmul.f32 %v8151_v20, %v1367_v0 }
 0x2e2   : > { %v1401_v17 = vadd.f32 %v8160_v32, %v1384_v31 }
 0x2e4   : > { %v870_v52 = vpop.permute.xlu2 %869 }
 0x2e5   : > { %v890_v34 = vmul.f32 %v8453_v35, %v870_v52 }
 0x2e6   : > { %v1136_v28 = vpop.xlane.xlu1 %1135 }
 0x2e7   : > { %v8456_v14 = vadd.f32 %v1002_v47, %v890_v34  ;;  %v1176_v63 = vmul.f32 %v1136_v28, %v8012_v24  ;;  %v494_v47 = vadd.f32 %v8417_v58, %v475_v29 }
 0x2e9   : > { %13977 = vst [vmem:[#allocation27_spill] sm:$0xff] %v8456_v14  ;;  %v1192_v45 = vadd.f32 1e-05, %v1176_v63  ;;  %v1067_v61 = vsel %vm1021_vm0, %v8456_v14, 0.0  ;;  %v608_v28 = vadd.f32 %v592_v30, %v494_v47 }
 0x2ea   : > { %1068 = vadd.xlane.f32.xlu1 %v1067_v61  ;;  %v788_v61 = vmul.f32 %v8443_v55, %v8189_v41 }
 0x2eb   : > { %7234 = vrsqrt.f32 %v1192_v45  ;;  %vm1241_vm7 = vweird.f32 %v1192_v45 }
 0x2ee   : > { %v1051_v62 = vpop.xlane.xlu1 %1050 }
 0x2ef   : > { %v1086_v1 = vmul.f32 %v8012_v24, %v1051_v62 }
 0x2f1   : > { %v7235_v18 = vpop.eup %7234  ;;  %v8463_v36 = vsub.f32 %v8259_v46, %v1086_v1 }
 0x2f2   : > { %v1236_v43 = vmul.f32 %v7235_v18, %v1192_v45  ;;  %vm1242_vm6 = vweird.f32 %v7235_v18  ;;  %v690_v45 = vmul.f32 %v8431_v3, %v8138_v15 }
 0x2f3   : > { %v1118_v8 = vmul.f32 %v8463_v36, %v8463_v36  ;;  %vm1243_vm8 = vmor %vm1241_vm7, %vm1242_vm6 }
 0x2f4   : > { %v1237_v16 = vmul.f32 %v7235_v18, %v1236_v43  ;;  %v706_v62 = vadd.f32 %v690_v45, %v608_v28  ;;  %v1145_v45 = vpop.xlane.xlu0 %1144 }
 0x2f5   : > { %v1152_v60 = vsel %vm1021_vm0, %v1118_v8, 0.0 }
 0x2f6   : > { %v1238_v26 = vmul.f32 0.5, %v1237_v16  ;;  %1153 = vadd.xlane.f32.xlu2 %v1152_v60  ;;  %v1177_v16 = vmul.f32 %v1139_v10, %v8012_v24 }
 0x2f8   : > { %v1239_v57 = vsub.f32 1.5, %v1238_v26  ;;  %v1193_v26 = vadd.f32 1e-05, %v1177_v16 }
 0x2fa   : > { %v1240_v52 = vmul.f32 %v7235_v18, %v1239_v57  ;;  %v889_v57 = vmul.f32 %v8453_v35, %v8436_v22  ;;  %7236 = vrsqrt.f32 %v1193_v26  ;;  %vm1251_vm10 = vweird.f32 %v1193_v26 }
 0x2fc   : > { %v1244_v34 = vsel %vm1243_vm8, %v7235_v18, %v1240_v52  ;;  %v8490_v18 = vadd.f32 %v788_v61, %v706_v62 }
 0x2fd   : > { %v1368_v27 = vmul.f32 %v1244_v34, %v8246_v44  ;;  %v495_v44 = vadd.f32 %v8417_v58, %v476_v4  ;;  %v691_v58 = vmul.f32 %v8431_v3, %v8357_v38 }
 0x2fe   : > { %13978 = vst [vmem:[#allocation28_spill] sm:$0xff] %v8490_v18  ;;  %v1000_v41 = vmul.f32 %v8438_v53, %v8490_v18 }
 0x2ff   : > { %v1385_v63 = vmul.f32 %v8151_v20, %v1368_v27  ;;  %v609_v43 = vadd.f32 %v593_v12, %v495_v44  ;;  %v1179_v44 = vmul.f32 %v1145_v45, %v8012_v24 }
 0x300   : > { %v7237_v3 = vpop.eup %7236 }
 0x301   : > { %v1402_v40 = vadd.f32 %v8160_v32, %v1385_v63  ;;  %v707_v60 = vadd.f32 %v691_v58, %v609_v43  ;;  %v1246_v55 = vmul.f32 %v7237_v3, %v1193_v26  ;;  %vm1252_vm9 = vweird.f32 %v7237_v3 }
 0x302   : > { %vm1253_vm11 = vmor %vm1251_vm10, %vm1252_vm9 }
 0x303   : > { %v1416_v1 = vpack.c.bf16 %v1402_v40, %v1401_v17  ;;  %v8505_v29 = vadd.f32 %v789_v51, %v707_v60  ;;  %v1247_v52 = vmul.f32 %v7237_v3, %v1246_v55 }
 0x305   : > { %7008 = vmatmul.msk.bf16.gmra.mxu0 %vm1021_vm0, %v1416_v1  ;;  %13980 = vst [vmem:[#allocation30_spill] sm:$0xff] %v8505_v29  ;;  %v1248_v27 = vmul.f32 0.5, %v1247_v52 }
 0x306   : > { %v862_v15 = vpop.permute.xlu1 %861 }
 0x307   : > { %v888_v8 = vmul.f32 %v8453_v35, %v862_v15  ;;  %v1249_v31 = vsub.f32 1.5, %v1248_v27  ;;  %v1195_v15 = vadd.f32 1e-05, %v1179_v44 }
 0x309   : > { %v8501_v9 = vadd.f32 %v1000_v41, %v888_v8  ;;  %v1250_v4 = vmul.f32 %v7237_v3, %v1249_v31  ;;  %vm1271_vm1 = vweird.f32 %v1195_v15 }
 0x30b   : > { %13979 = vst [vmem:[#allocation29_spill] sm:$0xff] %v8501_v9  ;;  %v1061_v39 = vsel %vm1021_vm0, %v8501_v9, 0.0  ;;  %v1254_v62 = vsel %vm1253_vm11, %v7237_v3, %v1250_v4 }
 0x30c   : > { %1062 = vadd.xlane.f32.xlu0 %v1061_v39  ;;  %v1369_v43 = vmul.f32 %v1254_v62, %v8195_v49 }
 0x30e   : > { %v980_v53 = vpop.permute.xlu1 %979  ;;  %v1386_v58 = vmul.f32 %v8151_v20, %v1369_v43 }
 0x30f   : > { %v1001_v0 = vmul.f32 %v980_v53, %v8505_v29 }
 0x310   : > { %v1403_v60 = vadd.f32 %v8160_v32, %v1386_v58 }
 0x311   : > { %v8510_v38 = vadd.f32 %v1001_v0, %v889_v57 }
 0x313   : > { %13981 = vst [vmem:[#allocation31_spill] sm:$0xff] %v8510_v38  ;;  %v1064_v19 = vsel %vm1021_vm0, %v8510_v38, 0.0 }
 0x314   : > { %1065 = vadd.xlane.f32.xlu0 %v1064_v19 }
 0x31d   : > { %v1142_v47 = vpop.xlane.xlu2 %1141 }
 0x31e   : > { %v1178_v30 = vmul.f32 %v1142_v47, %v8012_v24 }
 0x320   : > { %v1194_v34 = vadd.f32 1e-05, %v1178_v30 }
 0x322   : > { %7238 = vrsqrt.f32 %v1194_v34  ;;  %vm1261_vm13 = vweird.f32 %v1194_v34 }
 0x323   : > { %7240 = vrsqrt.f32 %v1195_v15 }
 0x325   : > { %v1057_v22 = vpop.xlane.xlu2 %1056 }
 0x326   : > { %v1088_v35 = vmul.f32 %v8012_v24, %v1057_v22 }
 0x328   : > { %v7239_v28 = vpop.eup %7238  ;;  %v8517_v63 = vsub.f32 %v8344_v5, %v1088_v35 }
 0x329   : > { %v1256_v61 = vmul.f32 %v7239_v28, %v1194_v34  ;;  %vm1262_vm12 = vweird.f32 %v7239_v28  ;;  %v7241_v53 = vpop.eup %7240 }
 0x32a   : > { %v1120_v17 = vmul.f32 %v8517_v63, %v8517_v63  ;;  %vm1263_vm14 = vmor %vm1261_vm13, %vm1262_vm12  ;;  %v1266_v19 = vmul.f32 %v7241_v53, %v1195_v15  ;;  %vm1272_vm15 = vweird.f32 %v7241_v53 }
 0x32b   : > { %v1257_v40 = vmul.f32 %v7239_v28, %v1256_v61  ;;  %vm1273_vm2 = vmor %vm1271_vm1, %vm1272_vm15 }
 0x32c   : > { %v1158_v12 = vsel %vm1021_vm0, %v1120_v17, 0.0  ;;  %v1267_v55 = vmul.f32 %v7241_v53, %v1266_v19 }
 0x32d   : > { %v1258_v1 = vmul.f32 0.5, %v1257_v40  ;;  %1159 = vadd.xlane.f32.xlu0 %v1158_v12 }
 0x32e   : > { %v1268_v34 = vmul.f32 0.5, %v1267_v55 }
 0x32f   : > { %v1259_v10 = vsub.f32 1.5, %v1258_v1 }
 0x330   : > { %v1269_v27 = vsub.f32 1.5, %v1268_v34 }
 0x331   : > { %v1260_v41 = vmul.f32 %v7239_v28, %v1259_v10 }
 0x332   : > { %v1270_v22 = vmul.f32 %v7241_v53, %v1269_v27 }
 0x333   : > { %v1264_v8 = vsel %vm1263_vm14, %v7239_v28, %v1260_v41 }
 0x334   : > { %v1370_v16 = vmul.f32 %v1264_v8, %v8319_v50  ;;  %v1274_v17 = vsel %vm1273_vm2, %v7241_v53, %v1270_v22  ;;  %v3968_v22 = vsel %vm1021_vm0, %v8008_v21, 0.0 }
 0x335   : > { %v1371_v43 = vmul.f32 %v1274_v17, %v8212_v42 }
 0x336   : > { %v1387_v51 = vmul.f32 %v8151_v20, %v1370_v16 }
 0x337   : > { %v1388_v58 = vmul.f32 %v8151_v20, %v1371_v43 }
 0x338   : > { %v1404_v39 = vadd.f32 %v8160_v32, %v1387_v51 }
 0x339   : > { %v1054_v26 = vpop.xlane.xlu1 %1053 }
 0x33a   : > { %v1087_v57 = vmul.f32 %v8012_v24, %v1054_v26  ;;  %v1417_v49 = vpack.c.bf16 %v1404_v39, %v1403_v60  ;;  %v1405_v60 = vadd.f32 %v8160_v32, %v1388_v58 }
 0x33c   : > { %v8531_v0 = vsub.f32 %v8374_v2, %v1087_v57  ;;  %7009 = vmatmul.msk.bf16.gmra.mxu0 %vm1021_vm0, %v1417_v49 }
 0x33e   : > { %v1119_v50 = vmul.f32 %v8531_v0, %v8531_v0 }
 0x340   : > { %v1155_v3 = vsel %vm1021_vm0, %v1119_v50, 0.0 }
 0x341   : > { %v1148_v52 = vpop.xlane.xlu1 %1147  ;;  %1156 = vadd.xlane.f32.xlu2 %v1155_v3 }
 0x342   : > { %v1180_v47 = vmul.f32 %v1148_v52, %v8012_v24 }
 0x344   : > { %v1196_v30 = vadd.f32 1e-05, %v1180_v47 }
 0x346   : > { %7242 = vrsqrt.f32 %v1196_v30  ;;  %vm1281_vm4 = vweird.f32 %v1196_v30 }
 0x349   : > { %v1151_v44 = vpop.xlane.xlu1 %1150 }
 0x34a   : > { %v1181_v1 = vmul.f32 %v1151_v44, %v8012_v24  ;;  %v3971_v44 = vsel %vm1021_vm0, %v8079_v11, 0.0 }
 0x34c   : > { %v7243_v31 = vpop.eup %7242  ;;  %v1197_v8 = vadd.f32 1e-05, %v1181_v1 }
 0x34d   : > { %v1276_v35 = vmul.f32 %v7243_v31, %v1196_v30  ;;  %v1060_v28 = vpop.xlane.xlu2 %1059  ;;  %vm1282_vm3 = vweird.f32 %v7243_v31  ;;  %v3959_v30 = vsel %vm1021_vm0, %v7944_v13, 0.0 }
 0x34e   : > { %v1089_v4 = vmul.f32 %v8012_v24, %v1060_v28  ;;  %vm1283_vm5 = vmor %vm1281_vm4, %vm1282_vm3  ;;  %7244 = vrsqrt.f32 %v1197_v8  ;;  %vm1291_vm7 = vweird.f32 %v1197_v8 }
 0x34f   : > { %v1277_v45 = vmul.f32 %v7243_v31, %v1276_v35 }
 0x350   : > { %v8540_v61 = vsub.f32 %v8426_v6, %v1089_v4 }
 0x351   : > { %v1278_v40 = vmul.f32 0.5, %v1277_v45  ;;  %v8568_v1 = vpop.f32.mrf.mxu1 }
 0x352   : > { %v1121_v12 = vmul.f32 %v8540_v61, %v8540_v61 }
 0x353   : > { %v1279_v62 = vsub.f32 1.5, %v1278_v40 }
 0x354   : > { %v1161_v10 = vsel %vm1021_vm0, %v1121_v12, 0.0  ;;  %v7245_v49 = vpop.eup %7244 }
 0x355   : > { %v1280_v15 = vmul.f32 %v7243_v31, %v1279_v62  ;;  %1162 = vadd.xlane.f32.xlu1 %v1161_v10  ;;  %v1286_v50 = vmul.f32 %v7245_v49, %v1197_v8  ;;  %vm1292_vm6 = vweird.f32 %v7245_v49 }
 0x356   : > { %vm1293_vm8 = vmor %vm1291_vm7, %vm1292_vm6 }
 0x357   : > { %v1284_v41 = vsel %vm1283_vm5, %v7243_v31, %v1280_v15  ;;  %v1287_v3 = vmul.f32 %v7245_v49, %v1286_v50 }
 0x358   : > { %v1372_v16 = vmul.f32 %v1284_v41, %v8377_v7 }
 0x359   : > { %v1288_v34 = vmul.f32 0.5, %v1287_v3  ;;  %v2239_v3 = vpop.f32.mrf.mxu1 }
 0x35a   : > { %v1389_v51 = vmul.f32 %v8151_v20, %v1372_v16 }
 0x35b   : > { %v1289_v27 = vsub.f32 1.5, %v1288_v34 }
 0x35c   : > { %v1406_v39 = vadd.f32 %v8160_v32, %v1389_v51 }
 0x35d   : > { %v1069_v26 = vpop.xlane.xlu1 %1068  ;;  %v1290_v35 = vmul.f32 %v7245_v49, %v1289_v27 }
 0x35e   : > { %v1092_v42 = vmul.f32 %v8012_v24, %v1069_v26  ;;  %v1418_v53 = vpack.c.bf16 %v1406_v39, %v1405_v60  ;;  %v13982_v60 = vld [vmem:[#allocation17_spill] sm:$0xff] }
 0x35f   : > { %v1294_v45 = vsel %vm1293_vm8, %v7245_v49, %v1290_v35  ;;  %v3977_v39 = vsel %vm1021_vm0, %v13982_v60, 0.0 }
 0x360   : > { %v8554_v57 = vsub.f32 %v8456_v14, %v1092_v42  ;;  %7010 = vmatmul.msk.bf16.gmra.mxu0 %vm1021_vm0, %v1418_v53  ;;  %v1373_v12 = vmul.f32 %v1294_v45, %v8396_v23 }
 0x362   : > { %v1124_v7 = vmul.f32 %v8554_v57, %v8554_v57  ;;  %v1390_v8 = vmul.f32 %v8151_v20, %v1373_v12 }
 0x364   : > { %v1170_v19 = vsel %vm1021_vm0, %v1124_v7, 0.0  ;;  %v1407_v42 = vadd.f32 %v8160_v32, %v1390_v8 }
 0x365   : > { %1171 = vadd.xlane.f32.xlu1 %v1170_v19 }
 0x369   : > { %v1154_v55 = vpop.xlane.xlu2 %1153 }
 0x36a   : > { %v1182_v52 = vmul.f32 %v1154_v55, %v8012_v24 }
 0x36c   : > { %v1198_v47 = vadd.f32 1e-05, %v1182_v52 }
 0x36d   : > { %3960 = vadd.xlane.f32.xlu1 %v3959_v30 }
 0x36e   : > { %7246 = vrsqrt.f32 %v1198_v47  ;;  %vm1301_vm10 = vweird.f32 %v1198_v47 }
 0x374   : > { %v7247_v31 = vpop.eup %7246 }
 0x375   : > { %v1296_v28 = vmul.f32 %v7247_v31, %v1198_v47  ;;  %3969 = vadd.xlane.f32.xlu1 %v3968_v22  ;;  %vm1302_vm9 = vweird.f32 %v7247_v31 }
 0x376   : > { %vm1303_vm11 = vmor %vm1301_vm10, %vm1302_vm9 }
 0x377   : > { %v1297_v4 = vmul.f32 %v7247_v31, %v1296_v28  ;;  %v13983_v28 = vld [vmem:[#allocation4_spill] sm:$0xff] }
 0x379   : > { %v1298_v17 = vmul.f32 0.5, %v1297_v4  ;;  %v3953_v4 = vsel %vm1021_vm0, %v13983_v28, 0.0 }
 0x37b   : > { %v1299_v40 = vsub.f32 1.5, %v1298_v17 }
 0x37d   : > { %v1300_v62 = vmul.f32 %v7247_v31, %v1299_v40  ;;  %3972 = vadd.xlane.f32.xlu1 %v3971_v44 }
 0x37f   : > { %v1304_v10 = vsel %vm1303_vm11, %v7247_v31, %v1300_v62  ;;  %v1063_v43 = vpop.xlane.xlu0 %1062  ;;  %v3983_v31 = vsel %vm1021_vm0, %v8365_v37, 0.0 }
 0x380   : > { %v1090_v15 = vmul.f32 %v8012_v24, %v1063_v43  ;;  %v1374_v41 = vmul.f32 %v1304_v10, %v8463_v36 }
 0x382   : > { %v8574_v16 = vsub.f32 %v8501_v9, %v1090_v15  ;;  %v1479_v58 = vpop.f32.mrf.mxu0  ;;  %v1391_v23 = vmul.f32 %v8151_v20, %v1374_v41  ;;  %v13986_v41 = vld [vmem:[#allocation8_spill] sm:$0xff] }
 0x383   : > { %v8578_v51 = vadd.f32 %v8269_v33, %v1479_v58  ;;  %v3962_v8 = vsel %vm1021_vm0, %v13986_v41, 0.0  ;;  %v13987_v58 = vld [vmem:[#allocation2_spill] sm:$0xff] }
 0x384   : > { %v1122_v26 = vmul.f32 %v8574_v16, %v8574_v16  ;;  %v1408_v36 = vadd.f32 %v8160_v32, %v1391_v23  ;;  %v8599_v32 = vld [vmem:[%s13787_s12] ss:$0 sm:$0xff]  ;;  %v3956_v23 = vsel %vm1021_vm0, %v13987_v58, 0.0 }
 0x385   : > { %v8587_v53 = vmul.f32 0.70710677, %v8578_v51  ;;  %3978 = vadd.xlane.f32.xlu1 %v3977_v39  ;;  %v2240_v27 = vadd.f32 %v8599_v32, %v2239_v3 }
 0x386   : > { %v1164_v49 = vsel %vm1021_vm0, %v1122_v26, 0.0  ;;  %v1419_v20 = vpack.c.bf16 %v1408_v36, %v1407_v42 }
 0x387   : > { %v8591_v7 = vand.u32 2147483647, %v8587_v53  ;;  %1165 = vadd.xlane.f32.xlu2 %v1164_v49  ;;  %v1066_v19 = vpop.xlane.xlu0 %1065  ;;  %vm1548_vm5 = vcmp.ge.f32.partialorder %v8587_v53, 0.0  ;;  %v8650_v53 = vld [vmem:[%s13785_s10] ss:$0 sm:$0xff] }
 0x388   : > { %v1091_v50 = vmul.f32 %v8012_v24, %v1066_v19  ;;  %7011 = vmatmul.msk.bf16.gmra.mxu0 %vm1021_vm0, %v1419_v20  ;;  %v3989_v19 = vsel %vm1021_vm0, %v8406_v48, 0.0 }
 0x389   : > { %v1596_v55 = vmul.f32 0.3275911, %v8591_v7 }
 0x38a   : > { %v8602_v52 = vsub.f32 %v8510_v38, %v1091_v50  ;;  %v1481_v47 = vpop.f32.mrf.mxu0 }
 0x38b   : > { %v1612_v30 = vadd.f32 1.0, %v1596_v55  ;;  %v8605_v34 = vadd.f32 %v8269_v33, %v1481_v47  ;;  %v13984_v33 = vld [vmem:[#allocation3_spill] sm:$0xff]  ;;  %v2012_v47 = vsub.f32 0.0, %v8591_v7 }
 0x38c   : > { %v1123_v22 = vmul.f32 %v8602_v52, %v8602_v52  ;;  %v8619_v17 = vadd.f32 %v2240_v27, %v13984_v33  ;;  %v13988_v27 = vld [vmem:[#allocation12_spill] sm:$0xff] }
 0x38d   : > { %7248 = vrcp.f32 %v1612_v30  ;;  %3984 = vadd.xlane.f32.xlu1 %v3983_v31  ;;  %v8613_v35 = vmul.f32 0.70710677, %v8605_v34  ;;  %v1667_v39 = vand.u32 2147483648, %v1612_v30  ;;  %v1665_v42 = vand.u32 2147483647, %v1612_v30 }
 0x38e   : > { %v1167_v45 = vsel %vm1021_vm0, %v1123_v22, 0.0  ;;  %13985 = vst [vmem:[#allocation3_spill] sm:$0xff] %v8619_v17  ;;  %v2298_v43 = vsel %vm1021_vm0, %v8619_v17, 0.0  ;;  %vm1661_vm13 = vweird.f32 %v1612_v30  ;;  %v3965_v31 = vsel %vm1021_vm0, %v13988_v27, 0.0 }
 0x38f   : > { %3954 = vadd.xlane.f32.xlu2 %v3953_v4  ;;  %1168 = vadd.xlane.f32.xlu0 %v1167_v45  ;;  %v1581_v40 = vand.u32 2147483647, %v8613_v35  ;;  %v1668_v49 = vor.u32 1.1754944e-38, %v1667_v39  ;;  %vm1666_vm15 = vcmp.eq.f32.partialorder %v1665_v42, 8.507059e+37  ;;  %vm1549_vm6 = vcmp.ge.f32.partialorder %v8613_v35, 0.0 }
 0x391   : > { %v1597_v44 = vmul.f32 0.3275911, %v1581_v40 }
 0x393   : > { %v7249_v12 = vpop.eup %7248  ;;  %v1613_v10 = vadd.f32 1.0, %v1597_v44 }
 0x394   : > { %v1657_v62 = vmul.f32 %v7249_v12, %v1612_v30  ;;  %vm1662_vm12 = vweird.f32 %v7249_v12 }
 0x395   : > { %2299 = vadd.xlane.f32.xlu1 %v2298_v43  ;;  %7250 = vrcp.f32 %v1613_v10  ;;  %vm1663_vm14 = vmor %vm1661_vm13, %vm1662_vm12  ;;  %v1682_v45 = vand.u32 2147483648, %v1613_v10  ;;  %v2028_v43 = vmul.f32 %v2012_v47, %v8591_v7  ;;  %vm1676_vm2 = vweird.f32 %v1613_v10 }
 0x396   : > { %v1658_v15 = vsub.f32 1.0, %v1657_v62 }
 0x397   : > { %3963 = vadd.xlane.f32.xlu2 %v3962_v8  ;;  %3957 = vadd.xlane.f32.xlu0 %v3956_v23  ;;  %v1683_v39 = vor.u32 1.1754944e-38, %v1682_v45 }
 0x398   : > { %v1659_v26 = vmul.f32 %v7249_v12, %v1658_v15 }
 0x39a   : > { %v1660_v36 = vadd.f32 %v7249_v12, %v1659_v26 }
 0x39b   : > { %v7251_v20 = vpop.eup %7250 }
 0x39c   : > { %v1664_v50 = vsel %vm1663_vm14, %v7249_v12, %v1660_v36  ;;  %v1672_v3 = vmul.f32 %v7251_v20, %v1613_v10  ;;  %vm1677_vm1 = vweird.f32 %v7251_v20  ;;  %v1680_v12 = vand.u32 2147483647, %v1613_v10 }
 0x39d   : > { %3990 = vadd.xlane.f32.xlu1 %v3989_v19  ;;  %v1669_v55 = vsel %vm1666_vm15, %v1668_v49, %v1664_v50  ;;  %vm1678_vm3 = vmor %vm1676_vm2, %vm1677_vm1  ;;  %v2046_v36 = vmul.f32 1.442695, %v2028_v43  ;;  %v2013_v49 = vsub.f32 0.0, %v1581_v40 }
 0x39e   : > { %v1868_v22 = vmul.f32 1.0614054, %v1669_v55  ;;  %v1673_v4 = vsub.f32 1.0, %v1672_v3  ;;  %vm1681_vm4 = vcmp.eq.f32.partialorder %v1680_v12, 8.507059e+37 }
 0x39f   : > { %3966 = vadd.xlane.f32.xlu0 %v3965_v31  ;;  %v2029_v7 = vmul.f32 %v2013_v49, %v1581_v40 }
 0x3a0   : > { %v1160_v30 = vpop.xlane.xlu0 %1159  ;;  %v1884_v33 = vadd.f32 -1.4531521, %v1868_v22  ;;  %v1674_v62 = vmul.f32 %v7251_v20, %v1673_v4 }
 0x3a1   : > { %v1184_v44 = vmul.f32 %v1160_v30, %v8012_v24  ;;  %v2048_v45 = vmul.f32 1.442695, %v2029_v7 }
 0x3a2   : > { %v1900_v15 = vmul.f32 %v1884_v33, %v1669_v55  ;;  %v1675_v8 = vadd.f32 %v7251_v20, %v1674_v62 }
 0x3a3   : > { %v8635_v23 = vadd.f32 1e-05, %v1184_v44 }
 0x3a4   : > { %v1916_v26 = vadd.f32 1.4214138, %v1900_v15  ;;  %v1679_v42 = vsel %vm1678_vm3, %v7251_v20, %v1675_v8 }
 0x3a5   : > { %v1684_v19 = vsel %vm1681_vm4, %v1683_v39, %v1679_v42  ;;  %7252 = vrsqrt.f32 %v8635_v23  ;;  %vm1321_vm8 = vweird.f32 %v8635_v23 }
 0x3a6   : > { %v1932_v50 = vmul.f32 %v1916_v26, %v1669_v55  ;;  %v1869_v3 = vmul.f32 1.0614054, %v1684_v19  ;;  %7254 = vpow2.f32 %v2046_v36 }
 0x3a7   : > { %7256 = vpow2.f32 %v2048_v45 }
 0x3a8   : > { %v1948_v31 = vadd.f32 -0.28449672, %v1932_v50  ;;  %v1885_v22 = vadd.f32 -1.4531521, %v1869_v3  ;;  %v1564_v3 = vsel %vm1548_vm5, 1.0, %v13818_v59 }
 0x3aa   : > { %v1964_v47 = vmul.f32 %v1948_v31, %v1669_v55  ;;  %v1901_v10 = vmul.f32 %v1885_v22, %v1684_v19 }
 0x3ab   : > { %v8638_v33 = vpop.eup %7252 }
 0x3ac   : > { %v1980_v4 = vadd.f32 0.2548296, %v1964_v47  ;;  %v1917_v30 = vadd.f32 1.4214138, %v1901_v10  ;;  %v7255_v62 = vpop.eup %7254  ;;  %v1316_v12 = vmul.f32 %v8638_v33, %v8635_v23  ;;  %vm1322_vm7 = vweird.f32 %v8638_v33 }
 0x3ad   : > { %v7257_v50 = vpop.eup %7256  ;;  %vm1323_vm9 = vmor %vm1321_vm8, %vm1322_vm7 }
 0x3ae   : > { %v1996_v20 = vmul.f32 %v1980_v4, %v1669_v55  ;;  %v1933_v44 = vmul.f32 %v1917_v30, %v1684_v19  ;;  %v1317_v39 = vmul.f32 %v8638_v33, %v1316_v12  ;;  %v1516_v12 = vmul.f32 0.5, %v8578_v51 }
 0x3b0   : > { %v1949_v43 = vadd.f32 -0.28449672, %v1933_v44  ;;  %v2076_v15 = vmul.f32 %v7255_v62, %v1996_v20  ;;  %v1318_v31 = vmul.f32 0.5, %v1317_v39 }
 0x3b2   : > { %v1965_v8 = vmul.f32 %v1949_v43, %v1684_v19  ;;  %v2092_v36 = vsub.f32 1.0, %v2076_v15  ;;  %v1319_v35 = vsub.f32 1.5, %v1318_v31  ;;  %v1517_v43 = vmul.f32 0.5, %v8605_v34 }
 0x3b4   : > { %v1157_v40 = vpop.xlane.xlu2 %1156  ;;  %v1981_v42 = vadd.f32 0.2548296, %v1965_v8  ;;  %v2108_v47 = vmul.f32 %v2092_v36, %v1564_v3  ;;  %v1320_v39 = vmul.f32 %v8638_v33, %v1319_v35 }
 0x3b5   : > { %v1183_v26 = vmul.f32 %v1157_v40, %v8012_v24 }
 0x3b6   : > { %v1997_v55 = vmul.f32 %v1981_v42, %v1684_v19  ;;  %v1565_v19 = vsel %vm1549_vm6, 1.0, %v13818_v59  ;;  %v2124_v20 = vadd.f32 1.0, %v2108_v47  ;;  %v1324_v31 = vsel %vm1323_vm9, %v8638_v33, %v1320_v39 }
 0x3b7   : > { %v1199_v49 = vadd.f32 1e-05, %v1183_v26 }
 0x3b8   : > { %v2077_v7 = vmul.f32 %v7257_v50, %v1997_v55  ;;  %v2140_v42 = vmul.f32 %v2124_v20, %v1516_v12 }
 0x3b9   : > { %7258 = vrsqrt.f32 %v1199_v49  ;;  %v1484_v22 = vpop.f32.mrf.mxu0  ;;  %vm1311_vm11 = vweird.f32 %v1199_v49 }
 0x3ba   : > { %v8653_v10 = vadd.f32 %v8650_v53, %v1484_v22  ;;  %v2093_v4 = vsub.f32 1.0, %v2077_v7 }
 0x3bc   : > { %v8657_v30 = vmul.f32 0.70710677, %v8653_v10  ;;  %v2109_v45 = vmul.f32 %v2093_v4, %v1565_v19  ;;  %v1376_v19 = vmul.f32 %v1324_v31, %v8517_v63 }
 0x3be   : > { %v8660_v44 = vand.u32 2147483647, %v8657_v30  ;;  %v2125_v15 = vadd.f32 1.0, %v2109_v45  ;;  %vm1550_vm6 = vcmp.ge.f32.partialorder %v8657_v30, 0.0 }
 0x3bf   : > { %v7259_v62 = vpop.eup %7258 }
 0x3c0   : > { %v1306_v8 = vmul.f32 %v7259_v62, %v1199_v49  ;;  %v1598_v40 = vmul.f32 0.3275911, %v8660_v44  ;;  %v2141_v36 = vmul.f32 %v2125_v15, %v1517_v43  ;;  %vm1312_vm10 = vweird.f32 %v7259_v62  ;;  %v8684_v43 = vld [vmem:[%s13782_s7] ss:$0 sm:$0xff] }
 0x3c1   : > { %v1486_v26 = vpop.f32.mrf.mxu0  ;;  %vm1313_vm12 = vmor %vm1311_vm11, %vm1312_vm10  ;;  %v1393_v15 = vmul.f32 %v8684_v43, %v1376_v19 }
 0x3c2   : > { %v1307_v55 = vmul.f32 %v7259_v62, %v1306_v8  ;;  %v1614_v50 = vadd.f32 1.0, %v1598_v40  ;;  %v8668_v3 = vadd.f32 %v8650_v53, %v1486_v26  ;;  %v2155_v51 = vpack.c.bf16 %v2141_v36, %v2140_v42 }
 0x3c4   : > { %v1308_v34 = vmul.f32 0.5, %v1307_v55  ;;  %7260 = vrcp.f32 %v1614_v50  ;;  %v8673_v22 = vmul.f32 0.70710677, %v8668_v3  ;;  %2241 = vmatmul.bf16.gmra.mxu1 %v2155_v51  ;;  %v1697_v49 = vand.u32 2147483648, %v1614_v50 }
 0x3c5   : > { %v1695_v39 = vand.u32 2147483647, %v1614_v50  ;;  %vm1691_vm14 = vweird.f32 %v1614_v50 }
 0x3c6   : > { %v1309_v7 = vsub.f32 1.5, %v1308_v34  ;;  %v8676_v47 = vand.u32 2147483647, %v8673_v22  ;;  %v1698_v55 = vor.u32 1.1754944e-38, %v1697_v49  ;;  %vm1551_vm7 = vcmp.ge.f32.partialorder %v8673_v22, 0.0 }
 0x3c7   : > { %vm1696_vm1 = vcmp.eq.f32.partialorder %v1695_v39, 8.507059e+37 }
 0x3c8   : > { %v1310_v4 = vmul.f32 %v7259_v62, %v1309_v7  ;;  %v1599_v23 = vmul.f32 0.3275911, %v8676_v47 }
 0x3ca   : > { %v7261_v35 = vpop.eup %7260  ;;  %v1314_v45 = vsel %vm1313_vm12, %v7259_v62, %v1310_v4  ;;  %v1615_v33 = vadd.f32 1.0, %v1599_v23  ;;  %v8691_v62 = vld [vmem:[%s13783_s8] ss:$0 sm:$0xff]  ;;  %v2014_v23 = vsub.f32 0.0, %v8660_v44 }
 0x3cb   : > { %v1687_v20 = vmul.f32 %v7261_v35, %v1614_v50  ;;  %v1375_v12 = vmul.f32 %v1314_v45, %v8531_v0  ;;  %vm1692_vm13 = vweird.f32 %v7261_v35  ;;  %v1410_v26 = vadd.f32 %v8691_v62, %v1393_v15  ;;  %v1163_v15 = vpop.xlane.xlu1 %1162 }
 0x3cc   : > { %7262 = vrcp.f32 %v1615_v33  ;;  %vm1693_vm15 = vmor %vm1691_vm14, %vm1692_vm13  ;;  %v1712_v45 = vand.u32 2147483648, %v1615_v33  ;;  %v1710_v50 = vand.u32 2147483647, %v1615_v33  ;;  %vm1706_vm3 = vweird.f32 %v1615_v33 }
 0x3cd   : > { %v1688_v8 = vsub.f32 1.0, %v1687_v20  ;;  %v1392_v63 = vmul.f32 %v8684_v43, %v1375_v12  ;;  %v1185_v39 = vmul.f32 %v1163_v15, %v8012_v24 }
 0x3ce   : > { %v1713_v49 = vor.u32 1.1754944e-38, %v1712_v45  ;;  %vm1711_vm5 = vcmp.eq.f32.partialorder %v1710_v50, 8.507059e+37 }
 0x3cf   : > { %v1689_v40 = vmul.f32 %v7261_v35, %v1688_v8  ;;  %v1409_v0 = vadd.f32 %v8691_v62, %v1392_v63 }
 0x3d1   : > { %v1690_v42 = vadd.f32 %v7261_v35, %v1689_v40  ;;  %v1420_v36 = vpack.c.bf16 %v1410_v26, %v1409_v0 }
 0x3d2   : > { %v7263_v51 = vpop.eup %7262 }
 0x3d3   : > { %v1694_v34 = vsel %vm1693_vm15, %v7261_v35, %v1690_v42  ;;  %v1702_v31 = vmul.f32 %v7263_v51, %v1615_v33  ;;  %7012 = vmatmul.msk.bf16.gmra.mxu0 %vm1021_vm0, %v1420_v36  ;;  %vm1707_vm2 = vweird.f32 %v7263_v51  ;;  %v2030_v35 = vmul.f32 %v2014_v23, %v8660_v44 }
 0x3d4   : > { %v1699_v7 = vsel %vm1696_vm1, %v1698_v55, %v1694_v34  ;;  %vm1708_vm4 = vmor %vm1706_vm3, %vm1707_vm2  ;;  %v8703_v33 = vadd.f32 1e-05, %v1185_v39 }
 0x3d5   : > { %v1870_v4 = vmul.f32 1.0614054, %v1699_v7  ;;  %v1703_v19 = vsub.f32 1.0, %v1702_v31  ;;  %v2050_v31 = vmul.f32 1.442695, %v2030_v35 }
 0x3d6   : > { %vm1331_vm1 = vweird.f32 %v8703_v33 }
 0x3d7   : > { %v1886_v20 = vadd.f32 -1.4531521, %v1870_v4  ;;  %v1704_v12 = vmul.f32 %v7263_v51, %v1703_v19  ;;  %v2015_v4 = vsub.f32 0.0, %v8676_v47  ;;  %7264 = vpow2.f32 %v2050_v31 }
 0x3d8   : > { %7266 = vrsqrt.f32 %v8703_v33 }
 0x3d9   : > { %v1902_v8 = vmul.f32 %v1886_v20, %v1699_v7  ;;  %v1705_v63 = vadd.f32 %v7263_v51, %v1704_v12  ;;  %v2031_v20 = vmul.f32 %v2015_v4, %v8676_v47 }
 0x3db   : > { %v1918_v40 = vadd.f32 1.4214138, %v1902_v8  ;;  %v1709_v0 = vsel %vm1708_vm4, %v7263_v51, %v1705_v63 }
 0x3dc   : > { %v1714_v42 = vsel %vm1711_vm5, %v1713_v49, %v1709_v0 }
 0x3dd   : > { %v1489_v26 = vpop.f32.mrf.mxu0  ;;  %v1871_v55 = vmul.f32 1.0614054, %v1714_v42  ;;  %v1934_v34 = vmul.f32 %v1918_v40, %v1699_v7  ;;  %v2052_v40 = vmul.f32 1.442695, %v2031_v20 }
 0x3de   : > { %v8700_v36 = vadd.f32 %v8650_v53, %v1489_v26  ;;  %v7265_v26 = vpop.eup %7264 }
 0x3df   : > { %v1887_v19 = vadd.f32 -1.4531521, %v1871_v55  ;;  %v1950_v23 = vadd.f32 -0.28449672, %v1934_v34  ;;  %v8720_v34 = vpop.eup %7266 }
 0x3e0   : > { %v8706_v44 = vmul.f32 0.70710677, %v8700_v36  ;;  %vm1332_vm13 = vweird.f32 %v8720_v34 }
 0x3e1   : > { %v1903_v45 = vmul.f32 %v1887_v19, %v1714_v42  ;;  %v1966_v12 = vmul.f32 %v1950_v23, %v1699_v7  ;;  %v1326_v23 = vmul.f32 %v8720_v34, %v8703_v33  ;;  %vm8760_vm3 = vmor %vm1331_vm1, %vm1332_vm13 }
 0x3e2   : > { %v8709_v51 = vand.u32 2147483647, %v8706_v44 }
 0x3e3   : > { %v1919_v8 = vadd.f32 1.4214138, %v1903_v45  ;;  %v1982_v63 = vadd.f32 0.2548296, %v1966_v12  ;;  %v1327_v30 = vmul.f32 %v8720_v34, %v1326_v23 }
 0x3e4   : > { %v1600_v50 = vmul.f32 0.3275911, %v8709_v51 }
 0x3e5   : > { %v1491_v15 = vpop.f32.mrf.mxu0  ;;  %v1935_v39 = vmul.f32 %v1919_v8, %v1714_v42  ;;  %v1998_v0 = vmul.f32 %v1982_v63, %v1699_v7 }
 0x3e6   : > { %v1616_v35 = vadd.f32 1.0, %v1600_v50  ;;  %v8715_v49 = vadd.f32 %v8650_v53, %v1491_v15  ;;  %v1172_v50 = vpop.xlane.xlu1 %1171 }
 0x3e7   : > { %v1951_v47 = vadd.f32 -0.28449672, %v1935_v39  ;;  %v2078_v31 = vmul.f32 %v7265_v26, %v1998_v0  ;;  %v1188_v26 = vmul.f32 %v1172_v50, %v8012_v24  ;;  %v1518_v50 = vmul.f32 0.5, %v8653_v10 }
 0x3e8   : > { %7268 = vrcp.f32 %v1616_v35  ;;  %v8718_v55 = vmul.f32 0.70710677, %v8715_v49  ;;  %vm1721_vm9 = vweird.f32 %v1616_v35 }
 0x3e9   : > { %7270 = vpow2.f32 %v2052_v40  ;;  %v1967_v19 = vmul.f32 %v1951_v47, %v1714_v42  ;;  %v2094_v12 = vsub.f32 1.0, %v2078_v31  ;;  %v1566_v40 = vsel %vm1550_vm6, 1.0, %v13818_v59 }
 0x3ea   : > { %v8723_v4 = vand.u32 2147483647, %v8718_v55  ;;  %v1727_v31 = vand.u32 2147483648, %v1616_v35  ;;  %v8737_v22 = vadd.f32 1e-05, %v1188_v26  ;;  %vm1552_vm6 = vcmp.ge.f32.partialorder %v8706_v44, 0.0 }
 0x3eb   : > { %v1983_v45 = vadd.f32 0.2548296, %v1967_v19  ;;  %v2110_v19 = vmul.f32 %v2094_v12, %v1566_v40 }
 0x3ec   : > { %v1601_v7 = vmul.f32 0.3275911, %v8723_v4  ;;  %v1728_v6 = vor.u32 1.1754944e-38, %v1727_v31 }
 0x3ed   : > { %v1999_v63 = vmul.f32 %v1983_v45, %v1714_v42  ;;  %v1567_v42 = vsel %vm1551_vm7, 1.0, %v13818_v59  ;;  %v1328_v45 = vmul.f32 0.5, %v1327_v30 }
 0x3ee   : > { %v7269_v20 = vpop.eup %7268  ;;  %v8729_v8 = vadd.f32 1.0, %v1601_v7  ;;  %v1725_v7 = vand.u32 2147483647, %v1616_v35 }
 0x3ef   : > { %v1717_v15 = vmul.f32 %v7269_v20, %v1616_v35  ;;  %v7271_v39 = vpop.eup %7270  ;;  %vm1722_vm8 = vweird.f32 %v7269_v20  ;;  %v1329_v35 = vsub.f32 1.5, %v1328_v45 }
 0x3f0   : > { %7272 = vrcp.f32 %v8729_v8  ;;  %v2079_v47 = vmul.f32 %v7271_v39, %v1999_v63  ;;  %vm1723_vm10 = vmor %vm1721_vm9, %vm1722_vm8  ;;  %vm1726_vm11 = vcmp.eq.f32.partialorder %v1725_v7, 8.507059e+37  ;;  %v1519_v63 = vmul.f32 0.5, %v8668_v3 }
 0x3f1   : > { %v1718_v0 = vsub.f32 1.0, %v1717_v15  ;;  %v2126_v15 = vadd.f32 1.0, %v2110_v19  ;;  %7274 = vrsqrt.f32 %v8737_v22  ;;  %vm1736_vm14 = vweird.f32 %v8729_v8 }
 0x3f2   : > { %v2095_v38 = vsub.f32 1.0, %v2079_v47 }
 0x3f3   : > { %v1719_v14 = vmul.f32 %v7269_v20, %v1718_v0  ;;  %v2142_v26 = vmul.f32 %v2126_v15, %v1518_v50 }
 0x3f4   : > { %v2111_v23 = vmul.f32 %v2095_v38, %v1567_v42  ;;  %v1330_v42 = vmul.f32 %v8720_v34, %v1329_v35 }
 0x3f5   : > { %v1720_v9 = vadd.f32 %v7269_v20, %v1719_v14 }
 0x3f6   : > { %v7273_v5 = vpop.eup %7272  ;;  %v2127_v39 = vadd.f32 1.0, %v2111_v23  ;;  %v1334_v35 = vsel %vm8760_vm3, %v8720_v34, %v1330_v42 }
 0x3f7   : > { %v1724_v12 = vsel %vm1723_vm10, %v7269_v20, %v1720_v9  ;;  %v1732_v40 = vmul.f32 %v7273_v5, %v8729_v8  ;;  %v1742_v9 = vand.u32 2147483648, %v8729_v8  ;;  %vm1737_vm12 = vweird.f32 %v7273_v5  ;;  %v8756_v50 = vpop.eup %7274 }
 0x3f8   : > { %v8742_v0 = vsel %vm1726_vm11, %v1728_v6, %v1724_v12  ;;  %v2143_v47 = vmul.f32 %v2127_v39, %v1519_v63  ;;  %v1740_v6 = vand.u32 2147483647, %v8729_v8  ;;  %vm1738_vm15 = vmor %vm1736_vm14, %vm1737_vm12  ;;  %v2016_v12 = vsub.f32 0.0, %v8709_v51 }
 0x3f9   : > { %v1872_v14 = vmul.f32 1.0614054, %v8742_v0  ;;  %v1733_v38 = vsub.f32 1.0, %v1732_v40  ;;  %v1743_v23 = vor.u32 1.1754944e-38, %v1742_v9  ;;  %v1377_v42 = vmul.f32 %v1334_v35, %v8540_v61 }
 0x3fa   : > { %v1166_v30 = vpop.xlane.xlu2 %1165  ;;  %v2156_v3 = vpack.c.bf16 %v2143_v47, %v2142_v26  ;;  %vm1741_vm2 = vcmp.eq.f32.partialorder %v1740_v6, 8.507059e+37  ;;  %v2017_v35 = vsub.f32 0.0, %v8723_v4  ;;  %vm1362_vm8 = vweird.f32 %v8756_v50 }
 0x3fb   : > { %v1186_v10 = vmul.f32 %v1166_v30, %v8012_v24  ;;  %v1888_v20 = vadd.f32 -1.4531521, %v1872_v14  ;;  %v1734_v19 = vmul.f32 %v7273_v5, %v1733_v38  ;;  %vm1361_vm11 = vweird.f32 %v8737_v22 }
 0x3fc   : > { %2246 = vmatmul.bf16.gmra.mxu1 %v2156_v3  ;;  %vm8890_vm13 = vmor %vm1361_vm11, %vm1362_vm8 }
 0x3fd   : > { %v8749_v31 = vadd.f32 1e-05, %v1186_v10  ;;  %v1904_v7 = vmul.f32 %v1888_v20, %v8742_v0  ;;  %v1735_v45 = vadd.f32 %v7273_v5, %v1734_v19  ;;  %v2032_v10 = vmul.f32 %v2016_v12, %v8709_v51 }
 0x3ff   : > { %7276 = vrsqrt.f32 %v8749_v31  ;;  %v1920_v15 = vadd.f32 1.4214138, %v1904_v7  ;;  %v1739_v63 = vsel %vm1738_vm15, %v7273_v5, %v1735_v45  ;;  %v1356_v5 = vmul.f32 %v8756_v50, %v8737_v22 }
 0x400   : > { %v8764_v39 = vsel %vm1741_vm2, %v1743_v23, %v1739_v63  ;;  %v3961_v23 = vpop.xlane.xlu1 %3960  ;;  %v2054_v63 = vmul.f32 1.442695, %v2032_v10  ;;  %vm1341_vm5 = vweird.f32 %v8749_v31  ;;  %vm1553_vm15 = vcmp.ge.f32.partialorder %v8718_v55, 0.0 }
 0x401   : > { %v1936_v8 = vmul.f32 %v1920_v15, %v8742_v0  ;;  %v1873_v33 = vmul.f32 1.0614054, %v8764_v39  ;;  %v1357_v51 = vmul.f32 %v8756_v50, %v1356_v5 }
 0x402   : > { %v1169_v14 = vpop.xlane.xlu0 %1168  ;;  %v3955_v38 = vpop.xlane.xlu2 %3954 }
 0x403   : > { %v1187_v30 = vmul.f32 %v1169_v14, %v8012_v24  ;;  %v4001_v26 = vmul.f32 %v3955_v38, %v8012_v24  ;;  %v1952_v47 = vadd.f32 -0.28449672, %v1936_v8  ;;  %v1889_v9 = vadd.f32 -1.4531521, %v1873_v33  ;;  %v13991_v14 = vld [vmem:[#allocation18_spill] sm:$0xff]  ;;  %v13992_v33 = vld [vmem:[#allocation16_spill] sm:$0xff] }
 0x404   : > { %v8801_v61 = vsel %vm1021_vm0, %v13991_v14, 0.0  ;;  %v3974_v5 = vsel %vm1021_vm0, %v13992_v33, 0.0 }
 0x405   : > { %v8776_v20 = vpop.eup %7276  ;;  %v8778_v3 = vadd.f32 1e-05, %v1187_v30  ;;  %v8781_v34 = vsub.f32 %v13983_v28, %v4001_v26  ;;  %v1494_v19 = vpop.f32.mrf.mxu0  ;;  %v1905_v45 = vmul.f32 %v1889_v9, %v8764_v39  ;;  %v1968_v12 = vmul.f32 %v1952_v47, %v8742_v0 }
 0x406   : > { %v1336_v6 = vmul.f32 %v8776_v20, %v8749_v31  ;;  %v8786_v7 = vadd.f32 %v8650_v53, %v1494_v19  ;;  %v8809_v26 = vadd.f32 %v8599_v32, %v8568_v1  ;;  %v4003_v47 = vmul.f32 %v3961_v23, %v8012_v24 }
 0x407   : > { %7278 = vrsqrt.f32 %v8778_v3  ;;  %v4033_v15 = vmul.f32 %v8781_v34, %v8781_v34  ;;  %v1921_v30 = vadd.f32 1.4214138, %v1905_v45  ;;  %v1394_v28 = vmul.f32 %v8684_v43, %v1377_v42 }
 0x408   : > { %v1337_v40 = vmul.f32 %v8776_v20, %v1336_v6  ;;  %v8797_v8 = vmul.f32 0.70710677, %v8786_v7  ;;  %v1358_v6 = vmul.f32 0.5, %v1357_v51  ;;  %v1984_v2 = vadd.f32 0.2548296, %v1968_v12 }
 0x409   : > { %v4049_v38 = vsel %vm1021_vm0, %v4033_v15, 0.0  ;;  %7280 = vpow2.f32 %v2054_v63  ;;  %vm1342_vm4 = vweird.f32 %v8776_v20  ;;  %v2033_v23 = vmul.f32 %v2017_v35, %v8723_v4 }
 0x40a   : > { %v1338_v10 = vmul.f32 0.5, %v1337_v40  ;;  %v8813_v9 = vand.u32 2147483647, %v8797_v8  ;;  %v3958_v19 = vpop.xlane.xlu0 %3957  ;;  %4050 = vadd.xlane.f32.xlu2 %v4049_v38  ;;  %v3964_v15 = vpop.xlane.xlu2 %3963  ;;  %v1937_v38 = vmul.f32 %v1921_v30, %v8764_v39  ;;  %v8835_v4 = vsub.f32 %v7944_v13, %v4003_v47  ;;  %vm8837_vm7 = vmor %vm1341_vm5, %vm1342_vm4 }
 0x40b   : > { %v4002_v59 = vmul.f32 %v3958_v19, %v8012_v24  ;;  %v2000_v30 = vmul.f32 %v1984_v2, %v8742_v0  ;;  %v1359_v19 = vsub.f32 1.5, %v1358_v6  ;;  %vm1351_vm10 = vweird.f32 %v8778_v3 }
 0x40c   : > { %v1339_v45 = vsub.f32 1.5, %v1338_v10  ;;  %v1602_v1 = vmul.f32 0.3275911, %v8813_v9  ;;  %v4004_v10 = vmul.f32 %v3964_v15, %v8012_v24  ;;  %v1953_v13 = vadd.f32 -0.28449672, %v1937_v38 }
 0x40d   : > { %v8819_v32 = vpop.eup %7278  ;;  %v8824_v51 = vsub.f32 %v13987_v58, %v4002_v59  ;;  %v1496_v40 = vpop.f32.mrf.mxu0  ;;  %vm1554_vm8 = vcmp.ge.f32.partialorder %v8797_v8, 0.0  ;;  %v3992_v8 = vsel %vm1021_vm0, %v8490_v18, 0.0 }
 0x40e   : > { %v1340_v42 = vmul.f32 %v8776_v20, %v1339_v45  ;;  %v1346_v12 = vmul.f32 %v8819_v32, %v8778_v3  ;;  %v8830_v63 = vadd.f32 1.0, %v1602_v1  ;;  %v8842_v31 = vadd.f32 %v8650_v53, %v1496_v40  ;;  %v3970_v1 = vpop.xlane.xlu1 %3969 }
 0x40f   : > { %v4034_v35 = vmul.f32 %v8824_v51, %v8824_v51  ;;  %v2056_v45 = vmul.f32 1.442695, %v2033_v23  ;;  %v7281_v58 = vpop.eup %7280  ;;  %v8857_v2 = vsub.f32 %v13986_v41, %v4004_v10  ;;  %v1411_v23 = vadd.f32 %v8691_v62, %v1394_v28 }
 0x410   : > { %v1344_v15 = vsel %vm8837_vm7, %v8776_v20, %v1340_v42  ;;  %v1347_v47 = vmul.f32 %v8819_v32, %v1346_v12  ;;  %7282 = vrcp.f32 %v8830_v63  ;;  %v8854_v40 = vmul.f32 0.70710677, %v8842_v31 }
 0x411   : > { %v4052_v0 = vsel %vm1021_vm0, %v4034_v35, 0.0  ;;  %v1378_v20 = vmul.f32 %v1344_v15, %v8574_v16  ;;  %v4035_v42 = vmul.f32 %v8835_v4, %v8835_v4  ;;  %v2080_v38 = vmul.f32 %v7281_v58, %v2000_v30 }
 0x412   : > { %v1348_v46 = vmul.f32 0.5, %v1347_v47  ;;  %3975 = vadd.xlane.f32.xlu2 %v3974_v5  ;;  %v8862_v6 = vand.u32 2147483647, %v8854_v40  ;;  %4053 = vadd.xlane.f32.xlu0 %v4052_v0  ;;  %v1360_v12 = vmul.f32 %v8756_v50, %v1359_v19  ;;  %v4006_v10 = vmul.f32 %v3970_v1, %v8012_v24 }
 0x413   : > { %v1395_v35 = vmul.f32 %v8684_v43, %v1378_v20  ;;  %7284 = vpow2.f32 %v2056_v45  ;;  %vm1352_vm9 = vweird.f32 %v8819_v32  ;;  %v1969_v5 = vmul.f32 %v1953_v13, %v8764_v39 }
 0x414   : > { %v1349_v59 = vsub.f32 1.5, %v1348_v46  ;;  %v1603_v16 = vmul.f32 0.3275911, %v8862_v6  ;;  %v4036_v30 = vmul.f32 %v8857_v2, %v8857_v2  ;;  %v2096_v45 = vsub.f32 1.0, %v2080_v38  ;;  %vm8883_vm12 = vmor %vm1351_vm10, %vm1352_vm9 }
 0x415   : > { %v1412_v58 = vadd.f32 %v8691_v62, %v1395_v35  ;;  %v1985_v47 = vadd.f32 0.2548296, %v1969_v5  ;;  %v1520_v13 = vmul.f32 0.5, %v8700_v36  ;;  %v4055_v0 = vsel %vm1021_vm0, %v4035_v42, 0.0  ;;  %v3967_v35 = vpop.xlane.xlu0 %3966 }
 0x416   : > { %v7283_v15 = vpop.eup %7282  ;;  %v1350_v28 = vmul.f32 %v8819_v32, %v1349_v59  ;;  %v8879_v19 = vadd.f32 1.0, %v1603_v16  ;;  %v8895_v59 = vsub.f32 %v8008_v21, %v4006_v10  ;;  %v13999_v42 = vmov -1.0  }
 0x417   : > { %v1747_v46 = vmul.f32 %v7283_v15, %v8830_v63  ;;  %v1421_v3 = vpack.c.bf16 %v1412_v58, %v1411_v23  ;;  %v1364_v23 = vsel %vm8890_vm13, %v8756_v50, %v1360_v12  ;;  %v1568_v38 = vsel %vm1552_vm6, 1.0, %v13999_v42 }
 0x418   : > { %v1354_v36 = vsel %vm8883_vm12, %v8819_v32, %v1350_v28  ;;  %7286 = vrcp.f32 %v8879_v19  ;;  %v4058_v10 = vsel %vm1021_vm0, %v4036_v30, 0.0  ;;  %v2001_v16 = vmul.f32 %v1985_v47, %v8764_v39 }
 0x419   : > { %v1748_v22 = vsub.f32 1.0, %v1747_v46  ;;  %7013 = vmatmul.msk.bf16.gmra.mxu0 %vm1021_vm0, %v1421_v3  ;;  %v7285_v32 = vpop.eup %7284  ;;  %v2112_v28 = vmul.f32 %v2096_v45, %v1568_v38  ;;  %vm1752_vm14 = vweird.f32 %v7283_v15  ;;  %v1755_v58 = vand.u32 2147483647, %v8830_v63 }
 0x41a   : > { %4056 = vadd.xlane.f32.xlu2 %v4055_v0  ;;  %4059 = vadd.xlane.f32.xlu0 %v4058_v10  ;;  %v2081_v50 = vmul.f32 %v7285_v32, %v2001_v16  ;;  %v1379_v44 = vmul.f32 %v1354_v36, %v8602_v52  ;;  %v1757_v12 = vand.u32 2147483648, %v8830_v63  ;;  %vm1751_vm1 = vweird.f32 %v8830_v63 }
 0x41b   : > { %v1749_v5 = vmul.f32 %v7283_v15, %v1748_v22  ;;  %v4005_v30 = vmul.f32 %v3967_v35, %v8012_v24  ;;  %v4038_v39 = vmul.f32 %v8895_v59, %v8895_v59  ;;  %v2018_v47 = vsub.f32 0.0, %v8813_v9  ;;  %vm1753_vm2 = vmor %vm1751_vm1, %vm1752_vm14 }
 0x41c   : > { %v2097_v45 = vsub.f32 1.0, %v2081_v50  ;;  %v1380_v1 = vmul.f32 %v1364_v23, %v8554_v57  ;;  %v1758_v55 = vor.u32 1.1754944e-38, %v1757_v12  ;;  %v1569_v52 = vsel %vm1553_vm15, 1.0, %v13999_v42 }
 0x41d   : > { %v1750_v46 = vadd.f32 %v7283_v15, %v1749_v5  ;;  %v2128_v0 = vadd.f32 1.0, %v2112_v28  ;;  %vm1756_vm3 = vcmp.eq.f32.partialorder %v1755_v58, 8.507059e+37  ;;  %v1396_v22 = vmul.f32 %v8684_v43, %v1379_v44 }
 0x41e   : > { %v7287_v3 = vpop.eup %7286  ;;  %v2113_v36 = vmul.f32 %v2097_v45, %v1569_v52  ;;  %v1521_v35 = vmul.f32 0.5, %v8715_v49  ;;  %v8925_v10 = vsub.f32 %v13988_v27, %v4005_v30  ;;  %v4064_v57 = vsel %vm1021_vm0, %v4038_v39, 0.0  ;;  %v14000_v39 = vld [vmem:[#allocation5_spill] sm:$0xff] }
 0x41f   : > { %v1754_v20 = vsel %vm1753_vm2, %v7283_v15, %v1750_v46  ;;  %v1762_v63 = vmul.f32 %v7287_v3, %v8879_v19  ;;  %v2034_v16 = vmul.f32 %v2018_v47, %v8813_v9  ;;  %v1397_v15 = vmul.f32 %v8684_v43, %v1380_v1 }
 0x420   : > { %v1759_v38 = vsel %vm1756_vm3, %v1758_v55, %v1754_v20  ;;  %v2129_v5 = vadd.f32 1.0, %v2113_v36  ;;  %v2144_v28 = vmul.f32 %v2128_v0, %v1520_v13  ;;  %v1770_v58 = vand.u32 2147483647, %v8879_v19 }
 0x421   : > { %v1874_v23 = vmul.f32 1.0614054, %v1759_v38  ;;  %v1763_v32 = vsub.f32 1.0, %v1762_v63  ;;  %v1772_v49 = vand.u32 2147483648, %v8879_v19  ;;  %v1413_v30 = vadd.f32 %v8691_v62, %v1396_v22  ;;  %v3973_v22 = vpop.xlane.xlu1 %3972 }
 0x422   : > { %3981 = vadd.xlane.f32.xlu2 %v8801_v61  ;;  %4065 = vadd.xlane.f32.xlu0 %v4064_v57  ;;  %v2145_v12 = vmul.f32 %v2129_v5, %v1521_v35  ;;  %vm1767_vm4 = vweird.f32 %v7287_v3  ;;  %v8936_v9 = vadd.f32 %v8809_v26, %v14000_v39  ;;  %v4037_v61 = vmul.f32 %v8925_v10, %v8925_v10 }
 0x423   : > { %v1890_v50 = vadd.f32 -1.4531521, %v1874_v23  ;;  %v1764_v44 = vmul.f32 %v7287_v3, %v1763_v32  ;;  %vm1766_vm5 = vweird.f32 %v8879_v19  ;;  %v1414_v46 = vadd.f32 %v8691_v62, %v1397_v15 }
 0x424   : > { %14001 = vst [vmem:[#allocation5_spill] sm:$0xff] %v8936_v9  ;;  %v2157_v13 = vpack.c.bf16 %v2145_v12, %v2144_v28  ;;  %vm1768_vm6 = vmor %vm1766_vm5, %vm1767_vm4  ;;  %v1773_v45 = vor.u32 1.1754944e-38, %v1772_v49  ;;  %v2058_v55 = vmul.f32 1.442695, %v2034_v16  ;;  %vm1771_vm7 = vcmp.eq.f32.partialorder %v1770_v58, 8.507059e+37  ;;  %v14002_v49 = vld [vmem:[#allocation20_spill] sm:$0xff] }
 0x425   : > { %v1906_v43 = vmul.f32 %v1890_v50, %v1759_v38  ;;  %v1765_v47 = vadd.f32 %v7287_v3, %v1764_v44  ;;  %v1422_v52 = vpack.c.bf16 %v1414_v46, %v1413_v30  ;;  %v2019_v26 = vsub.f32 0.0, %v8862_v6 }
 0x426   : > { %2251 = vmatmul.bf16.gmra.mxu1 %v2157_v13  ;;  %v4061_v20 = vsel %vm1021_vm0, %v4037_v61, 0.0  ;;  %v2295_v62 = vsel %vm1021_vm0, %v8936_v9, 0.0  ;;  %7288 = vpow2.f32 %v2058_v55  ;;  %v3986_v50 = vsel %vm1021_vm0, %v14002_v49, 0.0 }
 0x427   : > { %v1922_v1 = vadd.f32 1.4214138, %v1906_v43  ;;  %v1769_v0 = vsel %vm1768_vm6, %v7287_v3, %v1765_v47  ;;  %v4007_v3 = vmul.f32 %v3973_v22, %v8012_v24  ;;  %v2035_v23 = vmul.f32 %v2019_v26, %v8862_v6 }
 0x428   : > { %v1774_v63 = vsel %vm1771_vm7, %v1773_v45, %v1769_v0  ;;  %vm1555_vm9 = vcmp.ge.f32.partialorder %v8854_v40, 0.0  ;;  %v1522_v22 = vmul.f32 0.5, %v8786_v7 }
 0x429   : > { %v1938_v36 = vmul.f32 %v1922_v1, %v1759_v38  ;;  %7014 = vmatmul.msk.bf16.gmra.mxu0 %vm1021_vm0, %v1422_v52  ;;  %v1875_v19 = vmul.f32 1.0614054, %v1774_v63  ;;  %v8950_v28 = vsub.f32 %v8079_v11, %v4007_v3  ;;  %v2060_v58 = vmul.f32 1.442695, %v2035_v23  ;;  %v3979_v3 = vpop.xlane.xlu1 %3978 }
 0x42a   : > { %4062 = vadd.xlane.f32.xlu2 %v4061_v20  ;;  %2296 = vadd.xlane.f32.xlu0 %v2295_v62  ;;  %v1571_v26 = vsel %vm1555_vm9, 1.0, %v13999_v42  ;;  %v1523_v62 = vmul.f32 0.5, %v8842_v31  ;;  %v14003_v31 = vld [vmem:[#allocation9_spill] sm:$0xff] }
 0x42b   : > { %v1954_v35 = vadd.f32 -0.28449672, %v1938_v36  ;;  %v1891_v57 = vadd.f32 -1.4531521, %v1875_v19  ;;  %7290 = vpow2.f32 %v2060_v58  ;;  %v4039_v6 = vmul.f32 %v8950_v28, %v8950_v28 }
 0x42c   : > { %v7289_v30 = vpop.eup %7288 }
 0x42d   : > { %v1970_v16 = vmul.f32 %v1954_v35, %v1759_v38  ;;  %v1907_v32 = vmul.f32 %v1891_v57, %v1774_v63  ;;  %v4067_v47 = vsel %vm1021_vm0, %v4039_v6, 0.0 }
 0x42f   : > { %v1986_v5 = vadd.f32 0.2548296, %v1970_v16  ;;  %v1923_v15 = vadd.f32 1.4214138, %v1907_v32  ;;  %v4009_v16 = vmul.f32 %v3979_v3, %v8012_v24  ;;  %v8971_v32 = vld [vmem:[%s13787_s12] ss:$0 sm:$0xff] }
 0x431   : > { %v2002_v44 = vmul.f32 %v1986_v5, %v1759_v38  ;;  %v1939_v12 = vmul.f32 %v1923_v15, %v1774_v63  ;;  %v7291_v1 = vpop.eup %7290  ;;  %v1570_v38 = vsel %vm1554_vm8, 1.0, %v13999_v42  ;;  %v8978_v15 = vsub.f32 %v13982_v60, %v4009_v16 }
 0x432   : > { %3987 = vadd.xlane.f32.xlu2 %v3986_v50 }
 0x433   : > { %v1955_v39 = vadd.f32 -0.28449672, %v1939_v12  ;;  %v2082_v61 = vmul.f32 %v7289_v30, %v2002_v44  ;;  %v4041_v12 = vmul.f32 %v8978_v15, %v8978_v15 }
 0x435   : > { %v1971_v43 = vmul.f32 %v1955_v39, %v1774_v63  ;;  %v2098_v46 = vsub.f32 1.0, %v2082_v61  ;;  %v4073_v61 = vsel %vm1021_vm0, %v4041_v12, 0.0 }
 0x437   : > { %v1987_v13 = vadd.f32 0.2548296, %v1971_v43  ;;  %v2114_v52 = vmul.f32 %v2098_v46, %v1570_v38 }
 0x439   : > { %v2003_v45 = vmul.f32 %v1987_v13, %v1774_v63  ;;  %v2130_v36 = vadd.f32 1.0, %v2114_v52 }
 0x43a   : > { %4068 = vadd.xlane.f32.xlu2 %v4067_v47 }
 0x43b   : > { %v2083_v55 = vmul.f32 %v7291_v1, %v2003_v45  ;;  %v2146_v35 = vmul.f32 %v2130_v36, %v1522_v22 }
 0x43d   : > { %v2099_v0 = vsub.f32 1.0, %v2083_v55 }
 0x43f   : > { %v2115_v20 = vmul.f32 %v2099_v0, %v1571_v26 }
 0x441   : > { %v8965_v63 = vpop.f32.mrf.mxu1  ;;  %v2131_v19 = vadd.f32 1.0, %v2115_v20 }
 0x442   : > { %3993 = vadd.xlane.f32.xlu2 %v3992_v8 }
 0x443   : > { %v2147_v40 = vmul.f32 %v2131_v19, %v1523_v62 }
 0x445   : > { %v2158_v57 = vpack.c.bf16 %v2147_v40, %v2146_v35 }
 0x447   : > { %2256 = vmatmul.bf16.gmra.mxu1 %v2158_v57 }
 0x449   : > { %v2244_v23 = vpop.f32.mrf.mxu1 }
 0x44a   : > { %v2245_v7 = vadd.f32 %v8971_v32, %v2244_v23 }
 0x44c   : > { %v8975_v5 = vadd.f32 %v2245_v7, %v14003_v31 }
 0x44e   : > { %14004 = vst [vmem:[#allocation9_spill] sm:$0xff] %v8975_v5  ;;  %v2304_v58 = vsel %vm1021_vm0, %v8975_v5, 0.0 }
 0x44f   : > { %2305 = vadd.xlane.f32.xlu1 %v2304_v58 }
 0x450   : > { %v1499_v50 = vpop.f32.mrf.mxu0 }
 0x451   : > { %v8983_v44 = vadd.f32 %v8650_v53, %v1499_v50 }
 0x453   : > { %v8988_v30 = vmul.f32 0.70710677, %v8983_v44 }
 0x455   : > { %v1588_v39 = vand.u32 2147483647, %v8988_v30  ;;  %vm1556_vm3 = vcmp.ge.f32.partialorder %v8988_v30, 0.0 }
 0x457   : > { %v1604_v6 = vmul.f32 0.3275911, %v1588_v39  ;;  %4074 = vadd.xlane.f32.xlu1 %v4073_v61  ;;  %v2020_v57 = vsub.f32 0.0, %v1588_v39 }
 0x458   : > { %v1501_v43 = vpop.f32.mrf.mxu0 }
 0x459   : > { %v1620_v13 = vadd.f32 1.0, %v1604_v6  ;;  %v8993_v46 = vadd.f32 %v8650_v53, %v1501_v43  ;;  %v2036_v50 = vmul.f32 %v2020_v57, %v1588_v39 }
 0x45b   : > { %7292 = vrcp.f32 %v1620_v13  ;;  %v8996_v47 = vmul.f32 0.70710677, %v8993_v46  ;;  %v1787_v26 = vand.u32 2147483648, %v1620_v13  ;;  %v1785_v36 = vand.u32 2147483647, %v1620_v13 }
 0x45c   : > { %vm1781_vm11 = vweird.f32 %v1620_v13 }
 0x45d   : > { %v1589_v45 = vand.u32 2147483647, %v8996_v47  ;;  %v1788_v53 = vor.u32 1.1754944e-38, %v1787_v26  ;;  %vm1786_vm13 = vcmp.eq.f32.partialorder %v1785_v36, 8.507059e+37  ;;  %vm1557_vm4 = vcmp.ge.f32.partialorder %v8996_v47, 0.0 }
 0x45e   : > { %v1573_v47 = vsel %vm1557_vm4, 1.0, %v13999_v42 }
 0x45f   : > { %v1605_v1 = vmul.f32 0.3275911, %v1589_v45 }
 0x461   : > { %v7293_v38 = vpop.eup %7292  ;;  %v1621_v52 = vadd.f32 1.0, %v1605_v1 }
 0x462   : > { %v1777_v55 = vmul.f32 %v7293_v38, %v1620_v13  ;;  %vm1782_vm10 = vweird.f32 %v7293_v38  ;;  %v2021_v13 = vsub.f32 0.0, %v1589_v45 }
 0x463   : > { %7294 = vrcp.f32 %v1621_v52  ;;  %vm1783_vm12 = vmor %vm1781_vm11, %vm1782_vm10  ;;  %v1802_v23 = vand.u32 2147483648, %v1621_v52  ;;  %v1800_v31 = vand.u32 2147483647, %v1621_v52  ;;  %vm1796_vm15 = vweird.f32 %v1621_v52 }
 0x464   : > { %v1778_v0 = vsub.f32 1.0, %v1777_v55  ;;  %v8999_v55 = vpop.xlane.xlu1 %3984 }
 0x465   : > { %v1803_v61 = vor.u32 1.1754944e-38, %v1802_v23  ;;  %vm1801_vm2 = vcmp.eq.f32.partialorder %v1800_v31, 8.507059e+37 }
 0x466   : > { %v1779_v20 = vmul.f32 %v7293_v38, %v1778_v0  ;;  %v2062_v0 = vmul.f32 1.442695, %v2036_v50 }
 0x468   : > { %v1780_v8 = vadd.f32 %v7293_v38, %v1779_v20  ;;  %7296 = vpow2.f32 %v2062_v0 }
 0x469   : > { %v7295_v22 = vpop.eup %7294 }
 0x46a   : > { %v1784_v62 = vsel %vm1783_vm12, %v7293_v38, %v1780_v8  ;;  %v1792_v19 = vmul.f32 %v7295_v22, %v1621_v52  ;;  %vm1797_vm14 = vweird.f32 %v7295_v22  ;;  %v2037_v8 = vmul.f32 %v2021_v13, %v1589_v45 }
 0x46b   : > { %v1789_v35 = vsel %vm1786_vm13, %v1788_v53, %v1784_v62  ;;  %vm1798_vm1 = vmor %vm1796_vm15, %vm1797_vm14 }
 0x46c   : > { %v1876_v40 = vmul.f32 1.0614054, %v1789_v35  ;;  %v1793_v3 = vsub.f32 1.0, %v1792_v19 }
 0x46e   : > { %v1892_v16 = vadd.f32 -1.4531521, %v1876_v40  ;;  %v1794_v7 = vmul.f32 %v7295_v22, %v1793_v3  ;;  %v2064_v40 = vmul.f32 1.442695, %v2037_v8 }
 0x470   : > { %v1908_v58 = vmul.f32 %v1892_v16, %v1789_v35  ;;  %v1795_v12 = vadd.f32 %v7295_v22, %v1794_v7  ;;  %v7297_v16 = vpop.eup %7296  ;;  %v2300_v7 = vpop.xlane.xlu1 %2299  ;;  %7298 = vpow2.f32 %v2064_v40 }
 0x472   : > { %v1924_v6 = vadd.f32 1.4214138, %v1908_v58  ;;  %v1799_v43 = vsel %vm1798_vm1, %v7295_v22, %v1795_v12  ;;  %v2344_v12 = vmul.f32 %v2300_v7, %v8012_v24 }
 0x473   : > { %v1804_v1 = vsel %vm1801_vm2, %v1803_v61, %v1799_v43 }
 0x474   : > { %v1940_v38 = vmul.f32 %v1924_v6, %v1789_v35  ;;  %v1877_v26 = vmul.f32 1.0614054, %v1804_v1 }
 0x476   : > { %v1956_v20 = vadd.f32 -0.28449672, %v1940_v38  ;;  %v1893_v36 = vadd.f32 -1.4531521, %v1877_v26  ;;  %v14005_v38 = vld [vmem:[#allocation11_spill] sm:$0xff]  ;;  %v7299_v8 = vpop.eup %7298 }
 0x478   : > { %v1972_v53 = vmul.f32 %v1956_v20, %v1789_v35  ;;  %v1909_v39 = vmul.f32 %v1893_v36, %v1804_v1 }
 0x479   : > { %v9001_v52 = vpop.f32.mrf.mxu1 }
 0x47a   : > { %v1988_v62 = vadd.f32 0.2548296, %v1972_v53  ;;  %v1925_v19 = vadd.f32 1.4214138, %v1909_v39  ;;  %v9015_v53 = vsub.f32 %v8619_v17, %v2344_v12  ;;  %v1572_v39 = vsel %vm1556_vm3, 1.0, %v13999_v42 }
 0x47c   : > { %v2004_v57 = vmul.f32 %v1988_v62, %v1789_v35  ;;  %v1941_v23 = vmul.f32 %v1925_v19, %v1804_v1 }
 0x47d   : > { %v4051_v22 = vpop.xlane.xlu2 %4050 }
 0x47e   : > { %v4097_v3 = vmul.f32 %v4051_v22, %v8012_v24  ;;  %v1957_v58 = vadd.f32 -0.28449672, %v1941_v23  ;;  %v2084_v45 = vmul.f32 %v7297_v16, %v2004_v57 }
 0x480   : > { %v9004_v31 = vadd.f32 1e-05, %v4097_v3  ;;  %v1973_v50 = vmul.f32 %v1957_v58, %v1804_v1  ;;  %v2100_v13 = vsub.f32 1.0, %v2084_v45  ;;  %v2243_v58 = vadd.f32 %v8971_v32, %v8965_v63 }
 0x481   : > { %v2249_v61 = vpop.f32.mrf.mxu1 }
 0x482   : > { %7300 = vrsqrt.f32 %v9004_v31  ;;  %v2250_v35 = vadd.f32 %v8971_v32, %v2249_v61  ;;  %v1989_v6 = vadd.f32 0.2548296, %v1973_v50  ;;  %v2116_v3 = vmul.f32 %v2100_v13, %v1572_v39 }
 0x483   : > { %v2376_v50 = vmul.f32 %v9015_v53, %v9015_v53  ;;  %vm4135_vm6 = vweird.f32 %v9004_v31 }
 0x484   : > { %v9011_v0 = vadd.f32 %v2250_v35, %v14005_v38  ;;  %v2005_v36 = vmul.f32 %v1989_v6, %v1804_v1  ;;  %v2132_v6 = vadd.f32 1.0, %v2116_v3 }
 0x485   : > { %v3976_v43 = vpop.xlane.xlu2 %3975  ;;  %v4054_v26 = vpop.xlane.xlu0 %4053 }
 0x486   : > { %14006 = vst [vmem:[#allocation11_spill] sm:$0xff] %v9011_v0  ;;  %v4008_v20 = vmul.f32 %v3976_v43, %v8012_v24  ;;  %v4098_v30 = vmul.f32 %v4054_v26, %v8012_v24  ;;  %v2310_v40 = vsel %vm1021_vm0, %v9011_v0, 0.0  ;;  %v2085_v22 = vmul.f32 %v7299_v8, %v2005_v36  ;;  %v14007_v36 = vld [vmem:[#allocation7_spill] sm:$0xff] }
 0x487   : > { %2311 = vadd.xlane.f32.xlu1 %v2310_v40  ;;  %v1525_v43 = vmul.f32 0.5, %v8993_v46  ;;  %v9046_v8 = vadd.f32 %v2243_v58, %v14007_v36 }
 0x488   : > { %v9019_v62 = vpop.eup %7300  ;;  %v9023_v19 = vsub.f32 %v13992_v33, %v4008_v20  ;;  %v9029_v57 = vadd.f32 1e-05, %v4098_v30  ;;  %v2101_v16 = vsub.f32 1.0, %v2085_v22  ;;  %v1524_v20 = vmul.f32 0.5, %v8983_v44 }
 0x489   : > { %v4130_v1 = vmul.f32 %v9019_v62, %v9004_v31  ;;  %14008 = vst [vmem:[#allocation7_spill] sm:$0xff] %v9046_v8  ;;  %v2394_v30 = vsel %vm1021_vm0, %v2376_v50, 0.0  ;;  %v2248_v44 = vadd.f32 %v8971_v32, %v9001_v52  ;;  %vm4136_vm5 = vweird.f32 %v9019_v62  ;;  %v9082_v31 = vld [vmem:[%s13785_s10] ss:$0 sm:$0xff] }
 0x48a   : > { %v4040_v23 = vmul.f32 %v9023_v19, %v9023_v19  ;;  %7302 = vrsqrt.f32 %v9029_v57  ;;  %v2117_v12 = vmul.f32 %v2101_v16, %v1573_v47  ;;  %v2148_v46 = vmul.f32 %v2132_v6, %v1524_v20  ;;  %vm9072_vm7 = vmor %vm4135_vm6, %vm4136_vm5 }
 0x48b   : > { %v4131_v7 = vmul.f32 %v9019_v62, %v4130_v1  ;;  %vm4145_vm9 = vweird.f32 %v9029_v57 }
 0x48c   : > { %v4070_v45 = vsel %vm1021_vm0, %v4040_v23, 0.0  ;;  %v2133_v26 = vadd.f32 1.0, %v2117_v12 }
 0x48d   : > { %v4132_v61 = vmul.f32 0.5, %v4131_v7  ;;  %4071 = vadd.xlane.f32.xlu0 %v4070_v45  ;;  %v4057_v35 = vpop.xlane.xlu2 %4056  ;;  %v4060_v13 = vpop.xlane.xlu0 %4059  ;;  %v2301_v7 = vsel %vm1021_vm0, %v9046_v8, 0.0 }
 0x48e   : > { %v4099_v38 = vmul.f32 %v4057_v35, %v8012_v24  ;;  %v4100_v63 = vmul.f32 %v4060_v13, %v8012_v24  ;;  %v2149_v40 = vmul.f32 %v2133_v26, %v1525_v43  ;;  %v14009_v35 = vld [vmem:[#allocation13_spill] sm:$0xff]  ;;  %v3998_v43 = vsel %vm1021_vm0, %v8447_v25, 0.0 }
 0x48f   : > { %v4133_v1 = vsub.f32 1.5, %v4132_v61  ;;  %2395 = vadd.xlane.f32.xlu1 %v2394_v30  ;;  %v9064_v52 = vadd.f32 %v2248_v44, %v14009_v35 }
 0x490   : > { %v9048_v39 = vadd.f32 1e-05, %v4099_v38  ;;  %v7303_v22 = vpop.eup %7302  ;;  %v9051_v3 = vadd.f32 1e-05, %v4100_v63  ;;  %v2159_v16 = vpack.c.bf16 %v2149_v40, %v2148_v46 }
 0x491   : > { %v4140_v23 = vmul.f32 %v7303_v22, %v9029_v57  ;;  %v4134_v58 = vmul.f32 %v9019_v62, %v4133_v1  ;;  %14010 = vst [vmem:[#allocation13_spill] sm:$0xff] %v9064_v52  ;;  %vm4146_vm8 = vweird.f32 %v7303_v22 }
 0x492   : > { %7304 = vrsqrt.f32 %v9048_v39  ;;  %2261 = vmatmul.bf16.gmra.mxu1 %v2159_v16  ;;  %vm4147_vm10 = vmor %vm4145_vm9, %vm4146_vm8  ;;  %vm4155_vm13 = vweird.f32 %v9048_v39  ;;  %vm4165_vm14 = vweird.f32 %v9051_v3 }
 0x493   : > { %7306 = vrsqrt.f32 %v9051_v3  ;;  %v4141_v47 = vmul.f32 %v7303_v22, %v4140_v23  ;;  %v4138_v40 = vsel %vm9072_vm7, %v9019_v62, %v4134_v58  ;;  %v2307_v62 = vsel %vm1021_vm0, %v9064_v52, 0.0 }
 0x495   : > { %2302 = vadd.xlane.f32.xlu0 %v2301_v7  ;;  %v3982_v45 = vpop.xlane.xlu2 %3981  ;;  %v4142_v50 = vmul.f32 0.5, %v4141_v47  ;;  %v4066_v12 = vpop.xlane.xlu0 %4065  ;;  %v4289_v7 = vmul.f32 %v4138_v40, %v8781_v34 }
 0x496   : > { %v4010_v61 = vmul.f32 %v3982_v45, %v8012_v24  ;;  %v4102_v6 = vmul.f32 %v4066_v12, %v8012_v24  ;;  %v1504_v13 = vpop.f32.mrf.mxu0 }
 0x497   : > { %v4143_v20 = vsub.f32 1.5, %v4142_v50  ;;  %v9085_v36 = vadd.f32 %v9082_v31, %v1504_v13  ;;  %3999 = vadd.xlane.f32.xlu1 %v3998_v43 }
 0x498   : > { %v9070_v38 = vpop.eup %7304  ;;  %v9077_v63 = vsub.f32 %v13991_v14, %v4010_v61  ;;  %v9094_v46 = vadd.f32 1e-05, %v4102_v6 }
 0x499   : > { %v9087_v30 = vpop.eup %7306  ;;  %v4150_v1 = vmul.f32 %v9070_v38, %v9048_v39  ;;  %v4144_v23 = vmul.f32 %v7303_v22, %v4143_v20  ;;  %v9102_v47 = vmul.f32 0.70710677, %v9085_v36  ;;  %vm4156_vm11 = vweird.f32 %v9070_v38 }
 0x49a   : > { %v4160_v44 = vmul.f32 %v9087_v30, %v9051_v3  ;;  %7308 = vrsqrt.f32 %v9094_v46  ;;  %v4042_v57 = vmul.f32 %v9077_v63, %v9077_v63  ;;  %vm4166_vm12 = vweird.f32 %v9087_v30  ;;  %vm9162_vm15 = vmor %vm4155_vm13, %vm4156_vm11 }
 0x49b   : > { %v4151_v16 = vmul.f32 %v9070_v38, %v4150_v1  ;;  %v4148_v58 = vsel %vm4147_vm10, %v7303_v22, %v4144_v23  ;;  %v9112_v61 = vand.u32 2147483647, %v9102_v47  ;;  %vm9169_vm1 = vmor %vm4165_vm14, %vm4166_vm12  ;;  %vm4185_vm5 = vweird.f32 %v9094_v46 }
 0x49c   : > { %v4161_v45 = vmul.f32 %v9087_v30, %v4160_v44  ;;  %v4290_v50 = vmul.f32 %v4148_v58, %v8824_v51  ;;  %v4076_v43 = vsel %vm1021_vm0, %v4042_v57, 0.0  ;;  %v9122_v51 = vld [vmem:[%s13782_s7] ss:$0 sm:$0xff] }
 0x49d   : > { %v4152_v12 = vmul.f32 0.5, %v4151_v16  ;;  %2308 = vadd.xlane.f32.xlu0 %v2307_v62  ;;  %v4063_v35 = vpop.xlane.xlu2 %4062  ;;  %v1606_v34 = vmul.f32 0.3275911, %v9112_v61  ;;  %4077 = vadd.xlane.f32.xlu2 %v4076_v43  ;;  %v4305_v40 = vmul.f32 %v9122_v51, %v4289_v7  ;;  %v9141_v7 = vld [vmem:[%s13783_s8] ss:$0 sm:$0xff] }
 0x49e   : > { %v4162_v6 = vmul.f32 0.5, %v4161_v45  ;;  %v4101_v13 = vmul.f32 %v4063_v35, %v8012_v24  ;;  %v1506_v22 = vpop.f32.mrf.mxu0  ;;  %v4306_v16 = vmul.f32 %v9122_v51, %v4290_v50 }
 0x49f   : > { %v4153_v26 = vsub.f32 1.5, %v4152_v12  ;;  %v9127_v23 = vadd.f32 1.0, %v1606_v34  ;;  %v9130_v44 = vadd.f32 %v9082_v31, %v1506_v22  ;;  %v4321_v57 = vadd.f32 %v9141_v7, %v4305_v40 }
 0x4a0   : > { %v9117_v20 = vadd.f32 1e-05, %v4101_v13  ;;  %v9125_v1 = vpop.eup %7308  ;;  %v4163_v62 = vsub.f32 1.5, %v4162_v6  ;;  %v4322_v6 = vadd.f32 %v9141_v7, %v4306_v16 }
 0x4a1   : > { %v4180_v58 = vmul.f32 %v9125_v1, %v9094_v46  ;;  %v4154_v45 = vmul.f32 %v9070_v38, %v4153_v26  ;;  %v9147_v35 = vmul.f32 0.70710677, %v9130_v44  ;;  %vm4186_vm2 = vweird.f32 %v9125_v1 }
 0x4a2   : > { %7310 = vrsqrt.f32 %v9117_v20  ;;  %v4164_v43 = vmul.f32 %v9087_v30, %v4163_v62  ;;  %v4337_v22 = vpack.c.bf16 %v4322_v6, %v4321_v57  ;;  %v14015_v62 = vld [vmem:[#allocation15_spill] sm:$0xff]  ;;  %vm4175_vm4 = vweird.f32 %v9117_v20  ;;  %vm9244_vm7 = vmor %vm4185_vm5, %vm4186_vm2 }
 0x4a3   : > { %v4181_v12 = vmul.f32 %v9125_v1, %v4180_v58  ;;  %7312 = vrcp.f32 %v9127_v23  ;;  %v2252_v50 = vpop.f32.mrf.mxu1  ;;  %v9155_v34 = vand.u32 2147483647, %v9147_v35  ;;  %v4158_v57 = vsel %vm9162_vm15, %v9070_v38, %v4154_v45 }
 0x4a4   : > { %v2253_v13 = vadd.f32 %v8971_v32, %v2252_v50  ;;  %v2297_v50 = vpop.xlane.xlu0 %2296  ;;  %7115 = vmatmul.msk.bf16.vlgmr.msrb.gmra.mxu0 %vm1021_vm0, %v4337_v22  ;;  %vm1811_vm8 = vweird.f32 %v9127_v23 }
 0x4a5   : > { %v4182_v6 = vmul.f32 0.5, %v4181_v12  ;;  %v1607_v17 = vmul.f32 0.3275911, %v9155_v34  ;;  %v2343_v38 = vmul.f32 %v2297_v50, %v8012_v24 }
 0x4a6   : > { %v1509_v26 = vpop.f32.mrf.mxu0  ;;  %v9167_v58 = vadd.f32 %v2253_v13, %v14015_v62  ;;  %v4168_v13 = vsel %vm9169_vm1, %v9087_v30, %v4164_v43  ;;  %v4291_v30 = vmul.f32 %v4158_v57, %v8835_v4 }
 0x4a7   : > { %v9186_v14 = vadd.f32 %v9082_v31, %v1509_v26  ;;  %v9192_v12 = vadd.f32 1.0, %v1607_v17  ;;  %v4183_v43 = vsub.f32 1.5, %v4182_v6  ;;  %v4292_v60 = vmul.f32 %v4168_v13, %v8857_v2 }
 0x4a8   : > { %v9157_v40 = vpop.eup %7310  ;;  %14016 = vst [vmem:[#allocation15_spill] sm:$0xff] %v9167_v58  ;;  %v2313_v62 = vsel %vm1021_vm0, %v9167_v58, 0.0  ;;  %v4307_v33 = vmul.f32 %v9122_v51, %v4291_v30 }
 0x4a9   : > { %v4170_v3 = vmul.f32 %v9157_v40, %v9117_v20  ;;  %v9188_v16 = vpop.eup %7312  ;;  %2314 = vadd.xlane.f32.xlu2 %v2313_v62  ;;  %v9195_v22 = vmul.f32 0.70710677, %v9186_v14  ;;  %7314 = vrcp.f32 %v9192_v12  ;;  %v9208_v62 = vsub.f32 %v8936_v9, %v2343_v38 }
 0x4aa   : > { %v1807_v50 = vmul.f32 %v9188_v16, %v9127_v23  ;;  %vm4176_vm3 = vweird.f32 %v9157_v40  ;;  %v4308_v38 = vmul.f32 %v9122_v51, %v4292_v60  ;;  %v4011_v20 = vmul.f32 %v8999_v55, %v8012_v24  ;;  %v3988_v55 = vpop.xlane.xlu2 %3987 }
 0x4ab   : > { %v4171_v45 = vmul.f32 %v9157_v40, %v4170_v3  ;;  %v2254_v26 = vpop.f32.mrf.mxu1  ;;  %v9204_v17 = vand.u32 2147483647, %v9195_v22  ;;  %vm9233_vm6 = vmor %vm4175_vm4, %vm4176_vm3  ;;  %v4012_v27 = vmul.f32 %v3988_v55, %v8012_v24  ;;  %vm1826_vm9 = vweird.f32 %v9192_v12 }
 0x4ac   : > { %v2255_v3 = vadd.f32 %v8971_v32, %v2254_v26  ;;  %vm1812_vm10 = vweird.f32 %v9188_v16 }
 0x4ad   : > { %v4172_v39 = vmul.f32 0.5, %v4171_v45  ;;  %v1608_v2 = vmul.f32 0.3275911, %v9204_v17  ;;  %v4184_v45 = vmul.f32 %v9125_v1, %v4183_v43  ;;  %vm9305_vm11 = vmor %vm1811_vm8, %vm1812_vm10  ;;  %vm1559_vm10 = vcmp.ge.f32.partialorder %v9147_v35, 0.0 }
 0x4ae   : > { %v1511_v57 = vpop.f32.mrf.mxu0  ;;  %v9212_v6 = vadd.f32 %v2255_v3, %v8176_v56  ;;  %v1526_v35 = vmul.f32 0.5, %v9085_v36 }
 0x4af   : > { %v4173_v4 = vsub.f32 1.5, %v4172_v39  ;;  %v9216_v13 = vadd.f32 %v9082_v31, %v1511_v57  ;;  %v1808_v39 = vsub.f32 1.0, %v1807_v50  ;;  %v9223_v9 = vadd.f32 1.0, %v1608_v2  ;;  %v9227_v3 = vpop.eup %7314 }
 0x4b0   : > { %14019 = vst [vmem:[#allocation32_spill] sm:$0xff] %v9212_v6  ;;  %v2316_v56 = vsel %vm1021_vm0, %v9212_v6, 0.0  ;;  %v2022_v31 = vsub.f32 0.0, %v9112_v61  ;;  %v1822_v50 = vmul.f32 %v9227_v3, %v9192_v12  ;;  %v4323_v2 = vadd.f32 %v9141_v7, %v4307_v33 }
 0x4b1   : > { %v4174_v26 = vmul.f32 %v9157_v40, %v4173_v4  ;;  %2317 = vadd.xlane.f32.xlu0 %v2316_v56  ;;  %v9238_v60 = vmul.f32 0.70710677, %v9216_v13  ;;  %7316 = vrcp.f32 %v9223_v9  ;;  %v4188_v4 = vsel %vm9244_vm7, %v9125_v1, %v4184_v45 }
 0x4b2   : > { %v4324_v56 = vadd.f32 %v9141_v7, %v4308_v38  ;;  %v1809_v30 = vmul.f32 %v9188_v16, %v1808_v39  ;;  %v2038_v11 = vmul.f32 %v2022_v31, %v9112_v61  ;;  %v2023_v45 = vsub.f32 0.0, %v9155_v34 }
 0x4b3   : > { %v4178_v46 = vsel %vm9233_vm6, %v9157_v40, %v4174_v26  ;;  %v9258_v57 = vand.u32 2147483647, %v9238_v60  ;;  %v1823_v40 = vsub.f32 1.0, %v1822_v50  ;;  %v2375_v26 = vmul.f32 %v9208_v62, %v9208_v62  ;;  %v9286_v50 = vpop.xlane.xlu1 %3990 }
 0x4b4   : > { %v4338_v43 = vpack.c.bf16 %v4324_v56, %v4323_v2  ;;  %v4293_v1 = vmul.f32 %v4178_v46, %v8925_v10  ;;  %v4294_v33 = vmul.f32 %v4188_v4, %v8895_v59  ;;  %v9272_v38 = vsub.f32 %v8365_v37, %v4011_v20 }
 0x4b5   : > { %v1609_v21 = vmul.f32 0.3275911, %v9258_v57  ;;  %v3995_v61 = vsel %vm1021_vm0, %v8505_v29, 0.0  ;;  %v1824_v10 = vmul.f32 %v9227_v3, %v1823_v40  ;;  %v2391_v46 = vsel %vm1021_vm0, %v2375_v26, 0.0 }
 0x4b6   : > { %7116 = vmatmul.msk.bf16.gmra.mxu0 %vm1021_vm0, %v4338_v43  ;;  %v4309_v59 = vmul.f32 %v9122_v51, %v4293_v1  ;;  %v1810_v20 = vadd.f32 %v9188_v16, %v1809_v30  ;;  %v9288_v4 = vmul.f32 1.442695, %v2038_v11  ;;  %v4310_v55 = vmul.f32 %v9122_v51, %v4294_v33 }
 0x4b7   : > { %v9275_v39 = vadd.f32 1.0, %v1609_v21  ;;  %v9280_v31 = vpop.eup %7316  ;;  %v9296_v2 = vmul.f32 %v2023_v45, %v9155_v34  ;;  %v9299_v56 = vsub.f32 %v14002_v49, %v4012_v27  ;;  %v1815_v26 = vand.u32 2147483647, %v9127_v23 }
 0x4b8   : > { %v1837_v21 = vmul.f32 %v9280_v31, %v9223_v9  ;;  %v1817_v43 = vand.u32 2147483648, %v9127_v23  ;;  %vm1841_vm12 = vweird.f32 %v9223_v9  ;;  %v4325_v27 = vadd.f32 %v9141_v7, %v4309_v59 }
 0x4b9   : > { %7318 = vrcp.f32 %v9275_v39  ;;  %2392 = vadd.xlane.f32.xlu0 %v2391_v46  ;;  %v1814_v34 = vsel %vm9305_vm11, %v9188_v16, %v1810_v20  ;;  %v1825_v1 = vadd.f32 %v9227_v3, %v1824_v10  ;;  %v4326_v33 = vadd.f32 %v9141_v7, %v4310_v55 }
 0x4ba   : > { %v1838_v11 = vsub.f32 1.0, %v1837_v21  ;;  %v1818_v46 = vor.u32 1.1754944e-38, %v1817_v43  ;;  %vm1827_vm13 = vweird.f32 %v9227_v3  ;;  %vm1816_vm14 = vcmp.eq.f32.partialorder %v1815_v26, 8.507059e+37 }
 0x4bb   : > { %vm9322_vm15 = vmor %vm1826_vm9, %vm1827_vm13  ;;  %v1830_v59 = vand.u32 2147483647, %v9192_v12  ;;  %v1832_v16 = vand.u32 2147483648, %v9192_v12  ;;  %vm1842_vm1 = vweird.f32 %v9280_v31  ;;  %v2025_v26 = vsub.f32 0.0, %v9258_v57 }
 0x4bc   : > { %v1839_v45 = vmul.f32 %v9280_v31, %v1838_v11  ;;  %v9329_v20 = vsel %vm1816_vm14, %v1818_v46, %v1814_v34  ;;  %v1829_v21 = vsel %vm9322_vm15, %v9227_v3, %v1825_v1  ;;  %v1845_v11 = vand.u32 2147483647, %v9223_v9  ;;  %vm9340_vm2 = vmor %vm1841_vm12, %vm1842_vm1 }
 0x4bd   : > { %v4339_v43 = vpack.c.bf16 %v4326_v33, %v4325_v27  ;;  %v1833_v30 = vor.u32 1.1754944e-38, %v1832_v16  ;;  %vm1831_vm3 = vcmp.eq.f32.partialorder %v1830_v59, 8.507059e+37  ;;  %v1878_v3 = vmul.f32 1.0614054, %v9329_v20 }
 0x4be   : > { %v1840_v55 = vadd.f32 %v9280_v31, %v1839_v45  ;;  %v1847_v45 = vand.u32 2147483648, %v9223_v9  ;;  %vm1846_vm4 = vcmp.eq.f32.partialorder %v1845_v11, 8.507059e+37  ;;  %v1860_v9 = vand.u32 2147483647, %v9275_v39 }
 0x4bf   : > { %v7319_v10 = vpop.eup %7318  ;;  %v9350_v33 = vsel %vm1831_vm3, %v1833_v30, %v1829_v21  ;;  %v1862_v21 = vand.u32 2147483648, %v9275_v39  ;;  %vm1856_vm6 = vweird.f32 %v9275_v39  ;;  %7320 = vpow2.f32 %v9288_v4 }
 0x4c0   : > { %v1852_v40 = vmul.f32 %v7319_v10, %v9275_v39  ;;  %v1844_v1 = vsel %vm9340_vm2, %v9280_v31, %v1840_v55  ;;  %v1879_v16 = vmul.f32 1.0614054, %v9350_v33  ;;  %v1848_v49 = vor.u32 1.1754944e-38, %v1847_v45 }
 0x4c1   : > { %3996 = vadd.xlane.f32.xlu0 %v3995_v61  ;;  %v1894_v61 = vadd.f32 -1.4531521, %v1878_v3  ;;  %vm1857_vm5 = vweird.f32 %v7319_v10  ;;  %vm1861_vm8 = vcmp.eq.f32.partialorder %v1860_v9, 8.507059e+37  ;;  %vm1558_vm9 = vcmp.ge.f32.partialorder %v9102_v47, 0.0 }
 0x4c2   : > { %v2306_v34 = vpop.xlane.xlu1 %2305  ;;  %v1853_v46 = vsub.f32 1.0, %v1852_v40  ;;  %v1895_v55 = vadd.f32 -1.4531521, %v1879_v16  ;;  %v9359_v30 = vsel %vm1846_vm4, %v1848_v49, %v1844_v1  ;;  %vm1858_vm7 = vmor %vm1856_vm6, %vm1857_vm5  ;;  %v1863_v49 = vor.u32 1.1754944e-38, %v1862_v21 }
 0x4c3   : > { %v2346_v27 = vmul.f32 %v2306_v34, %v8012_v24  ;;  %v1910_v40 = vmul.f32 %v1894_v61, %v9329_v20  ;;  %v1880_v1 = vmul.f32 1.0614054, %v9359_v30  ;;  %v2068_v61 = vmul.f32 1.442695, %v9296_v2 }
 0x4c4   : > { %v2257_v23 = vpop.f32.mrf.mxu1  ;;  %v1854_v59 = vmul.f32 %v7319_v10, %v1853_v46  ;;  %v1911_v3 = vmul.f32 %v1895_v55, %v9350_v33  ;;  %v2041_v2 = vmul.f32 %v2025_v26, %v9258_v57  ;;  %v1575_v47 = vsel %vm1559_vm10, 1.0, %v13999_v42 }
 0x4c5   : > { %v9354_v37 = vsub.f32 %v8975_v5, %v2346_v27  ;;  %v2258_v31 = vadd.f32 %v8971_v32, %v2257_v23  ;;  %v1926_v45 = vadd.f32 1.4214138, %v1910_v40  ;;  %v1896_v16 = vadd.f32 -1.4531521, %v1880_v1 }
 0x4c6   : > { %v1855_v34 = vadd.f32 %v7319_v10, %v1854_v59  ;;  %7117 = vmatmul.msk.bf16.gmra.mxu0 %vm1021_vm0, %v4339_v43  ;;  %v1927_v27 = vadd.f32 1.4214138, %v1911_v3  ;;  %7322 = vpow2.f32 %v2068_v61  ;;  %v7321_v61 = vpop.eup %7320  ;;  %vm1561_vm11 = vcmp.ge.f32.partialorder %v9238_v60, 0.0 }
 0x4c7   : > { %v9364_v11 = vadd.f32 %v2258_v31, %v8229_v54  ;;  %v2378_v12 = vmul.f32 %v9354_v37, %v9354_v37  ;;  %v1942_v43 = vmul.f32 %v1926_v45, %v9329_v20  ;;  %v4043_v31 = vmul.f32 %v9272_v38, %v9272_v38 }
 0x4c8   : > { %v1859_v46 = vsel %vm1858_vm7, %v7319_v10, %v1855_v34  ;;  %v1943_v55 = vmul.f32 %v1927_v27, %v9350_v33  ;;  %v1912_v21 = vmul.f32 %v1896_v16, %v9359_v30  ;;  %v14031_v10 = vsub.f32 0.0, %v9204_v17 }
 0x4c9   : > { %14030 = vst [vmem:[#allocation33_spill] sm:$0xff] %v9364_v11  ;;  %v2319_v39 = vsel %vm1021_vm0, %v9364_v11, 0.0  ;;  %v2400_v54 = vsel %vm1021_vm0, %v2378_v12, 0.0  ;;  %v1864_v23 = vsel %vm1861_vm8, %v1863_v49, %v1859_v46  ;;  %v1958_v40 = vadd.f32 -0.28449672, %v1942_v43 }
 0x4ca   : > { %2320 = vadd.xlane.f32.xlu1 %v2319_v39  ;;  %2401 = vadd.xlane.f32.xlu0 %v2400_v54  ;;  %v1881_v59 = vmul.f32 1.0614054, %v1864_v23  ;;  %v2040_v9 = vmul.f32 %v14031_v10, %v9204_v17  ;;  %v4044_v12 = vmul.f32 %v9299_v56, %v9299_v56  ;;  %v1959_v3 = vadd.f32 -0.28449672, %v1943_v55 }
 0x4cb   : > { %v1974_v45 = vmul.f32 %v1958_v40, %v9329_v20  ;;  %v1928_v49 = vadd.f32 1.4214138, %v1912_v21  ;;  %v4079_v17 = vsel %vm1021_vm0, %v4043_v31, 0.0  ;;  %v2072_v16 = vmul.f32 1.442695, %v2041_v2 }
 0x4cc   : > { %v1897_v34 = vadd.f32 -1.4531521, %v1881_v59  ;;  %v1975_v39 = vmul.f32 %v1959_v3, %v9350_v33  ;;  %v2070_v46 = vmul.f32 1.442695, %v2040_v9  ;;  %v4082_v27 = vsel %vm1021_vm0, %v4044_v12, 0.0  ;;  %v7323_v31 = vpop.eup %7322 }
 0x4cd   : > { %v1990_v54 = vadd.f32 0.2548296, %v1974_v45  ;;  %v1944_v4 = vmul.f32 %v1928_v49, %v9359_v30  ;;  %vm1560_vm12 = vcmp.ge.f32.partialorder %v9195_v22, 0.0  ;;  %v1529_v60 = vmul.f32 0.5, %v9216_v13 }
 0x4ce   : > { %v1913_v1 = vmul.f32 %v1897_v34, %v1864_v23  ;;  %v1991_v57 = vadd.f32 0.2548296, %v1975_v39  ;;  %7324 = vpow2.f32 %v2070_v46  ;;  %v1576_v36 = vsel %vm1560_vm12, 1.0, %v13999_v42 }
 0x4cf   : > { %v2006_v26 = vmul.f32 %v1990_v54, %v9329_v20  ;;  %v1960_v59 = vadd.f32 -0.28449672, %v1944_v4  ;;  %7326 = vpow2.f32 %v2072_v16  ;;  %v1574_v20 = vsel %vm1558_vm9, 1.0, %v13999_v42 }
 0x4d0   : > { %v1929_v43 = vadd.f32 1.4214138, %v1913_v1  ;;  %v2007_v40 = vmul.f32 %v1991_v57, %v9350_v33  ;;  %v4013_v13 = vmul.f32 %v9286_v50, %v8012_v24 }
 0x4d1   : > { %v2086_v21 = vmul.f32 %v7321_v61, %v2006_v26  ;;  %v1976_v10 = vmul.f32 %v1960_v59, %v9359_v30 }
 0x4d2   : > { %4080 = vadd.xlane.f32.xlu0 %v4079_v17  ;;  %4083 = vadd.xlane.f32.xlu1 %v4082_v27  ;;  %v1945_v55 = vmul.f32 %v1929_v43, %v1864_v23  ;;  %v2087_v12 = vmul.f32 %v7323_v31, %v2007_v40  ;;  %v1527_v27 = vmul.f32 0.5, %v9130_v44  ;;  %v1577_v40 = vsel %vm1561_vm11, 1.0, %v13999_v42  ;;  %v4069_v44 = vpop.xlane.xlu2 %4068 }
 0x4d3   : > { %v2102_v34 = vsub.f32 1.0, %v2086_v21  ;;  %v1992_v3 = vadd.f32 0.2548296, %v1976_v10  ;;  %v4103_v31 = vmul.f32 %v4069_v44, %v8012_v24 }
 0x4d4   : > { %v1961_v9 = vadd.f32 -0.28449672, %v1945_v55  ;;  %v2103_v45 = vsub.f32 1.0, %v2087_v12  ;;  %v7325_v4 = vpop.eup %7324  ;;  %v1528_v12 = vmul.f32 0.5, %v9186_v14 }
 0x4d5   : > { %v2118_v49 = vmul.f32 %v2102_v34, %v1574_v20  ;;  %v2008_v1 = vmul.f32 %v1992_v3, %v9359_v30  ;;  %v7327_v17 = vpop.eup %7326  ;;  %v4119_v22 = vadd.f32 1e-05, %v4103_v31  ;;  %v4075_v3 = vpop.xlane.xlu1 %4074 }
 0x4d6   : > { %v1977_v2 = vmul.f32 %v1961_v9, %v1864_v23  ;;  %v2119_v39 = vmul.f32 %v2103_v45, %v1575_v47  ;;  %v4105_v47 = vmul.f32 %v4075_v3, %v8012_v24 }
 0x4d7   : > { %v2134_v54 = vadd.f32 1.0, %v2118_v49  ;;  %v2088_v16 = vmul.f32 %v7325_v4, %v2008_v1  ;;  %7328 = vrsqrt.f32 %v4119_v22  ;;  %vm4195_vm14 = vweird.f32 %v4119_v22 }
 0x4d8   : > { %v1993_v33 = vadd.f32 0.2548296, %v1977_v2  ;;  %v2135_v43 = vadd.f32 1.0, %v2119_v39 }
 0x4d9   : > { %v2150_v26 = vmul.f32 %v2134_v54, %v1526_v35  ;;  %v2104_v55 = vsub.f32 1.0, %v2088_v16  ;;  %v9417_v54 = vadd.f32 1e-05, %v4105_v47  ;;  %v14032_v47 = vld [vmem:[#allocation19_spill] sm:$0xff] }
 0x4da   : > { %v2009_v46 = vmul.f32 %v1993_v33, %v1864_v23  ;;  %v2151_v59 = vmul.f32 %v2135_v43, %v1527_v27  ;;  %v9423_v27 = vsub.f32 %v8406_v48, %v4013_v13 }
 0x4db   : > { %v2120_v21 = vmul.f32 %v2104_v55, %v1576_v36  ;;  %7330 = vrsqrt.f32 %v9417_v54  ;;  %v3994_v55 = vpop.xlane.xlu2 %3993  ;;  %vm4215_vm5 = vweird.f32 %v9417_v54 }
 0x4dc   : > { %v2089_v57 = vmul.f32 %v7327_v17, %v2009_v46  ;;  %v2160_v30 = vpack.c.bf16 %v2151_v59, %v2150_v26 }
 0x4dd   : > { %v2136_v9 = vadd.f32 1.0, %v2120_v21  ;;  %v7329_v45 = vpop.eup %7328 }
 0x4de   : > { %v2105_v61 = vsub.f32 1.0, %v2089_v57  ;;  %2266 = vmatmul.bf16.gmra.mxu1 %v2160_v30  ;;  %v4190_v49 = vmul.f32 %v7329_v45, %v4119_v22  ;;  %v4045_v57 = vmul.f32 %v9423_v27, %v9423_v27  ;;  %vm4196_vm13 = vweird.f32 %v7329_v45 }
 0x4df   : > { %v2152_v20 = vmul.f32 %v2136_v9, %v1528_v12  ;;  %vm4197_vm15 = vmor %vm4195_vm14, %vm4196_vm13  ;;  %v4014_v22 = vmul.f32 %v3994_v55, %v8012_v24 }
 0x4e0   : > { %v2121_v23 = vmul.f32 %v2105_v61, %v1577_v40  ;;  %v4191_v39 = vmul.f32 %v7329_v45, %v4190_v49  ;;  %v2259_v40 = vpop.f32.mrf.mxu1  ;;  %v4085_v21 = vsel %vm1021_vm0, %v4045_v57, 0.0 }
 0x4e1   : > { %v9430_v61 = vpop.eup %7330  ;;  %v2260_v9 = vadd.f32 %v8971_v32, %v2259_v40  ;;  %v9451_v32 = vld [vmem:[%s13787_s12] ss:$0 sm:$0xff] }
 0x4e2   : > { %v2137_v10 = vadd.f32 1.0, %v2121_v23  ;;  %v4192_v35 = vmul.f32 0.5, %v4191_v39  ;;  %vm4216_vm4 = vweird.f32 %v9430_v61 }
 0x4e3   : > { %vm4217_vm6 = vmor %vm4215_vm5, %vm4216_vm4 }
 0x4e4   : > { %v2153_v34 = vmul.f32 %v2137_v10, %v1529_v60  ;;  %v4193_v50 = vsub.f32 1.5, %v4192_v35  ;;  %v4210_v60 = vmul.f32 %v9430_v61, %v9417_v54  ;;  %v14034_v35 = vld [vmem:[#allocation23_spill] sm:$0xff] }
 0x4e6   : > { %v2161_v2 = vpack.c.bf16 %v2153_v34, %v2152_v20  ;;  %v4194_v30 = vmul.f32 %v7329_v45, %v4193_v50  ;;  %v4211_v49 = vmul.f32 %v9430_v61, %v4210_v60 }
 0x4e8   : > { %v4198_v31 = vsel %vm4197_vm15, %v7329_v45, %v4194_v30  ;;  %v4212_v57 = vmul.f32 0.5, %v4211_v49 }
 0x4e9   : > { %v4295_v3 = vmul.f32 %v4198_v31, %v8950_v28 }
 0x4eb   : > { %v4311_v30 = vmul.f32 %v9122_v51, %v4295_v3 }
 0x4ee   : > { %2271 = vmatmul.bf16.gmra.mxu1 %v2161_v2 }
 0x4fa   : > { %v2312_v33 = vpop.xlane.xlu1 %2311 }
 0x4fb   : > { %v2348_v1 = vmul.f32 %v2312_v33, %v8012_v24  ;;  %v9446_v33 = vadd.f32 %v2260_v9, %v14032_v47 }
 0x4fd   : > { %v9415_v14 = vsub.f32 %v9011_v0, %v2348_v1  ;;  %14033 = vst [vmem:[#allocation19_spill] sm:$0xff] %v9446_v33 }
 0x4ff   : > { %v2380_v17 = vmul.f32 %v9415_v14, %v9415_v14 }
 0x500   : > { %v4072_v4 = vpop.xlane.xlu0 %4071 }
 0x501   : > { %v4104_v46 = vmul.f32 %v4072_v4, %v8012_v24  ;;  %v2406_v16 = vsel %vm1021_vm0, %v2380_v17, 0.0  ;;  %v9457_v17 = vsub.f32 %v8490_v18, %v4014_v22 }
 0x502   : > { %2407 = vadd.xlane.f32.xlu0 %v2406_v16 }
 0x503   : > { %v4120_v43 = vadd.f32 1e-05, %v4104_v46 }
 0x505   : > { %7332 = vrsqrt.f32 %v4120_v43  ;;  %vm4205_vm2 = vweird.f32 %v4120_v43 }
 0x508   : > { %v2303_v26 = vpop.xlane.xlu0 %2302 }
 0x509   : > { %v2345_v59 = vmul.f32 %v2303_v26, %v8012_v24 }
 0x50a   : > { %4086 = vadd.xlane.f32.xlu0 %v4085_v21 }
 0x50b   : > { %v7333_v23 = vpop.eup %7332  ;;  %v9433_v36 = vsub.f32 %v9046_v8, %v2345_v59  ;;  %v2322_v59 = vsel %vm1021_vm0, %v9446_v33, 0.0 }
 0x50c   : > { %v4200_v44 = vmul.f32 %v7333_v23, %v4120_v43  ;;  %vm4206_vm1 = vweird.f32 %v7333_v23 }
 0x50d   : > { %v2377_v10 = vmul.f32 %v9433_v36, %v9433_v36  ;;  %vm4207_vm3 = vmor %vm4205_vm2, %vm4206_vm1 }
 0x50e   : > { %v4201_v12 = vmul.f32 %v7333_v23, %v4200_v44  ;;  %v4213_v44 = vsub.f32 1.5, %v4212_v57 }
 0x50f   : > { %v2397_v34 = vsel %vm1021_vm0, %v2377_v10, 0.0  ;;  %v2262_v1 = vpop.f32.mrf.mxu1  ;;  %v4327_v10 = vadd.f32 %v9141_v7, %v4311_v30 }
 0x510   : > { %v4202_v20 = vmul.f32 0.5, %v4201_v12  ;;  %v2309_v2 = vpop.xlane.xlu0 %2308  ;;  %2398 = vadd.xlane.f32.xlu2 %v2397_v34  ;;  %v4078_v39 = vpop.xlane.xlu2 %4077  ;;  %v2263_v13 = vadd.f32 %v9451_v32, %v2262_v1  ;;  %v4214_v22 = vmul.f32 %v9430_v61, %v4213_v44 }
 0x511   : > { %v2347_v4 = vmul.f32 %v2309_v2, %v8012_v24  ;;  %v4106_v28 = vmul.f32 %v4078_v39, %v8012_v24  ;;  %v2396_v34 = vpop.xlane.xlu1 %2395 }
 0x512   : > { %v4203_v45 = vsub.f32 1.5, %v4202_v20  ;;  %v9460_v16 = vadd.f32 %v2263_v13, %v14034_v35  ;;  %v2440_v47 = vmul.f32 %v2396_v34, %v8012_v24  ;;  %v4218_v13 = vsel %vm4217_vm6, %v9430_v61, %v4214_v22 }
 0x513   : > { %v4122_v50 = vadd.f32 1e-05, %v4106_v28  ;;  %v9466_v55 = vsub.f32 %v9064_v52, %v2347_v4  ;;  %v14036_v4 = vld [vmem:[#allocation21_spill] sm:$0xff] }
 0x514   : > { %v4204_v46 = vmul.f32 %v7333_v23, %v4203_v45  ;;  %14035 = vst [vmem:[#allocation23_spill] sm:$0xff] %v9460_v16  ;;  %v2325_v43 = vsel %vm1021_vm0, %v9460_v16, 0.0  ;;  %v9491_v35 = vadd.f32 1e-05, %v2440_v47 }
 0x515   : > { %7334 = vrsqrt.f32 %v4122_v50  ;;  %2326 = vadd.xlane.f32.xlu1 %v2325_v43  ;;  %v2379_v60 = vmul.f32 %v9466_v55, %v9466_v55  ;;  %vm4225_vm8 = vweird.f32 %v4122_v50 }
 0x516   : > { %v4208_v26 = vsel %vm4207_vm3, %v7333_v23, %v4204_v46  ;;  %v4046_v23 = vmul.f32 %v9457_v17, %v9457_v17  ;;  %7336 = vrsqrt.f32 %v9491_v35  ;;  %vm2487_vm12 = vweird.f32 %v9491_v35 }
 0x517   : > { %v4296_v40 = vmul.f32 %v4208_v26, %v9023_v19  ;;  %v2264_v9 = vpop.f32.mrf.mxu1  ;;  %v2403_v49 = vsel %vm1021_vm0, %v2379_v60, 0.0  ;;  %v4297_v26 = vmul.f32 %v4218_v13, %v8978_v15 }
 0x518   : > { %2323 = vadd.xlane.f32.xlu2 %v2322_v59  ;;  %v4088_v2 = vsel %vm1021_vm0, %v4046_v23, 0.0  ;;  %v2265_v3 = vadd.f32 %v9451_v32, %v2264_v9 }
 0x519   : > { %v4312_v21 = vmul.f32 %v9122_v51, %v4296_v40 }
 0x51a   : > { %v9488_v28 = vadd.f32 %v2265_v3, %v14036_v4  ;;  %v7143_v4 = vld [vmem:[%s13784_s9 + $0x10] sm:$0xff] }
 0x51b   : > { %v4328_v31 = vadd.f32 %v9141_v7, %v4312_v21  ;;  %v7335_v12 = vpop.eup %7334 }
 0x51c   : > { %v4220_v19 = vmul.f32 %v7335_v12, %v4122_v50  ;;  %v2315_v1 = vpop.xlane.xlu2 %2314  ;;  %14037 = vst [vmem:[#allocation21_spill] sm:$0xff] %v9488_v28  ;;  %vm4226_vm7 = vweird.f32 %v7335_v12  ;;  %v2328_v43 = vsel %vm1021_vm0, %v9488_v28, 0.0  ;;  %v4313_v50 = vmul.f32 %v9122_v51, %v4297_v26  ;;  %v7337_v9 = vpop.eup %7336 }
 0x51d   : > { %v4340_v20 = vpack.c.bf16 %v4328_v31, %v4327_v10  ;;  %4089 = vadd.xlane.f32.xlu1 %v4088_v2  ;;  %v2349_v46 = vmul.f32 %v2315_v1, %v8012_v24  ;;  %vm4227_vm9 = vmor %vm4225_vm8, %vm4226_vm7  ;;  %v2482_v2 = vmul.f32 %v7337_v9, %v9491_v35  ;;  %vm2488_vm10 = vweird.f32 %v7337_v9  ;;  %v9548_v35 = vld [vmem:[%s13782_s7 + $0x1] ss:$0 sm:$0xff] }
 0x51e   : > { %v4221_v45 = vmul.f32 %v7335_v12, %v4220_v19  ;;  %vm2489_vm13 = vmor %vm2487_vm12, %vm2488_vm10 }
 0x51f   : > { %7118 = vmatmul.msk.bf16.gmra.mxu0 %vm1021_vm0, %v4340_v20  ;;  %v9495_v54 = vsub.f32 %v9167_v58, %v2349_v46  ;;  %v2483_v3 = vmul.f32 %v7337_v9, %v2482_v2  ;;  %v4000_v46 = vpop.xlane.xlu1 %3999 }
 0x520   : > { %2404 = vadd.xlane.f32.xlu2 %v2403_v49  ;;  %v4222_v39 = vmul.f32 0.5, %v4221_v45  ;;  %v7144_v45 = vld [vmem:[%s13784_s9 + $0x18] sm:$0xff] }
 0x521   : > { %v2381_v10 = vmul.f32 %v9495_v54, %v9495_v54  ;;  %v2484_v1 = vmul.f32 0.5, %v2483_v3  ;;  %2738 = vmatpush.bf16.msra.mxu2 %v7144_v45  ;;  %5585 = vmatpush.bf16.msrb.mxu1 %v7144_v45 }
 0x522   : > { %v4223_v57 = vsub.f32 1.5, %v4222_v39 }
 0x523   : > { %v2409_v20 = vsel %vm1021_vm0, %v2381_v10, 0.0  ;;  %v2485_v26 = vsub.f32 1.5, %v2484_v1 }
 0x524   : > { %v4224_v59 = vmul.f32 %v7335_v12, %v4223_v57  ;;  %v2318_v30 = vpop.xlane.xlu0 %2317 }
 0x525   : > { %v2350_v61 = vmul.f32 %v2318_v30, %v8012_v24  ;;  %2739 = vmatpush.bf16.msra.mxu2 %v7143_v4  ;;  %5586 = vmatpush.bf16.msrb.mxu1 %v7143_v4  ;;  %v7681_v30 = vld [vmem:[%s13786_s11 + $0x38] sm:$0xff] }
 0x526   : > { %v4228_v40 = vsel %vm4227_vm9, %v7335_v12, %v4224_v59  ;;  %v4329_v12 = vadd.f32 %v9141_v7, %v4313_v50 }
 0x527   : > { %v4298_v21 = vmul.f32 %v4228_v40, %v9077_v63  ;;  %v9503_v15 = vsub.f32 %v9212_v6, %v2350_v61 }
 0x528   : > { %2329 = vadd.xlane.f32.xlu2 %v2328_v43 }
 0x529   : > { %v2382_v23 = vmul.f32 %v9503_v15, %v9503_v15  ;;  %v4314_v44 = vmul.f32 %v9122_v51, %v4298_v21  ;;  %5066 = vmatpush.bf16.msrb.mxu2 %v7681_v30  ;;  %v2486_v21 = vmul.f32 %v7337_v9, %v2485_v26 }
 0x52b   : > { %v2412_v31 = vsel %vm1021_vm0, %v2382_v23, 0.0  ;;  %v4330_v60 = vadd.f32 %v9141_v7, %v4314_v44  ;;  %v7682_v44 = vld [vmem:[%s13786_s11 + $0x30] sm:$0xff] }
 0x52c   : > { %2413 = vadd.xlane.f32.xlu0 %v2412_v31  ;;  %v2393_v63 = vpop.xlane.xlu0 %2392 }
 0x52d   : > { %v2439_v34 = vmul.f32 %v2393_v63, %v8012_v24  ;;  %v4341_v19 = vpack.c.bf16 %v4330_v60, %v4329_v12  ;;  %5067 = vmatpush.bf16.msrb.mxu2 %v7682_v44  ;;  %v2490_v60 = vsel %vm2489_vm13, %v7337_v9, %v2486_v21  ;;  %v7683_v12 = vld [vmem:[%s13786_s11 + $0x28] sm:$0xff]  ;;  %v7684_v9 = vld [vmem:[%s13786_s11 + $0x20] sm:$0xff]  ;;  %v4016_v44 = vmul.f32 %v4000_v46, %v8012_v24 }
 0x52f   : > { %v2455_v22 = vadd.f32 1e-05, %v2439_v34  ;;  %7119 = vmatmul.msk.bf16.gmra.mxu0 %vm1021_vm0, %v4341_v19 }
 0x530   : > { %2410 = vadd.xlane.f32.xlu2 %v2409_v20  ;;  %v2632_v20 = vmul.f32 %v2490_v60, %v9015_v53 }
 0x531   : > { %7338 = vrsqrt.f32 %v2455_v22  ;;  %vm2477_vm14 = vweird.f32 %v2455_v22  ;;  %5068 = vmatpush.bf16.msrb.mxu2 %v7683_v12 }
 0x534   : > { %v3997_v49 = vpop.xlane.xlu0 %3996 }
 0x535   : > { %v4015_v47 = vmul.f32 %v3997_v49, %v8012_v24  ;;  %5069 = vmatpush.bf16.msrb.mxu2 %v7684_v9  ;;  %v7685_v49 = vld [vmem:[%s13786_s11 + $0x18] sm:$0xff] }
 0x537   : > { %v7339_v39 = vpop.eup %7338  ;;  %v9523_v13 = vsub.f32 %v8505_v29, %v4015_v47 }
 0x538   : > { %v2472_v57 = vmul.f32 %v7339_v39, %v2455_v22  ;;  %vm2478_vm11 = vweird.f32 %v7339_v39  ;;  %v2649_v22 = vmul.f32 %v9548_v35, %v2632_v20 }
 0x539   : > { %v4047_v61 = vmul.f32 %v9523_v13, %v9523_v13  ;;  %vm2479_vm15 = vmor %vm2477_vm14, %vm2478_vm11  ;;  %5070 = vmatpush.bf16.msrb.mxu2 %v7685_v49 }
 0x53a   : > { %v2473_v59 = vmul.f32 %v7339_v39, %v2472_v57  ;;  %v7686_v57 = vld [vmem:[%s13786_s11 + $0x10] sm:$0xff] }
 0x53b   : > { %v4091_v50 = vsel %vm1021_vm0, %v4047_v61, 0.0 }
 0x53c   : > { %v2474_v43 = vmul.f32 0.5, %v2473_v59  ;;  %4092 = vadd.xlane.f32.xlu0 %v4091_v50  ;;  %v7687_v59 = vld [vmem:[%s13786_s11 + $0x8] sm:$0xff] }
 0x53d   : > { %v9533_v40 = vpop.xlane.xlu0 %2401  ;;  %v2321_v31 = vpop.xlane.xlu1 %2320  ;;  %5071 = vmatpush.bf16.msrb.mxu2 %v7686_v57 }
 0x53e   : > { %v2475_v23 = vsub.f32 1.5, %v2474_v43  ;;  %v7688_v43 = vld [vmem:[%s13786_s11] sm:$0xff] }
 0x540   : > { %v2476_v10 = vmul.f32 %v7339_v39, %v2475_v23 }
 0x541   : > { %5072 = vmatpush.bf16.msrb.mxu2 %v7687_v59 }
 0x542   : > { %v2480_v63 = vsel %vm2479_vm15, %v7339_v39, %v2476_v10 }
 0x543   : > { %v2631_v34 = vmul.f32 %v2480_v63, %v9208_v62  ;;  %v9558_v62 = vld [vmem:[%s13783_s8 + $0x1] ss:$0 sm:$0xff] }
 0x544   : > { %v2666_v45 = vadd.f32 %v9558_v62, %v2649_v22 }
 0x545   : > { %v4081_v19 = vpop.xlane.xlu0 %4080  ;;  %v2648_v2 = vmul.f32 %v9548_v35, %v2631_v34  ;;  %v4084_v3 = vpop.xlane.xlu1 %4083  ;;  %5073 = vmatpush.bf16.msrb.mxu2 %v7688_v43 }
 0x546   : > { %v4107_v53 = vmul.f32 %v4081_v19, %v8012_v24  ;;  %v4108_v39 = vmul.f32 %v4084_v3, %v8012_v24  ;;  %v14038_v19 = vld [vmem:[#allocation25_spill] sm:$0xff] }
 0x547   : > { %v2665_v47 = vadd.f32 %v9558_v62, %v2648_v2  ;;  %v9583_v2 = vsub.f32 %v8447_v25, %v4016_v44 }
 0x548   : > { %v4123_v1 = vadd.f32 1e-05, %v4107_v53  ;;  %v4124_v26 = vadd.f32 1e-05, %v4108_v39  ;;  %v2351_v39 = vmul.f32 %v2321_v31, %v8012_v24 }
 0x549   : > { %v2681_v4 = vpack.c.bf16 %v2666_v45, %v2665_v47 }
 0x54a   : > { %7340 = vrsqrt.f32 %v4123_v1  ;;  %vm4235_vm2 = vweird.f32 %v4123_v1  ;;  %vm4245_vm5 = vweird.f32 %v4124_v26 }
 0x54b   : > { %7059 = vmatmul.msk.bf16.vlgmr.msra.gmra.mxu2 %vm1021_vm0, %v2681_v4  ;;  %7342 = vrsqrt.f32 %v4124_v26 }
 0x550   : > { %v7341_v30 = vpop.eup %7340 }
 0x551   : > { %v4230_v61 = vmul.f32 %v7341_v30, %v4123_v1  ;;  %v7343_v23 = vpop.eup %7342  ;;  %vm4236_vm1 = vweird.f32 %v7341_v30  ;;  %v4048_v1 = vmul.f32 %v9583_v2, %v9583_v2 }
 0x552   : > { %v4240_v60 = vmul.f32 %v7343_v23, %v4124_v26  ;;  %vm4237_vm3 = vmor %vm4235_vm2, %vm4236_vm1  ;;  %vm4246_vm4 = vweird.f32 %v7343_v23  ;;  %v2442_v26 = vmul.f32 %v9533_v40, %v8012_v24 }
 0x553   : > { %v4231_v21 = vmul.f32 %v7341_v30, %v4230_v61  ;;  %vm4247_vm6 = vmor %vm4245_vm5, %vm4246_vm4  ;;  %v4094_v43 = vsel %vm1021_vm0, %v4048_v1, 0.0 }
 0x554   : > { %v4241_v20 = vmul.f32 %v7343_v23, %v4240_v60 }
 0x555   : > { %v4232_v50 = vmul.f32 0.5, %v4231_v21  ;;  %v9601_v21 = vsub.f32 %v9364_v11, %v2351_v39 }
 0x556   : > { %v4242_v53 = vmul.f32 0.5, %v4241_v20 }
 0x557   : > { %v4233_v10 = vsub.f32 1.5, %v4232_v50 }
 0x558   : > { %v4243_v49 = vsub.f32 1.5, %v4242_v53 }
 0x559   : > { %v4234_v34 = vmul.f32 %v7341_v30, %v4233_v10  ;;  %v2458_v10 = vadd.f32 1e-05, %v2442_v26 }
 0x55a   : > { %v4244_v47 = vmul.f32 %v7343_v23, %v4243_v49 }
 0x55b   : > { %v2267_v63 = vpop.f32.mrf.mxu1  ;;  %v4238_v22 = vsel %vm4237_vm3, %v7341_v30, %v4234_v34  ;;  %v14040_v30 = vld [vmem:[#allocation29_spill] sm:$0xff]  ;;  %7344 = vrsqrt.f32 %v2458_v10  ;;  %vm2507_vm8 = vweird.f32 %v2458_v10 }
 0x55c   : > { %v2268_v12 = vadd.f32 %v9451_v32, %v2267_v63  ;;  %v4299_v46 = vmul.f32 %v4238_v22, %v9272_v38  ;;  %v4248_v38 = vsel %vm4247_vm6, %v7343_v23, %v4244_v47  ;;  %v2383_v63 = vmul.f32 %v9601_v21, %v9601_v21 }
 0x55d   : > { %v4300_v59 = vmul.f32 %v4248_v38, %v9299_v56 }
 0x55e   : > { %v9580_v9 = vadd.f32 %v2268_v12, %v14038_v19  ;;  %v4315_v57 = vmul.f32 %v9122_v51, %v4299_v46  ;;  %v14042_v12 = vld [vmem:[#allocation31_spill] sm:$0xff]  ;;  %v2415_v20 = vsel %vm1021_vm0, %v2383_v63, 0.0 }
 0x55f   : > { %v4316_v50 = vmul.f32 %v9122_v51, %v4300_v59  ;;  %v14044_v46 = vld [vmem:[#allocation27_spill] sm:$0xff] }
 0x560   : > { %14039 = vst [vmem:[#allocation25_spill] sm:$0xff] %v9580_v9  ;;  %v2331_v3 = vsel %vm1021_vm0, %v9580_v9, 0.0  ;;  %v4331_v23 = vadd.f32 %v9141_v7, %v4315_v57 }
 0x561   : > { %2332 = vadd.xlane.f32.xlu1 %v2331_v3  ;;  %v4332_v56 = vadd.f32 %v9141_v7, %v4316_v50  ;;  %v7345_v53 = vpop.eup %7344 }
 0x562   : > { %v2502_v47 = vmul.f32 %v7345_v53, %v2458_v10  ;;  %vm2508_vm7 = vweird.f32 %v7345_v53  ;;  %v9660_v10 = vld [vmem:[%s13785_s10] ss:$0 sm:$0xff] }
 0x563   : > { %v2269_v45 = vpop.f32.mrf.mxu1  ;;  %v4342_v60 = vpack.c.bf16 %v4332_v56, %v4331_v23  ;;  %vm9646_vm9 = vmor %vm2507_vm8, %vm2508_vm7 }
 0x564   : > { %v2270_v4 = vadd.f32 %v9451_v32, %v2269_v45  ;;  %v2503_v39 = vmul.f32 %v7345_v53, %v2502_v47 }
 0x565   : > { %7120 = vmatmul.msk.bf16.gmra.mxu0 %vm1021_vm0, %v4342_v60 }
 0x566   : > { %v9595_v61 = vadd.f32 %v2270_v4, %v14040_v30  ;;  %v2504_v59 = vmul.f32 0.5, %v2503_v39 }
 0x568   : > { %14041 = vst [vmem:[#allocation29_spill] sm:$0xff] %v9595_v61  ;;  %v2334_v31 = vsel %vm1021_vm0, %v9595_v61, 0.0 }
 0x569   : > { %4095 = vadd.xlane.f32.xlu1 %v4094_v43  ;;  %2335 = vadd.xlane.f32.xlu2 %v2334_v31  ;;  %v2505_v43 = vsub.f32 1.5, %v2504_v59 }
 0x56b   : > { %v2272_v44 = vpop.f32.mrf.mxu1  ;;  %v2506_v60 = vmul.f32 %v7345_v53, %v2505_v43 }
 0x56c   : > { %v2273_v40 = vadd.f32 %v9451_v32, %v2272_v44 }
 0x56e   : > { %v9613_v34 = vadd.f32 %v2273_v40, %v14042_v12 }
 0x570   : > { %14043 = vst [vmem:[#allocation31_spill] sm:$0xff] %v9613_v34  ;;  %v2337_v51 = vsel %vm1021_vm0, %v9613_v34, 0.0 }
 0x571   : > { %2338 = vadd.xlane.f32.xlu1 %v2337_v51  ;;  %2416 = vadd.xlane.f32.xlu2 %v2415_v20 }
 0x573   : > { %v2274_v19 = vpop.f32.mrf.mxu1 }
 0x574   : > { %v2275_v22 = vadd.f32 %v9451_v32, %v2274_v19 }
 0x575   : > { %v2408_v7 = vpop.xlane.xlu0 %2407 }
 0x576   : > { %v9620_v3 = vadd.f32 %v2275_v22, %v14044_v46  ;;  %v2444_v4 = vmul.f32 %v2408_v7, %v8012_v24  ;;  %v4378_v7 = vpop.f32.mrf.mxu0 }
 0x577   : > { %v9663_v39 = vadd.f32 %v9660_v10, %v4378_v7 }
 0x578   : > { %14045 = vst [vmem:[#allocation27_spill] sm:$0xff] %v9620_v3  ;;  %v2340_v49 = vsel %vm1021_vm0, %v9620_v3, 0.0  ;;  %v9630_v30 = vadd.f32 1e-05, %v2444_v4 }
 0x579   : > { %2341 = vadd.xlane.f32.xlu2 %v2340_v49  ;;  %v2510_v49 = vsel %vm9646_vm9, %v7345_v53, %v2506_v60 }
 0x57a   : > { %vm2527_vm2 = vweird.f32 %v9630_v30 }
 0x57d   : > { %v4087_v45 = vpop.xlane.xlu0 %4086 }
 0x57e   : > { %v4109_v1 = vmul.f32 %v4087_v45, %v8012_v24 }
 0x580   : > { %v9626_v57 = vadd.f32 1e-05, %v4109_v1 }
 0x582   : > { %7346 = vrsqrt.f32 %v9626_v57  ;;  %vm4255_vm14 = vweird.f32 %v9626_v57 }
 0x583   : > { %v2399_v38 = vpop.xlane.xlu2 %2398 }
 0x584   : > { %v2441_v32 = vmul.f32 %v2399_v38, %v8012_v24 }
 0x586   : > { %v2457_v26 = vadd.f32 1e-05, %v2441_v32 }
 0x588   : > { %7348 = vrsqrt.f32 %v2457_v26  ;;  %v9633_v31 = vpop.eup %7346  ;;  %v2327_v50 = vpop.xlane.xlu1 %2326  ;;  %vm2497_vm11 = vweird.f32 %v2457_v26 }
 0x589   : > { %7350 = vrsqrt.f32 %v9630_v30  ;;  %v4250_v40 = vmul.f32 %v9633_v31, %v9626_v57  ;;  %v2353_v63 = vmul.f32 %v2327_v50, %v8012_v24  ;;  %vm4256_vm13 = vweird.f32 %v9633_v31 }
 0x58a   : > { %vm9706_vm15 = vmor %vm4255_vm14, %vm4256_vm13 }
 0x58b   : > { %v2324_v23 = vpop.xlane.xlu2 %2323  ;;  %v4251_v47 = vmul.f32 %v9633_v31, %v4250_v40  ;;  %v9654_v45 = vsub.f32 %v9460_v16, %v2353_v63 }
 0x58c   : > { %v2352_v56 = vmul.f32 %v2324_v23, %v8012_v24  ;;  %v2634_v23 = vmul.f32 %v2510_v49, %v9354_v37 }
 0x58d   : > { %14049 = vst [vmem:[#allocation35_spill] sm:$0xff] %v9654_v45  ;;  %v2385_v63 = vmul.f32 %v9654_v45, %v9654_v45 }
 0x58e   : > { %v7349_v44 = vpop.eup %7348  ;;  %v9640_v12 = vsub.f32 %v9446_v33, %v2352_v56  ;;  %v4252_v56 = vmul.f32 0.5, %v4251_v47  ;;  %v2651_v37 = vmul.f32 %v9548_v35, %v2634_v23 }
 0x58f   : > { %v2492_v51 = vmul.f32 %v7349_v44, %v2457_v26  ;;  %v9642_v20 = vpop.eup %7350  ;;  %vm2498_vm10 = vweird.f32 %v7349_v44  ;;  %v2421_v47 = vsel %vm1021_vm0, %v2385_v63, 0.0 }
 0x590   : > { %14046 = vst [vmem:[#allocation34_spill] sm:$0xff] %v9640_v12  ;;  %v2384_v19 = vmul.f32 %v9640_v12, %v9640_v12  ;;  %v2522_v4 = vmul.f32 %v9642_v20, %v9630_v30  ;;  %v4090_v53 = vpop.xlane.xlu1 %4089  ;;  %vm2499_vm12 = vmor %vm2497_vm11, %vm2498_vm10  ;;  %v4253_v49 = vsub.f32 1.5, %v4252_v56  ;;  %vm2528_vm1 = vweird.f32 %v9642_v20 }
 0x591   : > { %v2493_v46 = vmul.f32 %v7349_v44, %v2492_v51  ;;  %v4110_v59 = vmul.f32 %v4090_v53, %v8012_v24  ;;  %v9677_v51 = vmul.f32 0.70710677, %v9663_v39  ;;  %vm9726_vm4 = vmor %vm2527_vm2, %vm2528_vm1 }
 0x592   : > { %v2418_v1 = vsel %vm1021_vm0, %v2384_v19, 0.0  ;;  %v2523_v7 = vmul.f32 %v9642_v20, %v2522_v4 }
 0x593   : > { %v2494_v38 = vmul.f32 0.5, %v2493_v46  ;;  %2419 = vadd.xlane.f32.xlu0 %v2418_v1  ;;  %v2405_v32 = vpop.xlane.xlu2 %2404  ;;  %v9670_v60 = vadd.f32 1e-05, %v4110_v59  ;;  %v4380_v46 = vpop.f32.mrf.mxu0 }
 0x594   : > { %v2443_v43 = vmul.f32 %v2405_v32, %v8012_v24  ;;  %v2524_v4 = vmul.f32 0.5, %v2523_v7  ;;  %v2668_v32 = vadd.f32 %v9558_v62, %v2651_v37  ;;  %v9699_v63 = vadd.f32 %v9660_v10, %v4380_v46 }
 0x595   : > { %v2495_v50 = vsub.f32 1.5, %v2494_v38  ;;  %7352 = vrsqrt.f32 %v9670_v60  ;;  %v9686_v38 = vand.u32 2147483647, %v9677_v51  ;;  %vm4265_vm6 = vweird.f32 %v9670_v60 }
 0x596   : > { %v9672_v40 = vadd.f32 1e-05, %v2443_v43  ;;  %v4254_v43 = vmul.f32 %v9633_v31, %v4253_v49  ;;  %v2525_v7 = vsub.f32 1.5, %v2524_v4 }
 0x597   : > { %v2496_v19 = vmul.f32 %v7349_v44, %v2495_v50  ;;  %v4498_v56 = vmul.f32 0.3275911, %v9686_v38 }
 0x598   : > { %7354 = vrsqrt.f32 %v9672_v40  ;;  %v4258_v46 = vsel %vm9706_vm15, %v9633_v31, %v4254_v43  ;;  %vm2517_vm8 = vweird.f32 %v9672_v40 }
 0x599   : > { %v2500_v22 = vsel %vm2499_vm12, %v7349_v44, %v2496_v19 }
 0x59a   : > { %v2633_v1 = vmul.f32 %v2500_v22, %v9433_v36 }
 0x59b   : > { %2422 = vadd.xlane.f32.xlu0 %v2421_v47  ;;  %v2330_v26 = vpop.xlane.xlu2 %2329  ;;  %v7353_v59 = vpop.eup %7352 }
 0x59c   : > { %v2354_v53 = vmul.f32 %v2330_v26, %v8012_v24  ;;  %v2650_v44 = vmul.f32 %v9548_v35, %v2633_v1  ;;  %v4260_v19 = vmul.f32 %v7353_v59, %v9670_v60  ;;  %v4383_v31 = vpop.f32.mrf.mxu0  ;;  %vm4266_vm3 = vweird.f32 %v7353_v59 }
 0x59d   : > { %vm4267_vm7 = vmor %vm4265_vm6, %vm4266_vm3  ;;  %v9766_v11 = vadd.f32 %v9660_v10, %v4383_v31 }
 0x59e   : > { %v9694_v50 = vsub.f32 %v9488_v28, %v2354_v53  ;;  %v2667_v36 = vadd.f32 %v9558_v62, %v2650_v44  ;;  %v7355_v23 = vpop.eup %7354  ;;  %v4261_v1 = vmul.f32 %v7353_v59, %v4260_v19  ;;  %v9716_v44 = vadd.f32 1.0, %v4498_v56 }
 0x59f   : > { %v2512_v22 = vmul.f32 %v7355_v23, %v9672_v40  ;;  %v2414_v26 = vpop.xlane.xlu0 %2413  ;;  %v9721_v28 = vmul.f32 0.70710677, %v9699_v63  ;;  %v4301_v56 = vmul.f32 %v4258_v46, %v9423_v27  ;;  %vm2518_vm5 = vweird.f32 %v7355_v23 }
 0x5a0   : > { %14050 = vst [vmem:[#allocation36_spill] sm:$0xff] %v9694_v50  ;;  %v2682_v37 = vpack.c.bf16 %v2668_v32, %v2667_v36  ;;  %v2386_v49 = vmul.f32 %v9694_v50, %v9694_v50  ;;  %v2446_v53 = vmul.f32 %v2414_v26, %v8012_v24  ;;  %v2526_v32 = vmul.f32 %v9642_v20, %v2525_v7  ;;  %vm2519_vm9 = vmor %vm2517_vm8, %vm2518_vm5 }
 0x5a1   : > { %v2513_v4 = vmul.f32 %v7355_v23, %v2512_v22  ;;  %v4262_v36 = vmul.f32 0.5, %v4261_v1  ;;  %v9737_v30 = vand.u32 2147483647, %v9721_v28  ;;  %v9773_v31 = vmul.f32 0.70710677, %v9766_v11 }
 0x5a2   : > { %7060 = vmatmul.msk.bf16.gmra.mxu2 %vm1021_vm0, %v2682_v37  ;;  %v2424_v57 = vsel %vm1021_vm0, %v2386_v49, 0.0  ;;  %v2462_v22 = vadd.f32 1e-05, %v2446_v53  ;;  %v2530_v26 = vsel %vm9726_vm4, %v9642_v20, %v2526_v32  ;;  %v9743_v20 = vld [vmem:[%s13782_s7] ss:$0 sm:$0xff]  ;;  %vm4535_vm2 = vweird.f32 %v9716_v44 }
 0x5a3   : > { %2425 = vadd.xlane.f32.xlu1 %v2424_v57  ;;  %v2411_v19 = vpop.xlane.xlu2 %2410  ;;  %v2514_v43 = vmul.f32 0.5, %v2513_v4  ;;  %v4263_v37 = vsub.f32 1.5, %v4262_v36  ;;  %v4317_v60 = vmul.f32 %v9743_v20, %v4301_v56  ;;  %v2636_v32 = vmul.f32 %v2530_v26, %v9415_v14 }
 0x5a4   : > { %v2445_v47 = vmul.f32 %v2411_v19, %v8012_v24  ;;  %7356 = vrsqrt.f32 %v2462_v22  ;;  %vm2547_vm11 = vweird.f32 %v2462_v22 }
 0x5a5   : > { %v2515_v49 = vsub.f32 1.5, %v2514_v43  ;;  %7358 = vrcp.f32 %v9716_v44  ;;  %v4264_v4 = vmul.f32 %v7353_v59, %v4263_v37  ;;  %v9755_v37 = vld [vmem:[%s13783_s8] ss:$0 sm:$0xff] }
 0x5a6   : > { %v2461_v1 = vadd.f32 1e-05, %v2445_v47  ;;  %v4333_v56 = vadd.f32 %v9755_v37, %v4317_v60 }
 0x5a7   : > { %v2516_v27 = vmul.f32 %v7355_v23, %v2515_v49  ;;  %v4268_v46 = vsel %vm4267_vm7, %v7353_v59, %v4264_v4 }
 0x5a8   : > { %7360 = vrsqrt.f32 %v2461_v1  ;;  %v4302_v53 = vmul.f32 %v4268_v46, %v9457_v17  ;;  %v4499_v17 = vmul.f32 0.3275911, %v9737_v30  ;;  %vm2537_vm14 = vweird.f32 %v2461_v1 }
 0x5a9   : > { %v2520_v57 = vsel %vm2519_vm9, %v7355_v23, %v2516_v27  ;;  %v4385_v23 = vpop.f32.mrf.mxu0  ;;  %vm4450_vm9 = vcmp.ge.f32.partialorder %v9677_v51, 0.0  ;;  %v9889_v51 = vmul.f32 0.5, %v9766_v11 }
 0x5aa   : > { %v2635_v40 = vmul.f32 %v2520_v57, %v9466_v55  ;;  %v7357_v36 = vpop.eup %7356  ;;  %v4318_v19 = vmul.f32 %v9743_v20, %v4302_v53  ;;  %v2653_v55 = vmul.f32 %v9548_v35, %v2636_v32  ;;  %v9763_v57 = vadd.f32 1.0, %v4499_v17 }
 0x5ab   : > { %v9749_v43 = vpop.eup %7358  ;;  %v2542_v59 = vmul.f32 %v7357_v36, %v2462_v22  ;;  %vm2548_vm10 = vweird.f32 %v7357_v36  ;;  %14062 = vst [vmem:[#allocation44_spill] sm:$0xff] %v9889_v51 }
 0x5ac   : > { %v4334_v14 = vadd.f32 %v9755_v37, %v4318_v19  ;;  %v2652_v26 = vmul.f32 %v9548_v35, %v2635_v40  ;;  %v4531_v4 = vmul.f32 %v9749_v43, %v9716_v44  ;;  %v2670_v60 = vadd.f32 %v9558_v62, %v2653_v55  ;;  %vm2549_vm13 = vmor %vm2547_vm11, %vm2548_vm10 }
 0x5ad   : > { %v2543_v7 = vmul.f32 %v7357_v36, %v2542_v59  ;;  %7362 = vrcp.f32 %v9763_v57  ;;  %v9777_v55 = vadd.f32 %v9660_v10, %v4385_v23  ;;  %vm4536_vm1 = vweird.f32 %v9749_v43 }
 0x5ae   : > { %v7361_v47 = vpop.eup %7360  ;;  %v4343_v27 = vpack.c.bf16 %v4334_v14, %v4333_v56  ;;  %v2669_v40 = vadd.f32 %v9558_v62, %v2652_v26  ;;  %v4532_v59 = vsub.f32 1.0, %v4531_v4  ;;  %vm4537_vm3 = vmor %vm4535_vm2, %vm4536_vm1  ;;  %vm4550_vm6 = vweird.f32 %v9763_v57 }
 0x5af   : > { %v2532_v49 = vmul.f32 %v7361_v47, %v2461_v1  ;;  %v2544_v46 = vmul.f32 0.5, %v2543_v7  ;;  %vm2538_vm12 = vweird.f32 %v7361_v47  ;;  %v9786_v1 = vmul.f32 0.70710677, %v9777_v55 }
 0x5b0   : > { %7121 = vmatmul.msk.bf16.gmra.mxu0 %vm1021_vm0, %v4343_v27  ;;  %v2683_v14 = vpack.c.bf16 %v2670_v60, %v2669_v40  ;;  %vm2539_vm15 = vmor %vm2537_vm14, %vm2538_vm12  ;;  %v4533_v22 = vmul.f32 %v9749_v43, %v4532_v59  ;;  %v9782_v27 = vand.u32 2147483647, %v9773_v31  ;;  %vm4451_vm10 = vcmp.ge.f32.partialorder %v9721_v28, 0.0 }
 0x5b1   : > { %v2533_v53 = vmul.f32 %v7361_v47, %v2532_v49  ;;  %v2545_v32 = vsub.f32 1.5, %v2544_v46  ;;  %v4388_v49 = vpop.f32.mrf.mxu0  ;;  %v9802_v40 = vand.u32 2147483647, %v9786_v1  ;;  %vm4452_vm11 = vcmp.ge.f32.partialorder %v9773_v31, 0.0 }
 0x5b2   : > { %7061 = vmatmul.msk.bf16.gmra.mxu2 %vm1021_vm0, %v2683_v14  ;;  %v9885_v31 = vsel %vm4451_vm10, 1.0, %v13999_v42 }
 0x5b3   : > { %v2534_v19 = vmul.f32 0.5, %v2533_v53  ;;  %v2546_v0 = vmul.f32 %v7357_v36, %v2545_v32  ;;  %v9798_v32 = vadd.f32 %v9660_v10, %v4388_v49  ;;  %14061 = vst [vmem:[#allocation43_spill] sm:$0xff] %v9885_v31 }
 0x5b5   : > { %v2535_v56 = vsub.f32 1.5, %v2534_v19  ;;  %v2550_v17 = vsel %vm2549_vm13, %v7357_v36, %v2546_v0  ;;  %v7363_v0 = vpop.eup %7362  ;;  %v4534_v36 = vadd.f32 %v9749_v43, %v4533_v22  ;;  %vm4453_vm13 = vcmp.ge.f32.partialorder %v9786_v1, 0.0 }
 0x5b6   : > { %v2638_v26 = vmul.f32 %v2550_v17, %v9503_v15  ;;  %v4541_v15 = vand.u32 2147483648, %v9716_v44  ;;  %v4546_v60 = vmul.f32 %v7363_v0, %v9763_v57  ;;  %vm4551_vm5 = vweird.f32 %v7363_v0 }
 0x5b7   : > { %v2536_v7 = vmul.f32 %v7361_v47, %v2535_v56  ;;  %vm4552_vm7 = vmor %vm4550_vm6, %vm4551_vm5 }
 0x5b8   : > { %v2655_v53 = vmul.f32 %v9548_v35, %v2638_v26  ;;  %v4542_v56 = vor.u32 1.1754944e-38, %v4541_v15  ;;  %v4501_v26 = vmul.f32 0.3275911, %v9802_v40 }
 0x5b9   : > { %v2540_v4 = vsel %vm2539_vm15, %v7361_v47, %v2536_v7  ;;  %v4500_v47 = vmul.f32 0.3275911, %v9782_v27  ;;  %v4390_v17 = vpop.f32.mrf.mxu0  ;;  %v9809_v7 = vmul.f32 0.70710677, %v9798_v32 }
 0x5ba   : > { %v2637_v46 = vmul.f32 %v2540_v4, %v9495_v54  ;;  %v4539_v54 = vand.u32 2147483647, %v9716_v44  ;;  %v2672_v59 = vadd.f32 %v9558_v62, %v2655_v53  ;;  %v4547_v44 = vsub.f32 1.0, %v4546_v60  ;;  %v4093_v60 = vpop.xlane.xlu0 %4092 }
 0x5bb   : > { %v9806_v14 = vadd.f32 1.0, %v4500_v47  ;;  %v9815_v4 = vadd.f32 %v9660_v10, %v4390_v17  ;;  %v4914_v53 = vsub.f32 0.0, %v9686_v38 }
 0x5bc   : > { %v2654_v23 = vmul.f32 %v9548_v35, %v2637_v46  ;;  %v4538_v35 = vsel %vm4537_vm3, %v9749_v43, %v4534_v36  ;;  %vm4540_vm4 = vcmp.eq.f32.partialorder %v4539_v54, 8.507059e+37  ;;  %v4548_v43 = vmul.f32 %v7363_v0, %v4547_v44 }
 0x5bd   : > { %v9811_v22 = vsel %vm4540_vm4, %v4542_v56, %v4538_v35  ;;  %14055 = vst [vmem:[#allocation37_spill] sm:$0xff] %v9815_v4  ;;  %7364 = vrcp.f32 %v9806_v14  ;;  %v9820_v46 = vand.u32 2147483647, %v9809_v7  ;;  %v9823_v36 = vadd.f32 1.0, %v4501_v26 }
 0x5be   : > { %v2671_v19 = vadd.f32 %v9558_v62, %v2654_v23  ;;  %v4770_v62 = vmul.f32 1.0614054, %v9811_v22  ;;  %v9826_v23 = vmul.f32 0.70710677, %v9815_v4  ;;  %v4549_v47 = vadd.f32 %v7363_v0, %v4548_v43 }
 0x5bf   : > { %v4502_v54 = vmul.f32 0.3275911, %v9820_v46  ;;  %v4556_v35 = vand.u32 2147483648, %v9763_v57  ;;  %7366 = vrcp.f32 %v9823_v36  ;;  %v4554_v56 = vand.u32 2147483647, %v9763_v57 }
 0x5c0   : > { %v2684_v49 = vpack.c.bf16 %v2672_v59, %v2671_v19  ;;  %14056 = vst [vmem:[#allocation38_spill] sm:$0xff] %v9826_v23  ;;  %v4786_v15 = vadd.f32 -1.4531521, %v4770_v62  ;;  %v4915_v59 = vsub.f32 0.0, %v9737_v30  ;;  %v9838_v17 = vand.u32 2147483647, %v9826_v23 }
 0x5c1   : > { %v4930_v44 = vmul.f32 %v4914_v53, %v9686_v38  ;;  %v4553_v62 = vsel %vm4552_vm7, %v7363_v0, %v4549_v47  ;;  %v9845_v8 = vadd.f32 1.0, %v4502_v54  ;;  %v4557_v16 = vor.u32 1.1754944e-38, %v4556_v35 }
 0x5c2   : > { %7062 = vmatmul.msk.bf16.gmra.mxu2 %vm1021_vm0, %v2684_v49  ;;  %v4111_v49 = vmul.f32 %v4093_v60, %v8012_v24  ;;  %v4802_v26 = vmul.f32 %v4786_v15, %v9811_v22  ;;  %v4931_v6 = vmul.f32 %v4915_v59, %v9737_v30  ;;  %vm4555_vm8 = vcmp.eq.f32.partialorder %v4554_v56, 8.507059e+37 }
 0x5c3   : > { %v9830_v19 = vpop.eup %7364  ;;  %v4503_v57 = vmul.f32 0.3275911, %v9838_v17  ;;  %v9852_v38 = vsel %vm4555_vm8, %v4557_v16, %v4553_v62  ;;  %v4916_v53 = vsub.f32 0.0, %v9782_v27  ;;  %v4946_v47 = vmul.f32 1.442695, %v4930_v44 }
 0x5c4   : > { %v4561_v43 = vmul.f32 %v9830_v19, %v9806_v14  ;;  %v9855_v0 = vadd.f32 1e-05, %v4111_v49  ;;  %v4818_v15 = vadd.f32 1.4214138, %v4802_v26  ;;  %7368 = vrcp.f32 %v9845_v8  ;;  %v9865_v16 = vld [vmem:[%s13785_s10 + $0x1] ss:$0 sm:$0xff] }
 0x5c5   : > { %v9849_v33 = vpop.eup %7366  ;;  %v9859_v30 = vmul.f32 0.5, %v9663_v39  ;;  %v4948_v60 = vmul.f32 1.442695, %v4931_v6  ;;  %14058 = vst [vmem:[#allocation40_spill] sm:$0xff] %v9865_v16  ;;  %v4771_v35 = vmul.f32 1.0614054, %v9852_v38  ;;  %v4932_v28 = vmul.f32 %v4916_v53, %v9782_v27 }
 0x5c6   : > { %v4562_v54 = vsub.f32 1.0, %v4561_v43  ;;  %v4576_v59 = vmul.f32 %v9849_v33, %v9823_v36  ;;  %v9871_v56 = vadd.f32 1.0, %v4503_v57  ;;  %v9876_v39 = vsel %vm4450_vm9, 1.0, %v13999_v42 }
 0x5c7   : > { %14057 = vst [vmem:[#allocation39_spill] sm:$0xff] %v9859_v30  ;;  %v9879_v6 = vmul.f32 0.5, %v9699_v63  ;;  %7370 = vrsqrt.f32 %v9855_v0  ;;  %v4834_v44 = vmul.f32 %v4818_v15, %v9811_v22  ;;  %v9892_v63 = vsel %vm4452_vm11, 1.0, %v13999_v42 }
 0x5c8   : > { %14059 = vst [vmem:[#allocation41_spill] sm:$0xff] %v9876_v39  ;;  %7372 = vpow2.f32 %v4946_v47  ;;  %v4563_v49 = vmul.f32 %v9830_v19, %v4562_v54  ;;  %v4787_v43 = vadd.f32 -1.4531521, %v4771_v35  ;;  %vm4565_vm12 = vweird.f32 %v9806_v14 }
 0x5c9   : > { %14060 = vst [vmem:[#allocation42_spill] sm:$0xff] %v9879_v6  ;;  %7374 = vpow2.f32 %v4948_v60  ;;  %v4577_v57 = vsub.f32 1.0, %v4576_v59  ;;  %v4950_v15 = vmul.f32 1.442695, %v4932_v28  ;;  %v4850_v54 = vadd.f32 -0.28449672, %v4834_v44 }
 0x5ca   : > { %14063 = vst [vmem:[#allocation45_spill] sm:$0xff] %v9892_v63  ;;  %v9897_v62 = vpop.eup %7368  ;;  %7376 = vrcp.f32 %v9871_v56  ;;  %v4917_v60 = vsub.f32 0.0, %v9802_v40  ;;  %vm4566_vm14 = vweird.f32 %v9830_v19  ;;  %v4803_v52 = vmul.f32 %v4787_v43, %v9852_v38 }
 0x5cb   : > { %v4591_v59 = vmul.f32 %v9897_v62, %v9845_v8  ;;  %v4578_v5 = vmul.f32 %v9849_v33, %v4577_v57  ;;  %v4569_v25 = vand.u32 2147483647, %v9806_v14  ;;  %7378 = vpow2.f32 %v4950_v15  ;;  %vm9942_vm15 = vmor %vm4565_vm12, %vm4566_vm14 }
 0x5cc   : > { %v4866_v15 = vmul.f32 %v4850_v54, %v9811_v22  ;;  %v9950_v1 = vmul.f32 %v4917_v60, %v9802_v40  ;;  %v4819_v6 = vadd.f32 1.4214138, %v4803_v52  ;;  %vm4581_vm2 = vweird.f32 %v9849_v33 }
 0x5cd   : > { %v9909_v35 = vpop.eup %7370  ;;  %vm4570_vm1 = vcmp.eq.f32.partialorder %v4569_v25, 8.507059e+37  ;;  %v4579_v50 = vadd.f32 %v9849_v33, %v4578_v5  ;;  %v4586_v25 = vand.u32 2147483648, %v9823_v36  ;;  %vm4580_vm3 = vweird.f32 %v9823_v36 }
 0x5ce   : > { %v2741_v26 = vpop.f32.mrf.mxu2  ;;  %v9920_v44 = vpop.eup %7372  ;;  %v4270_v18 = vmul.f32 %v9909_v35, %v9855_v0  ;;  %vm9999_vm4 = vmor %vm4580_vm3, %vm4581_vm2  ;;  %vm4596_vm6 = vweird.f32 %v9897_v62  ;;  %vm4595_vm7 = vweird.f32 %v9845_v8  ;;  %vm4610_vm8 = vweird.f32 %v9871_v56 }
 0x5cf   : > { %v9895_v27 = vadd.f32 %v9865_v16, %v2741_v26  ;;  %v4564_v26 = vadd.f32 %v9830_v19, %v4563_v49  ;;  %v9924_v49 = vmul.f32 0.5, %v9777_v55  ;;  %v9928_v29 = vpop.eup %7374  ;;  %vm10045_vm9 = vmor %vm4595_vm7, %vm4596_vm6  ;;  %vm4276_vm11 = vweird.f32 %v9909_v35 }
 0x5d0   : > { %14066 = vst [vmem:[#allocation48_spill] sm:$0xff] %v9928_v29  ;;  %v9946_v57 = vpop.eup %7376  ;;  %vm4275_vm14 = vweird.f32 %v9855_v0  ;;  %v4616_v0 = vand.u32 2147483648, %v9871_v56 }
 0x5d1   : > { %v9903_v11 = vmul.f32 0.70710677, %v9895_v27  ;;  %14065 = vst [vmem:[#allocation47_spill] sm:$0xff] %v9924_v49  ;;  %v4568_v41 = vsel %vm9942_vm15, %v9830_v19, %v4564_v26  ;;  %v9976_v5 = vpop.eup %7378  ;;  %vm4611_vm12 = vweird.f32 %v9946_v57  ;;  %vm10112_vm3 = vmor %vm4275_vm14, %vm4276_vm11 }
 0x5d2   : > { %14070 = vst [vmem:[#allocation50_spill] sm:$0xff] %v9976_v5 }
 0x5d3   : > { %v9914_v28 = vand.u32 2147483647, %v9903_v11  ;;  %vm2813_vm14 = vcmp.ge.f32.partialorder %v9903_v11, 0.0 }
 0x5d4   : > { %v2333_v53 = vpop.xlane.xlu1 %2332 }
 0x5d5   : > { %v2355_v47 = vmul.f32 %v2333_v53, %v8012_v24  ;;  %v4571_v53 = vand.u32 2147483648, %v9806_v14  ;;  %v4592_v14 = vsub.f32 1.0, %v4591_v59  ;;  %v9987_v59 = vadd.f32 0.2548296, %v4866_v15 }
 0x5d6   : > { %v2743_v48 = vpop.f32.mrf.mxu2 }
 0x5d7   : > { %v9917_v58 = vsub.f32 %v9580_v9, %v2355_v47  ;;  %v9933_v47 = vsel %vm4453_vm13, 1.0, %v13999_v42  ;;  %v2861_v9 = vmul.f32 0.3275911, %v9914_v28  ;;  %v9960_v49 = vadd.f32 %v9865_v16, %v2743_v48 }
 0x5d8   : > { %14067 = vst [vmem:[#allocation49_spill] sm:$0xff] %v9933_v47  ;;  %v4572_v51 = vor.u32 1.1754944e-38, %v4571_v53  ;;  %v4606_v47 = vmul.f32 %v9946_v57, %v9871_v56  ;;  %v4271_v48 = vmul.f32 %v9909_v35, %v4270_v18  ;;  %v4593_v26 = vmul.f32 %v9897_v62, %v4592_v14 }
 0x5d9   : > { %14064 = vst [vmem:[#allocation46_spill] sm:$0xff] %v9917_v58  ;;  %v2387_v43 = vmul.f32 %v9917_v58, %v9917_v58  ;;  %v9957_v58 = vadd.f32 1.0, %v2861_v9  ;;  %v9972_v52 = vmul.f32 0.70710677, %v9960_v49  ;;  %v4584_v18 = vand.u32 2147483647, %v9823_v36 }
 0x5da   : > { %v9967_v9 = vsel %vm4570_vm1, %v4572_v51, %v4568_v41  ;;  %v9984_v51 = vld [vmem:[%s13786_s11 + $0x78] sm:$0xff]  ;;  %v9990_v53 = vmul.f32 %v4819_v6, %v9852_v38  ;;  %v4583_v36 = vsel %vm9999_vm4, %v9849_v33, %v4579_v50  ;;  %v4272_v15 = vmul.f32 0.5, %v4271_v48 }
 0x5db   : > { %v2427_v40 = vsel %vm1021_vm0, %v2387_v43, 0.0  ;;  %7380 = vrcp.f32 %v9957_v58  ;;  %v9993_v43 = vand.u32 2147483647, %v9972_v52  ;;  %3496 = vmatpush.bf16.msra.mxu3 %v9984_v51  ;;  %v4772_v6 = vmul.f32 1.0614054, %v9967_v9 }
 0x5dc   : > { %v4096_v54 = vpop.xlane.xlu1 %4095  ;;  %v2336_v60 = vpop.xlane.xlu2 %2335  ;;  %2428 = vadd.xlane.f32.xlu2 %v2427_v40  ;;  %vm4585_vm5 = vcmp.eq.f32.partialorder %v4584_v18, 8.507059e+37  ;;  %v10023_v33 = vadd.f32 %v9897_v62, %v4593_v26  ;;  %v4273_v30 = vsub.f32 1.5, %v4272_v15  ;;  %v10056_v15 = vld [vmem:[%s13786_s11 + $0x68] sm:$0xff]  ;;  %vm2898_vm13 = vweird.f32 %v9957_v58 }
 0x5dd   : > { %v4112_v19 = vmul.f32 %v4096_v54, %v8012_v24  ;;  %v2356_v41 = vmul.f32 %v2336_v60, %v8012_v24  ;;  %v4607_v54 = vsub.f32 1.0, %v4606_v47  ;;  %v2862_v60 = vmul.f32 0.3275911, %v9993_v43 }
 0x5de   : > { %v10037_v45 = vadd.f32 -1.4531521, %v4772_v6 }
 0x5df   : > { %v9995_v55 = vadd.f32 1e-05, %v4112_v19  ;;  %v10004_v40 = vsub.f32 %v9595_v61, %v2356_v41  ;;  %v4587_v19 = vor.u32 1.1754944e-38, %v4586_v25  ;;  %v10020_v41 = vld [vmem:[%s13786_s11 + $0x70] sm:$0xff]  ;;  %v10029_v48 = vadd.f32 1.0, %v2862_v60 }
 0x5e0   : > { %3497 = vmatpush.bf16.msra.mxu3 %v10020_v41  ;;  %v2904_v60 = vand.u32 2147483648, %v9957_v58 }
 0x5e1   : > { %14073 = vst [vmem:[#allocation51_spill] sm:$0xff] %v10004_v40  ;;  %7382 = vrsqrt.f32 %v9995_v55  ;;  %v10013_v63 = vpop.eup %7380  ;;  %v2388_v47 = vmul.f32 %v10004_v40, %v10004_v40  ;;  %v10031_v61 = vsel %vm4585_vm5, %v4587_v19, %v4583_v36  ;;  %v4608_v40 = vmul.f32 %v9946_v57, %v4607_v54  ;;  %vm10140_vm5 = vmor %vm4610_vm8, %vm4611_vm12 }
 0x5e2   : > { %v2894_v50 = vmul.f32 %v10013_v63, %v9957_v58  ;;  %7384 = vrcp.f32 %v10029_v48  ;;  %v4599_v36 = vand.u32 2147483647, %v9845_v8  ;;  %v10060_v19 = vmul.f32 1.0614054, %v10031_v61 }
 0x5e3   : > { %v2430_v26 = vsel %vm1021_vm0, %v2388_v47, 0.0  ;;  %vm2899_vm10 = vweird.f32 %v10013_v63  ;;  %v10077_v31 = vadd.f32 %v9946_v57, %v4608_v40  ;;  %v10090_v40 = vld [vmem:[%s13786_s11 + $0x60] sm:$0xff]  ;;  %vm4285_vm6 = vweird.f32 %v9995_v55 }
 0x5e4   : > { %v2339_v25 = vpop.xlane.xlu1 %2338  ;;  %v2417_v14 = vpop.xlane.xlu2 %2416  ;;  %v2895_v16 = vsub.f32 1.0, %v2894_v50  ;;  %2431 = vadd.xlane.f32.xlu0 %v2430_v26  ;;  %v4601_v26 = vand.u32 2147483648, %v9845_v8  ;;  %3498 = vmatpush.bf16.msra.mxu3 %v10056_v15  ;;  %vm10094_vm15 = vmor %vm2898_vm13, %vm2899_vm10  ;;  %vm10098_vm1 = vcmp.eq.f32.partialorder %v4599_v36, 8.507059e+37  ;;  %vm2913_vm10 = vweird.f32 %v10029_v48 }
 0x5e5   : > { %v2357_v18 = vmul.f32 %v2339_v25, %v8012_v24  ;;  %vm4454_vm13 = vcmp.ge.f32.partialorder %v9809_v7, 0.0 }
 0x5e6   : > { %v2896_v25 = vmul.f32 %v10013_v63, %v2895_v16  ;;  %v4274_v16 = vmul.f32 %v9909_v35, %v4273_v30 }
 0x5e7   : > { %v10051_v6 = vsub.f32 %v9613_v34, %v2357_v18  ;;  %v10066_v50 = vpop.eup %7382  ;;  %v2902_v18 = vand.u32 2147483647, %v9957_v58  ;;  %v2905_v58 = vor.u32 1.1754944e-38, %v2904_v60 }
 0x5e8   : > { %v4280_v34 = vmul.f32 %v10066_v50, %v9995_v55  ;;  %v2897_v8 = vadd.f32 %v10013_v63, %v2896_v25  ;;  %v10103_v25 = vpop.eup %7384  ;;  %3499 = vmatpush.bf16.msra.mxu3 %v10090_v40  ;;  %vm4286_vm4 = vweird.f32 %v10066_v50 }
 0x5e9   : > { %14076 = vst [vmem:[#allocation52_spill] sm:$0xff] %v10051_v6  ;;  %v2389_v47 = vmul.f32 %v10051_v6, %v10051_v6  ;;  %vm2903_vm2 = vcmp.eq.f32.partialorder %v2902_v18, 8.507059e+37  ;;  %v2909_v60 = vmul.f32 %v10103_v25, %v10029_v48  ;;  %v4602_v18 = vor.u32 1.1754944e-38, %v4601_v26  ;;  %vm4287_vm8 = vmor %vm4285_vm6, %vm4286_vm4 }
 0x5ea   : > { %v4281_v5 = vmul.f32 %v10066_v50, %v4280_v34  ;;  %v2447_v34 = vmul.f32 %v2417_v14, %v8012_v24  ;;  %v2901_v39 = vsel %vm10094_vm15, %v10013_v63, %v2897_v8  ;;  %v4278_v63 = vsel %vm10112_vm3, %v9909_v35, %v4274_v16 }
 0x5eb   : > { %v2433_v23 = vsel %vm1021_vm0, %v2389_v47, 0.0  ;;  %v10120_v47 = vsel %vm2903_vm2, %v2905_v58, %v2901_v39  ;;  %v4614_v8 = vand.u32 2147483647, %v9871_v56  ;;  %v2910_v30 = vsub.f32 1.0, %v2909_v60 }
 0x5ec   : > { %v2342_v4 = vpop.xlane.xlu2 %2341  ;;  %v4282_v12 = vmul.f32 0.5, %v4281_v5  ;;  %2434 = vadd.xlane.f32.xlu1 %v2433_v23  ;;  %v3133_v23 = vmul.f32 1.0614054, %v10120_v47  ;;  %v4613_v35 = vsel %vm10140_vm5, %v9946_v57, %v10077_v31  ;;  %v4617_v26 = vor.u32 1.1754944e-38, %v4616_v0 }
 0x5ed   : > { %v2358_v14 = vmul.f32 %v2342_v4, %v8012_v24  ;;  %v10133_v4 = vld [vmem:[%s13786_s11 + $0x58] sm:$0xff]  ;;  %v2911_v56 = vmul.f32 %v10103_v25, %v2910_v30  ;;  %vm2914_vm7 = vweird.f32 %v10103_v25  ;;  %v4303_v55 = vmul.f32 %v4278_v63, %v9523_v13 }
 0x5ee   : > { %v4283_v29 = vsub.f32 1.5, %v4282_v12  ;;  %v10145_v12 = vadd.f32 1e-05, %v2447_v34  ;;  %3500 = vmatpush.bf16.msra.mxu3 %v10133_v4  ;;  %v2917_v31 = vand.u32 2147483647, %v10029_v48  ;;  %v10168_v34 = vld [vmem:[%s13786_s11 + $0x50] sm:$0xff]  ;;  %vm10173_vm11 = vmor %vm2913_vm10, %vm2914_vm7  ;;  %v4804_v30 = vmul.f32 %v10037_v45, %v9967_v9 }
 0x5ef   : > { %v10128_v5 = vsub.f32 %v9620_v3, %v2358_v14  ;;  %v2912_v13 = vadd.f32 %v10103_v25, %v2911_v56  ;;  %v3149_v36 = vadd.f32 -1.4531521, %v3133_v23  ;;  %vm4615_vm12 = vcmp.eq.f32.partialorder %v4614_v8, 8.507059e+37 }
 0x5f0   : > { %v4284_v16 = vmul.f32 %v10066_v50, %v4283_v29  ;;  %v2919_v29 = vand.u32 2147483648, %v10029_v48  ;;  %7386 = vrsqrt.f32 %v10145_v12  ;;  %v14087_v48 = vsel %vm10045_vm9, %v9897_v62, %v10023_v33  ;;  %v4393_v33 = vpop.f32.mrf.mxu0 }
 0x5f1   : > { %v2390_v58 = vmul.f32 %v10128_v5, %v10128_v5  ;;  %v4918_v63 = vsub.f32 0.0, %v9820_v46  ;;  %v10193_v54 = vsel %vm4615_vm12, %v4617_v26, %v4613_v35  ;;  %v4952_v62 = vmul.f32 1.442695, %v9950_v1  ;;  %v10206_v1 = vld [vmem:[%s13786_s11 + $0x48] sm:$0xff] }
 0x5f2   : > { %v4288_v57 = vsel %vm4287_vm8, %v10066_v50, %v4284_v16  ;;  %v10184_v50 = vsel %vm10098_vm1, %v4602_v18, %v14087_v48  ;;  %3501 = vmatpush.bf16.msra.mxu3 %v10168_v34  ;;  %v3277_v6 = vsub.f32 0.0, %v9914_v28  ;;  %v4319_v18 = vmul.f32 %v9743_v20, %v4303_v55 }
 0x5f3   : > { %v2436_v0 = vsel %vm1021_vm0, %v2390_v58, 0.0  ;;  %v4304_v60 = vmul.f32 %v4288_v57, %v9583_v2  ;;  %v2916_v2 = vsel %vm10173_vm11, %v10103_v25, %v2912_v13  ;;  %v2920_v8 = vor.u32 1.1754944e-38, %v2919_v29 }
 0x5f4   : > { %2437 = vadd.xlane.f32.xlu2 %v2436_v0  ;;  %vm2918_vm9 = vcmp.eq.f32.partialorder %v2917_v31, 8.507059e+37  ;;  %v3165_v23 = vmul.f32 %v3149_v36, %v10120_v47  ;;  %v4789_v39 = vadd.f32 -1.4531521, %v10060_v19  ;;  %v4774_v25 = vmul.f32 1.0614054, %v10184_v50 }
 0x5f5   : > { %v4851_v16 = vadd.f32 -0.28449672, %v9990_v53  ;;  %v4320_v45 = vmul.f32 %v9743_v20, %v4304_v60  ;;  %v10208_v35 = vsel %vm2918_vm9, %v2920_v8, %v2916_v2  ;;  %v4775_v26 = vmul.f32 1.0614054, %v10193_v54 }
 0x5f6   : > { %v4898_v58 = vmul.f32 %v9987_v59, %v9811_v22  ;;  %v4934_v19 = vmul.f32 %v4918_v63, %v9820_v46  ;;  %v3278_v56 = vsub.f32 0.0, %v9993_v43  ;;  %v4820_v55 = vadd.f32 1.4214138, %v4804_v30  ;;  %v10215_v53 = vpop.eup %7386  ;;  %3502 = vmatpush.bf16.msra.mxu3 %v10206_v1  ;;  %v10227_v46 = vld [vmem:[%s13786_s11 + $0x40] sm:$0xff] }
 0x5f7   : > { %v3293_v20 = vmul.f32 %v3277_v6, %v9914_v28  ;;  %v4335_v31 = vadd.f32 %v9755_v37, %v4319_v18  ;;  %v4336_v29 = vadd.f32 %v9755_v37, %v4320_v45  ;;  %v3134_v57 = vmul.f32 1.0614054, %v10208_v35 }
 0x5f8   : > { %v4919_v22 = vsub.f32 0.0, %v9838_v17  ;;  %v3181_v59 = vadd.f32 1.4214138, %v3165_v23  ;;  %v4805_v28 = vmul.f32 %v4789_v39, %v10031_v61  ;;  %v4790_v0 = vadd.f32 -1.4531521, %v4774_v25  ;;  %v4395_v25 = vpop.f32.mrf.mxu0 }
 0x5f9   : > { %v4867_v13 = vmul.f32 %v4851_v16, %v9852_v38  ;;  %v4344_v37 = vpack.c.bf16 %v4336_v29, %v4335_v31  ;;  %v3150_v36 = vadd.f32 -1.4531521, %v3134_v57  ;;  %v4791_v60 = vadd.f32 -1.4531521, %v4775_v26 }
 0x5fa   : > { %7388 = vpow2.f32 %v4952_v62  ;;  %v3294_v14 = vmul.f32 %v3278_v56, %v9993_v43  ;;  %v2552_v48 = vmul.f32 %v10215_v53, %v10145_v12  ;;  %v4836_v63 = vmul.f32 %v4820_v55, %v9967_v9  ;;  %3503 = vmatpush.bf16.msra.mxu3 %v10227_v46 }
 0x5fb   : > { %v10236_v2 = vadd.f32 %v9660_v10, %v4393_v33  ;;  %v3309_v30 = vmul.f32 1.442695, %v3293_v20  ;;  %7122 = vmatmul.msk.bf16.gmra.mxu0 %vm1021_vm0, %v4344_v37  ;;  %v3166_v6 = vmul.f32 %v3150_v36, %v10208_v35  ;;  %v3197_v18 = vmul.f32 %v3181_v59, %v10120_v47 }
 0x5fc   : > { %v10243_v62 = vmul.f32 %v9920_v44, %v4898_v58  ;;  %v4935_v43 = vmul.f32 %v4919_v22, %v9838_v17  ;;  %v4821_v8 = vadd.f32 1.4214138, %v4805_v28  ;;  %v4806_v23 = vmul.f32 %v4790_v0, %v10184_v50 }
 0x5fd   : > { %v4883_v33 = vadd.f32 0.2548296, %v4867_v13  ;;  %v4954_v39 = vmul.f32 1.442695, %v4934_v19  ;;  %v3182_v16 = vadd.f32 1.4214138, %v3166_v6  ;;  %v4807_v45 = vmul.f32 %v4791_v60, %v10193_v54 }
 0x5fe   : > { %6276 = vmatpush.bf16.msrb.mxu3 %v9984_v51  ;;  %v3311_v26 = vmul.f32 1.442695, %v3294_v14  ;;  %v2553_v56 = vmul.f32 %v10215_v53, %v2552_v48  ;;  %v3213_v20 = vadd.f32 -0.28449672, %v3197_v18  ;;  %v4852_v44 = vadd.f32 -0.28449672, %v4836_v63 }
 0x5ff   : > { %v10251_v58 = vmul.f32 0.70710677, %v10236_v2  ;;  %7390 = vpow2.f32 %v3309_v30  ;;  %v3198_v51 = vmul.f32 %v3182_v16, %v10208_v35  ;;  %v4956_v19 = vmul.f32 1.442695, %v4935_v43 }
 0x600   : > { %v10255_v31 = vpop.eup %7388  ;;  %v3229_v29 = vmul.f32 %v3213_v20, %v10120_v47  ;;  %v4837_v57 = vmul.f32 %v4821_v8, %v10031_v61  ;;  %v4822_v22 = vadd.f32 1.4214138, %v4806_v23  ;;  %7392 = vpow2.f32 %v4954_v39 }
 0x601   : > { %v3214_v28 = vadd.f32 -0.28449672, %v3198_v51  ;;  %v4823_v0 = vadd.f32 1.4214138, %v4807_v45  ;;  %v10263_v13 = vmul.f32 0.5, %v9798_v32  ;;  %7394 = vpow2.f32 %v3311_v26  ;;  %v4398_v26 = vpop.f32.mrf.mxu0 }
 0x602   : > { %6277 = vmatpush.bf16.msrb.mxu3 %v10020_v41  ;;  %v2554_v37 = vmul.f32 0.5, %v2553_v56  ;;  %v3245_v36 = vadd.f32 0.2548296, %v3229_v29  ;;  %v10268_v60 = vsel %vm4454_vm13, 1.0, %v13999_v42  ;;  %v10271_v14 = vand.u32 2147483647, %v10251_v58 }
 0x603   : > { %v4868_v41 = vmul.f32 %v4852_v44, %v9967_v9  ;;  %v3230_v48 = vmul.f32 %v3214_v28, %v10208_v35  ;;  %v4853_v63 = vadd.f32 -0.28449672, %v4837_v57  ;;  %v4838_v30 = vmul.f32 %v4822_v22, %v10184_v50 }
 0x604   : > { %v3261_v32 = vmul.f32 %v3245_v36, %v10120_v47  ;;  %v4994_v7 = vsub.f32 1.0, %v10243_v62  ;;  %v10281_v18 = vmul.f32 %v4883_v33, %v9852_v38  ;;  %v4839_v43 = vmul.f32 %v4823_v0, %v10193_v54 }
 0x605   : > { %v7391_v6 = vpop.eup %7390  ;;  %v2555_v8 = vsub.f32 1.5, %v2554_v37  ;;  %v3246_v23 = vadd.f32 0.2548296, %v3230_v48  ;;  %v4504_v45 = vmul.f32 0.3275911, %v10271_v14  ;;  %v4869_v44 = vmul.f32 %v4853_v63, %v10031_v61 }
 0x606   : > { %v2420_v55 = vpop.xlane.xlu0 %2419  ;;  %6278 = vmatpush.bf16.msrb.mxu3 %v10056_v15  ;;  %v3341_v39 = vmul.f32 %v7391_v6, %v3261_v32  ;;  %v10285_v16 = vpop.eup %7392  ;;  %v10289_v15 = vadd.f32 %v9660_v10, %v4395_v25  ;;  %v10292_v33 = vadd.f32 0.2548296, %v4868_v41  ;;  %v2829_v10 = vsel %vm2813_vm14, 1.0, %v13999_v42  ;;  %v10319_v41 = vld [vmem:[%s13785_s10] ss:$0 sm:$0xff] }
 0x607   : > { %v2448_v17 = vmul.f32 %v2420_v55, %v8012_v24  ;;  %v7395_v56 = vpop.eup %7394  ;;  %v3262_v55 = vmul.f32 %v3246_v23, %v10208_v35  ;;  %vm2814_vm15 = vcmp.ge.f32.partialorder %v9972_v52, 0.0  ;;  %v2556_v29 = vmul.f32 %v10215_v53, %v2555_v8 }
 0x608   : > { %14088 = vst [vmem:[#allocation53_spill] sm:$0xff] %v10289_v15  ;;  %v3357_v20 = vsub.f32 1.0, %v3341_v39  ;;  %vm2558_vm1 = vweird.f32 %v10215_v53  ;;  %v10311_v28 = vmul.f32 0.70710677, %v10289_v15  ;;  %vm2557_vm2 = vweird.f32 %v10145_v12  ;;  %v10371_v12 = vld [vmem:[%s13782_s7 + $0x1] ss:$0 sm:$0xff] }
 0x609   : > { %v10260_v59 = vadd.f32 1e-05, %v2448_v17  ;;  %v4854_v17 = vadd.f32 -0.28449672, %v4838_v30  ;;  %v3342_v57 = vmul.f32 %v7395_v56, %v3262_v55  ;;  %v4885_v36 = vadd.f32 0.2548296, %v4869_v44  ;;  %vm10329_vm3 = vmor %vm2557_vm2, %vm2558_vm1  ;;  %v4400_v55 = vpop.f32.mrf.mxu0 }
 0x60a   : > { %6279 = vmatpush.bf16.msrb.mxu3 %v10090_v40  ;;  %v10308_v40 = vadd.f32 1.0, %v4504_v45  ;;  %14089 = vst [vmem:[#allocation54_spill] sm:$0xff] %v10311_v28  ;;  %v3373_v11 = vmul.f32 %v3357_v20, %v2829_v10  ;;  %v10322_v48 = vadd.f32 %v10319_v41, %v4398_v26  ;;  %v2830_v32 = vsel %vm2814_vm15, 1.0, %v13999_v42 }
 0x60b   : > { %7396 = vrsqrt.f32 %v10260_v59  ;;  %v3358_v37 = vsub.f32 1.0, %v3342_v57  ;;  %v2560_v30 = vsel %vm10329_vm3, %v10215_v53, %v2556_v29  ;;  %v10340_v52 = vand.u32 2147483647, %v10311_v28 }
 0x60c   : > { %7398 = vpow2.f32 %v4956_v19  ;;  %v4855_v19 = vadd.f32 -0.28449672, %v4839_v43  ;;  %14090 = vst [vmem:[#allocation55_spill] sm:$0xff] %v10322_v48  ;;  %v3389_v8 = vadd.f32 1.0, %v3373_v11  ;;  %v2781_v39 = vmul.f32 0.5, %v9895_v27 }
 0x60d   : > { %v3374_v43 = vmul.f32 %v3358_v37, %v2830_v32  ;;  %14093 = vst [vmem:[#allocation56_spill] sm:$0xff] %v10340_v52  ;;  %v2782_v45 = vmul.f32 0.5, %v9960_v49  ;;  %v10349_v56 = vmul.f32 0.70710677, %v10322_v48  ;;  %v2639_v20 = vmul.f32 %v2560_v30, %v9601_v21  ;;  %v14096_v32 = vld [vmem:[#allocation34_spill] sm:$0xff] }
 0x60e   : > { %v2423_v47 = vpop.xlane.xlu0 %2422  ;;  %6280 = vmatpush.bf16.msrb.mxu3 %v10133_v4  ;;  %v4870_v4 = vmul.f32 %v4854_v17, %v10184_v50  ;;  %v4871_v63 = vmul.f32 %v4855_v19, %v10193_v54  ;;  %vm2567_vm5 = vweird.f32 %v10260_v59  ;;  %v3405_v17 = vmul.f32 %v3389_v8, %v2781_v39  ;;  %v14102_v39 = vld [vmem:[#allocation50_spill] sm:$0xff] }
 0x60f   : > { %v2449_v38 = vmul.f32 %v2423_v47, %v8012_v24  ;;  %14094 = vst [vmem:[#allocation57_spill] sm:$0xff] %v10349_v56  ;;  %v4900_v11 = vmul.f32 %v10292_v33, %v9967_v9  ;;  %v4505_v37 = vmul.f32 0.3275911, %v10340_v52  ;;  %v10382_v30 = vand.u32 2147483647, %v10349_v56 }
 0x610   : > { %v4886_v29 = vadd.f32 0.2548296, %v4870_v4  ;;  %v4901_v4 = vmul.f32 %v4885_v36, %v10031_v61  ;;  %v10389_v62 = vadd.f32 %v10319_v41, %v4400_v55  ;;  %vm4625_vm15 = vweird.f32 %v10308_v40 }
 0x611   : > { %v7397_v51 = vpop.eup %7396  ;;  %v10301_v25 = vadd.f32 1e-05, %v2449_v38  ;;  %v3390_v38 = vadd.f32 1.0, %v3374_v43  ;;  %v14100_v43 = vld [vmem:[#allocation38_spill] sm:$0xff]  ;;  %vm4456_vm3 = vcmp.ge.f32.partialorder %v10251_v58, 0.0 }
 0x612   : > { %v2562_v35 = vmul.f32 %v7397_v51, %v10260_v59  ;;  %v10306_v22 = vpop.eup %7398  ;;  %vm2568_vm4 = vweird.f32 %v7397_v51  ;;  %6281 = vmatpush.bf16.msrb.mxu3 %v10168_v34  ;;  %v14095_v34 = vld [vmem:[#allocation48_spill] sm:$0xff]  ;;  %vm4455_vm7 = vcmp.ge.f32.partialorder %v14100_v43, 0.0  ;;  %14101 = vst [vmem:[#allocation34_spill] sm:$0xff] %v10389_v62  ;;  %v4981_v55 = vmul.f32 %v10255_v31, %v4901_v4 }
 0x613   : > { %7400 = vrsqrt.f32 %v10301_v25  ;;  %v3406_v49 = vmul.f32 %v3390_v38, %v2782_v45  ;;  %v4979_v19 = vmul.f32 %v14095_v34, %v10281_v18  ;;  %vm2569_vm6 = vmor %vm2567_vm5, %vm2568_vm4  ;;  %14099 = vst [vmem:[#allocation48_spill] sm:$0xff] %v10382_v30  ;;  %v4403_v38 = vpop.f32.mrf.mxu0  ;;  %vm2577_vm10 = vweird.f32 %v10301_v25 }
 0x614   : > { %v2563_v0 = vmul.f32 %v7397_v51, %v2562_v35  ;;  %7402 = vrcp.f32 %v10308_v40  ;;  %v4887_v35 = vadd.f32 0.2548296, %v4871_v63  ;;  %v14097_v63 = vld [vmem:[#allocation41_spill] sm:$0xff] }
 0x615   : > { %v3421_v21 = vpack.c.bf16 %v3406_v49, %v3405_v17  ;;  %v5010_v9 = vmul.f32 %v4994_v7, %v14097_v63  ;;  %v4995_v36 = vsub.f32 1.0, %v4979_v19  ;;  %v4997_v63 = vsub.f32 1.0, %v4981_v55 }
 0x616   : > { %v2564_v6 = vmul.f32 0.5, %v2563_v0  ;;  %v2426_v23 = vpop.xlane.xlu1 %2425  ;;  %6282 = vmatpush.bf16.msrb.mxu3 %v10206_v1  ;;  %v14098_v1 = vld [vmem:[#allocation37_spill] sm:$0xff]  ;;  %v4903_v61 = vmul.f32 %v4887_v35, %v10193_v54  ;;  %v10412_v35 = vmul.f32 0.70710677, %v10389_v62 }
 0x617   : > { %v2450_v47 = vmul.f32 %v2426_v23, %v8012_v24  ;;  %v10379_v33 = vmul.f32 0.5, %v14098_v1  ;;  %3504 = vmatmul.bf16.vlgmr.msra.gmra.mxu3 %v3421_v21  ;;  %v4902_v23 = vmul.f32 %v4886_v29, %v10184_v50  ;;  %v5026_v29 = vadd.f32 1.0, %v5010_v9 }
 0x618   : > { %v2565_v26 = vsub.f32 1.5, %v2564_v6  ;;  %v4983_v19 = vmul.f32 %v10306_v22, %v4903_v61  ;;  %14103 = vst [vmem:[#allocation41_spill] sm:$0xff] %v10412_v35 }
 0x619   : > { %v10346_v53 = vpop.eup %7400  ;;  %v10353_v27 = vadd.f32 1e-05, %v2450_v47  ;;  %v4980_v47 = vmul.f32 %v14102_v39, %v4900_v11  ;;  %v4982_v34 = vmul.f32 %v10285_v16, %v4902_v23  ;;  %v14109_v23 = vld [vmem:[#allocation39_spill] sm:$0xff]  ;;  %v14113_v39 = vld [vmem:[#allocation45_spill] sm:$0xff] }
 0x61a   : > { %v2566_v44 = vmul.f32 %v7397_v51, %v2565_v26  ;;  %v2572_v10 = vmul.f32 %v10346_v53, %v10301_v25  ;;  %v10364_v0 = vpop.eup %7402  ;;  %6283 = vmatpush.bf16.msrb.mxu3 %v10227_v46  ;;  %v10393_v26 = vadd.f32 1.0, %v4505_v37  ;;  %vm2578_vm8 = vweird.f32 %v10346_v53 }
 0x61b   : > { %7404 = vrsqrt.f32 %v10353_v27  ;;  %v4621_v49 = vmul.f32 %v10364_v0, %v10308_v40  ;;  %vm10420_vm11 = vmor %vm2577_vm10, %vm2578_vm8  ;;  %v4996_v22 = vsub.f32 1.0, %v4980_v47  ;;  %v4998_v9 = vsub.f32 1.0, %v4982_v34 }
 0x61c   : > { %v2570_v57 = vsel %vm2569_vm6, %v7397_v51, %v2566_v44  ;;  %v2573_v59 = vmul.f32 %v10346_v53, %v2572_v10  ;;  %v2656_v51 = vmul.f32 %v10371_v12, %v2639_v20  ;;  %v10398_v20 = vld [vmem:[%s13783_s8 + $0x1] ss:$0 sm:$0xff]  ;;  %v4506_v44 = vmul.f32 0.3275911, %v10382_v30 }
 0x61d   : > { %v2640_v18 = vmul.f32 %v2570_v57, %v14096_v32  ;;  %v14104_v57 = vld [vmem:[#allocation43_spill] sm:$0xff]  ;;  %7406 = vrcp.f32 %v10393_v26  ;;  %v4622_v4 = vsub.f32 1.0, %v4621_v49  ;;  %v4999_v1 = vsub.f32 1.0, %v4983_v19 }
 0x61e   : > { %v2574_v6 = vmul.f32 0.5, %v2573_v59  ;;  %v2673_v50 = vadd.f32 %v10398_v20, %v2656_v51  ;;  %v5011_v21 = vmul.f32 %v4995_v36, %v14104_v57  ;;  %v4471_v59 = vsel %vm4455_vm7, 1.0, %v13999_v42  ;;  %v14112_v36 = vld [vmem:[#allocation35_spill] sm:$0xff]  ;;  %v14116_v57 = vld [vmem:[#allocation36_spill] sm:$0xff] }
 0x61f   : > { %v2657_v8 = vmul.f32 %v10371_v12, %v2640_v18  ;;  %v10425_v37 = vadd.f32 1.0, %v4506_v44  ;;  %v14107_v18 = vld [vmem:[#allocation40_spill] sm:$0xff]  ;;  %v10440_v61 = vmul.f32 %v5026_v29, %v14109_v23  ;;  %v5012_v47 = vmul.f32 %v4996_v22, %v14113_v39 }
 0x620   : > { %v2575_v7 = vsub.f32 1.5, %v2574_v6  ;;  %v10434_v6 = vand.u32 2147483647, %v10412_v35  ;;  %vm2587_vm9 = vweird.f32 %v10353_v27  ;;  %v5027_v44 = vadd.f32 1.0, %v5011_v21 }
 0x621   : > { %v7405_v45 = vpop.eup %7404  ;;  %v2674_v54 = vadd.f32 %v10398_v20, %v2657_v8  ;;  %14110 = vst [vmem:[#allocation38_spill] sm:$0xff] %v10440_v61  ;;  %7408 = vrcp.f32 %v10425_v37  ;;  %v5014_v49 = vmul.f32 %v4998_v9, %v10268_v60  ;;  %v4623_v34 = vmul.f32 %v10364_v0, %v4622_v4 }
 0x622   : > { %v2576_v17 = vmul.f32 %v10346_v53, %v2575_v7  ;;  %v2582_v46 = vmul.f32 %v7405_v45, %v10353_v27  ;;  %14108 = vst [vmem:[#allocation37_spill] sm:$0xff] %v10434_v6  ;;  %vm2588_vm12 = vweird.f32 %v7405_v45  ;;  %v4507_v19 = vmul.f32 0.3275911, %v10434_v6 }
 0x623   : > { %v2685_v10 = vpack.c.bf16 %v2674_v54, %v2673_v50  ;;  %v10452_v55 = vpop.eup %7406  ;;  %vm2589_vm13 = vmor %vm2587_vm9, %vm2588_vm12  ;;  %v5028_v22 = vadd.f32 1.0, %v5012_v47  ;;  %v4624_v23 = vadd.f32 %v10364_v0, %v4623_v34  ;;  %vm4626_vm14 = vweird.f32 %v10364_v0 }
 0x624   : > { %v2583_v31 = vmul.f32 %v7405_v45, %v2582_v46  ;;  %v2580_v25 = vsel %vm10420_vm11, %v10346_v53, %v2576_v17  ;;  %v10443_v53 = vadd.f32 %v10319_v41, %v4403_v38  ;;  %v4405_v17 = vpop.f32.mrf.mxu0  ;;  %v14114_v46 = vld [vmem:[#allocation49_spill] sm:$0xff]  ;;  %v4636_v60 = vmul.f32 %v10452_v55, %v10393_v26  ;;  %vm10515_vm1 = vmor %vm4625_vm15, %vm4626_vm14 }
 0x625   : > { %v2746_v16 = vpop.f32.mrf.mxu2  ;;  %7063 = vmatmul.msk.bf16.gmra.mxu2 %vm1021_vm0, %v2685_v10  ;;  %v2641_v7 = vmul.f32 %v2580_v25, %v14112_v36  ;;  %v5013_v38 = vmul.f32 %v4997_v63, %v14114_v46  ;;  %v5015_v10 = vmul.f32 %v4999_v1, %v4471_v59  ;;  %v10467_v59 = vadd.f32 %v10319_v41, %v4405_v17 }
 0x626   : > { %v2584_v32 = vmul.f32 0.5, %v2583_v31  ;;  %v10431_v51 = vadd.f32 %v14107_v18, %v2746_v16  ;;  %14111 = vst [vmem:[#allocation50_spill] sm:$0xff] %v10443_v53  ;;  %v10460_v31 = vmul.f32 0.70710677, %v10443_v53  ;;  %v5030_v63 = vadd.f32 1.0, %v5014_v49 }
 0x627   : > { %v2658_v16 = vmul.f32 %v10371_v12, %v2641_v7  ;;  %14117 = vst [vmem:[#allocation40_spill] sm:$0xff] %v10467_v59  ;;  %v5029_v4 = vadd.f32 1.0, %v5013_v38  ;;  %v5031_v9 = vadd.f32 1.0, %v5015_v10  ;;  %v10475_v1 = vpop.eup %7408  ;;  %v10492_v17 = vmul.f32 0.70710677, %v10467_v59 }
 0x628   : > { %v2585_v43 = vsub.f32 1.5, %v2584_v32  ;;  %v10437_v8 = vmul.f32 0.70710677, %v10431_v51  ;;  %14115 = vst [vmem:[#allocation43_spill] sm:$0xff] %v10460_v31  ;;  %v10483_v36 = vand.u32 2147483647, %v10460_v31  ;;  %v4651_v38 = vmul.f32 %v10475_v1, %v10425_v37 }
 0x629   : > { %v2675_v39 = vadd.f32 %v10398_v20, %v2658_v16  ;;  %14119 = vst [vmem:[#allocation35_spill] sm:$0xff] %v10492_v17  ;;  %v4631_v46 = vand.u32 2147483648, %v10308_v40  ;;  %v4629_v34 = vand.u32 2147483647, %v10308_v40  ;;  %v10511_v16 = vmul.f32 %v5031_v9, %v10379_v33 }
 0x62a   : > { %v2586_v50 = vmul.f32 %v7405_v45, %v2585_v43  ;;  %v10450_v54 = vand.u32 2147483647, %v10437_v8  ;;  %v10477_v43 = vadd.f32 1.0, %v4507_v19  ;;  %14118 = vst [vmem:[#allocation39_spill] sm:$0xff] %v10483_v36  ;;  %v14120_v19 = vld [vmem:[#allocation42_spill] sm:$0xff]  ;;  %v10533_v9 = vmul.f32 %v5030_v63, %v10263_v13 }
 0x62b   : > { %14126 = vst [vmem:[#allocation42_spill] sm:$0xff] %v10511_v16  ;;  %v4508_v40 = vmul.f32 0.3275911, %v10483_v36  ;;  %vm4630_vm2 = vcmp.eq.f32.partialorder %v4629_v34, 8.507059e+37  ;;  %vm4641_vm4 = vweird.f32 %v10452_v55  ;;  %vm4640_vm5 = vweird.f32 %v10393_v26 }
 0x62c   : > { %v2590_v29 = vsel %vm2589_vm13, %v7405_v45, %v2586_v50  ;;  %v2863_v27 = vmul.f32 0.3275911, %v10450_v54  ;;  %v4637_v50 = vsub.f32 1.0, %v4636_v60  ;;  %v10557_v60 = vmul.f32 0.5, %v10236_v2  ;;  %vm10574_vm6 = vmor %vm4640_vm5, %vm4641_vm4 }
 0x62d   : > { %v2642_v11 = vmul.f32 %v2590_v29, %v14116_v57  ;;  %v2748_v21 = vpop.f32.mrf.mxu2  ;;  %v10502_v29 = vmul.f32 %v5027_v44, %v14120_v19  ;;  %v10546_v13 = vadd.f32 1.0, %v4508_v40  ;;  %v4646_v40 = vand.u32 2147483648, %v10393_v26 }
 0x62e   : > { %v10469_v25 = vadd.f32 1.0, %v2863_v27  ;;  %v10472_v45 = vadd.f32 %v14107_v18, %v2748_v21  ;;  %v14122_v27 = vld [vmem:[#allocation44_spill] sm:$0xff]  ;;  %14131 = vst [vmem:[#allocation58_spill] sm:$0xff] %v10557_v60  ;;  %vm4656_vm7 = vweird.f32 %v10475_v1  ;;  %vm4655_vm8 = vweird.f32 %v10425_v37 }
 0x62f   : > { %v2659_v32 = vmul.f32 %v10371_v12, %v2642_v11  ;;  %14121 = vst [vmem:[#allocation45_spill] sm:$0xff] %v10502_v29  ;;  %v10505_v57 = vmul.f32 %v5028_v22, %v14122_v27  ;;  %v14124_v11 = vld [vmem:[#allocation47_spill] sm:$0xff]  ;;  %v4628_v22 = vsel %vm10515_vm1, %v10364_v0, %v4624_v23  ;;  %v4659_v63 = vand.u32 2147483647, %v10425_v37  ;;  %vm10600_vm11 = vmor %vm4655_vm8, %vm4656_vm7 }
 0x630   : > { %7410 = vrcp.f32 %v10469_v25  ;;  %v10486_v7 = vmul.f32 0.70710677, %v10472_v45  ;;  %v10508_v21 = vmul.f32 %v5029_v4, %v14124_v11  ;;  %v10530_v4 = vand.u32 2147483647, %v10492_v17  ;;  %14130 = vst [vmem:[#allocation47_spill] sm:$0xff] %v10533_v9 }
 0x631   : > { %v2676_v47 = vadd.f32 %v10398_v20, %v2659_v32  ;;  %14123 = vst [vmem:[#allocation49_spill] sm:$0xff] %v10505_v57  ;;  %7412 = vrcp.f32 %v10477_v43  ;;  %v4638_v32 = vmul.f32 %v10452_v55, %v4637_v50  ;;  %vm2928_vm9 = vweird.f32 %v10469_v25 }
 0x632   : > { %v10498_v49 = vand.u32 2147483647, %v10486_v7  ;;  %14125 = vst [vmem:[#allocation36_spill] sm:$0xff] %v10508_v21  ;;  %vm4660_vm13 = vcmp.eq.f32.partialorder %v4659_v63, 8.507059e+37  ;;  %vm4670_vm14 = vweird.f32 %v10477_v43 }
 0x633   : > { %v2686_v10 = vpack.c.bf16 %v2676_v47, %v2675_v39  ;;  %14129 = vst [vmem:[#allocation44_spill] sm:$0xff] %v10530_v4  ;;  %v4632_v39 = vor.u32 1.1754944e-38, %v4631_v46  ;;  %v4652_v47 = vsub.f32 1.0, %v4651_v38  ;;  %v4509_v46 = vmul.f32 0.3275911, %v10530_v4 }
 0x634   : > { %v2864_v44 = vmul.f32 0.3275911, %v10498_v49  ;;  %v4639_v27 = vadd.f32 %v10452_v55, %v4638_v32 }
 0x635   : > { %7064 = vmatmul.msk.bf16.gmra.mxu2 %vm1021_vm0, %v2686_v10  ;;  %v10543_v50 = vsel %vm4630_vm2, %v4632_v39, %v4628_v22  ;;  %v2751_v34 = vpop.f32.mrf.mxu2  ;;  %v4653_v58 = vmul.f32 %v10475_v1, %v4652_v47  ;;  %v10563_v22 = vsel %vm4456_vm3, 1.0, %v13999_v42  ;;  %v4644_v39 = vand.u32 2147483647, %v10393_v26 }
 0x636   : > { %v10526_v33 = vpop.eup %7410  ;;  %v10537_v10 = vadd.f32 1.0, %v2864_v44  ;;  %v4776_v44 = vmul.f32 1.0614054, %v10543_v50  ;;  %14132 = vst [vmem:[#allocation59_spill] sm:$0xff] %v10563_v22  ;;  %v10567_v32 = vadd.f32 %v14107_v18, %v2751_v34  ;;  %v4661_v47 = vand.u32 2147483648, %v10425_v37 }
 0x637   : > { %v2924_v19 = vmul.f32 %v10526_v33, %v10469_v25  ;;  %v10554_v11 = vpop.eup %7412  ;;  %v10580_v0 = vadd.f32 1.0, %v4509_v46  ;;  %v4643_v26 = vsel %vm10574_vm6, %v10452_v55, %v4639_v27  ;;  %v4654_v2 = vadd.f32 %v10475_v1, %v4653_v58 }
 0x638   : > { %7414 = vrcp.f32 %v10537_v10  ;;  %v4666_v23 = vmul.f32 %v10554_v11, %v10477_v43  ;;  %v4792_v3 = vadd.f32 -1.4531521, %v4776_v44  ;;  %v10594_v53 = vmul.f32 0.70710677, %v10567_v32 }
 0x639   : > { %v2925_v38 = vsub.f32 1.0, %v2924_v19  ;;  %7416 = vrcp.f32 %v10546_v13  ;;  %v4647_v19 = vor.u32 1.1754944e-38, %v4646_v40  ;;  %vm4645_vm10 = vcmp.eq.f32.partialorder %v4644_v39, 8.507059e+37 }
 0x63a   : > { %v4662_v55 = vor.u32 1.1754944e-38, %v4661_v47  ;;  %v4667_v40 = vsub.f32 1.0, %v4666_v23  ;;  %7418 = vrcp.f32 %v10580_v0  ;;  %vm2929_vm12 = vweird.f32 %v10526_v33 }
 0x63b   : > { %v2926_v18 = vmul.f32 %v10526_v33, %v2925_v38  ;;  %v4674_v38 = vand.u32 2147483647, %v10477_v43  ;;  %v10598_v27 = vsel %vm4645_vm10, %v4647_v19, %v4643_v26  ;;  %v4658_v37 = vsel %vm10600_vm11, %v10475_v1, %v4654_v2  ;;  %v10615_v19 = vld [vmem:[%s13785_s10 + $0x1] ss:$0 sm:$0xff]  ;;  %vm10629_vm15 = vmor %vm2928_vm9, %vm2929_vm12 }
 0x63c   : > { %14137 = vst [vmem:[#allocation60_spill] sm:$0xff] %v10615_v19  ;;  %v2934_v47 = vand.u32 2147483648, %v10469_v25  ;;  %v10624_v16 = vand.u32 2147483647, %v10594_v53  ;;  %v2932_v1 = vand.u32 2147483647, %v10469_v25  ;;  %vm4671_vm1 = vweird.f32 %v10554_v11 }
 0x63d   : > { %v2753_v44 = vpop.f32.mrf.mxu2  ;;  %v2927_v9 = vadd.f32 %v10526_v33, %v2926_v18  ;;  %v4808_v18 = vmul.f32 %v4792_v3, %v10543_v50  ;;  %v4676_v2 = vand.u32 2147483648, %v10477_v43  ;;  %v10634_v3 = vsel %vm4660_vm13, %v4662_v55, %v4658_v37  ;;  %vm10683_vm7 = vmor %vm4670_vm14, %vm4671_vm1 }
 0x63e   : > { %v10586_v34 = vpop.eup %7414  ;;  %v10618_v23 = vadd.f32 %v10615_v19, %v2753_v44  ;;  %v4777_v44 = vmul.f32 1.0614054, %v10598_v27  ;;  %v2935_v60 = vor.u32 1.1754944e-38, %v2934_v47  ;;  %vm10650_vm2 = vcmp.eq.f32.partialorder %v4674_v38, 8.507059e+37 }
 0x63f   : > { %v2939_v46 = vmul.f32 %v10586_v34, %v10537_v10  ;;  %v10607_v39 = vpop.eup %7416  ;;  %v2931_v25 = vsel %vm10629_vm15, %v10526_v33, %v2927_v9  ;;  %v10646_v62 = vadd.f32 1.4214138, %v4808_v18  ;;  %vm2933_vm3 = vcmp.eq.f32.partialorder %v2932_v1, 8.507059e+37 }
 0x640   : > { %v4681_v59 = vmul.f32 %v10607_v39, %v10546_v13  ;;  %v10644_v63 = vmul.f32 0.70710677, %v10618_v23  ;;  %v10648_v48 = vpop.eup %7418  ;;  %v2949_v33 = vand.u32 2147483648, %v10537_v10  ;;  %v4778_v9 = vmul.f32 1.0614054, %v10634_v3 }
 0x641   : > { %v2940_v26 = vsub.f32 1.0, %v2939_v46  ;;  %v4668_v46 = vmul.f32 %v10554_v11, %v4667_v40  ;;  %v2865_v40 = vmul.f32 0.3275911, %v10624_v16  ;;  %v10658_v58 = vsel %vm2933_vm3, %v2935_v60, %v2931_v25 }
 0x642   : > { %vm2944_vm4 = vweird.f32 %v10586_v34  ;;  %v2947_v47 = vand.u32 2147483647, %v10537_v10  ;;  %v4682_v18 = vsub.f32 1.0, %v4681_v59  ;;  %vm2943_vm5 = vweird.f32 %v10537_v10 }
 0x643   : > { %v2941_v37 = vmul.f32 %v10586_v34, %v2940_v26  ;;  %v4669_v38 = vadd.f32 %v10554_v11, %v4668_v46  ;;  %v4696_v26 = vmul.f32 %v10648_v48, %v10580_v0  ;;  %v10668_v1 = vand.u32 2147483647, %v10644_v63  ;;  %vm2945_vm6 = vmor %vm2943_vm5, %vm2944_vm4 }
 0x644   : > { %v4793_v25 = vadd.f32 -1.4531521, %v4777_v44  ;;  %v10673_v22 = vadd.f32 1.0, %v2865_v40  ;;  %v2950_v46 = vor.u32 1.1754944e-38, %v2949_v33  ;;  %v10677_v35 = vadd.f32 -1.4531521, %v4778_v9 }
 0x645   : > { %v2756_v31 = vpop.f32.mrf.mxu2  ;;  %v2942_v17 = vadd.f32 %v10586_v34, %v2941_v37  ;;  %v3135_v37 = vmul.f32 1.0614054, %v10658_v58  ;;  %vm2948_vm8 = vcmp.eq.f32.partialorder %v2947_v47, 8.507059e+37  ;;  %v4689_v40 = vand.u32 2147483647, %v10546_v13 }
 0x646   : > { %v10671_v60 = vadd.f32 %v10615_v19, %v2756_v31  ;;  %v4677_v31 = vor.u32 1.1754944e-38, %v4676_v2  ;;  %v4691_v43 = vand.u32 2147483648, %v10546_v13  ;;  %v4697_v9 = vsub.f32 1.0, %v4696_v26 }
 0x647   : > { %v2946_v59 = vsel %vm2945_vm6, %v10586_v34, %v2942_v17  ;;  %v4673_v17 = vsel %vm10683_vm7, %v10554_v11, %v4669_v38  ;;  %v4683_v34 = vmul.f32 %v10607_v39, %v4682_v18  ;;  %v2866_v57 = vmul.f32 0.3275911, %v10668_v1 }
 0x648   : > { %14142 = vst [vmem:[#allocation61_spill] sm:$0xff] %v10671_v60  ;;  %v10688_v44 = vmul.f32 0.70710677, %v10671_v60  ;;  %v10695_v33 = vsel %vm2948_vm8, %v2950_v46, %v2946_v59  ;;  %v10700_v2 = vmul.f32 %v4793_v25, %v10598_v27  ;;  %7420 = vrcp.f32 %v10673_v22 }
 0x649   : > { %v3136_v11 = vmul.f32 1.0614054, %v10695_v33  ;;  %v3151_v38 = vadd.f32 -1.4531521, %v3135_v37  ;;  %v10709_v18 = vsel %vm10650_vm2, %v4677_v31, %v4673_v17  ;;  %vm4685_vm10 = vweird.f32 %v10546_v13 }
 0x64a   : > { %v10704_v47 = vand.u32 2147483647, %v10688_v44  ;;  %vm4686_vm11 = vweird.f32 %v10607_v39  ;;  %v4706_v26 = vand.u32 2147483648, %v10580_v0  ;;  %v4684_v25 = vadd.f32 %v10607_v39, %v4683_v34 }
 0x64b   : > { %vm10715_vm12 = vcmp.eq.f32.partialorder %v4689_v40, 8.507059e+37  ;;  %v3279_v46 = vsub.f32 0.0, %v10450_v54  ;;  %v3152_v55 = vadd.f32 -1.4531521, %v3136_v11  ;;  %v4692_v31 = vor.u32 1.1754944e-38, %v4691_v43  ;;  %vm10735_vm13 = vmor %vm4685_vm10, %vm4686_vm11 }
 0x64c   : > { %v2867_v37 = vmul.f32 0.3275911, %v10704_v47  ;;  %v3280_v17 = vsub.f32 0.0, %v10498_v49  ;;  %v10722_v21 = vadd.f32 1.0, %v2866_v57  ;;  %v4698_v34 = vmul.f32 %v10648_v48, %v4697_v9 }
 0x64d   : > { %v2758_v10 = vpop.f32.mrf.mxu2  ;;  %vm4700_vm9 = vweird.f32 %v10580_v0  ;;  %v3167_v40 = vmul.f32 %v3151_v38, %v10658_v58  ;;  %v3168_v36 = vmul.f32 %v3152_v55, %v10695_v33  ;;  %v10740_v11 = vor.u32 1.1754944e-38, %v4706_v26 }
 0x64e   : > { %v10725_v56 = vadd.f32 %v10615_v19, %v2758_v10  ;;  %v3281_v9 = vsub.f32 0.0, %v10624_v16  ;;  %v10743_v10 = vadd.f32 1.0, %v2867_v37  ;;  %v10745_v38 = vpop.eup %7420  ;;  %v4688_v55 = vsel %vm10735_vm13, %v10607_v39, %v4684_v25 }
 0x64f   : > { %v2429_v19 = vpop.xlane.xlu2 %2428  ;;  %vm4701_vm14 = vweird.f32 %v10648_v48  ;;  %v3295_v13 = vmul.f32 %v3279_v46, %v10450_v54  ;;  %v3296_v26 = vmul.f32 %v3280_v17, %v10498_v49  ;;  %7422 = vrcp.f32 %v10722_v21  ;;  %v4408_v17 = vpop.f32.mrf.mxu0 }
 0x650   : > { %14147 = vst [vmem:[#allocation62_spill] sm:$0xff] %v10725_v56  ;;  %v2451_v61 = vmul.f32 %v2429_v19, %v8012_v24  ;;  %v3282_v37 = vsub.f32 0.0, %v10668_v1  ;;  %v10757_v57 = vmul.f32 0.70710677, %v10725_v56  ;;  %v10760_v29 = vadd.f32 %v10648_v48, %v4698_v34  ;;  %vm10782_vm1 = vmor %vm4700_vm9, %vm4701_vm14 }
 0x651   : > { %v3183_v39 = vadd.f32 1.4214138, %v3167_v40  ;;  %v3184_v25 = vadd.f32 1.4214138, %v3168_v36  ;;  %v2954_v54 = vmul.f32 %v10745_v38, %v10673_v22  ;;  %v3297_v19 = vmul.f32 %v3281_v9, %v10624_v16 }
 0x652   : > { %v10762_v43 = vadd.f32 1e-05, %v2451_v61  ;;  %7424 = vrcp.f32 %v10743_v10  ;;  %v10769_v49 = vand.u32 2147483647, %v10757_v57  ;;  %vm2815_vm15 = vcmp.ge.f32.partialorder %v10437_v8, 0.0 }
 0x653   : > { %v3313_v46 = vmul.f32 1.442695, %v3295_v13  ;;  %v3199_v61 = vmul.f32 %v3183_v39, %v10658_v58  ;;  %v10776_v36 = vsel %vm10715_vm12, %v4692_v31, %v4688_v55  ;;  %v3315_v34 = vmul.f32 1.442695, %v3296_v26 }
 0x654   : > { %7426 = vrsqrt.f32 %v10762_v43  ;;  %v3298_v8 = vmul.f32 %v3282_v37, %v10668_v1  ;;  %v2868_v40 = vmul.f32 0.3275911, %v10769_v49  ;;  %v10793_v31 = vmul.f32 0.5, %v10431_v51 }
 0x655   : > { %v3200_v9 = vmul.f32 %v3184_v25, %v10695_v33  ;;  %v3215_v55 = vadd.f32 -0.28449672, %v3199_v61  ;;  %v10796_v13 = vpop.eup %7422  ;;  %v2831_v39 = vsel %vm2815_vm15, 1.0, %v13999_v42  ;;  %v10800_v26 = vadd.f32 %v10319_v41, %v4408_v17 }
 0x656   : > { %v2955_v1 = vsub.f32 1.0, %v2954_v54  ;;  %v3317_v37 = vmul.f32 1.442695, %v3297_v19  ;;  %7428 = vpow2.f32 %v3313_v46  ;;  %v10802_v4 = vadd.f32 1.0, %v2868_v40 }
 0x657   : > { %14152 = vst [vmem:[#allocation63_spill] sm:$0xff] %v10800_v26  ;;  %v2432_v60 = vpop.xlane.xlu0 %2431  ;;  %v3216_v59 = vadd.f32 -0.28449672, %v3200_v9  ;;  %v3231_v51 = vmul.f32 %v3215_v55, %v10658_v58  ;;  %v10808_v25 = vmul.f32 0.5, %v10472_v45  ;;  %vm2816_vm2 = vcmp.ge.f32.partialorder %v10486_v7, 0.0 }
 0x658   : > { %v10805_v28 = vpop.eup %7424  ;;  %7430 = vpow2.f32 %v3315_v34  ;;  %v3319_v61 = vmul.f32 1.442695, %v3298_v8  ;;  %v2969_v54 = vmul.f32 %v10796_v13, %v10722_v21  ;;  %v2452_v19 = vmul.f32 %v2432_v60, %v8012_v24 }
 0x659   : > { %v3232_v46 = vmul.f32 %v3216_v59, %v10695_v33  ;;  %v3247_v40 = vadd.f32 0.2548296, %v3231_v51  ;;  %v10816_v9 = vmul.f32 0.70710677, %v10800_v26  ;;  %v2956_v55 = vmul.f32 %v10745_v38, %v2955_v1 }
 0x65a   : > { %v7427_v17 = vpop.eup %7426  ;;  %7432 = vpow2.f32 %v3317_v37  ;;  %v2984_v34 = vmul.f32 %v10805_v28, %v10743_v10  ;;  %v10823_v8 = vadd.f32 1e-05, %v2452_v19  ;;  %v2832_v60 = vsel %vm2816_vm2, 1.0, %v13999_v42 }
 0x65b   : > { %v2592_v45 = vmul.f32 %v7427_v17, %v10762_v43  ;;  %7434 = vrcp.f32 %v10802_v4  ;;  %v3248_v56 = vadd.f32 0.2548296, %v3232_v46  ;;  %v3263_v51 = vmul.f32 %v3247_v40, %v10658_v58 }
 0x65c   : > { %7436 = vpow2.f32 %v3319_v61  ;;  %v7429_v1 = vpop.eup %7428  ;;  %vm2958_vm3 = vweird.f32 %v10673_v22  ;;  %v2970_v37 = vsub.f32 1.0, %v2969_v54  ;;  %v2957_v15 = vadd.f32 %v10745_v38, %v2956_v55 }
 0x65d   : > { %v2593_v59 = vmul.f32 %v7427_v17, %v2592_v45  ;;  %7438 = vrsqrt.f32 %v10823_v8  ;;  %v3264_v26 = vmul.f32 %v3248_v56, %v10695_v33  ;;  %v3343_v46 = vmul.f32 %v7429_v1, %v3263_v51 }
 0x65e   : > { %v7431_v6 = vpop.eup %7430  ;;  %vm2959_vm4 = vweird.f32 %v10745_v38  ;;  %v2985_v7 = vsub.f32 1.0, %v2984_v34  ;;  %v2962_v40 = vand.u32 2147483647, %v10673_v22  ;;  %vm2598_vm5 = vweird.f32 %v7427_v17 }
 0x65f   : > { %v2594_v19 = vmul.f32 0.5, %v2593_v59  ;;  %v2435_v30 = vpop.xlane.xlu1 %2434  ;;  %v3344_v58 = vmul.f32 %v7431_v6, %v3264_v26  ;;  %v3359_v52 = vsub.f32 1.0, %v3343_v46  ;;  %v2964_v56 = vand.u32 2147483648, %v10673_v22  ;;  %vm10846_vm6 = vmor %vm2958_vm3, %vm2959_vm4 }
 0x660   : > { %v2453_v61 = vmul.f32 %v2435_v30, %v8012_v24  ;;  %v10836_v45 = vpop.eup %7432  ;;  %v3283_v59 = vsub.f32 0.0, %v10704_v47  ;;  %v2971_v6 = vmul.f32 %v10796_v13, %v2970_v37  ;;  %vm2597_vm7 = vweird.f32 %v10762_v43 }
 0x661   : > { %v2595_v54 = vsub.f32 1.5, %v2594_v19  ;;  %v10839_v33 = vpop.eup %7434  ;;  %v3360_v51 = vsub.f32 1.0, %v3344_v58  ;;  %v3375_v1 = vmul.f32 %v3359_v52, %v2831_v39  ;;  %v2961_v19 = vsel %vm10846_vm6, %v10745_v38, %v2957_v15  ;;  %vm2599_vm8 = vmor %vm2597_vm7, %vm2598_vm5  ;;  %v14157_v38 = vld [vmem:[#allocation46_spill] sm:$0xff] }
 0x662   : > { %v10842_v55 = vadd.f32 1e-05, %v2453_v61  ;;  %v10851_v26 = vpop.eup %7436  ;;  %v2986_v61 = vmul.f32 %v10805_v28, %v2985_v7  ;;  %vm10860_vm10 = vcmp.eq.f32.partialorder %v2962_v40, 8.507059e+37  ;;  %v2999_v52 = vmul.f32 %v10839_v33, %v10802_v4 }
 0x663   : > { %v2596_v34 = vmul.f32 %v7427_v17, %v2595_v54  ;;  %v7439_v46 = vpop.eup %7438  ;;  %v3376_v22 = vmul.f32 %v3360_v51, %v2832_v60  ;;  %vm2607_vm11 = vweird.f32 %v10823_v8  ;;  %v2965_v15 = vor.u32 1.1754944e-38, %v2964_v56 }
 0x664   : > { %7440 = vrsqrt.f32 %v10842_v55  ;;  %v2602_v43 = vmul.f32 %v7439_v46, %v10823_v8  ;;  %vm2988_vm12 = vweird.f32 %v10743_v10  ;;  %v3391_v54 = vadd.f32 1.0, %v3375_v1  ;;  %v14162_v8 = vld [vmem:[#allocation51_spill] sm:$0xff] }
 0x665   : > { %v2600_v58 = vsel %vm2599_vm8, %v7427_v17, %v2596_v34  ;;  %v3392_v60 = vadd.f32 1.0, %v3376_v22  ;;  %v2972_v40 = vadd.f32 %v10796_v13, %v2971_v6  ;;  %vm2973_vm9 = vweird.f32 %v10722_v21 }
 0x666   : > { %v2643_v39 = vmul.f32 %v2600_v58, %v14157_v38  ;;  %v2603_v51 = vmul.f32 %v7439_v46, %v2602_v43  ;;  %vm2974_vm13 = vweird.f32 %v10796_v13  ;;  %v3407_v30 = vmul.f32 %v3391_v54, %v10793_v31 }
 0x667   : > { %v2438_v7 = vpop.xlane.xlu2 %2437  ;;  %v3408_v56 = vmul.f32 %v3392_v60, %v10808_v25  ;;  %v2977_v58 = vand.u32 2147483647, %v10722_v21  ;;  %v3000_v38 = vsub.f32 1.0, %v2999_v52  ;;  %v10882_v6 = vsel %vm10860_vm10, %v2965_v15, %v2961_v19  ;;  %vm10884_vm14 = vmor %vm2973_vm9, %vm2974_vm13 }
 0x668   : > { %v2454_v17 = vmul.f32 %v2438_v7, %v8012_v24  ;;  %v2660_v34 = vmul.f32 %v10371_v12, %v2643_v39  ;;  %v2604_v1 = vmul.f32 0.5, %v2603_v51  ;;  %vm2608_vm15 = vweird.f32 %v7439_v46 }
 0x669   : > { %v3422_v31 = vpack.c.bf16 %v3408_v56, %v3407_v30  ;;  %v2976_v25 = vsel %vm10884_vm14, %v10796_v13, %v2972_v40  ;;  %v2979_v52 = vand.u32 2147483648, %v10722_v21  ;;  %vm2978_vm2 = vcmp.eq.f32.partialorder %v2977_v58, 8.507059e+37  ;;  %vm2609_vm4 = vmor %vm2607_vm11, %vm2608_vm15 }
 0x66a   : > { %v10878_v22 = vadd.f32 1e-05, %v2454_v17  ;;  %v10888_v7 = vpop.eup %7440  ;;  %v2605_v39 = vsub.f32 1.5, %v2604_v1  ;;  %v2677_v19 = vadd.f32 %v10398_v20, %v2660_v34  ;;  %v3137_v54 = vmul.f32 1.0614054, %v10882_v6 }
 0x66b   : > { %v2612_v37 = vmul.f32 %v10888_v7, %v10842_v55  ;;  %3509 = vmatmul.bf16.gmra.mxu3 %v3422_v31  ;;  %v2980_v15 = vor.u32 1.1754944e-38, %v2979_v52  ;;  %v2987_v60 = vadd.f32 %v10805_v28, %v2986_v61  ;;  %vm2989_vm3 = vweird.f32 %v10805_v28 }
 0x66c   : > { %7442 = vrsqrt.f32 %v10878_v22  ;;  %v2606_v51 = vmul.f32 %v7439_v46, %v2605_v39  ;;  %v2992_v21 = vand.u32 2147483647, %v10743_v10  ;;  %v3153_v17 = vadd.f32 -1.4531521, %v3137_v54  ;;  %vm10914_vm6 = vmor %vm2988_vm12, %vm2989_vm3 }
 0x66d   : > { %v2613_v13 = vmul.f32 %v10888_v7, %v2612_v37  ;;  %v10906_v40 = vsel %vm2978_vm2, %v2980_v15, %v2976_v25  ;;  %v2994_v30 = vand.u32 2147483648, %v10743_v10  ;;  %v3001_v56 = vmul.f32 %v10839_v33, %v3000_v38 }
 0x66e   : > { %v2610_v34 = vsel %vm2609_vm4, %v7439_v46, %v2606_v51  ;;  %vm2618_vm5 = vweird.f32 %v10888_v7  ;;  %v3138_v58 = vmul.f32 1.0614054, %v10906_v40  ;;  %v3169_v31 = vmul.f32 %v3153_v17, %v10882_v6 }
 0x66f   : > { %v2614_v61 = vmul.f32 0.5, %v2613_v13  ;;  %v2644_v43 = vmul.f32 %v2610_v34, %v14162_v8  ;;  %v2991_v38 = vsel %vm10914_vm6, %v10805_v28, %v2987_v60  ;;  %vm2993_vm7 = vcmp.eq.f32.partialorder %v2992_v21, 8.507059e+37 }
 0x670   : > { %v3154_v52 = vadd.f32 -1.4531521, %v3138_v58  ;;  %v2995_v39 = vor.u32 1.1754944e-38, %v2994_v30  ;;  %v3002_v37 = vadd.f32 %v10839_v33, %v3001_v56  ;;  %v3185_v54 = vadd.f32 1.4214138, %v3169_v31 }
 0x671   : > { %v2615_v25 = vsub.f32 1.5, %v2614_v61  ;;  %v2661_v15 = vmul.f32 %v10371_v12, %v2644_v43  ;;  %vm3003_vm8 = vweird.f32 %v10802_v4  ;;  %vm3004_vm10 = vweird.f32 %v10839_v33 }
 0x672   : > { %v7443_v46 = vpop.eup %7442  ;;  %v3170_v13 = vmul.f32 %v3154_v52, %v10906_v40  ;;  %v10929_v17 = vsel %vm2993_vm7, %v2995_v39, %v2991_v38  ;;  %v3201_v21 = vmul.f32 %v3185_v54, %v10882_v6  ;;  %v3007_v30 = vand.u32 2147483647, %v10802_v4  ;;  %vm10937_vm12 = vmor %vm3003_vm8, %vm3004_vm10  ;;  %v4410_v39 = vpop.f32.mrf.mxu0 }
 0x673   : > { %v2622_v10 = vmul.f32 %v7443_v46, %v10878_v22  ;;  %v2616_v51 = vmul.f32 %v10888_v7, %v2615_v25  ;;  %v2678_v60 = vadd.f32 %v10398_v20, %v2661_v15  ;;  %v3284_v56 = vsub.f32 0.0, %v10769_v49 }
 0x674   : > { %vm2617_vm11 = vweird.f32 %v10842_v55  ;;  %v3186_v34 = vadd.f32 1.4214138, %v3170_v13  ;;  %v3009_v58 = vand.u32 2147483648, %v10802_v4  ;;  %v3217_v31 = vadd.f32 -0.28449672, %v3201_v21 }
 0x675   : > { %v2623_v28 = vmul.f32 %v7443_v46, %v2622_v10  ;;  %vm10944_vm9 = vmor %vm2617_vm11, %vm2618_vm5  ;;  %v2687_v43 = vpack.c.bf16 %v2678_v60, %v2677_v19  ;;  %v3006_v55 = vsel %vm10937_vm12, %v10839_v33, %v3002_v37  ;;  %v3139_v52 = vmul.f32 1.0614054, %v10929_v17 }
 0x676   : > { %v2620_v38 = vsel %vm10944_vm9, %v10888_v7, %v2616_v51  ;;  %v3202_v25 = vmul.f32 %v3186_v34, %v10906_v40  ;;  %v3010_v4 = vor.u32 1.1754944e-38, %v3009_v58  ;;  %vm2628_vm13 = vweird.f32 %v7443_v46  ;;  %v14170_v51 = vld [vmem:[#allocation52_spill] sm:$0xff] }
 0x677   : > { %v2624_v8 = vmul.f32 0.5, %v2623_v28  ;;  %7065 = vmatmul.msk.bf16.gmra.mxu2 %vm1021_vm0, %v2687_v43  ;;  %v3233_v19 = vmul.f32 %v3217_v31, %v10882_v6  ;;  %vm3008_vm14 = vcmp.eq.f32.partialorder %v3007_v30, 8.507059e+37  ;;  %vm2627_vm15 = vweird.f32 %v10878_v22 }
 0x678   : > { %v3218_v33 = vadd.f32 -0.28449672, %v3202_v25  ;;  %v10959_v37 = vsel %vm3008_vm14, %v3010_v4, %v3006_v55  ;;  %v3155_v15 = vadd.f32 -1.4531521, %v3139_v52  ;;  %v14167_v7 = vand.u32 2147483647, %v10580_v0  ;;  %vm2629_vm3 = vmor %vm2627_vm15, %vm2628_vm13 }
 0x679   : > { %v2625_v10 = vsub.f32 1.5, %v2624_v8  ;;  %v2645_v13 = vmul.f32 %v2620_v38, %v14170_v51  ;;  %v3249_v60 = vadd.f32 0.2548296, %v3233_v19  ;;  %v3140_v21 = vmul.f32 1.0614054, %v10959_v37 }
 0x67a   : > { %vm10963_vm2 = vcmp.eq.f32.partialorder %v14167_v7, 8.507059e+37  ;;  %v10970_v30 = vand.u32 2147483647, %v10816_v9  ;;  %v10973_v22 = vadd.f32 %v10319_v41, %v4410_v39  ;;  %v3234_v0 = vmul.f32 %v3218_v33, %v10906_v40 }
 0x67b   : > { %v2626_v28 = vmul.f32 %v7443_v46, %v2625_v10  ;;  %v3171_v34 = vmul.f32 %v3155_v15, %v10929_v17  ;;  %vm2817_vm4 = vcmp.ge.f32.partialorder %v10594_v53, 0.0  ;;  %v3265_v58 = vmul.f32 %v3249_v60, %v10882_v6 }
 0x67c   : > { %v3156_v1 = vadd.f32 -1.4531521, %v3140_v21  ;;  %v3299_v8 = vmul.f32 %v3283_v59, %v10704_v47  ;;  %v3300_v43 = vmul.f32 %v3284_v56, %v10769_v49  ;;  %v3250_v31 = vadd.f32 0.2548296, %v3234_v0 }
 0x67d   : > { %v2630_v61 = vsel %vm2629_vm3, %v7443_v46, %v2626_v28  ;;  %v3345_v55 = vmul.f32 %v10836_v45, %v3265_v58  ;;  %v2662_v38 = vmul.f32 %v10371_v12, %v2645_v13  ;;  %v3187_v53 = vadd.f32 1.4214138, %v3171_v34 }
 0x67e   : > { %v2646_v41 = vmul.f32 %v2630_v61, %v10128_v5  ;;  %v3172_v25 = vmul.f32 %v3156_v1, %v10959_v37  ;;  %v10989_v46 = vmul.f32 0.70710677, %v10973_v22  ;;  %v2833_v6 = vsel %vm2817_vm4, 1.0, %v13999_v42 }
 0x67f   : > { %v3266_v4 = vmul.f32 %v3250_v31, %v10906_v40  ;;  %vm2818_vm5 = vcmp.ge.f32.partialorder %v10644_v63, 0.0  ;;  %v3361_v5 = vsub.f32 1.0, %v3345_v55  ;;  %v3203_v45 = vmul.f32 %v3187_v53, %v10929_v17 }
 0x680   : > { %v2663_v47 = vmul.f32 %v10371_v12, %v2646_v41  ;;  %v3188_v49 = vadd.f32 1.4214138, %v3172_v25  ;;  %v3321_v59 = vmul.f32 1.442695, %v3299_v8  ;;  %v3323_v56 = vmul.f32 1.442695, %v3300_v43 }
 0x681   : > { %v3346_v52 = vmul.f32 %v10851_v26, %v3266_v4  ;;  %v3377_v10 = vmul.f32 %v3361_v5, %v2833_v6  ;;  %v2679_v19 = vadd.f32 %v10398_v20, %v2662_v38  ;;  %v3219_v40 = vadd.f32 -0.28449672, %v3203_v45 }
 0x682   : > { %v2680_v39 = vadd.f32 %v10398_v20, %v2663_v47  ;;  %v3204_v33 = vmul.f32 %v3188_v49, %v10959_v37  ;;  %v4779_v12 = vmul.f32 1.0614054, %v10709_v18  ;;  %v14171_v15 = vsel %vm10782_vm1, %v10648_v48, %v10760_v29  ;;  %v11036_v47 = vpop.f32.mrf.mxu0 }
 0x683   : > { %v11009_v7 = vsel %vm10963_vm2, %v10740_v11, %v14171_v15  ;;  %v4510_v26 = vmul.f32 0.3275911, %v10970_v30  ;;  %v3362_v51 = vsub.f32 1.0, %v3346_v52  ;;  %v4810_v20 = vmul.f32 %v10677_v35, %v10634_v3 }
 0x684   : > { %v2688_v13 = vpack.c.bf16 %v2680_v39, %v2679_v19  ;;  %v3220_v28 = vadd.f32 -0.28449672, %v3204_v33  ;;  %v3235_v60 = vmul.f32 %v3219_v40, %v10929_v17  ;;  %v4780_v16 = vmul.f32 1.0614054, %v10776_v36  ;;  %v14173_v19 = vld [vmem:[#allocation56_spill] sm:$0xff] }
 0x685   : > { %v11017_v21 = vand.u32 2147483647, %v10989_v46  ;;  %v2834_v48 = vsel %vm2818_vm5, 1.0, %v13999_v42  ;;  %7444 = vpow2.f32 %v3321_v59  ;;  %v4781_v29 = vmul.f32 1.0614054, %v11009_v7 }
 0x686   : > { %7446 = vpow2.f32 %v3323_v56  ;;  %v3378_v11 = vmul.f32 %v3362_v51, %v2834_v48  ;;  %v3393_v54 = vadd.f32 1.0, %v3377_v10  ;;  %v4795_v35 = vadd.f32 -1.4531521, %v4779_v12 }
 0x687   : > { %v11023_v0 = vadd.f32 1.0, %v4510_v26  ;;  %v3236_v34 = vmul.f32 %v3220_v28, %v10959_v37  ;;  %v4825_v61 = vadd.f32 1.4214138, %v10700_v2  ;;  %v2785_v58 = vmul.f32 0.5, %v10567_v32  ;;  %7066 = vmatmul.msk.bf16.gmra.mxu2 %vm1021_vm0, %v2688_v13  ;;  %v14175_v26 = vld [vmem:[#allocation53_spill] sm:$0xff] }
 0x688   : > { %v2786_v1 = vmul.f32 0.5, %v10618_v23  ;;  %v3394_v8 = vadd.f32 1.0, %v3378_v11  ;;  %v3251_v63 = vadd.f32 0.2548296, %v3235_v60  ;;  %v14172_v43 = vsub.f32 0.0, %v10271_v14 }
 0x689   : > { %v4796_v31 = vadd.f32 -1.4531521, %v4780_v16  ;;  %v4511_v55 = vmul.f32 0.3275911, %v11017_v21  ;;  %v3252_v38 = vadd.f32 0.2548296, %v3236_v34  ;;  %v3409_v53 = vmul.f32 %v3393_v54, %v2785_v58 }
 0x68a   : > { %v4936_v41 = vmul.f32 %v14172_v43, %v10271_v14  ;;  %v4797_v25 = vadd.f32 -1.4531521, %v4781_v29  ;;  %v3410_v6 = vmul.f32 %v3394_v8, %v2786_v1  ;;  %v3267_v2 = vmul.f32 %v3251_v63, %v10929_v17  ;;  %v14177_v58 = vld [vmem:[#allocation37_spill] sm:$0xff]  ;;  %v14178_v43 = vld [vmem:[#allocation62_spill] sm:$0xff] }
 0x68b   : > { %v7445_v32 = vpop.eup %7444  ;;  %v4826_v4 = vadd.f32 1.4214138, %v4810_v20  ;;  %v4811_v23 = vmul.f32 %v4795_v35, %v10709_v18  ;;  %v3268_v5 = vmul.f32 %v3252_v38, %v10959_v37  ;;  %v4840_v14 = vmul.f32 %v10646_v62, %v10543_v50  ;;  %v14179_v38 = vld [vmem:[#allocation54_spill] sm:$0xff] }
 0x68c   : > { %v7447_v49 = vpop.eup %7446  ;;  %7448 = vrcp.f32 %v11023_v0  ;;  %vm2819_vm1 = vcmp.ge.f32.partialorder %v10688_v44, 0.0  ;;  %v3423_v45 = vpack.c.bf16 %v3410_v6, %v3409_v53  ;;  %v3347_v59 = vmul.f32 %v7445_v32, %v3267_v2  ;;  %v4415_v2 = vpop.f32.mrf.mxu0 }
 0x68d   : > { %v4958_v56 = vmul.f32 1.442695, %v4936_v41  ;;  %v4812_v17 = vmul.f32 %v4796_v31, %v10776_v36  ;;  %v11044_v52 = vadd.f32 1.0, %v4511_v55  ;;  %v3348_v39 = vmul.f32 %v7447_v49, %v3268_v5 }
 0x68e   : > { %v4813_v10 = vmul.f32 %v4797_v25, %v11009_v7  ;;  %vm2820_vm6 = vcmp.ge.f32.partialorder %v10757_v57, 0.0  ;;  %3514 = vmatmul.bf16.gmra.mxu3 %v3423_v45  ;;  %v3363_v37 = vsub.f32 1.0, %v3347_v59  ;;  %v4841_v62 = vmul.f32 %v4825_v61, %v10598_v27  ;;  %v14176_v57 = vld [vmem:[#allocation48_spill] sm:$0xff] }
 0x68f   : > { %v14174_v33 = vsub.f32 0.0, %v14173_v19  ;;  %v4842_v40 = vmul.f32 %v4826_v4, %v10634_v3  ;;  %v2835_v12 = vsel %vm2819_vm1, 1.0, %v13999_v42  ;;  %v4856_v15 = vadd.f32 -0.28449672, %v4840_v14  ;;  %v14180_v4 = vld [vmem:[#allocation61_spill] sm:$0xff]  ;;  %v14181_v59 = vld [vmem:[#allocation44_spill] sm:$0xff] }
 0x690   : > { %v11055_v51 = vmul.f32 0.5, %v14175_v26  ;;  %v4827_v20 = vadd.f32 1.4214138, %v4811_v23  ;;  %v3364_v13 = vsub.f32 1.0, %v3348_v39  ;;  %v3379_v28 = vmul.f32 %v3363_v37, %v2835_v12 }
 0x691   : > { %v4937_v44 = vmul.f32 %v14174_v33, %v14173_v19  ;;  %v4922_v60 = vsub.f32 0.0, %v14176_v57  ;;  %v4828_v16 = vadd.f32 1.4214138, %v4812_v17  ;;  %7450 = vrcp.f32 %v11044_v52 }
 0x692   : > { %v2836_v48 = vsel %vm2820_vm6, 1.0, %v13999_v42  ;;  %v11060_v29 = vpop.eup %7448  ;;  %7452 = vpow2.f32 %v4958_v56  ;;  %v4829_v11 = vadd.f32 1.4214138, %v4813_v10  ;;  %v4857_v35 = vadd.f32 -0.28449672, %v4841_v62 }
 0x693   : > { %v3380_v54 = vmul.f32 %v3364_v13, %v2836_v48  ;;  %v4960_v34 = vmul.f32 1.442695, %v4937_v44  ;;  %v4858_v61 = vadd.f32 -0.28449672, %v4842_v40  ;;  %v4923_v1 = vsub.f32 0.0, %v14177_v58  ;;  %v14182_v44 = vld [vmem:[#allocation45_spill] sm:$0xff] }
 0x694   : > { %v4872_v8 = vmul.f32 %v4856_v15, %v10543_v50  ;;  %v4843_v63 = vmul.f32 %v4827_v20, %v10709_v18  ;;  %v2788_v41 = vmul.f32 0.5, %v14178_v43  ;;  %v3395_v31 = vadd.f32 1.0, %v3379_v28  ;;  %v7696_v62 = vld [vmem:[%s13785_s10] ss:$0 sm:$0xff]  ;;  %v14185_v20 = vld [vmem:[#allocation39_spill] sm:$0xff] }
 0x695   : > { %v3396_v55 = vadd.f32 1.0, %v3380_v54  ;;  %vm4457_vm7 = vcmp.ge.f32.partialorder %v14179_v38, 0.0  ;;  %v4938_v25 = vmul.f32 %v4922_v60, %v14176_v57  ;;  %v4844_v53 = vmul.f32 %v4828_v16, %v10776_v36  ;;  %v14183_v40 = vld [vmem:[#allocation38_spill] sm:$0xff] }
 0x696   : > { %v4711_v6 = vmul.f32 %v11060_v29, %v11023_v0  ;;  %v4845_v32 = vmul.f32 %v4829_v11, %v11009_v7  ;;  %v2787_v23 = vmul.f32 0.5, %v14180_v4  ;;  %v4873_v14 = vmul.f32 %v4857_v35, %v10598_v27  ;;  %v14186_v11 = vld [vmem:[#allocation57_spill] sm:$0xff] }
 0x697   : > { %v3412_v5 = vmul.f32 %v3396_v55, %v2788_v41  ;;  %v11074_v49 = vpop.eup %7450  ;;  %7454 = vpow2.f32 %v4960_v34  ;;  %v4939_v45 = vmul.f32 %v4923_v1, %v14177_v58  ;;  %v4925_v56 = vsub.f32 0.0, %v14181_v59 }
 0x698   : > { %v4888_v17 = vadd.f32 0.2548296, %v4872_v8  ;;  %v7453_v39 = vpop.eup %7452  ;;  %v4874_v10 = vmul.f32 %v4858_v61, %v10634_v3  ;;  %v4859_v37 = vadd.f32 -0.28449672, %v4843_v63  ;;  %v11082_v19 = vadd.f32 %v7696_v62, %v4415_v2 }
 0x699   : > { %v3411_v33 = vmul.f32 %v3395_v31, %v2787_v23  ;;  %v14184_v12 = vpack.c.bf16 %v14182_v44, %v14183_v40  ;;  %v4962_v15 = vmul.f32 1.442695, %v4938_v25  ;;  %v4860_v26 = vadd.f32 -0.28449672, %v4844_v53 }
 0x69a   : > { %v4924_v13 = vsub.f32 0.0, %v14185_v20  ;;  %v4712_v28 = vsub.f32 1.0, %v4711_v6  ;;  %v4861_v57 = vadd.f32 -0.28449672, %v4845_v32  ;;  %v4726_v60 = vmul.f32 %v11074_v49, %v11044_v52 }
 0x69b   : > { %5074 = vmatmul.bf16.vlgmr.msrb.gmra.mxu2 %v14184_v12  ;;  %v3424_v16 = vpack.c.bf16 %v3412_v5, %v3411_v33  ;;  %v4889_v48 = vadd.f32 0.2548296, %v4873_v14  ;;  %vm4458_vm8 = vcmp.ge.f32.partialorder %v14186_v11, 0.0  ;;  %v4964_v54 = vmul.f32 1.442695, %v4939_v45  ;;  %v14190_v11 = vld [vmem:[#allocation36_spill] sm:$0xff] }
 0x69c   : > { %v4941_v35 = vmul.f32 %v4925_v56, %v14181_v59  ;;  %v4904_v34 = vmul.f32 %v4888_v17, %v10543_v50  ;;  %v4890_v61 = vadd.f32 0.2548296, %v4874_v10  ;;  %v4875_v58 = vmul.f32 %v4859_v37, %v10709_v18  ;;  %v14187_v37 = vld [vmem:[#allocation60_spill] sm:$0xff] }
 0x69d   : > { %v11095_v1 = vadd.f32 %v7696_v62, %v11036_v47  ;;  %v11098_v8 = vmul.f32 0.70710677, %v11082_v19  ;;  %v7455_v63 = vpop.eup %7454  ;;  %7456 = vpow2.f32 %v4962_v15  ;;  %v4876_v43 = vmul.f32 %v4860_v26, %v10776_v36 }
 0x69e   : > { %v4940_v41 = vmul.f32 %v4924_v13, %v14185_v20  ;;  %v4713_v31 = vmul.f32 %v11060_v29, %v4712_v28  ;;  %v11106_v50 = vsel %vm4457_vm7, 1.0, %v13999_v42  ;;  %v4877_v55 = vmul.f32 %v4861_v57, %v11009_v7  ;;  %3519 = vmatmul.bf16.gmra.mxu3 %v3424_v16 }
 0x69f   : > { %v4727_v47 = vsub.f32 1.0, %v4726_v60  ;;  %v4905_v25 = vmul.f32 %v4889_v48, %v10598_v27  ;;  %v11113_v53 = vsel %vm4458_vm8, 1.0, %v13999_v42  ;;  %7458 = vpow2.f32 %v4964_v54  ;;  %v14191_v54 = vld [vmem:[#allocation49_spill] sm:$0xff] }
 0x6a0   : > { %v4968_v6 = vmul.f32 1.442695, %v4941_v35  ;;  %v11115_v2 = vmul.f32 %v7453_v39, %v4904_v34  ;;  %v4906_v32 = vmul.f32 %v4890_v61, %v10634_v3  ;;  %v4891_v38 = vadd.f32 0.2548296, %v4875_v58  ;;  %v14193_v61 = vld [vmem:[#allocation41_spill] sm:$0xff] }
 0x6a1   : > { %v11119_v4 = vmul.f32 0.70710677, %v11095_v1  ;;  %v11122_v23 = vand.u32 2147483647, %v11098_v8  ;;  %v4892_v5 = vadd.f32 0.2548296, %v4876_v43  ;;  %v4714_v14 = vadd.f32 %v11060_v29, %v4713_v31 }
 0x6a2   : > { %v4966_v27 = vmul.f32 1.442695, %v4940_v41  ;;  %vm4716_vm10 = vweird.f32 %v11060_v29  ;;  %v4893_v45 = vadd.f32 0.2548296, %v4877_v55  ;;  %v4721_v59 = vand.u32 2147483648, %v11023_v0 }
 0x6a3   : > { %v4728_v56 = vmul.f32 %v11074_v49, %v4727_v47  ;;  %v4985_v3 = vmul.f32 %v7455_v63, %v4905_v25  ;;  %v7457_v39 = vpop.eup %7456  ;;  %7460 = vpow2.f32 %v4968_v6  ;;  %vm4715_vm11 = vweird.f32 %v11023_v0 }
 0x6a4   : > { %v4719_v10 = vand.u32 2147483647, %v11023_v0  ;;  %v4986_v33 = vmul.f32 %v7457_v39, %v4906_v32  ;;  %v4907_v44 = vmul.f32 %v4891_v38, %v10709_v18  ;;  %vm11134_vm12 = vmor %vm4715_vm11, %vm4716_vm10  ;;  %v11139_v12 = vand.u32 2147483647, %v11119_v4 }
 0x6a5   : > { %v4513_v15 = vmul.f32 0.3275911, %v11122_v23  ;;  %v7459_v26 = vpop.eup %7458  ;;  %v4908_v20 = vmul.f32 %v4892_v5, %v10776_v36  ;;  %7462 = vpow2.f32 %v4966_v27  ;;  %v4718_v0 = vsel %vm11134_vm12, %v11060_v29, %v4714_v14 }
 0x6a6   : > { %v4909_v18 = vmul.f32 %v4893_v45, %v11009_v7  ;;  %v4722_v28 = vor.u32 1.1754944e-38, %v4721_v59  ;;  %v4729_v57 = vadd.f32 %v11074_v49, %v4728_v56  ;;  %vm4731_vm9 = vweird.f32 %v11074_v49 }
 0x6a7   : > { %vm4720_vm13 = vcmp.eq.f32.partialorder %v4719_v10, 8.507059e+37  ;;  %vm4730_vm14 = vweird.f32 %v11044_v52  ;;  %v4736_v36 = vand.u32 2147483648, %v11044_v52  ;;  %v4734_v29 = vand.u32 2147483647, %v11044_v52 }
 0x6a8   : > { %v2761_v17 = vpop.f32.mrf.mxu2  ;;  %v11157_v16 = vsel %vm4720_vm13, %v4722_v28, %v4718_v0  ;;  %v4512_v48 = vmul.f32 0.3275911, %v11139_v12  ;;  %v11161_v7 = vadd.f32 1.0, %v4513_v15  ;;  %v14192_v35 = vpack.c.bf16 %v14190_v11, %v14191_v54  ;;  %vm11167_vm2 = vmor %vm4730_vm14, %vm4731_vm9  ;;  %v14199_v0 = vld [vmem:[#allocation55_spill] sm:$0xff] }
 0x6a9   : > { %v11131_v62 = vadd.f32 %v14187_v37, %v2761_v17  ;;  %v7461_v34 = vpop.eup %7460  ;;  %vm4459_vm15 = vcmp.ge.f32.partialorder %v14193_v61, 0.0  ;;  %v4987_v58 = vmul.f32 %v7459_v26, %v4907_v44  ;;  %v5000_v52 = vsub.f32 1.0, %v11115_v2 }
 0x6aa   : > { %v5002_v41 = vsub.f32 1.0, %v4986_v33  ;;  %v4989_v31 = vmul.f32 %v7461_v34, %v4909_v18  ;;  %v4733_v55 = vsel %vm11167_vm2, %v11074_v49, %v4729_v57  ;;  %v5001_v25 = vsub.f32 1.0, %v4985_v3  ;;  %v14196_v49 = vld [vmem:[#allocation59_spill] sm:$0xff] }
 0x6ab   : > { %v11147_v13 = vmul.f32 0.70710677, %v11131_v62  ;;  %5079 = vmatmul.bf16.gmra.mxu2 %v14192_v35  ;;  %v7463_v6 = vpop.eup %7462  ;;  %v4782_v32 = vmul.f32 1.0614054, %v11157_v16  ;;  %v4737_v38 = vor.u32 1.1754944e-38, %v4736_v36  ;;  %vm4735_vm3 = vcmp.eq.f32.partialorder %v4734_v29, 8.507059e+37 }
 0x6ac   : > { %v4988_v14 = vmul.f32 %v7463_v6, %v4908_v20  ;;  %v11182_v2 = vadd.f32 1.0, %v4512_v48  ;;  %7464 = vrcp.f32 %v11161_v7  ;;  %v5003_v45 = vsub.f32 1.0, %v4987_v58  ;;  %v14197_v3 = vld [vmem:[#allocation35_spill] sm:$0xff]  ;;  %v14200_v29 = vld [vmem:[#allocation34_spill] sm:$0xff] }
 0x6ad   : > { %v11155_v60 = vand.u32 2147483647, %v11147_v13  ;;  %v11185_v59 = vsel %vm4735_vm3, %v4737_v38, %v4733_v55  ;;  %v5016_v56 = vmul.f32 %v5000_v52, %v14196_v49  ;;  %v4475_v17 = vsel %vm4459_vm15, 1.0, %v13999_v42  ;;  %v14198_v33 = vld [vmem:[#allocation43_spill] sm:$0xff]  ;;  %v14201_v38 = vld [vmem:[#allocation58_spill] sm:$0xff] }
 0x6ae   : > { %vm4461_vm4 = vcmp.ge.f32.partialorder %v14197_v3, 0.0  ;;  %v5005_v39 = vsub.f32 1.0, %v4989_v31  ;;  %vm4460_vm5 = vcmp.ge.f32.partialorder %v14198_v33, 0.0  ;;  %v4798_v44 = vadd.f32 -1.4531521, %v4782_v32 }
 0x6af   : > { %v2869_v43 = vmul.f32 0.3275911, %v11155_v60  ;;  %v5017_v40 = vmul.f32 %v5001_v25, %v11106_v50  ;;  %v5004_v15 = vsub.f32 1.0, %v4988_v14  ;;  %v4783_v26 = vmul.f32 1.0614054, %v11185_v59 }
 0x6b0   : > { %v2763_v47 = vpop.f32.mrf.mxu2  ;;  %v4426_v18 = vmul.f32 0.5, %v14199_v0  ;;  %v5019_v28 = vmul.f32 %v5003_v45, %v4475_v17  ;;  %v4477_v57 = vsel %vm4461_vm4, 1.0, %v13999_v42  ;;  %v5032_v36 = vadd.f32 1.0, %v5016_v56  ;;  %v14203_v0 = vld [vmem:[#allocation42_spill] sm:$0xff] }
 0x6b1   : > { %v11177_v5 = vadd.f32 1.0, %v2869_v43  ;;  %v11180_v27 = vadd.f32 %v14187_v37, %v2763_v47  ;;  %v5018_v37 = vmul.f32 %v5002_v41, %v11113_v53  ;;  %v4427_v48 = vmul.f32 0.5, %v14200_v29  ;;  %v11220_v43 = vld [vmem:[%s13785_s10 + $0x1] ss:$0 sm:$0xff] }
 0x6b2   : > { %v11206_v53 = vpop.eup %7464  ;;  %v5021_v11 = vmul.f32 %v5005_v39, %v4477_v57  ;;  %v4926_v50 = vsub.f32 0.0, %v10970_v30  ;;  %v4476_v58 = vsel %vm4460_vm5, 1.0, %v13999_v42  ;;  %v4814_v63 = vmul.f32 %v4798_v44, %v11157_v16 }
 0x6b3   : > { %7466 = vrcp.f32 %v11177_v5  ;;  %v11194_v10 = vmul.f32 0.70710677, %v11180_v27  ;;  %v5034_v61 = vadd.f32 1.0, %v5018_v37  ;;  %v5020_v41 = vmul.f32 %v5004_v15, %v4476_v58 }
 0x6b4   : > { %7468 = vrcp.f32 %v11182_v2  ;;  %v4799_v31 = vadd.f32 -1.4531521, %v4783_v26  ;;  %v5033_v47 = vadd.f32 1.0, %v5017_v40  ;;  %v5035_v25 = vadd.f32 1.0, %v5019_v28  ;;  %v14202_v40 = vld [vmem:[#allocation40_spill] sm:$0xff] }
 0x6b5   : > { %v11202_v20 = vand.u32 2147483647, %v11194_v10  ;;  %v4756_v6 = vmul.f32 %v11206_v53, %v11161_v7  ;;  %v11233_v14 = vmul.f32 %v5032_v36, %v14201_v38  ;;  %v5037_v49 = vadd.f32 1.0, %v5021_v11 }
 0x6b6   : > { %v4942_v56 = vmul.f32 %v4926_v50, %v10970_v30  ;;  %v11241_v3 = vmul.f32 %v5034_v61, %v4426_v18  ;;  %v4830_v39 = vadd.f32 1.4214138, %v4814_v63  ;;  %v4927_v37 = vsub.f32 0.0, %v11017_v21  ;;  %v14204_v30 = vld [vmem:[#allocation47_spill] sm:$0xff]  ;;  %v14206_v50 = vld [vmem:[#allocation50_spill] sm:$0xff] }
 0x6b7   : > { %v2870_v54 = vmul.f32 0.3275911, %v11202_v20  ;;  %v5036_v44 = vadd.f32 1.0, %v5020_v41  ;;  %v4429_v15 = vmul.f32 0.5, %v14202_v40  ;;  %v4815_v26 = vmul.f32 %v4799_v31, %v11185_v59 }
 0x6b8   : > { %v2766_v35 = vpop.f32.mrf.mxu2  ;;  %v14205_v28 = vpack.c.bf16 %v14203_v0, %v14204_v30  ;;  %v11253_v57 = vmul.f32 %v5033_v47, %v11055_v51  ;;  %v11255_v18 = vmul.f32 %v5035_v25, %v4427_v48  ;;  %v4757_v29 = vsub.f32 1.0, %v4756_v6 }
 0x6b9   : > { %v11211_v34 = vpop.eup %7466  ;;  %v11223_v52 = vadd.f32 %v11220_v43, %v2766_v35  ;;  %v11225_v55 = vadd.f32 1.0, %v2870_v54  ;;  %v4428_v54 = vmul.f32 0.5, %v14206_v50  ;;  %v11261_v35 = vmul.f32 %v5037_v49, %v4429_v15 }
 0x6ba   : > { %v11235_v45 = vpop.eup %7468  ;;  %v3014_v17 = vmul.f32 %v11211_v34, %v11177_v5  ;;  %v4970_v61 = vmul.f32 1.442695, %v4942_v56  ;;  %v4846_v41 = vmul.f32 %v4830_v39, %v11157_v16  ;;  %v4943_v51 = vmul.f32 %v4927_v37, %v11017_v21 }
 0x6bb   : > { %v11230_v32 = vmul.f32 0.70710677, %v11223_v52  ;;  %7470 = vrcp.f32 %v11225_v55  ;;  %5084 = vmatmul.bf16.gmra.mxu2 %v14205_v28  ;;  %v4741_v36 = vmul.f32 %v11235_v45, %v11182_v2  ;;  %v11272_v25 = vmul.f32 %v5036_v44, %v4428_v54 }
 0x6bc   : > { %v3015_v58 = vsub.f32 1.0, %v3014_v17  ;;  %v4831_v6 = vadd.f32 1.4214138, %v4815_v26  ;;  %v5061_v38 = vpack.c.bf16 %v11253_v57, %v11233_v14  ;;  %v4758_v56 = vmul.f32 %v11206_v53, %v4757_v29 }
 0x6bd   : > { %v11245_v33 = vand.u32 2147483647, %v11230_v32  ;;  %v4742_v49 = vsub.f32 1.0, %v4741_v36  ;;  %v4862_v14 = vadd.f32 -0.28449672, %v4846_v41  ;;  %v3024_v15 = vand.u32 2147483648, %v11177_v5 }
 0x6be   : > { %v3016_v17 = vmul.f32 %v11211_v34, %v3015_v58  ;;  %v11288_v40 = vmul.f32 1.442695, %v4943_v51  ;;  %v4847_v26 = vmul.f32 %v4831_v6, %v11185_v59  ;;  %vm3019_vm1 = vweird.f32 %v11211_v34 }
 0x6bf   : > { %v2871_v11 = vmul.f32 0.3275911, %v11245_v33  ;;  %v3022_v30 = vand.u32 2147483647, %v11177_v5  ;;  %v4743_v28 = vmul.f32 %v11235_v45, %v4742_v49  ;;  %vm4745_vm6 = vweird.f32 %v11182_v2 }
 0x6c0   : > { %v2768_v63 = vpop.f32.mrf.mxu2  ;;  %v4759_v57 = vadd.f32 %v11206_v53, %v4758_v56  ;;  %vm4761_vm7 = vweird.f32 %v11206_v53  ;;  %vm3018_vm8 = vweird.f32 %v11177_v5  ;;  %v4751_v54 = vand.u32 2147483648, %v11182_v2 }
 0x6c1   : > { %v11265_v31 = vadd.f32 1.0, %v2871_v11  ;;  %v11268_v48 = vadd.f32 %v11220_v43, %v2768_v63  ;;  %v11270_v47 = vpop.eup %7470  ;;  %v3017_v11 = vadd.f32 %v11211_v34, %v3016_v17  ;;  %vm4760_vm10 = vweird.f32 %v11161_v7  ;;  %vm3020_vm11 = vmor %vm3018_vm8, %vm3019_vm1 }
 0x6c2   : > { %v3029_v39 = vmul.f32 %v11270_v47, %v11225_v55  ;;  %v3025_v58 = vor.u32 1.1754944e-38, %v3024_v15  ;;  %v4764_v63 = vand.u32 2147483647, %v11161_v7  ;;  %vm3023_vm12 = vcmp.eq.f32.partialorder %v3022_v30, 8.507059e+37  ;;  %vm11319_vm13 = vmor %vm4760_vm10, %vm4761_vm7 }
 0x6c3   : > { %7472 = vrcp.f32 %v11265_v31  ;;  %v11284_v37 = vmul.f32 0.70710677, %v11268_v48  ;;  %v3021_v5 = vsel %vm3020_vm11, %v11211_v34, %v3017_v11  ;;  %v4744_v6 = vadd.f32 %v11235_v45, %v4743_v28 }
 0x6c4   : > { %7474 = vpow2.f32 %v4970_v61  ;;  %v3030_v36 = vsub.f32 1.0, %v3029_v39  ;;  %v4766_v61 = vand.u32 2147483648, %v11161_v7  ;;  %vm4746_vm9 = vweird.f32 %v11235_v45 }
 0x6c5   : > { %v11293_v0 = vand.u32 2147483647, %v11284_v37  ;;  %v3285_v56 = vsub.f32 0.0, %v11155_v60  ;;  %v11324_v7 = vsel %vm3023_vm12, %v3025_v58, %v3021_v5  ;;  %v4763_v34 = vsel %vm11319_vm13, %v11206_v53, %v4759_v57  ;;  %vm11339_vm14 = vmor %vm4745_vm6, %vm4746_vm9 }
 0x6c6   : > { %v3031_v17 = vmul.f32 %v11270_v47, %v3030_v36  ;;  %v4749_v15 = vand.u32 2147483647, %v11182_v2  ;;  %v4767_v30 = vor.u32 1.1754944e-38, %v4766_v61  ;;  %v3039_v28 = vand.u32 2147483648, %v11225_v55 }
 0x6c7   : > { %v2872_v29 = vmul.f32 0.3275911, %v11293_v0  ;;  %v4878_v11 = vmul.f32 %v4862_v14, %v11157_v16  ;;  %vm4765_vm15 = vcmp.eq.f32.partialorder %v4764_v63, 8.507059e+37  ;;  %vm3034_vm2 = vweird.f32 %v11270_v47 }
 0x6c8   : > { %v3037_v57 = vand.u32 2147483647, %v11225_v55  ;;  %v4748_v36 = vsel %vm11339_vm14, %v11235_v45, %v4744_v6  ;;  %v11348_v61 = vsel %vm4765_vm15, %v4767_v30, %v4763_v34  ;;  %v3301_v14 = vmul.f32 %v3285_v56, %v11155_v60 }
 0x6c9   : > { %v11304_v50 = vpop.eup %7472  ;;  %v11310_v41 = vadd.f32 1.0, %v2872_v29  ;;  %v3141_v29 = vmul.f32 1.0614054, %v11324_v7  ;;  %v4752_v2 = vor.u32 1.1754944e-38, %v4751_v54  ;;  %vm3033_vm3 = vweird.f32 %v11225_v55 }
 0x6ca   : > { %v11313_v51 = vpop.eup %7474  ;;  %v3044_v39 = vmul.f32 %v11304_v50, %v11265_v31  ;;  %v3032_v63 = vadd.f32 %v11270_v47, %v3031_v17  ;;  %vm4750_vm4 = vcmp.eq.f32.partialorder %v4749_v15, 8.507059e+37  ;;  %vm3035_vm5 = vmor %vm3033_vm3, %vm3034_vm2  ;;  %v3040_v49 = vor.u32 1.1754944e-38, %v3039_v28 }
 0x6cb   : > { %7476 = vrcp.f32 %v11310_v41  ;;  %5089 = vmatmul.bf16.gmra.mxu2 %v5061_v38  ;;  %v3157_v58 = vadd.f32 -1.4531521, %v3141_v29  ;;  %v4863_v38 = vadd.f32 -0.28449672, %v4847_v26  ;;  %v11356_v45 = vsel %vm4750_vm4, %v4752_v2, %v4748_v36 }
 0x6cc   : > { %v3045_v5 = vsub.f32 1.0, %v3044_v39  ;;  %v4785_v6 = vmul.f32 1.0614054, %v11348_v61  ;;  %v3036_v60 = vsel %vm3035_vm5, %v11270_v47, %v3032_v63  ;;  %vm3038_vm1 = vcmp.eq.f32.partialorder %v3037_v57, 8.507059e+37 }
 0x6cd   : > { %v3173_v44 = vmul.f32 %v3157_v58, %v11324_v7  ;;  %v3325_v54 = vmul.f32 1.442695, %v3301_v14  ;;  %v3286_v55 = vsub.f32 0.0, %v11202_v20  ;;  %v11361_v56 = vsel %vm3038_vm1, %v3040_v49, %v3036_v60 }
 0x6ce   : > { %7478 = vpow2.f32 %v11288_v40  ;;  %v3046_v34 = vmul.f32 %v11304_v50, %v3045_v5  ;;  %v3142_v39 = vmul.f32 1.0614054, %v11361_v56  ;;  %v4879_v15 = vmul.f32 %v4863_v38, %v11185_v59 }
 0x6cf   : > { %v3189_v26 = vadd.f32 1.4214138, %v3173_v44  ;;  %v4784_v47 = vmul.f32 1.0614054, %v11356_v45  ;;  %v3054_v28 = vand.u32 2147483648, %v11265_v31  ;;  %vm3049_vm6 = vweird.f32 %v11304_v50 }
 0x6d0   : > { %v4801_v29 = vadd.f32 -1.4531521, %v4785_v6  ;;  %v3158_v53 = vadd.f32 -1.4531521, %v3142_v39  ;;  %v3052_v44 = vand.u32 2147483647, %v11265_v31  ;;  %7480 = vpow2.f32 %v3325_v54 }
 0x6d1   : > { %v11354_v21 = vpop.eup %7476  ;;  %v3205_v30 = vmul.f32 %v3189_v26, %v11324_v7  ;;  %v4894_v40 = vadd.f32 0.2548296, %v4878_v11  ;;  %v3302_v57 = vmul.f32 %v3286_v55, %v11202_v20  ;;  %vm3048_vm7 = vweird.f32 %v11265_v31 }
 0x6d2   : > { %v3059_v17 = vmul.f32 %v11354_v21, %v11310_v41  ;;  %v3174_v58 = vmul.f32 %v3158_v53, %v11361_v56  ;;  %v3047_v2 = vadd.f32 %v11304_v50, %v3046_v34  ;;  %v4895_v5 = vadd.f32 0.2548296, %v4879_v15  ;;  %vm3050_vm8 = vmor %vm3048_vm7, %vm3049_vm6 }
 0x6d3   : > { %v3221_v36 = vadd.f32 -0.28449672, %v3205_v30  ;;  %v4800_v63 = vadd.f32 -1.4531521, %v4784_v47  ;;  %v3055_v49 = vor.u32 1.1754944e-38, %v3054_v28  ;;  %v4817_v11 = vmul.f32 %v4801_v29, %v11348_v61 }
 0x6d4   : > { %v3060_v14 = vsub.f32 1.0, %v3059_v17  ;;  %v7479_v6 = vpop.eup %7478  ;;  %v3190_v60 = vadd.f32 1.4214138, %v3174_v58  ;;  %v3051_v20 = vsel %vm3050_vm8, %v11304_v50, %v3047_v2  ;;  %vm3053_vm10 = vcmp.eq.f32.partialorder %v3052_v44, 8.507059e+37 }
 0x6d5   : > { %v3237_v38 = vmul.f32 %v3221_v36, %v11324_v7  ;;  %v3327_v54 = vmul.f32 1.442695, %v3302_v57  ;;  %v3287_v31 = vsub.f32 0.0, %v11245_v33  ;;  %v11382_v26 = vsel %vm3053_vm10, %v3055_v49, %v3051_v20 }
 0x6d6   : > { %v4910_v34 = vmul.f32 %v4894_v40, %v11157_v16  ;;  %v3061_v17 = vmul.f32 %v11354_v21, %v3060_v14  ;;  %v3206_v39 = vmul.f32 %v3190_v60, %v11361_v56  ;;  %v3143_v15 = vmul.f32 1.0614054, %v11382_v26  ;;  %v7481_v47 = vpop.eup %7480 }
 0x6d7   : > { %v3253_v55 = vadd.f32 0.2548296, %v3237_v38  ;;  %v4816_v30 = vmul.f32 %v4800_v63, %v11356_v45  ;;  %v3067_v28 = vand.u32 2147483647, %v11310_v41  ;;  %v3069_v29 = vand.u32 2147483648, %v11310_v41 }
 0x6d8   : > { %v4911_v53 = vmul.f32 %v4895_v5, %v11185_v59  ;;  %v14211_v16 = vpack.c.bf16 %v11255_v18, %v11241_v3  ;;  %v3222_v44 = vadd.f32 -0.28449672, %v3206_v39  ;;  %vm3064_vm11 = vweird.f32 %v11354_v21 }
 0x6d9   : > { %v3269_v50 = vmul.f32 %v3253_v55, %v11324_v7  ;;  %v3159_v40 = vadd.f32 -1.4531521, %v3143_v15  ;;  %v4833_v57 = vadd.f32 1.4214138, %v4817_v11  ;;  %7482 = vpow2.f32 %v3327_v54 }
 0x6da   : > { %v3303_v36 = vmul.f32 %v3287_v31, %v11245_v33  ;;  %vm3063_vm12 = vweird.f32 %v11310_v41  ;;  %v3238_v7 = vmul.f32 %v3222_v44, %v11361_v56  ;;  %v3062_v58 = vadd.f32 %v11354_v21, %v3061_v17 }
 0x6db   : > { %5094 = vmatmul.bf16.gmra.mxu2 %v14211_v16  ;;  %v3349_v14 = vmul.f32 %v7481_v47, %v3269_v50  ;;  %v3175_v59 = vmul.f32 %v3159_v40, %v11382_v26  ;;  %v4832_v2 = vadd.f32 1.4214138, %v4816_v30  ;;  %vm2821_vm9 = vcmp.ge.f32.partialorder %v11147_v13, 0.0  ;;  %vm3065_vm13 = vmor %vm3063_vm12, %vm3064_vm11 }
 0x6dc   : > { %vm3068_vm14 = vcmp.eq.f32.partialorder %v3067_v28, 8.507059e+37  ;;  %v3070_v3 = vor.u32 1.1754944e-38, %v3069_v29  ;;  %vm4463_vm15 = vcmp.ge.f32.partialorder %v10989_v46, 0.0  ;;  %v3254_v18 = vadd.f32 0.2548296, %v3238_v7 }
 0x6dd   : > { %v3365_v5 = vsub.f32 1.0, %v3349_v14  ;;  %v3066_v33 = vsel %vm3065_vm13, %v11354_v21, %v3062_v58  ;;  %v3191_v63 = vadd.f32 1.4214138, %v3175_v59  ;;  %v4849_v41 = vmul.f32 %v4833_v57, %v11348_v61 }
 0x6de   : > { %v3329_v38 = vmul.f32 1.442695, %v3303_v36  ;;  %v3288_v49 = vsub.f32 0.0, %v11293_v0  ;;  %v11407_v11 = vsel %vm3068_vm14, %v3070_v3, %v3066_v33  ;;  %v4991_v60 = vmul.f32 %v7479_v6, %v4911_v53 }
 0x6df   : > { %v3270_v20 = vmul.f32 %v3254_v18, %v11361_v56  ;;  %v3144_v54 = vmul.f32 1.0614054, %v11407_v11  ;;  %v3207_v31 = vmul.f32 %v3191_v63, %v11382_v26  ;;  %v7483_v55 = vpop.eup %7482  ;;  %vm4462_vm2 = vcmp.ge.f32.partialorder %v10816_v9, 0.0 }
 0x6e0   : > { %v4848_v21 = vmul.f32 %v4832_v2, %v11356_v45  ;;  %v4929_v17 = vsub.f32 0.0, %v11122_v23  ;;  %v2837_v39 = vsel %vm2821_vm9, 1.0, %v13999_v42  ;;  %vm2822_vm3 = vcmp.ge.f32.partialorder %v11194_v10, 0.0 }
 0x6e1   : > { %v3350_v6 = vmul.f32 %v7483_v55, %v3270_v20  ;;  %v3381_v15 = vmul.f32 %v3365_v5, %v2837_v39  ;;  %v3160_v56 = vadd.f32 -1.4531521, %v3144_v54  ;;  %v3223_v47 = vadd.f32 -0.28449672, %v3207_v31 }
 0x6e2   : > { %v4928_v30 = vsub.f32 0.0, %v11139_v12  ;;  %v4865_v50 = vadd.f32 -0.28449672, %v4849_v41  ;;  %7484 = vpow2.f32 %v3329_v38  ;;  %v3304_v28 = vmul.f32 %v3288_v49, %v11293_v0 }
 0x6e3   : > { %v4990_v29 = vmul.f32 %v11313_v51, %v4910_v34  ;;  %v3366_v53 = vsub.f32 1.0, %v3350_v6  ;;  %v3176_v16 = vmul.f32 %v3160_v56, %v11407_v11  ;;  %v3239_v13 = vmul.f32 %v3223_v47, %v11382_v26 }
 0x6e4   : > { %v5007_v44 = vsub.f32 1.0, %v4991_v60  ;;  %v4864_v40 = vadd.f32 -0.28449672, %v4848_v21  ;;  %v4945_v57 = vmul.f32 %v4929_v17, %v11122_v23  ;;  %v2838_v36 = vsel %vm2822_vm3, 1.0, %v13999_v42 }
 0x6e5   : > { %v3382_v14 = vmul.f32 %v3366_v53, %v2838_v36  ;;  %v3397_v7 = vadd.f32 1.0, %v3381_v15  ;;  %v3192_v58 = vadd.f32 1.4214138, %v3176_v16  ;;  %v3255_v59 = vadd.f32 0.2548296, %v3239_v13  ;;  %v14213_v53 = vld [vmem:[#allocation63_spill] sm:$0xff] }
 0x6e6   : > { %v4944_v0 = vmul.f32 %v4928_v30, %v11139_v12  ;;  %v4881_v51 = vmul.f32 %v4865_v50, %v11348_v61  ;;  %v2789_v34 = vmul.f32 0.5, %v11131_v62  ;;  %v3331_v2 = vmul.f32 1.442695, %v3304_v28 }
 0x6e7   : > { %v2790_v3 = vmul.f32 0.5, %v11180_v27  ;;  %v3398_v18 = vadd.f32 1.0, %v3382_v14  ;;  %v3208_v23 = vmul.f32 %v3192_v58, %v11407_v11  ;;  %v3271_v5 = vmul.f32 %v3255_v59, %v11382_v26 }
 0x6e8   : > { %v7485_v10 = vpop.eup %7484  ;;  %v5006_v33 = vsub.f32 1.0, %v4990_v29  ;;  %v4479_v63 = vsel %vm4463_vm15, 1.0, %v13999_v42  ;;  %v4880_v12 = vmul.f32 %v4864_v40, %v11356_v45  ;;  %v4976_v41 = vmul.f32 1.442695, %v4945_v57 }
 0x6e9   : > { %v14212_v62 = vpack.c.bf16 %v11261_v35, %v11272_v25  ;;  %v3413_v38 = vmul.f32 %v3397_v7, %v2789_v34  ;;  %v3414_v27 = vmul.f32 %v3398_v18, %v2790_v3  ;;  %v3224_v49 = vadd.f32 -0.28449672, %v3208_v23 }
 0x6ea   : > { %v3351_v60 = vmul.f32 %v7485_v10, %v3271_v5  ;;  %v5023_v20 = vmul.f32 %v5007_v44, %v4479_v63  ;;  %v4974_v54 = vmul.f32 1.442695, %v4944_v0  ;;  %7486 = vpow2.f32 %v3331_v2 }
 0x6eb   : > { %5099 = vmatmul.bf16.gmra.mxu2 %v14212_v62  ;;  %v4478_v26 = vsel %vm4462_vm2, 1.0, %v13999_v42  ;;  %v4897_v46 = vadd.f32 0.2548296, %v4881_v51  ;;  %v3425_v31 = vpack.c.bf16 %v3414_v27, %v3413_v38  ;;  %v3240_v55 = vmul.f32 %v3224_v49, %v11407_v11 }
 0x6ec   : > { %v5022_v21 = vmul.f32 %v5006_v33, %v4478_v26  ;;  %7488 = vpow2.f32 %v4976_v41  ;;  %v4896_v17 = vadd.f32 0.2548296, %v4880_v12  ;;  %vm2823_vm4 = vcmp.ge.f32.partialorder %v11230_v32, 0.0 }
 0x6ed   : > { %3524 = vmatmul.bf16.gmra.mxu3 %v3425_v31  ;;  %v3256_v35 = vadd.f32 0.2548296, %v3240_v55  ;;  %v3367_v25 = vsub.f32 1.0, %v3351_v60  ;;  %v5039_v39 = vadd.f32 1.0, %v5023_v20  ;;  %7490 = vpow2.f32 %v4974_v54 }
 0x6ee   : > { %v4913_v6 = vmul.f32 %v4897_v46, %v11348_v61  ;;  %v5038_v56 = vadd.f32 1.0, %v5022_v21  ;;  %v4431_v47 = vmul.f32 0.5, %v10973_v22  ;;  %v2839_v30 = vsel %vm2823_vm4, 1.0, %v13999_v42 }
 0x6ef   : > { %v3272_v15 = vmul.f32 %v3256_v35, %v11407_v11  ;;  %v4912_v50 = vmul.f32 %v4896_v17, %v11356_v45  ;;  %vm2824_vm5 = vcmp.ge.f32.partialorder %v11284_v37, 0.0  ;;  %v3383_v28 = vmul.f32 %v3367_v25, %v2839_v30 }
 0x6f0   : > { %v7487_v9 = vpop.eup %7486  ;;  %v4430_v16 = vmul.f32 0.5, %v14213_v53  ;;  %v5055_v13 = vmul.f32 %v5039_v39, %v4431_v47  ;;  %v2840_v57 = vsel %vm2824_vm5, 1.0, %v13999_v42  ;;  %vm4465_vm1 = vcmp.ge.f32.partialorder %v11098_v8, 0.0 }
 0x6f1   : > { %v3352_v32 = vmul.f32 %v7487_v9, %v3272_v15  ;;  %v3399_v14 = vadd.f32 1.0, %v3383_v28  ;;  %v2791_v37 = vmul.f32 0.5, %v11223_v52  ;;  %v2792_v58 = vmul.f32 0.5, %v11268_v48 }
 0x6f2   : > { %v7489_v29 = vpop.eup %7488  ;;  %v5054_v11 = vmul.f32 %v5038_v56, %v4430_v16  ;;  %vm4464_vm6 = vcmp.ge.f32.partialorder %v11119_v4, 0.0  ;;  %v4481_v2 = vsel %vm4465_vm1, 1.0, %v13999_v42  ;;  %v4433_v33 = vmul.f32 0.5, %v11082_v19 }
 0x6f3   : > { %v4993_v44 = vmul.f32 %v7489_v29, %v4913_v6  ;;  %v3368_v61 = vsub.f32 1.0, %v3352_v32  ;;  %v7491_v40 = vpop.eup %7490  ;;  %v3415_v51 = vmul.f32 %v3399_v14, %v2791_v37  ;;  %v4480_v23 = vsel %vm4464_vm6, 1.0, %v13999_v42 }
 0x6f4   : > { %v4992_v36 = vmul.f32 %v7491_v40, %v4912_v50  ;;  %v5064_v45 = vpack.c.bf16 %v5055_v13, %v5054_v11  ;;  %v4432_v12 = vmul.f32 0.5, %v11095_v1 }
 0x6f5   : > { %v3384_v22 = vmul.f32 %v3368_v61, %v2840_v57  ;;  %v5009_v7 = vsub.f32 1.0, %v4993_v44 }
 0x6f6   : > { %v5008_v0 = vsub.f32 1.0, %v4992_v36 }
 0x6f7   : > { %v3400_v59 = vadd.f32 1.0, %v3384_v22  ;;  %v5025_v3 = vmul.f32 %v5009_v7, %v4481_v2 }
 0x6f8   : > { %v5024_v5 = vmul.f32 %v5008_v0, %v4480_v23 }
 0x6f9   : > { %v3416_v34 = vmul.f32 %v3400_v59, %v2792_v58  ;;  %v5041_v52 = vadd.f32 1.0, %v5025_v3  ;;  %v11508_v58 = vld [vmem:[%s13787_s12] ss:$0 sm:$0xff] }
 0x6fa   : > { %v2771_v8 = vpop.f32.mrf.mxu2  ;;  %v5040_v4 = vadd.f32 1.0, %v5024_v5 }
 0x6fb   : > { %5104 = vmatmul.bf16.gmra.mxu2 %v5064_v45  ;;  %v3426_v18 = vpack.c.bf16 %v3416_v34, %v3415_v51  ;;  %v11461_v10 = vadd.f32 %v11220_v43, %v2771_v8  ;;  %v5057_v41 = vmul.f32 %v5041_v52, %v4433_v33 }
 0x6fc   : > { %v5056_v27 = vmul.f32 %v5040_v4, %v4432_v12 }
 0x6fd   : > { %3529 = vmatmul.bf16.gmra.mxu3 %v3426_v18  ;;  %v11464_v48 = vmul.f32 0.70710677, %v11461_v10  ;;  %v14214_v18 = vld [vmem:[#allocation4_spill] sm:$0xff] }
 0x6fe   : > { %v5065_v20 = vpack.c.bf16 %v5057_v41, %v5056_v27 }
 0x6ff   : > { %v2857_v63 = vand.u32 2147483647, %v11464_v48  ;;  %vm2825_vm1 = vcmp.ge.f32.partialorder %v11464_v48, 0.0  ;;  %v14220_v48 = vld [vmem:[#allocation8_spill] sm:$0xff] }
 0x701   : > { %v2873_v62 = vmul.f32 0.3275911, %v2857_v63  ;;  %v3289_v28 = vsub.f32 0.0, %v2857_v63 }
 0x702   : > { %v2773_v38 = vpop.f32.mrf.mxu2 }
 0x703   : > { %v2889_v49 = vadd.f32 1.0, %v2873_v62  ;;  %v11470_v60 = vadd.f32 %v11220_v43, %v2773_v38  ;;  %v3305_v11 = vmul.f32 %v3289_v28, %v2857_v63 }
 0x705   : > { %7492 = vrcp.f32 %v2889_v49  ;;  %v11473_v54 = vmul.f32 0.70710677, %v11470_v60  ;;  %v3084_v6 = vand.u32 2147483648, %v2889_v49  ;;  %v3082_v9 = vand.u32 2147483647, %v2889_v49 }
 0x706   : > { %vm3078_vm8 = vweird.f32 %v2889_v49  ;;  %v3333_v34 = vmul.f32 1.442695, %v3305_v11 }
 0x707   : > { %v11476_v19 = vand.u32 2147483647, %v11473_v54  ;;  %v3085_v53 = vor.u32 1.1754944e-38, %v3084_v6  ;;  %vm3083_vm11 = vcmp.eq.f32.partialorder %v3082_v9, 8.507059e+37 }
 0x709   : > { %v2874_v26 = vmul.f32 0.3275911, %v11476_v19  ;;  %v3290_v4 = vsub.f32 0.0, %v11476_v19 }
 0x70a   : > { %v2776_v1 = vpop.f32.mrf.mxu2 }
 0x70b   : > { %5109 = vmatmul.bf16.gmra.mxu2 %v5065_v20  ;;  %v7493_v46 = vpop.eup %7492  ;;  %v11480_v31 = vadd.f32 %v11220_v43, %v2776_v1  ;;  %v2890_v21 = vadd.f32 1.0, %v2874_v26 }
 0x70c   : > { %v3074_v55 = vmul.f32 %v7493_v46, %v2889_v49  ;;  %vm3079_vm7 = vweird.f32 %v7493_v46 }
 0x70d   : > { %v11483_v17 = vmul.f32 0.70710677, %v11480_v31  ;;  %7494 = vrcp.f32 %v2890_v21  ;;  %vm3080_vm10 = vmor %vm3078_vm8, %vm3079_vm7  ;;  %v3099_v36 = vand.u32 2147483648, %v2890_v21  ;;  %v3097_v7 = vand.u32 2147483647, %v2890_v21 }
 0x70e   : > { %v3075_v35 = vsub.f32 1.0, %v3074_v55  ;;  %vm3093_vm9 = vweird.f32 %v2890_v21  ;;  %v3306_v55 = vmul.f32 %v3290_v4, %v11476_v19  ;;  %v14218_v4 = vld [vmem:[#allocation6_spill] sm:$0xff] }
 0x70f   : > { %v11486_v25 = vand.u32 2147483647, %v11483_v17  ;;  %v3100_v5 = vor.u32 1.1754944e-38, %v3099_v36  ;;  %vm3098_vm14 = vcmp.eq.f32.partialorder %v3097_v7, 8.507059e+37 }
 0x710   : > { %v3076_v39 = vmul.f32 %v7493_v46, %v3075_v35 }
 0x711   : > { %v2875_v15 = vmul.f32 0.3275911, %v11486_v25 }
 0x712   : > { %v2778_v56 = vpop.f32.mrf.mxu2  ;;  %v3077_v47 = vadd.f32 %v7493_v46, %v3076_v39 }
 0x713   : > { %v11489_v30 = vadd.f32 1.0, %v2875_v15  ;;  %v11492_v50 = vadd.f32 %v11220_v43, %v2778_v56  ;;  %v7495_v32 = vpop.eup %7494  ;;  %v3291_v15 = vsub.f32 0.0, %v11486_v25 }
 0x714   : > { %v3081_v29 = vsel %vm3080_vm10, %v7493_v46, %v3077_v47  ;;  %v3089_v16 = vmul.f32 %v7495_v32, %v2890_v21  ;;  %vm3094_vm12 = vweird.f32 %v7495_v32  ;;  %vm2826_vm10 = vcmp.ge.f32.partialorder %v11473_v54, 0.0 }
 0x715   : > { %7496 = vrcp.f32 %v11489_v30  ;;  %v11496_v13 = vmul.f32 0.70710677, %v11492_v50  ;;  %v11498_v44 = vsel %vm3083_vm11, %v3085_v53, %v3081_v29  ;;  %vm3095_vm13 = vmor %vm3093_vm9, %vm3094_vm12  ;;  %v3114_v62 = vand.u32 2147483648, %v11489_v30 }
 0x716   : > { %v3090_v61 = vsub.f32 1.0, %v3089_v16  ;;  %v3145_v40 = vmul.f32 1.0614054, %v11498_v44  ;;  %v3112_v49 = vand.u32 2147483647, %v11489_v30  ;;  %vm3108_vm2 = vweird.f32 %v11489_v30 }
 0x717   : > { %v11502_v43 = vand.u32 2147483647, %v11496_v13  ;;  %v3115_v39 = vor.u32 1.1754944e-38, %v3114_v62  ;;  %v3335_v16 = vmul.f32 1.442695, %v3306_v55  ;;  %v3307_v36 = vmul.f32 %v3291_v15, %v11486_v25 }
 0x718   : > { %v3091_v57 = vmul.f32 %v7495_v32, %v3090_v61  ;;  %v3161_v22 = vadd.f32 -1.4531521, %v3145_v40  ;;  %vm3113_vm4 = vcmp.eq.f32.partialorder %v3112_v49, 8.507059e+37  ;;  %vm2827_vm11 = vcmp.ge.f32.partialorder %v11483_v17, 0.0 }
 0x719   : > { %v2876_v14 = vmul.f32 0.3275911, %v11502_v43  ;;  %vm2828_vm12 = vcmp.ge.f32.partialorder %v11496_v13, 0.0 }
 0x71a   : > { %v3092_v0 = vadd.f32 %v7495_v32, %v3091_v57  ;;  %v3177_v51 = vmul.f32 %v3161_v22, %v11498_v44 }
 0x71b   : > { %v7497_v37 = vpop.eup %7496  ;;  %v11513_v3 = vadd.f32 1.0, %v2876_v14 }
 0x71c   : > { %v3104_v2 = vmul.f32 %v7497_v37, %v11489_v30  ;;  %v3096_v8 = vsel %vm3095_vm13, %v7495_v32, %v3092_v0  ;;  %v3193_v52 = vadd.f32 1.4214138, %v3177_v51  ;;  %vm3109_vm15 = vweird.f32 %v7497_v37  ;;  %v14216_v30 = vld [vmem:[#allocation2_spill] sm:$0xff] }
 0x71d   : > { %7498 = vrcp.f32 %v11513_v3  ;;  %v11523_v12 = vsel %vm3098_vm14, %v3100_v5, %v3096_v8  ;;  %vm3110_vm3 = vmor %vm3108_vm2, %vm3109_vm15  ;;  %v3129_v14 = vand.u32 2147483648, %v11513_v3  ;;  %vm3123_vm6 = vweird.f32 %v11513_v3 }
 0x71e   : > { %v5075_v45 = vpop.f32.mrf.mxu2  ;;  %v3105_v33 = vsub.f32 1.0, %v3104_v2  ;;  %v3209_v41 = vmul.f32 %v3193_v52, %v11498_v44  ;;  %v3146_v27 = vmul.f32 1.0614054, %v11523_v12  ;;  %7500 = vpow2.f32 %v3333_v34 }
 0x71f   : > { %v5076_v59 = vadd.f32 %v11508_v58, %v5075_v45  ;;  %7502 = vpow2.f32 %v3335_v16  ;;  %v3337_v2 = vmul.f32 1.442695, %v3307_v36  ;;  %v3130_v8 = vor.u32 1.1754944e-38, %v3129_v14 }
 0x720   : > { %v3106_v38 = vmul.f32 %v7497_v37, %v3105_v33  ;;  %v3225_v20 = vadd.f32 -0.28449672, %v3209_v41  ;;  %v3162_v1 = vadd.f32 -1.4531521, %v3146_v27  ;;  %v3292_v52 = vsub.f32 0.0, %v11502_v43 }
 0x721   : > { %v11517_v23 = vadd.f32 %v5076_v59, %v14214_v18  ;;  %7504 = vpow2.f32 %v3337_v2  ;;  %v2794_v36 = vmul.f32 0.5, %v11470_v60 }
 0x722   : > { %v3107_v46 = vadd.f32 %v7497_v37, %v3106_v38  ;;  %v3241_v35 = vmul.f32 %v3225_v20, %v11498_v44  ;;  %v3178_v9 = vmul.f32 %v3162_v1, %v11523_v12 }
 0x723   : > { %14215 = vst [vmem:[#allocation46_spill] sm:$0xff] %v11517_v23  ;;  %v5131_v63 = vsel %vm1021_vm0, %v11517_v23, 0.0  ;;  %v7499_v6 = vpop.eup %7498 }
 0x724   : > { %5132 = vadd.xlane.f32.xlu0 %v5131_v63  ;;  %v3111_v56 = vsel %vm3110_vm3, %v7497_v37, %v3107_v46  ;;  %v3119_v47 = vmul.f32 %v7499_v6, %v11513_v3  ;;  %v3257_v28 = vadd.f32 0.2548296, %v3241_v35  ;;  %v3194_v29 = vadd.f32 1.4214138, %v3178_v9  ;;  %v7501_v57 = vpop.eup %7500 }
 0x725   : > { %v11539_v19 = vsel %vm3113_vm4, %v3115_v39, %v3111_v56  ;;  %vm3124_vm5 = vweird.f32 %v7499_v6  ;;  %v3127_v37 = vand.u32 2147483647, %v11513_v3  ;;  %v7503_v1 = vpop.eup %7502  ;;  %v2841_v46 = vsel %vm2825_vm1, 1.0, %v13999_v42 }
 0x726   : > { %v5077_v26 = vpop.f32.mrf.mxu2  ;;  %v3147_v53 = vmul.f32 1.0614054, %v11539_v19  ;;  %v3120_v61 = vsub.f32 1.0, %v3119_v47  ;;  %v3273_v11 = vmul.f32 %v3257_v28, %v11498_v44  ;;  %v3210_v22 = vmul.f32 %v3194_v29, %v11523_v12  ;;  %vm3125_vm7 = vmor %vm3123_vm6, %vm3124_vm5 }
 0x727   : > { %v5078_v21 = vadd.f32 %v11508_v58, %v5077_v26  ;;  %vm3128_vm8 = vcmp.eq.f32.partialorder %v3127_v37, 8.507059e+37 }
 0x728   : > { %v3163_v45 = vadd.f32 -1.4531521, %v3147_v53  ;;  %v3121_v7 = vmul.f32 %v7499_v6, %v3120_v61  ;;  %v3226_v0 = vadd.f32 -0.28449672, %v3210_v22  ;;  %v3353_v51 = vmul.f32 %v7501_v57, %v3273_v11  ;;  %v7505_v61 = vpop.eup %7504 }
 0x729   : > { %v11537_v32 = vadd.f32 %v5078_v21, %v14216_v30  ;;  %v3308_v21 = vmul.f32 %v3292_v52, %v11502_v43  ;;  %v2842_v30 = vsel %vm2826_vm10, 1.0, %v13999_v42  ;;  %v2793_v57 = vmul.f32 0.5, %v11461_v10 }
 0x72a   : > { %v3179_v44 = vmul.f32 %v3163_v45, %v11539_v19  ;;  %v3122_v34 = vadd.f32 %v7499_v6, %v3121_v7  ;;  %v3242_v18 = vmul.f32 %v3226_v0, %v11523_v12  ;;  %v3369_v62 = vsub.f32 1.0, %v3353_v51 }
 0x72b   : > { %14217 = vst [vmem:[#allocation51_spill] sm:$0xff] %v11537_v32  ;;  %v5134_v40 = vsel %vm1021_vm0, %v11537_v32, 0.0  ;;  %v3339_v29 = vmul.f32 1.442695, %v3308_v21 }
 0x72c   : > { %5135 = vadd.xlane.f32.xlu1 %v5134_v40  ;;  %v3195_v5 = vadd.f32 1.4214138, %v3179_v44  ;;  %v3126_v63 = vsel %vm3125_vm7, %v7499_v6, %v3122_v34  ;;  %v3258_v41 = vadd.f32 0.2548296, %v3242_v18  ;;  %v3385_v6 = vmul.f32 %v3369_v62, %v2841_v46  ;;  %v14222_v44 = vld [vmem:[#allocation12_spill] sm:$0xff]  ;;  %v14224_v62 = vld [vmem:[#allocation10_spill] sm:$0xff] }
 0x72d   : > { %v3131_v38 = vsel %vm3128_vm8, %v3130_v8, %v3126_v63  ;;  %7506 = vpow2.f32 %v3339_v29  ;;  %v2843_v8 = vsel %vm2827_vm11, 1.0, %v13999_v42 }
 0x72e   : > { %v5080_v59 = vpop.f32.mrf.mxu2  ;;  %v3211_v3 = vmul.f32 %v3195_v5, %v11539_v19  ;;  %v3148_v49 = vmul.f32 1.0614054, %v3131_v38  ;;  %v3274_v20 = vmul.f32 %v3258_v41, %v11523_v12  ;;  %v3401_v16 = vadd.f32 1.0, %v3385_v6 }
 0x72f   : > { %v5081_v25 = vadd.f32 %v11508_v58, %v5080_v59  ;;  %v2844_v41 = vsel %vm2828_vm12, 1.0, %v13999_v42 }
 0x730   : > { %v3227_v26 = vadd.f32 -0.28449672, %v3211_v3  ;;  %v3164_v55 = vadd.f32 -1.4531521, %v3148_v49  ;;  %v3354_v39 = vmul.f32 %v7503_v1, %v3274_v20  ;;  %v3417_v37 = vmul.f32 %v3401_v16, %v2793_v57  ;;  %v14228_v16 = vld [vmem:[#allocation16_spill] sm:$0xff] }
 0x731   : > { %v11556_v33 = vadd.f32 %v5081_v25, %v14218_v4  ;;  %v2796_v20 = vmul.f32 0.5, %v11492_v50 }
 0x732   : > { %v3243_v15 = vmul.f32 %v3227_v26, %v11539_v19  ;;  %v3180_v12 = vmul.f32 %v3164_v55, %v3131_v38  ;;  %v3370_v56 = vsub.f32 1.0, %v3354_v39  ;;  %v14226_v39 = vld [vmem:[#allocation14_spill] sm:$0xff] }
 0x733   : > { %14219 = vst [vmem:[#allocation52_spill] sm:$0xff] %v11556_v33  ;;  %v5137_v27 = vsel %vm1021_vm0, %v11556_v33, 0.0  ;;  %v7507_v18 = vpop.eup %7506 }
 0x734   : > { %5138 = vadd.xlane.f32.xlu2 %v5137_v27  ;;  %v3259_v47 = vadd.f32 0.2548296, %v3243_v15  ;;  %v3196_v54 = vadd.f32 1.4214138, %v3180_v12  ;;  %v3386_v53 = vmul.f32 %v3370_v56, %v2842_v30 }
 0x736   : > { %v5082_v35 = vpop.f32.mrf.mxu2  ;;  %v3275_v43 = vmul.f32 %v3259_v47, %v11539_v19  ;;  %v3212_v11 = vmul.f32 %v3196_v54, %v3131_v38  ;;  %v3402_v22 = vadd.f32 1.0, %v3386_v53 }
 0x737   : > { %v5083_v9 = vadd.f32 %v11508_v58, %v5082_v35 }
 0x738   : > { %v3228_v14 = vadd.f32 -0.28449672, %v3212_v11  ;;  %v3355_v45 = vmul.f32 %v7505_v61, %v3275_v43  ;;  %v3418_v59 = vmul.f32 %v3402_v22, %v2794_v36 }
 0x739   : > { %v11571_v28 = vadd.f32 %v5083_v9, %v14220_v48 }
 0x73a   : > { %v3244_v19 = vmul.f32 %v3228_v14, %v3131_v38  ;;  %v3427_v51 = vpack.c.bf16 %v3418_v59, %v3417_v37  ;;  %v3371_v34 = vsub.f32 1.0, %v3355_v45  ;;  %v14230_v45 = vld [vmem:[#allocation17_spill] sm:$0xff] }
 0x73b   : > { %14221 = vst [vmem:[#allocation56_spill] sm:$0xff] %v11571_v28  ;;  %v5140_v40 = vsel %vm1021_vm0, %v11571_v28, 0.0 }
 0x73c   : > { %5141 = vadd.xlane.f32.xlu0 %v5140_v40  ;;  %v3260_v10 = vadd.f32 0.2548296, %v3244_v19  ;;  %3534 = vmatmul.bf16.gmra.mxu3 %v3427_v51  ;;  %v3387_v52 = vmul.f32 %v3371_v34, %v2843_v8 }
 0x73e   : > { %v5085_v7 = vpop.f32.mrf.mxu2  ;;  %v3276_v2 = vmul.f32 %v3260_v10, %v3131_v38  ;;  %v3403_v49 = vadd.f32 1.0, %v3387_v52  ;;  %v2795_v38 = vmul.f32 0.5, %v11480_v31 }
 0x73f   : > { %v5086_v0 = vadd.f32 %v11508_v58, %v5085_v7 }
 0x740   : > { %v3356_v5 = vmul.f32 %v7507_v18, %v3276_v2  ;;  %v3419_v1 = vmul.f32 %v3403_v49, %v2795_v38 }
 0x741   : > { %v11581_v25 = vadd.f32 %v5086_v0, %v14222_v44 }
 0x742   : > { %v3372_v63 = vsub.f32 1.0, %v3356_v5 }
 0x743   : > { %14223 = vst [vmem:[#allocation53_spill] sm:$0xff] %v11581_v25  ;;  %v5143_v60 = vsel %vm1021_vm0, %v11581_v25, 0.0 }
 0x744   : > { %5144 = vadd.xlane.f32.xlu1 %v5143_v60  ;;  %v3388_v27 = vmul.f32 %v3372_v63, %v2844_v41  ;;  %v14232_v60 = vld [vmem:[#allocation18_spill] sm:$0xff] }
 0x746   : > { %v5087_v4 = vpop.f32.mrf.mxu2  ;;  %v3404_v26 = vadd.f32 1.0, %v3388_v27 }
 0x747   : > { %v5088_v17 = vadd.f32 %v11508_v58, %v5087_v4 }
 0x748   : > { %v3420_v46 = vmul.f32 %v3404_v26, %v2796_v20 }
 0x749   : > { %v11590_v3 = vadd.f32 %v5088_v17, %v14224_v62  ;;  %v14234_v62 = vld [vmem:[#allocation22_spill] sm:$0xff] }
 0x74a   : > { %v3428_v35 = vpack.c.bf16 %v3420_v46, %v3419_v1 }
 0x74b   : > { %14225 = vst [vmem:[#allocation48_spill] sm:$0xff] %v11590_v3  ;;  %v5146_v13 = vsel %vm1021_vm0, %v11590_v3, 0.0 }
 0x74c   : > { %5147 = vadd.xlane.f32.xlu2 %v5146_v13  ;;  %3539 = vmatmul.bf16.gmra.mxu3 %v3428_v35 }
 0x74e   : > { %v5090_v55 = vpop.f32.mrf.mxu2 }
 0x74f   : > { %v5091_v21 = vadd.f32 %v11508_v58, %v5090_v55 }
 0x751   : > { %v11598_v6 = vadd.f32 %v5091_v21, %v14226_v39  ;;  %v14236_v21 = vld [vmem:[#allocation20_spill] sm:$0xff] }
 0x753   : > { %14227 = vst [vmem:[#allocation37_spill] sm:$0xff] %v11598_v6  ;;  %v5149_v31 = vsel %vm1021_vm0, %v11598_v6, 0.0 }
 0x754   : > { %5150 = vadd.xlane.f32.xlu2 %v5149_v31 }
 0x756   : > { %v5092_v50 = vpop.f32.mrf.mxu2 }
 0x757   : > { %v5093_v30 = vadd.f32 %v11508_v58, %v5092_v50 }
 0x759   : > { %v11612_v43 = vadd.f32 %v5093_v30, %v14228_v16 }
 0x75b   : > { %14229 = vst [vmem:[#allocation62_spill] sm:$0xff] %v11612_v43  ;;  %v5152_v36 = vsel %vm1021_vm0, %v11612_v43, 0.0 }
 0x75e   : > { %v5095_v15 = vpop.f32.mrf.mxu2 }
 0x75f   : > { %v5096_v11 = vadd.f32 %v11508_v58, %v5095_v15 }
 0x761   : > { %v11625_v7 = vadd.f32 %v5096_v11, %v14230_v45 }
 0x763   : > { %14231 = vst [vmem:[#allocation54_spill] sm:$0xff] %v11625_v7  ;;  %v5155_v44 = vsel %vm1021_vm0, %v11625_v7, 0.0 }
 0x766   : > { %v5097_v53 = vpop.f32.mrf.mxu2 }
 0x767   : > { %v5098_v19 = vadd.f32 %v11508_v58, %v5097_v53 }
 0x769   : > { %v11638_v2 = vadd.f32 %v5098_v19, %v14232_v60 }
 0x76b   : > { %14233 = vst [vmem:[#allocation61_spill] sm:$0xff] %v11638_v2  ;;  %v5158_v4 = vsel %vm1021_vm0, %v11638_v2, 0.0 }
 0x76e   : > { %v5100_v59 = vpop.f32.mrf.mxu2 }
 0x76f   : > { %v5101_v52 = vadd.f32 %v11508_v58, %v5100_v59  ;;  %v14242_v59 = vld [vmem:[#allocation30_spill] sm:$0xff] }
 0x771   : > { %v11651_v27 = vadd.f32 %v5101_v52, %v14234_v62 }
 0x773   : > { %14235 = vst [vmem:[#allocation44_spill] sm:$0xff] %v11651_v27  ;;  %v5161_v13 = vsel %vm1021_vm0, %v11651_v27, 0.0 }
 0x776   : > { %v5102_v5 = vpop.f32.mrf.mxu2 }
 0x777   : > { %v5103_v20 = vadd.f32 %v11508_v58, %v5102_v5 }
 0x779   : > { %v11664_v35 = vadd.f32 %v5103_v20, %v14236_v21 }
 0x77b   : > { %14237 = vst [vmem:[#allocation45_spill] sm:$0xff] %v11664_v35 }
 0x77e   : > { %v5105_v1 = vpop.f32.mrf.mxu2 }
 0x77f   : > { %v5106_v50 = vadd.f32 %v11508_v58, %v5105_v1 }
 0x786   : > { %v5107_v30 = vpop.f32.mrf.mxu2 }
 0x787   : > { %v5108_v16 = vadd.f32 %v11508_v58, %v5107_v30 }
 0x797   : > { %v5133_v9 = vpop.xlane.xlu0 %5132 }
 0x798   : > { %v5179_v12 = vmul.f32 %v5133_v9, %v8012_v24  ;;  %v5164_v9 = vsel %vm1021_vm0, %v11664_v35, 0.0 }
 0x79a   : > { %v11604_v56 = vsub.f32 %v11517_v23, %v5179_v12 }
 0x79c   : > { %v5211_v47 = vmul.f32 %v11604_v56, %v11604_v56 }
 0x79e   : > { %v5227_v48 = vsel %vm1021_vm0, %v5211_v47, 0.0 }
 0x79f   : > { %v5136_v54 = vpop.xlane.xlu1 %5135  ;;  %5228 = vadd.xlane.f32.xlu0 %v5227_v48  ;;  %v14238_v48 = vld [vmem:[#allocation24_spill] sm:$0xff] }
 0x7a0   : > { %v5180_v29 = vmul.f32 %v5136_v54, %v8012_v24  ;;  %v11677_v54 = vadd.f32 %v5106_v50, %v14238_v48 }
 0x7a2   : > { %v11615_v61 = vsub.f32 %v11537_v32, %v5180_v29  ;;  %14239 = vst [vmem:[#allocation38_spill] sm:$0xff] %v11677_v54  ;;  %v5167_v11 = vsel %vm1021_vm0, %v11677_v54, 0.0 }
 0x7a4   : > { %v5212_v40 = vmul.f32 %v11615_v61, %v11615_v61 }
 0x7a6   : > { %v5230_v57 = vsel %vm1021_vm0, %v5212_v40, 0.0 }
 0x7a7   : > { %v5139_v22 = vpop.xlane.xlu2 %5138  ;;  %5231 = vadd.xlane.f32.xlu1 %v5230_v57  ;;  %5153 = vadd.xlane.f32.xlu0 %v5152_v36  ;;  %v14240_v57 = vld [vmem:[#allocation28_spill] sm:$0xff] }
 0x7a8   : > { %v5181_v14 = vmul.f32 %v5139_v22, %v8012_v24  ;;  %v11689_v36 = vadd.f32 %v5108_v16, %v14240_v57  ;;  %v5110_v22 = vpop.f32.mrf.mxu2 }
 0x7aa   : > { %v11628_v37 = vsub.f32 %v11556_v33, %v5181_v14  ;;  %14241 = vst [vmem:[#allocation39_spill] sm:$0xff] %v11689_v36  ;;  %v5111_v14 = vadd.f32 %v11508_v58, %v5110_v22  ;;  %v5170_v45 = vsel %vm1021_vm0, %v11689_v36, 0.0 }
 0x7ac   : > { %v5213_v0 = vmul.f32 %v11628_v37, %v11628_v37 }
 0x7ae   : > { %v5233_v51 = vsel %vm1021_vm0, %v5213_v0, 0.0  ;;  %v11695_v0 = vadd.f32 %v5111_v14, %v14242_v59 }
 0x7af   : > { %5234 = vadd.xlane.f32.xlu1 %v5233_v51  ;;  %5156 = vadd.xlane.f32.xlu0 %v5155_v44  ;;  %v5142_v10 = vpop.xlane.xlu0 %5141  ;;  %v11699_v51 = vpop.f32.mrf.mxu3 }
 0x7b0   : > { %v5182_v34 = vmul.f32 %v5142_v10, %v8012_v24  ;;  %14243 = vst [vmem:[#allocation57_spill] sm:$0xff] %v11695_v0  ;;  %v5173_v19 = vsel %vm1021_vm0, %v11695_v0, 0.0  ;;  %v5112_v16 = vpop.f32.mrf.mxu2 }
 0x7b2   : > { %v11641_v18 = vsub.f32 %v11571_v28, %v5182_v34 }
 0x7b4   : > { %v5214_v8 = vmul.f32 %v11641_v18, %v11641_v18 }
 0x7b6   : > { %v5236_v17 = vsel %vm1021_vm0, %v5214_v8, 0.0 }
 0x7b7   : > { %5159 = vadd.xlane.f32.xlu1 %v5158_v4  ;;  %v5145_v63 = vpop.xlane.xlu1 %5144  ;;  %5237 = vadd.xlane.f32.xlu2 %v5236_v17  ;;  %v11701_v44 = vpop.f32.mrf.mxu3 }
 0x7b8   : > { %v5183_v41 = vmul.f32 %v5145_v63, %v8012_v24 }
 0x7ba   : > { %v11654_v49 = vsub.f32 %v11581_v25, %v5183_v41 }
 0x7bc   : > { %v5215_v38 = vmul.f32 %v11654_v49, %v11654_v49 }
 0x7be   : > { %v5239_v26 = vsel %vm1021_vm0, %v5215_v38, 0.0 }
 0x7bf   : > { %v5148_v46 = vpop.xlane.xlu2 %5147  ;;  %5162 = vadd.xlane.f32.xlu1 %v5161_v13  ;;  %5240 = vadd.xlane.f32.xlu2 %v5239_v26  ;;  %v11703_v10 = vpop.f32.mrf.mxu3 }
 0x7c0   : > { %v5184_v55 = vmul.f32 %v5148_v46, %v8012_v24 }
 0x7c2   : > { %v11667_v39 = vsub.f32 %v11590_v3, %v5184_v55 }
 0x7c4   : > { %v5216_v31 = vmul.f32 %v11667_v39, %v11667_v39 }
 0x7c6   : > { %v5242_v15 = vsel %vm1021_vm0, %v5216_v31, 0.0 }
 0x7c7   : > { %v5151_v12 = vpop.xlane.xlu2 %5150  ;;  %5243 = vadd.xlane.f32.xlu0 %v5242_v15  ;;  %5165 = vadd.xlane.f32.xlu2 %v5164_v9  ;;  %v11705_v34 = vpop.f32.mrf.mxu3 }
 0x7c8   : > { %v5185_v47 = vmul.f32 %v5151_v12, %v8012_v24 }
 0x7ca   : > { %v11680_v29 = vsub.f32 %v11598_v6, %v5185_v47 }
 0x7cc   : > { %v5217_v53 = vmul.f32 %v11680_v29, %v11680_v29 }
 0x7ce   : > { %v5245_v40 = vsel %vm1021_vm0, %v5217_v53, 0.0 }
 0x7cf   : > { %5246 = vadd.xlane.f32.xlu0 %v5245_v40  ;;  %5168 = vadd.xlane.f32.xlu2 %v5167_v11  ;;  %v11707_v60 = vpop.f32.mrf.mxu3 }
 0x7d7   : > { %5171 = vadd.xlane.f32.xlu0 %v5170_v45  ;;  %v11710_v52 = vpop.f32.mrf.mxu3  ;;  %v5113_v45 = vadd.f32 %v11508_v58, %v5112_v16 }
 0x7df   : > { %5174 = vadd.xlane.f32.xlu0 %v5173_v19  ;;  %v11717_v1 = vpop.f32.mrf.mxu3 }
 0x7e7   : > { %v11732_v14 = vpop.f32.mrf.mxu3 }
 0x812   : > { %v5229_v8 = vpop.xlane.xlu0 %5228 }
 0x813   : > { %v5275_v5 = vmul.f32 %v5229_v8, %v8012_v24 }
 0x815   : > { %v5291_v4 = vadd.f32 1e-05, %v5275_v5 }
 0x817   : > { %7508 = vrsqrt.f32 %v5291_v4  ;;  %vm5313_vm13 = vweird.f32 %v5291_v4 }
 0x81a   : > { %v5232_v17 = vpop.xlane.xlu1 %5231  ;;  %v5154_v63 = vpop.xlane.xlu0 %5153 }
 0x81b   : > { %v5276_v41 = vmul.f32 %v5232_v17, %v8012_v24  ;;  %v5186_v62 = vmul.f32 %v5154_v63, %v8012_v24 }
 0x81d   : > { %v7509_v38 = vpop.eup %7508  ;;  %v5292_v20 = vadd.f32 1e-05, %v5276_v41  ;;  %v11715_v13 = vsub.f32 %v11612_v43, %v5186_v62 }
 0x81e   : > { %v5308_v26 = vmul.f32 %v7509_v38, %v5291_v4  ;;  %vm5314_vm9 = vweird.f32 %v7509_v38 }
 0x81f   : > { %7510 = vrsqrt.f32 %v5292_v20  ;;  %v5218_v46 = vmul.f32 %v11715_v13, %v11715_v13  ;;  %vm5315_vm14 = vmor %vm5313_vm13, %vm5314_vm9  ;;  %vm5323_vm2 = vweird.f32 %v5292_v20 }
 0x820   : > { %v5309_v55 = vmul.f32 %v7509_v38, %v5308_v26  ;;  %v14244_v26 = vld [vmem:[#allocation26_spill] sm:$0xff] }
 0x821   : > { %v5248_v21 = vsel %vm1021_vm0, %v5218_v46, 0.0  ;;  %v11739_v46 = vadd.f32 %v5113_v45, %v14244_v26 }
 0x822   : > { %v5310_v31 = vmul.f32 0.5, %v5309_v55  ;;  %v5235_v50 = vpop.xlane.xlu1 %5234  ;;  %5249 = vadd.xlane.f32.xlu1 %v5248_v21  ;;  %v5157_v15 = vpop.xlane.xlu0 %5156 }
 0x823   : > { %v5277_v9 = vmul.f32 %v5235_v50, %v8012_v24  ;;  %v5187_v12 = vmul.f32 %v5157_v15, %v8012_v24  ;;  %14245 = vst [vmem:[#allocation60_spill] sm:$0xff] %v11739_v46  ;;  %v5176_v16 = vsel %vm1021_vm0, %v11739_v46, 0.0 }
 0x824   : > { %v5311_v47 = vsub.f32 1.5, %v5310_v31 }
 0x825   : > { %v7511_v30 = vpop.eup %7510  ;;  %v11724_v48 = vadd.f32 1e-05, %v5277_v9  ;;  %v11727_v53 = vsub.f32 %v11625_v7, %v5187_v12  ;;  %v11750_v12 = vpop.f32.mrf.mxu3 }
 0x826   : > { %v5312_v40 = vmul.f32 %v7509_v38, %v5311_v47  ;;  %v5318_v11 = vmul.f32 %v7511_v30, %v5292_v20  ;;  %vm5324_vm15 = vweird.f32 %v7511_v30  ;;  %v11761_v20 = vld [vmem:[%s13782_s7 + $0x1] ss:$0 sm:$0xff] }
 0x827   : > { %7512 = vrsqrt.f32 %v11724_v48  ;;  %v5219_v57 = vmul.f32 %v11727_v53, %v11727_v53  ;;  %vm5325_vm3 = vmor %vm5323_vm2, %vm5324_vm15  ;;  %vm5333_vm5 = vweird.f32 %v11724_v48 }
 0x828   : > { %v5319_v22 = vmul.f32 %v7511_v30, %v5318_v11  ;;  %v5316_v19 = vsel %vm5315_vm14, %v7509_v38, %v5312_v40 }
 0x829   : > { %v5251_v59 = vsel %vm1021_vm0, %v5219_v57, 0.0  ;;  %v11742_v58 = vmul.f32 %v5316_v19, %v11604_v56 }
 0x82a   : > { %v5320_v8 = vmul.f32 0.5, %v5319_v22  ;;  %v5160_v5 = vpop.xlane.xlu1 %5159  ;;  %v5238_v17 = vpop.xlane.xlu2 %5237  ;;  %5252 = vadd.xlane.f32.xlu1 %v5251_v59 }
 0x82b   : > { %v5188_v63 = vmul.f32 %v5160_v5, %v8012_v24  ;;  %v5278_v41 = vmul.f32 %v5238_v17, %v8012_v24  ;;  %14246 = vst [vmem:[#allocation36_spill] sm:$0xff] %v11742_v58  ;;  %v5515_v40 = vmul.f32 %v11761_v20, %v11742_v58  ;;  %v11775_v17 = vld [vmem:[%s13783_s8 + $0x1] ss:$0 sm:$0xff] }
 0x82c   : > { %v5321_v62 = vsub.f32 1.5, %v5320_v8 }
 0x82d   : > { %v7513_v4 = vpop.eup %7512  ;;  %v11745_v55 = vsub.f32 %v11638_v2, %v5188_v63  ;;  %v5294_v38 = vadd.f32 1e-05, %v5278_v41  ;;  %v5531_v63 = vadd.f32 %v11775_v17, %v5515_v40 }
 0x82e   : > { %v5322_v21 = vmul.f32 %v7511_v30, %v5321_v62  ;;  %v5328_v31 = vmul.f32 %v7513_v4, %v11724_v48  ;;  %vm5334_vm4 = vweird.f32 %v7513_v4 }
 0x82f   : > { %7514 = vrsqrt.f32 %v5294_v38  ;;  %v5220_v50 = vmul.f32 %v11745_v55, %v11745_v55  ;;  %vm5335_vm1 = vmor %vm5333_vm5, %vm5334_vm4  ;;  %vm5343_vm7 = vweird.f32 %v5294_v38 }
 0x830   : > { %v5326_v15 = vsel %vm5325_vm3, %v7511_v30, %v5322_v21  ;;  %v5329_v9 = vmul.f32 %v7513_v4, %v5328_v31 }
 0x831   : > { %v11753_v56 = vmul.f32 %v5326_v15, %v11615_v61  ;;  %v5254_v47 = vsel %vm1021_vm0, %v5220_v50, 0.0 }
 0x832   : > { %v5330_v30 = vmul.f32 0.5, %v5329_v9  ;;  %v5163_v11 = vpop.xlane.xlu1 %5162  ;;  %5255 = vadd.xlane.f32.xlu2 %v5254_v47  ;;  %v5241_v57 = vpop.xlane.xlu2 %5240  ;;  %5177 = vadd.xlane.f32.xlu1 %v5176_v16 }
 0x833   : > { %14247 = vst [vmem:[#allocation49_spill] sm:$0xff] %v11753_v56  ;;  %v5189_v61 = vmul.f32 %v5163_v11, %v8012_v24  ;;  %v5279_v22 = vmul.f32 %v5241_v57, %v8012_v24  ;;  %v5516_v45 = vmul.f32 %v11761_v20, %v11753_v56  ;;  %v11786_v57 = vpop.f32.mrf.mxu3 }
 0x834   : > { %v5331_v59 = vsub.f32 1.5, %v5330_v30 }
 0x835   : > { %v7515_v19 = vpop.eup %7514  ;;  %v11770_v8 = vsub.f32 %v11651_v27, %v5189_v61  ;;  %v5295_v5 = vadd.f32 1e-05, %v5279_v22  ;;  %v5532_v41 = vadd.f32 %v11775_v17, %v5516_v45 }
 0x836   : > { %v5332_v62 = vmul.f32 %v7513_v4, %v5331_v59  ;;  %v5338_v26 = vmul.f32 %v7515_v19, %v5294_v38  ;;  %vm5344_vm6 = vweird.f32 %v7515_v19 }
 0x837   : > { %7516 = vrsqrt.f32 %v5295_v5  ;;  %v5547_v21 = vpack.c.bf16 %v5532_v41, %v5531_v63  ;;  %v5221_v31 = vmul.f32 %v11770_v8, %v11770_v8  ;;  %vm5345_vm8 = vmor %vm5343_vm7, %vm5344_vm6  ;;  %vm5353_vm11 = vweird.f32 %v5295_v5 }
 0x838   : > { %v5339_v50 = vmul.f32 %v7515_v19, %v5338_v26  ;;  %v5336_v9 = vsel %vm5335_vm1, %v7513_v4, %v5332_v62 }
 0x839   : > { %7123 = vmatmul.msk.bf16.vlgmr.msrb.gmra.mxu1 %vm1021_vm0, %v5547_v21  ;;  %v5257_v15 = vsel %vm1021_vm0, %v5221_v31, 0.0  ;;  %v11789_v22 = vmul.f32 %v5336_v9, %v11628_v37 }
 0x83a   : > { %v5340_v47 = vmul.f32 0.5, %v5339_v50  ;;  %5258 = vadd.xlane.f32.xlu2 %v5257_v15  ;;  %v5166_v16 = vpop.xlane.xlu2 %5165  ;;  %v5244_v40 = vpop.xlane.xlu0 %5243 }
 0x83b   : > { %v5190_v30 = vmul.f32 %v5166_v16, %v8012_v24  ;;  %v5280_v11 = vmul.f32 %v5244_v40, %v8012_v24  ;;  %14248 = vst [vmem:[#allocation41_spill] sm:$0xff] %v11789_v22  ;;  %v5517_v31 = vmul.f32 %v11761_v20, %v11789_v22 }
 0x83c   : > { %v5341_v61 = vsub.f32 1.5, %v5340_v47 }
 0x83d   : > { %v7517_v48 = vpop.eup %7516  ;;  %v11792_v45 = vsub.f32 %v11664_v35, %v5190_v30  ;;  %v5296_v4 = vadd.f32 1e-05, %v5280_v11  ;;  %v5533_v40 = vadd.f32 %v11775_v17, %v5517_v31  ;;  %v11812_v11 = vpop.f32.mrf.mxu3 }
 0x83e   : > { %v5342_v59 = vmul.f32 %v7515_v19, %v5341_v61  ;;  %v5348_v63 = vmul.f32 %v7517_v48, %v5295_v5  ;;  %vm5354_vm10 = vweird.f32 %v7517_v48 }
 0x83f   : > { %7518 = vrsqrt.f32 %v5296_v4  ;;  %v5222_v41 = vmul.f32 %v11792_v45, %v11792_v45  ;;  %vm5355_vm12 = vmor %vm5353_vm11, %vm5354_vm10  ;;  %vm5363_vm13 = vweird.f32 %v5296_v4 }
 0x840   : > { %v5346_v62 = vsel %vm5345_vm8, %v7515_v19, %v5342_v59  ;;  %v5349_v26 = vmul.f32 %v7517_v48, %v5348_v63 }
 0x841   : > { %v11797_v21 = vmul.f32 %v5346_v62, %v11641_v18  ;;  %v5260_v37 = vsel %vm1021_vm0, %v5222_v41, 0.0 }
 0x842   : > { %v5350_v50 = vmul.f32 0.5, %v5349_v26  ;;  %5261 = vadd.xlane.f32.xlu0 %v5260_v37  ;;  %v5169_v15 = vpop.xlane.xlu2 %5168  ;;  %v11802_v38 = vpop.xlane.xlu0 %5246 }
 0x843   : > { %14249 = vst [vmem:[#allocation59_spill] sm:$0xff] %v11797_v21  ;;  %v5191_v9 = vmul.f32 %v5169_v15, %v8012_v24  ;;  %v5518_v47 = vmul.f32 %v11761_v20, %v11797_v21 }
 0x844   : > { %v5351_v19 = vsub.f32 1.5, %v5350_v50 }
 0x845   : > { %v7519_v16 = vpop.eup %7518  ;;  %v11808_v18 = vsub.f32 %v11677_v54, %v5191_v9  ;;  %v5534_v30 = vadd.f32 %v11775_v17, %v5518_v47  ;;  %v11822_v47 = vld [vmem:[%s13787_s12 + $0x1] ss:$0 sm:$0xff]  ;;  %v14273_v54 = vld [vmem:[#allocation21_spill] sm:$0xff] }
 0x846   : > { %v5352_v61 = vmul.f32 %v7517_v48, %v5351_v19  ;;  %v5358_v59 = vmul.f32 %v7519_v16, %v5296_v4  ;;  %vm5364_vm9 = vweird.f32 %v7519_v16 }
 0x847   : > { %v5548_v63 = vpack.c.bf16 %v5534_v30, %v5533_v40  ;;  %v5223_v41 = vmul.f32 %v11808_v18, %v11808_v18  ;;  %vm5365_vm14 = vmor %vm5363_vm13, %vm5364_vm9  ;;  %v11832_v30 = vpop.f32.mrf.mxu3 }
 0x848   : > { %v5359_v62 = vmul.f32 %v7519_v16, %v5358_v59  ;;  %v5356_v37 = vsel %vm5355_vm12, %v7517_v48, %v5352_v61  ;;  %v3506_v59 = vadd.f32 %v11822_v47, %v11699_v51 }
 0x849   : > { %7124 = vmatmul.msk.bf16.gmra.mxu1 %vm1021_vm0, %v5548_v63  ;;  %v5263_v26 = vsel %vm1021_vm0, %v5223_v41, 0.0  ;;  %v11825_v5 = vmul.f32 %v5356_v37, %v11654_v49  ;;  %v14252_v37 = vld [vmem:[#allocation5_spill] sm:$0xff] }
 0x84a   : > { %v5360_v31 = vmul.f32 0.5, %v5359_v62  ;;  %5264 = vadd.xlane.f32.xlu1 %v5263_v26  ;;  %v5172_v50 = vpop.xlane.xlu0 %5171 }
 0x84b   : > { %v5192_v15 = vmul.f32 %v5172_v50, %v8012_v24  ;;  %14250 = vst [vmem:[#allocation35_spill] sm:$0xff] %v11825_v5  ;;  %v5519_v41 = vmul.f32 %v11761_v20, %v11825_v5 }
 0x84c   : > { %v5361_v9 = vsub.f32 1.5, %v5360_v31 }
 0x84d   : > { %v11828_v19 = vsub.f32 %v11689_v36, %v5192_v15 }
 0x84e   : > { %v5362_v40 = vmul.f32 %v7519_v16, %v5361_v9 }
 0x84f   : > { %v5224_v48 = vmul.f32 %v11828_v19, %v11828_v19  ;;  %v3535_v9 = vpop.f32.mrf.mxu3 }
 0x850   : > { %v5366_v61 = vsel %vm5365_vm14, %v7519_v16, %v5362_v40  ;;  %v11846_v16 = vadd.f32 %v3506_v59, %v14252_v37  ;;  %v3508_v40 = vadd.f32 %v11822_v47, %v11701_v44  ;;  %v3516_v44 = vadd.f32 %v11822_v47, %v11707_v60 }
 0x851   : > { %v11837_v63 = vmul.f32 %v5366_v61, %v11667_v39  ;;  %v5266_v49 = vsel %vm1021_vm0, %v5224_v48, 0.0  ;;  %v5535_v39 = vadd.f32 %v11775_v17, %v5519_v41  ;;  %v3513_v48 = vadd.f32 %v11822_v47, %v11705_v34 }
 0x852   : > { %5267 = vadd.xlane.f32.xlu2 %v5266_v49  ;;  %v5175_v4 = vpop.xlane.xlu0 %5174  ;;  %v3563_v61 = vsel %vm1021_vm0, %v11846_v16, 0.0  ;;  %v14253_v49 = vld [vmem:[#allocation9_spill] sm:$0xff]  ;;  %v3521_v34 = vadd.f32 %v11822_v47, %v11717_v1  ;;  %v3523_v60 = vadd.f32 %v11822_v47, %v11732_v14  ;;  %v3528_v1 = vadd.f32 %v11822_v47, %v11786_v57 }
 0x853   : > { %14251 = vst [vmem:[#allocation43_spill] sm:$0xff] %v11837_v63  ;;  %v5193_v62 = vmul.f32 %v5175_v4, %v8012_v24  ;;  %v5520_v26 = vmul.f32 %v11761_v20, %v11837_v63  ;;  %v11864_v41 = vadd.f32 %v3513_v48, %v14253_v49  ;;  %v14254_v4 = vld [vmem:[#allocation3_spill] sm:$0xff]  ;;  %v3531_v14 = vadd.f32 %v11822_v47, %v11812_v11 }
 0x854   : > { %v14257_v49 = vld [vmem:[#allocation19_spill] sm:$0xff]  ;;  %v3536_v57 = vadd.f32 %v11822_v47, %v3535_v9 }
 0x855   : > { %v11849_v51 = vsub.f32 %v11695_v0, %v5193_v62  ;;  %v5536_v31 = vadd.f32 %v11775_v17, %v5520_v26  ;;  %v11867_v62 = vadd.f32 %v3508_v40, %v14254_v4  ;;  %v3572_v26 = vsel %vm1021_vm0, %v11864_v41, 0.0 }
 0x856   : > { %v11894_v4 = vadd.f32 %v3528_v1, %v14257_v49  ;;  %v14260_v1 = vld [vmem:[#allocation25_spill] sm:$0xff] }
 0x857   : > { %v5549_v50 = vpack.c.bf16 %v5536_v31, %v5535_v39  ;;  %v5225_v15 = vmul.f32 %v11849_v51, %v11849_v51  ;;  %v3566_v37 = vsel %vm1021_vm0, %v11867_v62, 0.0  ;;  %v3537_v39 = vpop.f32.mrf.mxu3  ;;  %v14255_v31 = vld [vmem:[#allocation13_spill] sm:$0xff] }
 0x859   : > { %7125 = vmatmul.msk.bf16.gmra.mxu1 %vm1021_vm0, %v5549_v50  ;;  %v5269_v59 = vsel %vm1021_vm0, %v5225_v15, 0.0  ;;  %v11878_v50 = vadd.f32 %v3516_v44, %v14255_v31  ;;  %v14256_v15 = vld [vmem:[#allocation15_spill] sm:$0xff]  ;;  %v14258_v44 = vld [vmem:[#allocation32_spill] sm:$0xff] }
 0x85a   : > { %3564 = vadd.xlane.f32.xlu2 %v3563_v61  ;;  %5270 = vadd.xlane.f32.xlu0 %v5269_v59  ;;  %v11881_v40 = vadd.f32 %v3521_v34, %v14256_v15  ;;  %v11897_v34 = vadd.f32 %v3523_v60, %v14258_v44  ;;  %v14259_v31 = vld [vmem:[#allocation23_spill] sm:$0xff]  ;;  %v14261_v44 = vld [vmem:[#allocation29_spill] sm:$0xff] }
 0x85b   : > { %v3575_v61 = vsel %vm1021_vm0, %v11878_v50, 0.0  ;;  %v11907_v15 = vadd.f32 %v3531_v14, %v14259_v31  ;;  %v14262_v14 = vld [vmem:[#allocation27_spill] sm:$0xff] }
 0x85c   : > { %v3581_v48 = vsel %vm1021_vm0, %v11881_v40, 0.0 }
 0x85d   : > { %v3593_v49 = vsel %vm1021_vm0, %v11907_v15, 0.0 }
 0x85f   : > { %v11891_v59 = vpop.f32.mrf.mxu3 }
 0x862   : > { %3573 = vadd.xlane.f32.xlu2 %v3572_v26  ;;  %3567 = vadd.xlane.f32.xlu0 %v3566_v37  ;;  %v3590_v26 = vsel %vm1021_vm0, %v11894_v4, 0.0  ;;  %v3584_v37 = vsel %vm1021_vm0, %v11897_v34, 0.0 }
 0x867   : > { %v3542_v60 = vpop.f32.mrf.mxu3 }
 0x868   : > { %v3543_v11 = vadd.f32 %v11822_v47, %v3542_v60 }
 0x86a   : > { %3582 = vadd.xlane.f32.xlu2 %v3581_v48  ;;  %3576 = vadd.xlane.f32.xlu0 %v3575_v61  ;;  %v11910_v48 = vadd.f32 %v3536_v57, %v14260_v1  ;;  %v3538_v61 = vadd.f32 %v11822_v47, %v3537_v39  ;;  %v5281_v57 = vmul.f32 %v11802_v38, %v8012_v24 }
 0x86c   : > { %v3599_v9 = vsel %vm1021_vm0, %v11910_v48, 0.0  ;;  %v5297_v1 = vadd.f32 1e-05, %v5281_v57 }
 0x86e   : > { %7520 = vrsqrt.f32 %v5297_v1  ;;  %vm5373_vm2 = vweird.f32 %v5297_v1 }
 0x872   : > { %3591 = vadd.xlane.f32.xlu2 %v3590_v26  ;;  %3585 = vadd.xlane.f32.xlu0 %v3584_v37  ;;  %v11919_v26 = vadd.f32 %v3538_v61, %v14261_v44  ;;  %v11922_v37 = vadd.f32 %v3543_v11, %v14262_v14 }
 0x874   : > { %14263 = vst [vmem:[#allocation55_spill] sm:$0xff] %v11922_v37  ;;  %v3602_v39 = vsel %vm1021_vm0, %v11919_v26, 0.0  ;;  %v3608_v31 = vsel %vm1021_vm0, %v11922_v37, 0.0  ;;  %v7521_v60 = vpop.eup %7520 }
 0x875   : > { %vm5374_vm15 = vweird.f32 %v7521_v60 }
 0x876   : > { %vm5375_vm3 = vmor %vm5373_vm2, %vm5374_vm15 }
 0x87a   : > { %3600 = vadd.xlane.f32.xlu2 %v3599_v9  ;;  %3594 = vadd.xlane.f32.xlu0 %v3593_v49  ;;  %v5368_v9 = vmul.f32 %v7521_v60, %v5297_v1 }
 0x87c   : > { %v5369_v61 = vmul.f32 %v7521_v60, %v5368_v9 }
 0x87e   : > { %v5370_v14 = vmul.f32 0.5, %v5369_v61 }
 0x880   : > { %v5371_v38 = vsub.f32 1.5, %v5370_v14 }
 0x882   : > { %3603 = vadd.xlane.f32.xlu0 %v3602_v39  ;;  %3609 = vadd.xlane.f32.xlu2 %v3608_v31  ;;  %v5372_v63 = vmul.f32 %v7521_v60, %v5371_v38 }
 0x884   : > { %v5376_v31 = vsel %vm5375_vm3, %v7521_v60, %v5372_v63 }
 0x895   : > { %v5250_v49 = vpop.xlane.xlu1 %5249 }
 0x896   : > { %v5282_v11 = vmul.f32 %v5250_v49, %v8012_v24 }
 0x898   : > { %v5298_v44 = vadd.f32 1e-05, %v5282_v11 }
 0x89a   : > { %7522 = vrsqrt.f32 %v5298_v44  ;;  %vm5383_vm5 = vweird.f32 %v5298_v44 }
 0x89d   : > { %v5253_v5 = vpop.xlane.xlu1 %5252 }
 0x89e   : > { %v5283_v21 = vmul.f32 %v5253_v5, %v8012_v24 }
 0x8a0   : > { %v7523_v56 = vpop.eup %7522  ;;  %v5299_v58 = vadd.f32 1e-05, %v5283_v21  ;;  %v11935_v21 = vmul.f32 %v5376_v31, %v11680_v29 }
 0x8a1   : > { %v5378_v39 = vmul.f32 %v7523_v56, %v5298_v44  ;;  %vm5384_vm4 = vweird.f32 %v7523_v56 }
 0x8a2   : > { %7524 = vrsqrt.f32 %v5299_v58  ;;  %14264 = vst [vmem:[#allocation34_spill] sm:$0xff] %v11935_v21  ;;  %vm5385_vm1 = vmor %vm5383_vm5, %vm5384_vm4  ;;  %vm5393_vm7 = vweird.f32 %v5299_v58 }
 0x8a3   : > { %v5379_v57 = vmul.f32 %v7523_v56, %v5378_v39 }
 0x8a5   : > { %v5380_v9 = vmul.f32 0.5, %v5379_v57  ;;  %v5256_v22 = vpop.xlane.xlu2 %5255  ;;  %v5178_v49 = vpop.xlane.xlu1 %5177  ;;  %v3511_v57 = vadd.f32 %v11822_v47, %v11703_v10 }
 0x8a6   : > { %v5284_v61 = vmul.f32 %v5256_v22, %v8012_v24  ;;  %v5194_v11 = vmul.f32 %v5178_v49, %v8012_v24 }
 0x8a7   : > { %v5381_v14 = vsub.f32 1.5, %v5380_v9  ;;  %v5521_v9 = vmul.f32 %v11761_v20, %v11935_v21 }
 0x8a8   : > { %v7525_v5 = vpop.eup %7524  ;;  %v5300_v38 = vadd.f32 1e-05, %v5284_v61  ;;  %v11938_v0 = vsub.f32 %v11739_v46, %v5194_v11 }
 0x8a9   : > { %v5382_v1 = vmul.f32 %v7523_v56, %v5381_v14  ;;  %v5388_v63 = vmul.f32 %v7525_v5, %v5299_v58  ;;  %v14267_v14 = vld [vmem:[#allocation7_spill] sm:$0xff]  ;;  %vm5394_vm6 = vweird.f32 %v7525_v5 }
 0x8aa   : > { %14265 = vst [vmem:[#allocation58_spill] sm:$0xff] %v11938_v0  ;;  %7526 = vrsqrt.f32 %v5300_v38  ;;  %v5226_v22 = vmul.f32 %v11938_v0, %v11938_v0  ;;  %vm5395_vm8 = vmor %vm5393_vm7, %vm5394_vm6  ;;  %vm5403_vm11 = vweird.f32 %v5300_v38 }
 0x8ab   : > { %v5386_v60 = vsel %vm5385_vm1, %v7523_v56, %v5382_v1  ;;  %v5389_v39 = vmul.f32 %v7525_v5, %v5388_v63  ;;  %v11954_v1 = vadd.f32 %v3511_v57, %v14267_v14 }
 0x8ac   : > { %v11945_v29 = vmul.f32 %v5386_v60, %v11715_v13  ;;  %v5272_v31 = vsel %vm1021_vm0, %v5226_v22, 0.0  ;;  %v5537_v13 = vadd.f32 %v11775_v17, %v5521_v9 }
 0x8ad   : > { %v5390_v44 = vmul.f32 0.5, %v5389_v39  ;;  %v5259_v49 = vpop.xlane.xlu2 %5258  ;;  %5273 = vadd.xlane.f32.xlu1 %v5272_v31  ;;  %v3518_v31 = vadd.f32 %v11822_v47, %v11710_v52  ;;  %v3569_v57 = vsel %vm1021_vm0, %v11954_v1, 0.0  ;;  %v11970_v52 = vld [vmem:[%s13785_s10 + $0x1] ss:$0 sm:$0xff] }
 0x8ae   : > { %14266 = vst [vmem:[#allocation40_spill] sm:$0xff] %v11945_v29  ;;  %v5285_v61 = vmul.f32 %v5259_v49, %v8012_v24  ;;  %v5522_v56 = vmul.f32 %v11761_v20, %v11945_v29 }
 0x8af   : > { %v5391_v10 = vsub.f32 1.5, %v5390_v44 }
 0x8b0   : > { %v7527_v11 = vpop.eup %7526  ;;  %v5538_v63 = vadd.f32 %v11775_v17, %v5522_v56  ;;  %v11958_v60 = vadd.f32 1e-05, %v5285_v61 }
 0x8b1   : > { %v5398_v22 = vmul.f32 %v7527_v11, %v5300_v38  ;;  %v5392_v49 = vmul.f32 %v7525_v5, %v5391_v10  ;;  %vm5404_vm10 = vweird.f32 %v7527_v11 }
 0x8b2   : > { %v5550_v39 = vpack.c.bf16 %v5538_v63, %v5537_v13  ;;  %7528 = vrsqrt.f32 %v11958_v60  ;;  %v14268_v63 = vld [vmem:[#allocation11_spill] sm:$0xff]  ;;  %vm5405_vm12 = vmor %vm5403_vm11, %vm5404_vm10  ;;  %vm5413_vm2 = vweird.f32 %v11958_v60 }
 0x8b3   : > { %v5399_v21 = vmul.f32 %v7527_v11, %v5398_v22  ;;  %v11978_v22 = vadd.f32 %v3518_v31, %v14268_v63 }
 0x8b4   : > { %7126 = vmatmul.msk.bf16.gmra.mxu1 %vm1021_vm0, %v5550_v39 }
 0x8b5   : > { %v5400_v44 = vmul.f32 0.5, %v5399_v21  ;;  %3570 = vadd.xlane.f32.xlu1 %v3569_v57  ;;  %v5262_v9 = vpop.xlane.xlu0 %5261  ;;  %v5396_v21 = vsel %vm5395_vm8, %v7525_v5, %v5392_v49  ;;  %v3526_v5 = vadd.f32 %v11822_v47, %v11750_v12  ;;  %v3578_v49 = vsel %vm1021_vm0, %v11978_v22, 0.0 }
 0x8b6   : > { %v5286_v61 = vmul.f32 %v5262_v9, %v8012_v24  ;;  %v5588_v56 = vpop.f32.mrf.mxu1 }
 0x8b7   : > { %v5401_v14 = vsub.f32 1.5, %v5400_v44  ;;  %v11973_v10 = vadd.f32 %v11970_v52, %v5588_v56  ;;  %v11987_v44 = vmul.f32 %v5396_v21, %v11727_v53  ;;  %v14271_v21 = vld [vmem:[#allocation33_spill] sm:$0xff] }
 0x8b8   : > { %v11975_v13 = vadd.f32 1e-05, %v5286_v61  ;;  %v11984_v57 = vpop.eup %7528  ;;  %v12009_v63 = vadd.f32 %v3526_v5, %v14271_v21  ;;  %v3533_v5 = vadd.f32 %v11822_v47, %v11832_v30 }
 0x8b9   : > { %v5402_v58 = vmul.f32 %v7527_v11, %v5401_v14  ;;  %v11982_v39 = vmul.f32 0.70710677, %v11973_v10  ;;  %14269 = vst [vmem:[#allocation42_spill] sm:$0xff] %v11987_v44  ;;  %v5408_v56 = vmul.f32 %v11984_v57, %v11958_v60  ;;  %vm5414_vm13 = vweird.f32 %v11984_v57 }
 0x8ba   : > { %7530 = vrsqrt.f32 %v11975_v13  ;;  %14272 = vst [vmem:[#allocation50_spill] sm:$0xff] %v12009_v63  ;;  %v12036_v35 = vadd.f32 %v3533_v5, %v14273_v54  ;;  %vm5423_vm3 = vweird.f32 %v11975_v13  ;;  %vm12071_vm5 = vmor %vm5413_vm2, %vm5414_vm13 }
 0x8bb   : > { %v5406_v9 = vsel %vm5405_vm12, %v7527_v11, %v5402_v58  ;;  %v11995_v38 = vand.u32 2147483647, %v11982_v39  ;;  %vm5660_vm12 = vcmp.ge.f32.partialorder %v11982_v39, 0.0 }
 0x8bc   : > { %v11992_v31 = vmul.f32 %v5406_v9, %v11745_v55  ;;  %v5523_v55 = vmul.f32 %v11761_v20, %v11987_v44  ;;  %14274 = vst [vmem:[#allocation63_spill] sm:$0xff] %v12036_v35  ;;  %v3596_v54 = vsel %vm1021_vm0, %v12036_v35, 0.0 }
 0x8bd   : > { %3579 = vadd.xlane.f32.xlu1 %v3578_v49  ;;  %v5265_v61 = vpop.xlane.xlu1 %5264  ;;  %v5708_v53 = vmul.f32 0.3275911, %v11995_v38 }
 0x8be   : > { %14270 = vst [vmem:[#allocation47_spill] sm:$0xff] %v11992_v31  ;;  %v5590_v11 = vpop.f32.mrf.mxu1  ;;  %v5524_v12 = vmul.f32 %v11761_v20, %v11992_v31  ;;  %v5287_v9 = vmul.f32 %v5265_v61, %v8012_v24  ;;  %v5409_v31 = vmul.f32 %v11984_v57, %v5408_v56  ;;  %v5539_v37 = vadd.f32 %v11775_v17, %v5523_v55 }
 0x8bf   : > { %v5724_v58 = vadd.f32 1.0, %v5708_v53  ;;  %v12015_v29 = vadd.f32 %v11970_v52, %v5590_v11  ;;  %v3587_v61 = vsel %vm1021_vm0, %v12009_v63, 0.0 }
 0x8c0   : > { %v12006_v14 = vpop.eup %7530  ;;  %v5540_v46 = vadd.f32 %v11775_v17, %v5524_v12  ;;  %v12023_v53 = vadd.f32 1e-05, %v5287_v9  ;;  %v5410_v56 = vmul.f32 0.5, %v5409_v31 }
 0x8c1   : > { %v5418_v49 = vmul.f32 %v12006_v14, %v11975_v13  ;;  %7532 = vrcp.f32 %v5724_v58  ;;  %v12028_v11 = vmul.f32 0.70710677, %v12015_v29  ;;  %v5751_v2 = vand.u32 2147483648, %v5724_v58 }
 0x8c2   : > { %v5551_v21 = vpack.c.bf16 %v5540_v46, %v5539_v37  ;;  %7534 = vrsqrt.f32 %v12023_v53  ;;  %v5411_v31 = vsub.f32 1.5, %v5410_v56  ;;  %v14275_v56 = vld [vmem:[#allocation31_spill] sm:$0xff]  ;;  %vm5424_vm14 = vweird.f32 %v12006_v14 }
 0x8c3   : > { %v5419_v44 = vmul.f32 %v12006_v14, %v5418_v49  ;;  %v12032_v55 = vand.u32 2147483647, %v12028_v11  ;;  %vm5745_vm15 = vweird.f32 %v5724_v58  ;;  %vm12080_vm6 = vmor %vm5423_vm3, %vm5424_vm14  ;;  %vm5433_vm13 = vweird.f32 %v12023_v53 }
 0x8c4   : > { %7127 = vmatmul.msk.bf16.gmra.mxu1 %vm1021_vm0, %v5551_v21 }
 0x8c5   : > { %3588 = vadd.xlane.f32.xlu1 %v3587_v61  ;;  %v5268_v12 = vpop.xlane.xlu2 %5267  ;;  %v5420_v49 = vmul.f32 0.5, %v5419_v44  ;;  %v5709_v37 = vmul.f32 0.3275911, %v12032_v55  ;;  %v3541_v44 = vadd.f32 %v11822_v47, %v11891_v59 }
 0x8c6   : > { %v5288_v36 = vmul.f32 %v5268_v12, %v8012_v24  ;;  %v5593_v30 = vpop.f32.mrf.mxu1 }
 0x8c7   : > { %v7533_v9 = vpop.eup %7532  ;;  %v5421_v61 = vsub.f32 1.5, %v5420_v49  ;;  %v12045_v12 = vadd.f32 1.0, %v5709_v37  ;;  %v12057_v49 = vadd.f32 %v3541_v44, %v14275_v56  ;;  %v5752_v44 = vor.u32 1.1754944e-38, %v5751_v2 }
 0x8c8   : > { %v12039_v27 = vadd.f32 1e-05, %v5288_v36  ;;  %v5741_v46 = vmul.f32 %v7533_v9, %v5724_v58  ;;  %vm5746_vm9 = vweird.f32 %v7533_v9  ;;  %v5749_v36 = vand.u32 2147483647, %v5724_v58  ;;  %v12054_v59 = vpop.eup %7534 }
 0x8c9   : > { %14276 = vst [vmem:[#allocation4_spill] sm:$0xff] %v12057_v49  ;;  %v5422_v37 = vmul.f32 %v12006_v14, %v5421_v61  ;;  %vm5747_vm4 = vmor %vm5745_vm15, %vm5746_vm9  ;;  %v12069_v56 = vadd.f32 %v11970_v52, %v5593_v30  ;;  %v6124_v58 = vsub.f32 0.0, %v11995_v38  ;;  %v5764_v33 = vand.u32 2147483647, %v12045_v12 }
 0x8ca   : > { %7536 = vrsqrt.f32 %v12039_v27  ;;  %v5742_v21 = vsub.f32 1.0, %v5741_v46  ;;  %v5412_v46 = vmul.f32 %v11984_v57, %v5411_v31  ;;  %vm5750_vm1 = vcmp.eq.f32.partialorder %v5749_v36, 8.507059e+37 }
 0x8cb   : > { %7538 = vrcp.f32 %v12045_v12  ;;  %v5426_v36 = vsel %vm12080_vm6, %v12006_v14, %v5422_v37  ;;  %v12097_v3 = vmul.f32 0.70710677, %v12069_v56  ;;  %v6140_v31 = vmul.f32 %v6124_v58, %v11995_v38 }
 0x8cc   : > { %v5743_v5 = vmul.f32 %v7533_v9, %v5742_v21  ;;  %v12112_v25 = vmul.f32 %v5426_v36, %v11792_v45  ;;  %vm5760_vm8 = vweird.f32 %v12045_v12  ;;  %vm5765_vm11 = vcmp.eq.f32.partialorder %v5764_v33, 8.507059e+37 }
 0x8cd   : > { %3597 = vadd.xlane.f32.xlu1 %v3596_v54  ;;  %v12050_v7 = vpop.xlane.xlu2 %3564  ;;  %v12052_v47 = vpop.xlane.xlu0 %5270  ;;  %v6156_v45 = vmul.f32 1.442695, %v6140_v31  ;;  %v6125_v31 = vsub.f32 0.0, %v12032_v55  ;;  %vm5434_vm9 = vweird.f32 %v12054_v59  ;;  %vm5443_vm2 = vweird.f32 %v12039_v27 }
 0x8ce   : > { %v5744_v21 = vadd.f32 %v7533_v9, %v5743_v5  ;;  %v5428_v5 = vmul.f32 %v12054_v59, %v12023_v53  ;;  %v5595_v60 = vpop.f32.mrf.mxu1  ;;  %14282 = vst [vmem:[#allocation6_spill] sm:$0xff] %v12112_v25  ;;  %vm12169_vm15 = vmor %vm5433_vm13, %vm5434_vm9 }
 0x8cf   : > { %7540 = vpow2.f32 %v6156_v45 }
 0x8d0   : > { %v12063_v54 = vpop.eup %7536  ;;  %v5748_v61 = vsel %vm5747_vm4, %v7533_v9, %v5744_v21  ;;  %v5416_v9 = vsel %vm12071_vm5, %v11984_v57, %v5412_v46  ;;  %v3605_v57 = vsel %vm1021_vm0, %v12057_v49, 0.0  ;;  %v5429_v14 = vmul.f32 %v12054_v59, %v5428_v5 }
 0x8d1   : > { %v12084_v2 = vsel %vm5750_vm1, %v5752_v44, %v5748_v61  ;;  %v7539_v30 = vpop.eup %7538  ;;  %v5438_v43 = vmul.f32 %v12063_v54, %v12039_v27  ;;  %v12100_v44 = vadd.f32 %v11970_v52, %v5595_v60  ;;  %v12109_v13 = vmul.f32 %v5416_v9, %v11770_v8 }
 0x8d2   : > { %v5980_v21 = vmul.f32 1.0614054, %v12084_v2  ;;  %v5756_v6 = vmul.f32 %v7539_v30, %v12045_v12  ;;  %vm5761_vm7 = vweird.f32 %v7539_v30  ;;  %v12119_v5 = vand.u32 2147483647, %v12097_v3 }
 0x8d3   : > { %14281 = vst [vmem:[#allocation2_spill] sm:$0xff] %v12109_v13  ;;  %v5439_v38 = vmul.f32 %v12063_v54, %v5438_v43  ;;  %v12122_v8 = vmul.f32 0.70710677, %v12100_v44  ;;  %v5430_v36 = vmul.f32 0.5, %v5429_v14  ;;  %v5526_v43 = vmul.f32 %v11761_v20, %v12112_v25  ;;  %vm5762_vm10 = vmor %vm5760_vm8, %vm5761_vm7 }
 0x8d4   : > { %v5996_v46 = vadd.f32 -1.4531521, %v5980_v21  ;;  %v5757_v60 = vsub.f32 1.0, %v5756_v6  ;;  %v5766_v21 = vand.u32 2147483648, %v12045_v12  ;;  %v5525_v23 = vmul.f32 %v11761_v20, %v12109_v13 }
 0x8d5   : > { %v12106_v37 = vpop.xlane.xlu2 %3573  ;;  %v3568_v61 = vpop.xlane.xlu0 %3567  ;;  %3606 = vadd.xlane.f32.xlu1 %v3605_v57  ;;  %v12126_v57 = vand.u32 2147483647, %v12122_v8  ;;  %v5440_v32 = vmul.f32 0.5, %v5439_v38  ;;  %v5710_v12 = vmul.f32 0.3275911, %v12119_v5  ;;  %v12136_v14 = vmul.f32 0.5, %v11973_v10 }
 0x8d6   : > { %v6012_v28 = vmul.f32 %v5996_v46, %v12084_v2  ;;  %v5758_v58 = vmul.f32 %v7539_v30, %v5757_v60  ;;  %v5767_v60 = vor.u32 1.1754944e-38, %v5766_v21  ;;  %v5431_v49 = vsub.f32 1.5, %v5430_v36  ;;  %v7541_v53 = vpop.eup %7540 }
 0x8d7   : > { %v5711_v38 = vmul.f32 0.3275911, %v12126_v57  ;;  %v5542_v33 = vadd.f32 %v11775_v17, %v5526_v43  ;;  %v5441_v13 = vsub.f32 1.5, %v5440_v32  ;;  %v5541_v10 = vadd.f32 %v11775_v17, %v5525_v23 }
 0x8d8   : > { %v6028_v9 = vadd.f32 1.4214138, %v6012_v28  ;;  %v5759_v6 = vadd.f32 %v7539_v30, %v5758_v58  ;;  %v5432_v63 = vmul.f32 %v12054_v59, %v5431_v49  ;;  %v3611_v43 = vmul.f32 %v12050_v7, %v8012_v24 }
 0x8d9   : > { %v12156_v45 = vadd.f32 1.0, %v5711_v38  ;;  %v3612_v23 = vmul.f32 %v3568_v61, %v8012_v24  ;;  %vm5444_vm14 = vweird.f32 %v12063_v54  ;;  %v5676_v27 = vsel %vm5660_vm12, 1.0, %v13999_v42 }
 0x8da   : > { %v6044_v46 = vmul.f32 %v6028_v9, %v12084_v2  ;;  %v5763_v28 = vsel %vm5762_vm10, %v7539_v30, %v5759_v6  ;;  %v5598_v30 = vpop.f32.mrf.mxu1  ;;  %vm12188_vm3 = vmor %vm5443_vm2, %vm5444_vm14  ;;  %vm5661_vm4 = vcmp.ge.f32.partialorder %v12028_v11, 0.0  ;;  %v6126_v39 = vsub.f32 0.0, %v12119_v5 }
 0x8db   : > { %v12138_v25 = vsel %vm5765_vm11, %v5767_v60, %v5763_v28  ;;  %v6141_v60 = vmul.f32 %v6125_v31, %v12032_v55  ;;  %v12150_v28 = vadd.f32 1.0, %v5710_v12  ;;  %v12160_v0 = vadd.f32 %v11970_v52, %v5598_v30 }
 0x8dc   : > { %v6060_v58 = vadd.f32 -0.28449672, %v6044_v46  ;;  %v5981_v21 = vmul.f32 1.0614054, %v12138_v25  ;;  %v5442_v31 = vmul.f32 %v12063_v54, %v5441_v13  ;;  %v12175_v61 = vsub.f32 %v11867_v62, %v3612_v23 }
 0x8dd   : > { %v3577_v9 = vpop.xlane.xlu0 %3576  ;;  %v12146_v46 = vpop.xlane.xlu2 %3582  ;;  %7542 = vrcp.f32 %v12150_v28  ;;  %v6158_v13 = vmul.f32 1.442695, %v6141_v60  ;;  %v12185_v12 = vsub.f32 %v11846_v16, %v3611_v43  ;;  %v3614_v43 = vmul.f32 %v12106_v37, %v8012_v24 }
 0x8de   : > { %v6076_v6 = vmul.f32 %v6060_v58, %v12084_v2  ;;  %v5997_v36 = vadd.f32 -1.4531521, %v5981_v21  ;;  %v5552_v58 = vpack.c.bf16 %v5542_v33, %v5541_v10  ;;  %7544 = vrcp.f32 %v12156_v45 }
 0x8df   : > { %7546 = vpow2.f32 %v6158_v13  ;;  %v5629_v7 = vmul.f32 0.5, %v12015_v29  ;;  %v5677_v37 = vsel %vm5661_vm4, 1.0, %v13999_v42  ;;  %v3617_v11 = vmul.f32 %v12146_v46, %v8012_v24 }
 0x8e0   : > { %v6092_v35 = vadd.f32 0.2548296, %v6076_v6  ;;  %v6013_v32 = vmul.f32 %v5997_v36, %v12138_v25  ;;  %7128 = vmatmul.msk.bf16.gmra.mxu1 %vm1021_vm0, %v5552_v58  ;;  %v3615_v36 = vmul.f32 %v3577_v9, %v8012_v24  ;;  %v3643_v9 = vmul.f32 %v12185_v12, %v12185_v12 }
 0x8e1   : > { %vm5775_vm5 = vweird.f32 %v12150_v28  ;;  %vm5790_vm1 = vweird.f32 %v12156_v45 }
 0x8e2   : > { %v6108_v55 = vmul.f32 %v6092_v35, %v12084_v2  ;;  %v6029_v49 = vadd.f32 1.4214138, %v6013_v32  ;;  %v12178_v35 = vmul.f32 0.70710677, %v12160_v0  ;;  %v5436_v2 = vsel %vm12169_vm15, %v12054_v59, %v5432_v63  ;;  %v5600_v60 = vpop.f32.mrf.mxu1 }
 0x8e3   : > { %v3644_v63 = vmul.f32 %v12175_v61, %v12175_v61  ;;  %v5446_v59 = vsel %vm12188_vm3, %v12063_v54, %v5442_v31  ;;  %v12206_v30 = vmul.f32 %v5436_v2, %v11808_v18  ;;  %v12214_v23 = vpop.eup %7542  ;;  %v12235_v2 = vsub.f32 %v11878_v50, %v3615_v36 }
 0x8e4   : > { %v6045_v38 = vmul.f32 %v6029_v49, %v12138_v25  ;;  %v12194_v33 = vand.u32 2147483647, %v12178_v35  ;;  %v6188_v16 = vmul.f32 %v7541_v53, %v6108_v55  ;;  %v12218_v54 = vmul.f32 %v5446_v59, %v11828_v19  ;;  %v12231_v53 = vpop.eup %7544 }
 0x8e5   : > { %v3586_v21 = vpop.xlane.xlu0 %3585  ;;  %14287 = vst [vmem:[#allocation8_spill] sm:$0xff] %v12206_v30  ;;  %v3662_v58 = vsel %vm1021_vm0, %v3644_v63, 0.0  ;;  %v3592_v32 = vpop.xlane.xlu2 %3591  ;;  %v12229_v49 = vadd.f32 %v11970_v52, %v5600_v60  ;;  %v5527_v13 = vmul.f32 %v11761_v20, %v12206_v30  ;;  %v5771_v29 = vmul.f32 %v12214_v23, %v12150_v28 }
 0x8e6   : > { %v6061_v6 = vadd.f32 -0.28449672, %v6045_v38  ;;  %v5712_v10 = vmul.f32 0.3275911, %v12194_v33  ;;  %14288 = vst [vmem:[#allocation12_spill] sm:$0xff] %v12218_v54  ;;  %3663 = vadd.xlane.f32.xlu2 %v3662_v58  ;;  %v6204_v31 = vsub.f32 1.0, %v6188_v16  ;;  %v12249_v50 = vmul.f32 %v6126_v39, %v12119_v5 }
 0x8e7   : > { %14289 = vst [vmem:[#allocation10_spill] sm:$0xff] %v12235_v2  ;;  %v3659_v38 = vsel %vm1021_vm0, %v3643_v9, 0.0  ;;  %v12245_v62 = vmul.f32 0.70710677, %v12229_v49  ;;  %v12252_v59 = vsub.f32 %v11864_v41, %v3614_v43  ;;  %v5786_v36 = vmul.f32 %v12231_v53, %v12156_v45 }
 0x8e8   : > { %v6077_v18 = vmul.f32 %v6061_v6, %v12138_v25  ;;  %v12220_v55 = vadd.f32 1.0, %v5712_v10  ;;  %3660 = vadd.xlane.f32.xlu1 %v3659_v38  ;;  %v5528_v6 = vmul.f32 %v11761_v20, %v12218_v54  ;;  %v7547_v10 = vpop.eup %7546  ;;  %v6220_v46 = vmul.f32 %v6204_v31, %v5676_v27 }
 0x8e9   : > { %14290 = vst [vmem:[#allocation14_spill] sm:$0xff] %v12252_v59  ;;  %v12259_v60 = vand.u32 2147483647, %v12245_v62  ;;  %v5543_v5 = vadd.f32 %v11775_v17, %v5527_v13  ;;  %v3647_v39 = vmul.f32 %v12235_v2, %v12235_v2  ;;  %v5772_v43 = vsub.f32 1.0, %v5771_v29 }
 0x8ea   : > { %v6093_v19 = vadd.f32 0.2548296, %v6077_v18  ;;  %7548 = vrcp.f32 %v12220_v55  ;;  %v5544_v41 = vadd.f32 %v11775_v17, %v5528_v6  ;;  %v12267_v20 = vsub.f32 %v11881_v40, %v3617_v11 }
 0x8eb   : > { %v5713_v27 = vmul.f32 0.3275911, %v12259_v60  ;;  %v3646_v17 = vmul.f32 %v12252_v59, %v12252_v59  ;;  %v5787_v13 = vsub.f32 1.0, %v5786_v36  ;;  %v3620_v11 = vmul.f32 %v3592_v32, %v8012_v24 }
 0x8ec   : > { %v6109_v16 = vmul.f32 %v6093_v19, %v12138_v25  ;;  %v3618_v25 = vmul.f32 %v3586_v21, %v8012_v24  ;;  %14291 = vst [vmem:[#allocation16_spill] sm:$0xff] %v12267_v20  ;;  %v5553_v31 = vpack.c.bf16 %v5544_v41, %v5543_v5  ;;  %v3671_v19 = vsel %vm1021_vm0, %v3647_v39, 0.0 }
 0x8ed   : > { %v3595_v63 = vpop.xlane.xlu0 %3594  ;;  %v12280_v40 = vadd.f32 1.0, %v5713_v27  ;;  %v6236_v38 = vadd.f32 1.0, %v6220_v46  ;;  %v5773_v36 = vmul.f32 %v12214_v23, %v5772_v43  ;;  %v6127_v5 = vsub.f32 0.0, %v12126_v57 }
 0x8ee   : > { %v6189_v58 = vmul.f32 %v7547_v10, %v6109_v16  ;;  %v12271_v18 = vsub.f32 %v11897_v34, %v3618_v25  ;;  %3672 = vadd.xlane.f32.xlu2 %v3671_v19  ;;  %v3601_v34 = vpop.xlane.xlu2 %3600  ;;  %v3621_v6 = vmul.f32 %v3595_v63, %v8012_v24  ;;  %v3668_v25 = vsel %vm1021_vm0, %v3646_v17, 0.0 }
 0x8ef   : > { %7550 = vrcp.f32 %v12280_v40  ;;  %v12298_v41 = vsub.f32 %v11894_v4, %v3620_v11  ;;  %v3649_v39 = vmul.f32 %v12267_v20, %v12267_v20  ;;  %v6252_v43 = vmul.f32 %v6236_v38, %v12136_v14 }
 0x8f0   : > { %14292 = vst [vmem:[#allocation17_spill] sm:$0xff] %v12271_v18  ;;  %v12273_v9 = vpop.eup %7548  ;;  %v6205_v21 = vsub.f32 1.0, %v6189_v58  ;;  %7129 = vmatmul.msk.bf16.gmra.mxu1 %vm1021_vm0, %v5553_v31  ;;  %v3650_v10 = vmul.f32 %v12271_v18, %v12271_v18  ;;  %3669 = vadd.xlane.f32.xlu1 %v3668_v25  ;;  %v12293_v46 = vsub.f32 %v11907_v15, %v3621_v6  ;;  %vm5805_vm6 = vweird.f32 %v12220_v55  ;;  %v14326_v18 = vld [vmem:[#allocation46_spill] sm:$0xff] }
 0x8f1   : > { %v5801_v29 = vmul.f32 %v12273_v9, %v12220_v55  ;;  %14294 = vst [vmem:[#allocation22_spill] sm:$0xff] %v12298_v41  ;;  %v5774_v4 = vadd.f32 %v12214_v23, %v5773_v36  ;;  %vm5820_vm7 = vweird.f32 %v12280_v40  ;;  %v3652_v11 = vmul.f32 %v12298_v41, %v12298_v41 }
 0x8f2   : > { %v6221_v16 = vmul.f32 %v6205_v21, %v5677_v37  ;;  %v3623_v37 = vmul.f32 %v3601_v34, %v8012_v24  ;;  %14293 = vst [vmem:[#allocation18_spill] sm:$0xff] %v12293_v46  ;;  %v5788_v21 = vmul.f32 %v12231_v53, %v5787_v13  ;;  %v3680_v31 = vsel %vm1021_vm0, %v3650_v10, 0.0 }
 0x8f3   : > { %v5802_v58 = vsub.f32 1.0, %v5801_v29  ;;  %v3653_v19 = vmul.f32 %v12293_v46, %v12293_v46  ;;  %v3677_v29 = vsel %vm1021_vm0, %v3649_v39, 0.0  ;;  %vm5776_vm8 = vweird.f32 %v12214_v23 }
 0x8f4   : > { %v6237_v32 = vadd.f32 1.0, %v6221_v16  ;;  %v12313_v14 = vsub.f32 %v11910_v48, %v3623_v37  ;;  %v5779_v34 = vand.u32 2147483647, %v12150_v28  ;;  %vm12323_vm10 = vmor %vm5775_vm5, %vm5776_vm8  ;;  %v5781_v16 = vand.u32 2147483648, %v12150_v28 }
 0x8f5   : > { %v3604_v63 = vpop.xlane.xlu0 %3603  ;;  %v5803_v17 = vmul.f32 %v12273_v9, %v5802_v58  ;;  %v7551_v13 = vpop.eup %7550  ;;  %v5789_v6 = vadd.f32 %v12231_v53, %v5788_v21  ;;  %vm5791_vm11 = vweird.f32 %v12231_v53  ;;  %v3689_v36 = vsel %vm1021_vm0, %v3653_v19, 0.0 }
 0x8f6   : > { %v6253_v27 = vmul.f32 %v6237_v32, %v5629_v7  ;;  %v3624_v15 = vmul.f32 %v3604_v63, %v8012_v24  ;;  %14295 = vst [vmem:[#allocation20_spill] sm:$0xff] %v12313_v14  ;;  %3681 = vadd.xlane.f32.xlu2 %v3680_v31  ;;  %v5816_v38 = vmul.f32 %v7551_v13, %v12280_v40  ;;  %v5794_v32 = vand.u32 2147483647, %v12156_v45  ;;  %vm12340_vm9 = vmor %vm5790_vm1, %vm5791_vm11 }
 0x8f7   : > { %v5778_v25 = vsel %vm12323_vm10, %v12214_v23, %v5774_v4  ;;  %vm5780_vm12 = vcmp.eq.f32.partialorder %v5779_v34, 8.507059e+37  ;;  %v5782_v37 = vor.u32 1.1754944e-38, %v5781_v16  ;;  %v5793_v63 = vsel %vm12340_vm9, %v12231_v53, %v5789_v6 }
 0x8f8   : > { %v6268_v7 = vpack.c.bf16 %v6253_v27, %v6252_v43  ;;  %v12331_v10 = vsub.f32 %v11919_v26, %v3624_v15  ;;  %v5817_v58 = vsub.f32 1.0, %v5816_v38  ;;  %3678 = vadd.xlane.f32.xlu1 %v3677_v29  ;;  %v5796_v26 = vand.u32 2147483648, %v12156_v45 }
 0x8f9   : > { %v5804_v23 = vadd.f32 %v12273_v9, %v5803_v17  ;;  %vm5806_vm13 = vweird.f32 %v12273_v9  ;;  %v5809_v39 = vand.u32 2147483647, %v12220_v55  ;;  %v12351_v27 = vsel %vm5780_vm12, %v5782_v37, %v5778_v25 }
 0x8fa   : > { %6284 = vmatmul.bf16.vlgmr.msrb.gmra.mxu3 %v6268_v7  ;;  %14298 = vst [vmem:[#allocation24_spill] sm:$0xff] %v12331_v10  ;;  %v5818_v43 = vmul.f32 %v7551_v13, %v5817_v58  ;;  %v5797_v21 = vor.u32 1.1754944e-38, %v5796_v26  ;;  %vm12355_vm14 = vmor %vm5805_vm6, %vm5806_vm13  ;;  %v5811_v45 = vand.u32 2147483648, %v12220_v55  ;;  %vm5795_vm15 = vcmp.eq.f32.partialorder %v5794_v32, 8.507059e+37 }
 0x8fb   : > { %v5982_v53 = vmul.f32 1.0614054, %v12351_v27  ;;  %v5808_v15 = vsel %vm12355_vm14, %v12273_v9, %v5804_v23  ;;  %vm5821_vm2 = vweird.f32 %v7551_v13  ;;  %v5824_v7 = vand.u32 2147483647, %v12280_v40 }
 0x8fc   : > { %v12364_v19 = vsel %vm5795_vm15, %v5797_v21, %v5793_v63  ;;  %v5812_v4 = vor.u32 1.1754944e-38, %v5811_v45  ;;  %v5819_v17 = vadd.f32 %v7551_v13, %v5818_v43  ;;  %vm5810_vm3 = vcmp.eq.f32.partialorder %v5809_v39, 8.507059e+37  ;;  %vm12370_vm4 = vmor %vm5820_vm7, %vm5821_vm2 }
 0x8fd   : > { %v5983_v29 = vmul.f32 1.0614054, %v12364_v19  ;;  %v5998_v34 = vadd.f32 -1.4531521, %v5982_v53  ;;  %v5826_v9 = vand.u32 2147483648, %v12280_v40  ;;  %v3686_v38 = vsel %vm1021_vm0, %v3652_v11, 0.0 }
 0x8fe   : > { %3690 = vadd.xlane.f32.xlu2 %v3689_v36  ;;  %v3656_v48 = vmul.f32 %v12331_v10, %v12331_v10  ;;  %v12378_v16 = vsel %vm5810_vm3, %v5812_v4, %v5808_v15  ;;  %v5823_v6 = vsel %vm12370_vm4, %v7551_v13, %v5819_v17  ;;  %v6143_v40 = vmul.f32 %v6127_v5, %v12126_v57 }
 0x8ff   : > { %v5999_v36 = vadd.f32 -1.4531521, %v5983_v29  ;;  %v6014_v25 = vmul.f32 %v5998_v34, %v12351_v27  ;;  %v5827_v32 = vor.u32 1.1754944e-38, %v5826_v9  ;;  %v5984_v58 = vmul.f32 1.0614054, %v12378_v16 }
 0x900   : > { %v6129_v11 = vsub.f32 0.0, %v12259_v60  ;;  %3687 = vadd.xlane.f32.xlu1 %v3686_v38  ;;  %vm5825_vm5 = vcmp.eq.f32.partialorder %v5824_v7, 8.507059e+37  ;;  %v6160_v13 = vmul.f32 1.442695, %v12249_v50  ;;  %v6128_v23 = vsub.f32 0.0, %v12194_v33 }
 0x901   : > { %v6015_v37 = vmul.f32 %v5999_v36, %v12364_v19  ;;  %v6030_v28 = vadd.f32 1.4214138, %v6014_v25  ;;  %v5828_v26 = vsel %vm5825_vm5, %v5827_v32, %v5823_v6  ;;  %v6000_v63 = vadd.f32 -1.4531521, %v5984_v58 }
 0x902   : > { %v3698_v39 = vsel %vm1021_vm0, %v3656_v48, 0.0  ;;  %v5985_v43 = vmul.f32 1.0614054, %v5828_v26  ;;  %v3655_v21 = vmul.f32 %v12313_v14, %v12313_v14  ;;  %v5289_v45 = vmul.f32 %v12052_v47, %v8012_v24 }
 0x903   : > { %v6031_v57 = vadd.f32 1.4214138, %v6015_v37  ;;  %v6046_v5 = vmul.f32 %v6030_v28, %v12351_v27  ;;  %v6016_v31 = vmul.f32 %v6000_v63, %v12378_v16  ;;  %v6162_v53 = vmul.f32 1.442695, %v6143_v40 }
 0x904   : > { %v6001_v15 = vadd.f32 -1.4531521, %v5985_v43  ;;  %v6145_v50 = vmul.f32 %v6129_v11, %v12259_v60  ;;  %7552 = vpow2.f32 %v6160_v13  ;;  %v6144_v29 = vmul.f32 %v6128_v23, %v12194_v33 }
 0x905   : > { %v6047_v4 = vmul.f32 %v6031_v57, %v12364_v19  ;;  %v6062_v17 = vadd.f32 -0.28449672, %v6046_v5  ;;  %v6032_v7 = vadd.f32 1.4214138, %v6016_v31  ;;  %v3695_v55 = vsel %vm1021_vm0, %v3655_v21, 0.0 }
 0x906   : > { %3699 = vadd.xlane.f32.xlu2 %v3698_v39  ;;  %v6017_v34 = vmul.f32 %v6001_v15, %v5828_v26  ;;  %v12404_v48 = vadd.f32 1e-05, %v5289_v45  ;;  %7554 = vpow2.f32 %v6162_v53  ;;  %v6166_v6 = vmul.f32 1.442695, %v6145_v50 }
 0x907   : > { %v6063_v9 = vadd.f32 -0.28449672, %v6047_v4  ;;  %v6078_v38 = vmul.f32 %v6062_v17, %v12351_v27  ;;  %v6048_v47 = vmul.f32 %v6032_v7, %v12378_v16  ;;  %v6164_v58 = vmul.f32 1.442695, %v6144_v29 }
 0x908   : > { %3696 = vadd.xlane.f32.xlu1 %v3695_v55  ;;  %v6033_v60 = vadd.f32 1.4214138, %v6017_v34  ;;  %vm5662_vm1 = vcmp.ge.f32.partialorder %v12097_v3, 0.0  ;;  %7556 = vrsqrt.f32 %v12404_v48  ;;  %vm5663_vm6 = vcmp.ge.f32.partialorder %v12122_v8, 0.0 }
 0x909   : > { %v6079_v36 = vmul.f32 %v6063_v9, %v12364_v19  ;;  %v6094_v25 = vadd.f32 0.2548296, %v6078_v38  ;;  %v6064_v32 = vadd.f32 -0.28449672, %v6048_v47  ;;  %7558 = vpow2.f32 %v6166_v6 }
 0x90a   : > { %v6049_v33 = vmul.f32 %v6033_v60, %v5828_v26  ;;  %v7553_v28 = vpop.eup %7552  ;;  %7560 = vpow2.f32 %v6164_v58  ;;  %v5678_v5 = vsel %vm5662_vm1, 1.0, %v13999_v42  ;;  %v5679_v50 = vsel %vm5663_vm6, 1.0, %v13999_v42 }
 0x90b   : > { %v6095_v40 = vadd.f32 0.2548296, %v6079_v36  ;;  %v6110_v11 = vmul.f32 %v6094_v25, %v12351_v27  ;;  %v6080_v37 = vmul.f32 %v6064_v32, %v12378_v16  ;;  %v5630_v8 = vmul.f32 0.5, %v12069_v56 }
 0x90c   : > { %v6065_v63 = vadd.f32 -0.28449672, %v6049_v33  ;;  %v7555_v43 = vpop.eup %7554  ;;  %v5631_v55 = vmul.f32 0.5, %v12100_v44  ;;  %vm5665_vm7 = vcmp.ge.f32.partialorder %v12245_v62, 0.0  ;;  %vm5664_vm8 = vcmp.ge.f32.partialorder %v12178_v35, 0.0 }
 0x90d   : > { %v6111_v13 = vmul.f32 %v6095_v40, %v12364_v19  ;;  %v6190_v23 = vmul.f32 %v7553_v28, %v6110_v11  ;;  %v6096_v39 = vadd.f32 0.2548296, %v6080_v37  ;;  %v5681_v32 = vsel %vm5665_vm7, 1.0, %v13999_v42 }
 0x90e   : > { %v6081_v21 = vmul.f32 %v6065_v63, %v5828_v26  ;;  %v7557_v15 = vpop.eup %7556  ;;  %v5680_v33 = vsel %vm5664_vm8, 1.0, %v13999_v42  ;;  %v5633_v28 = vmul.f32 0.5, %v12229_v49  ;;  %vm5453_vm11 = vweird.f32 %v12404_v48 }
 0x90f   : > { %v6191_v57 = vmul.f32 %v7555_v43, %v6111_v13  ;;  %v6206_v27 = vsub.f32 1.0, %v6190_v23  ;;  %v6112_v53 = vmul.f32 %v6096_v39, %v12378_v16  ;;  %v7559_v4 = vpop.eup %7558  ;;  %v5448_v47 = vmul.f32 %v7557_v15, %v12404_v48 }
 0x910   : > { %v6097_v31 = vadd.f32 0.2548296, %v6081_v21  ;;  %v7561_v29 = vpop.eup %7560  ;;  %v5632_v23 = vmul.f32 0.5, %v12160_v0  ;;  %vm5454_vm10 = vweird.f32 %v7557_v15 }
 0x911   : > { %v6207_v45 = vsub.f32 1.0, %v6191_v57  ;;  %v6222_v3 = vmul.f32 %v6206_v27, %v5678_v5  ;;  %v6192_v38 = vmul.f32 %v7561_v29, %v6112_v53  ;;  %v5449_v25 = vmul.f32 %v7557_v15, %v5448_v47  ;;  %vm5455_vm12 = vmor %vm5453_vm11, %vm5454_vm10 }
 0x912   : > { %v6113_v19 = vmul.f32 %v6097_v31, %v5828_v26 }
 0x913   : > { %v6223_v17 = vmul.f32 %v6207_v45, %v5679_v50  ;;  %v6238_v7 = vadd.f32 1.0, %v6222_v3  ;;  %v6208_v36 = vsub.f32 1.0, %v6192_v38  ;;  %v5450_v62 = vmul.f32 0.5, %v5449_v25 }
 0x914   : > { %v6193_v34 = vmul.f32 %v7559_v4, %v6113_v19 }
 0x915   : > { %v6239_v9 = vadd.f32 1.0, %v6223_v17  ;;  %v6254_v16 = vmul.f32 %v6238_v7, %v5630_v8  ;;  %v6224_v40 = vmul.f32 %v6208_v36, %v5680_v33  ;;  %v5451_v63 = vsub.f32 1.5, %v5450_v62 }
 0x916   : > { %v6209_v6 = vsub.f32 1.0, %v6193_v34  ;;  %v14308_v34 = vld [vmem:[#allocation58_spill] sm:$0xff] }
 0x917   : > { %v6255_v60 = vmul.f32 %v6239_v9, %v5631_v55  ;;  %v6240_v35 = vadd.f32 1.0, %v6224_v40  ;;  %v5452_v5 = vmul.f32 %v7557_v15, %v5451_v63 }
 0x918   : > { %v6225_v56 = vmul.f32 %v6209_v6, %v5681_v32 }
 0x919   : > { %v6269_v26 = vpack.c.bf16 %v6255_v60, %v6254_v16  ;;  %v6256_v57 = vmul.f32 %v6240_v35, %v5632_v23  ;;  %v5456_v53 = vsel %vm5455_vm12, %v7557_v15, %v5452_v5  ;;  %v14310_v60 = vld [vmem:[#allocation50_spill] sm:$0xff]  ;;  %v14314_v23 = vld [vmem:[#allocation4_spill] sm:$0xff] }
 0x91a   : > { %v6241_v37 = vadd.f32 1.0, %v6225_v56  ;;  %v12436_v17 = vmul.f32 %v5456_v53, %v11849_v51  ;;  %v7702_v51 = vld [vmem:[%s13782_s7 + $0x1] ss:$0 sm:$0xff] }
 0x91b   : > { %6289 = vmatmul.bf16.gmra.mxu3 %v6269_v26  ;;  %v7703_v26 = vld [vmem:[%s13783_s8 + $0x1] ss:$0 sm:$0xff] }
 0x91c   : > { %v6257_v39 = vmul.f32 %v6241_v37, %v5633_v28  ;;  %14306 = vst [vmem:[#allocation30_spill] sm:$0xff] %v12436_v17  ;;  %v5529_v9 = vmul.f32 %v7702_v51, %v12436_v17 }
 0x91e   : > { %v6270_v45 = vpack.c.bf16 %v6257_v39, %v6256_v57  ;;  %v5545_v36 = vadd.f32 %v7703_v26, %v5529_v9 }
 0x920   : > { %v5274_v58 = vpop.xlane.xlu1 %5273 }
 0x921   : > { %v5290_v44 = vmul.f32 %v5274_v58, %v8012_v24 }
 0x923   : > { %v5306_v11 = vadd.f32 1e-05, %v5290_v44 }
 0x925   : > { %7562 = vrsqrt.f32 %v5306_v11  ;;  %vm5463_vm13 = vweird.f32 %v5306_v11 }
 0x928   : > { %v3571_v13 = vpop.xlane.xlu1 %3570 }
 0x929   : > { %v3613_v43 = vmul.f32 %v3571_v13, %v8012_v24 }
 0x92b   : > { %v7563_v21 = vpop.eup %7562  ;;  %v12428_v27 = vsub.f32 %v11954_v1, %v3613_v43  ;;  %6294 = vmatmul.bf16.gmra.mxu3 %v6270_v45 }
 0x92c   : > { %v5458_v31 = vmul.f32 %v7563_v21, %v5306_v11  ;;  %vm5464_vm9 = vweird.f32 %v7563_v21  ;;  %v14312_v11 = vld [vmem:[#allocation63_spill] sm:$0xff] }
 0x92d   : > { %14305 = vst [vmem:[#allocation28_spill] sm:$0xff] %v12428_v27  ;;  %v3645_v49 = vmul.f32 %v12428_v27, %v12428_v27  ;;  %vm5465_vm14 = vmor %vm5463_vm13, %vm5464_vm9 }
 0x92e   : > { %v5459_v3 = vmul.f32 %v7563_v21, %v5458_v31 }
 0x92f   : > { %v3665_v0 = vsel %vm1021_vm0, %v3645_v49, 0.0 }
 0x930   : > { %v5460_v50 = vmul.f32 0.5, %v5459_v3  ;;  %v3580_v19 = vpop.xlane.xlu1 %3579  ;;  %3666 = vadd.xlane.f32.xlu0 %v3665_v0 }
 0x931   : > { %v3616_v1 = vmul.f32 %v3580_v19, %v8012_v24  ;;  %v5603_v38 = vpop.f32.mrf.mxu1 }
 0x932   : > { %v5461_v4 = vsub.f32 1.5, %v5460_v50  ;;  %v12493_v53 = vadd.f32 %v11970_v52, %v5603_v38 }
 0x933   : > { %v12439_v7 = vsub.f32 %v11978_v22, %v3616_v1 }
 0x934   : > { %v5462_v48 = vmul.f32 %v7563_v21, %v5461_v4  ;;  %v12500_v1 = vmul.f32 0.70710677, %v12493_v53 }
 0x935   : > { %14307 = vst [vmem:[#allocation26_spill] sm:$0xff] %v12439_v7  ;;  %v3648_v15 = vmul.f32 %v12439_v7, %v12439_v7 }
 0x936   : > { %v5466_v29 = vsel %vm5465_vm14, %v7563_v21, %v5462_v48 }
 0x937   : > { %v12444_v8 = vmul.f32 %v5466_v29, %v14308_v34  ;;  %v3674_v55 = vsel %vm1021_vm0, %v3648_v15, 0.0  ;;  %v12507_v29 = vand.u32 2147483647, %v12500_v1 }
 0x938   : > { %v3589_v22 = vpop.xlane.xlu1 %3588  ;;  %3675 = vadd.xlane.f32.xlu0 %v3674_v55 }
 0x939   : > { %14309 = vst [vmem:[#allocation5_spill] sm:$0xff] %v12444_v8  ;;  %v3619_v47 = vmul.f32 %v3589_v22, %v8012_v24  ;;  %v5530_v16 = vmul.f32 %v7702_v51, %v12444_v8  ;;  %v5605_v44 = vpop.f32.mrf.mxu1  ;;  %v5714_v9 = vmul.f32 0.3275911, %v12507_v29 }
 0x93a   : > { %v12504_v48 = vadd.f32 %v11970_v52, %v5605_v44 }
 0x93b   : > { %v12454_v6 = vsub.f32 %v14310_v60, %v3619_v47  ;;  %v5546_v25 = vadd.f32 %v7703_v26, %v5530_v16  ;;  %v12519_v47 = vadd.f32 1.0, %v5714_v9  ;;  %v12557_v9 = vld [vmem:[%s13785_s10 + $0x1] ss:$0 sm:$0xff] }
 0x93c   : > { %v12510_v51 = vmul.f32 0.70710677, %v12504_v48 }
 0x93d   : > { %14311 = vst [vmem:[#allocation9_spill] sm:$0xff] %v12454_v6  ;;  %v5554_v32 = vpack.c.bf16 %v5546_v25, %v5545_v36  ;;  %v3651_v58 = vmul.f32 %v12454_v6, %v12454_v6  ;;  %vm5835_vm10 = vweird.f32 %v12519_v47 }
 0x93e   : > { %v12517_v38 = vand.u32 2147483647, %v12510_v51 }
 0x93f   : > { %7130 = vmatmul.msk.bf16.gmra.mxu1 %vm1021_vm0, %v5554_v32  ;;  %v3683_v56 = vsel %vm1021_vm0, %v3651_v58, 0.0 }
 0x940   : > { %3684 = vadd.xlane.f32.xlu0 %v3683_v56  ;;  %v3598_v33 = vpop.xlane.xlu1 %3597  ;;  %v5715_v36 = vmul.f32 0.3275911, %v12517_v38 }
 0x941   : > { %v3622_v40 = vmul.f32 %v3598_v33, %v8012_v24  ;;  %v5608_v37 = vpop.f32.mrf.mxu1 }
 0x942   : > { %v12481_v31 = vadd.f32 %v11970_v52, %v5608_v37  ;;  %v12535_v44 = vadd.f32 1.0, %v5715_v36 }
 0x943   : > { %v12465_v62 = vsub.f32 %v14312_v11, %v3622_v40 }
 0x944   : > { %v12487_v49 = vmul.f32 0.70710677, %v12481_v31  ;;  %v5856_v10 = vand.u32 2147483648, %v12535_v44  ;;  %vm5850_vm13 = vweird.f32 %v12535_v44 }
 0x945   : > { %14313 = vst [vmem:[#allocation3_spill] sm:$0xff] %v12465_v62  ;;  %v3654_v28 = vmul.f32 %v12465_v62, %v12465_v62 }
 0x946   : > { %v12496_v50 = vand.u32 2147483647, %v12487_v49 }
 0x947   : > { %v3692_v35 = vsel %vm1021_vm0, %v3654_v28, 0.0 }
 0x948   : > { %v3607_v63 = vpop.xlane.xlu1 %3606  ;;  %3693 = vadd.xlane.f32.xlu0 %v3692_v35  ;;  %v5716_v4 = vmul.f32 0.3275911, %v12496_v50 }
 0x949   : > { %v3625_v13 = vmul.f32 %v3607_v63, %v8012_v24  ;;  %v5610_v43 = vpop.f32.mrf.mxu1 }
 0x94a   : > { %v12477_v57 = vadd.f32 %v11970_v52, %v5610_v43  ;;  %v5732_v34 = vadd.f32 1.0, %v5716_v4 }
 0x94b   : > { %v12472_v39 = vsub.f32 %v14314_v23, %v3625_v13 }
 0x94c   : > { %v12484_v45 = vmul.f32 0.70710677, %v12477_v57  ;;  %vm5865_vm5 = vweird.f32 %v5732_v34 }
 0x94d   : > { %14315 = vst [vmem:[#allocation13_spill] sm:$0xff] %v12472_v39  ;;  %v3657_v21 = vmul.f32 %v12472_v39, %v12472_v39 }
 0x94e   : > { %v12490_v3 = vand.u32 2147483647, %v12484_v45 }
 0x94f   : > { %v3701_v5 = vsel %vm1021_vm0, %v3657_v21, 0.0 }
 0x950   : > { %3702 = vadd.xlane.f32.xlu0 %v3701_v5  ;;  %v5717_v19 = vmul.f32 0.3275911, %v12490_v3 }
 0x952   : > { %v5733_v15 = vadd.f32 1.0, %v5717_v19 }
 0x954   : > { %7564 = vrcp.f32 %v5733_v15  ;;  %vm5880_vm3 = vweird.f32 %v5733_v15 }
 0x955   : > { %7566 = vrcp.f32 %v5732_v34 }
 0x956   : > { %7568 = vrcp.f32 %v12519_v47 }
 0x957   : > { %7570 = vrcp.f32 %v12535_v44 }
 0x95a   : > { %v7565_v26 = vpop.eup %7564 }
 0x95b   : > { %v7567_v25 = vpop.eup %7566  ;;  %v5876_v32 = vmul.f32 %v7565_v26, %v5733_v15  ;;  %vm5881_vm15 = vweird.f32 %v7565_v26 }
 0x95c   : > { %v12541_v37 = vpop.eup %7568  ;;  %vm5866_vm2 = vweird.f32 %v7567_v25  ;;  %vm5882_vm4 = vmor %vm5880_vm3, %vm5881_vm15 }
 0x95d   : > { %v5613_v0 = vpop.f32.mrf.mxu1  ;;  %v5877_v33 = vsub.f32 1.0, %v5876_v32  ;;  %v5831_v23 = vmul.f32 %v12541_v37, %v12519_v47  ;;  %v12549_v5 = vpop.eup %7570  ;;  %vm5867_vm1 = vmor %vm5865_vm5, %vm5866_vm2  ;;  %vm5836_vm8 = vweird.f32 %v12541_v37 }
 0x95e   : > { %v12522_v16 = vadd.f32 %v11970_v52, %v5613_v0  ;;  %vm12593_vm11 = vmor %vm5835_vm10, %vm5836_vm8  ;;  %vm5851_vm9 = vweird.f32 %v12549_v5  ;;  %vm5666_vm10 = vcmp.ge.f32.partialorder %v12500_v1, 0.0 }
 0x95f   : > { %v5878_v35 = vmul.f32 %v7565_v26, %v5877_v33  ;;  %v5832_v4 = vsub.f32 1.0, %v5831_v23  ;;  %v5846_v33 = vmul.f32 %v12549_v5, %v12535_v44  ;;  %vm12619_vm14 = vmor %vm5850_vm13, %vm5851_vm9 }
 0x960   : > { %v12530_v58 = vmul.f32 0.70710677, %v12522_v16 }
 0x961   : > { %v5879_v0 = vadd.f32 %v7565_v26, %v5878_v35  ;;  %v5847_v39 = vsub.f32 1.0, %v5846_v33 }
 0x962   : > { %v12538_v40 = vand.u32 2147483647, %v12530_v58 }
 0x963   : > { %v5883_v35 = vsel %vm5882_vm4, %v7565_v26, %v5879_v0 }
 0x964   : > { %v5718_v63 = vmul.f32 0.3275911, %v12538_v40 }
 0x965   : > { %v5615_v55 = vpop.f32.mrf.mxu1 }
 0x966   : > { %v12514_v22 = vadd.f32 %v11970_v52, %v5615_v55  ;;  %v5861_v52 = vmul.f32 %v7567_v25, %v5732_v34  ;;  %v12551_v19 = vadd.f32 1.0, %v5718_v63  ;;  %v5886_v55 = vand.u32 2147483648, %v5733_v15 }
 0x968   : > { %v12525_v60 = vmul.f32 0.70710677, %v12514_v22  ;;  %v5862_v28 = vsub.f32 1.0, %v5861_v52  ;;  %v5884_v52 = vand.u32 2147483647, %v5733_v15  ;;  %v5887_v63 = vor.u32 1.1754944e-38, %v5886_v55 }
 0x96a   : > { %v12533_v56 = vand.u32 2147483647, %v12525_v60  ;;  %v5863_v43 = vmul.f32 %v7567_v25, %v5862_v28  ;;  %v5869_v28 = vand.u32 2147483647, %v5732_v34  ;;  %vm5885_vm6 = vcmp.eq.f32.partialorder %v5884_v52, 8.507059e+37 }
 0x96b   : > { %v12571_v17 = vsel %vm5885_vm6, %v5887_v63, %v5883_v35  ;;  %v5857_v35 = vor.u32 1.1754944e-38, %v5856_v10  ;;  %v6133_v10 = vsub.f32 0.0, %v12490_v3 }
 0x96c   : > { %v5719_v11 = vmul.f32 0.3275911, %v12533_v56  ;;  %v5864_v32 = vadd.f32 %v7567_v25, %v5863_v43  ;;  %v5833_v43 = vmul.f32 %v12541_v37, %v5832_v4  ;;  %vm5870_vm7 = vcmp.eq.f32.partialorder %v5869_v28, 8.507059e+37 }
 0x96d   : > { %v5618_v21 = vpop.f32.mrf.mxu1  ;;  %v5989_v54 = vmul.f32 1.0614054, %v12571_v17  ;;  %v5839_v4 = vand.u32 2147483647, %v12519_v47 }
 0x96e   : > { %v12545_v13 = vadd.f32 1.0, %v5719_v11  ;;  %v12560_v36 = vadd.f32 %v12557_v9, %v5618_v21  ;;  %v5871_v11 = vand.u32 2147483648, %v5732_v34  ;;  %v5868_v15 = vsel %vm5867_vm1, %v7567_v25, %v5864_v32 }
 0x96f   : > { %v5834_v25 = vadd.f32 %v12541_v37, %v5833_v43  ;;  %v5841_v32 = vand.u32 2147483648, %v12519_v47  ;;  %v6005_v63 = vadd.f32 -1.4531521, %v5989_v54  ;;  %vm5840_vm12 = vcmp.eq.f32.partialorder %v5839_v4, 8.507059e+37 }
 0x970   : > { %7572 = vrcp.f32 %v12545_v13  ;;  %v12566_v23 = vmul.f32 0.70710677, %v12560_v36  ;;  %v5872_v8 = vor.u32 1.1754944e-38, %v5871_v11  ;;  %v5854_v4 = vand.u32 2147483647, %v12535_v44 }
 0x971   : > { %7574 = vrcp.f32 %v12551_v19  ;;  %v5838_v47 = vsel %vm12593_vm11, %v12541_v37, %v5834_v25  ;;  %v6021_v25 = vmul.f32 %v6005_v63, %v12571_v17  ;;  %v6131_v63 = vsub.f32 0.0, %v12517_v38 }
 0x972   : > { %v12574_v34 = vand.u32 2147483647, %v12566_v23  ;;  %v12576_v26 = vsel %vm5870_vm7, %v5872_v8, %v5868_v15  ;;  %v5848_v8 = vmul.f32 %v12549_v5, %v5847_v39  ;;  %v6130_v39 = vsub.f32 0.0, %v12507_v29 }
 0x973   : > { %v5988_v52 = vmul.f32 1.0614054, %v12576_v26  ;;  %v5842_v15 = vor.u32 1.1754944e-38, %v5841_v32  ;;  %vm5855_vm2 = vcmp.eq.f32.partialorder %v5854_v4, 8.507059e+37  ;;  %vm5910_vm3 = vweird.f32 %v12545_v13 }
 0x974   : > { %v5720_v33 = vmul.f32 0.3275911, %v12574_v34  ;;  %v6146_v32 = vmul.f32 %v6130_v39, %v12507_v29  ;;  %vm5895_vm1 = vweird.f32 %v12551_v19  ;;  %vm5667_vm11 = vcmp.ge.f32.partialorder %v12510_v51, 0.0 }
 0x975   : > { %v5620_v43 = vpop.f32.mrf.mxu1  ;;  %v6004_v30 = vadd.f32 -1.4531521, %v5988_v52  ;;  %v12610_v37 = vsel %vm5840_vm12, %v5842_v15, %v5838_v47  ;;  %v5914_v47 = vand.u32 2147483647, %v12545_v13  ;;  %v6132_v15 = vsub.f32 0.0, %v12496_v50 }
 0x976   : > { %v12568_v21 = vpop.eup %7572  ;;  %v12602_v14 = vadd.f32 1.0, %v5720_v33  ;;  %v12608_v6 = vadd.f32 %v12557_v9, %v5620_v43  ;;  %v6037_v43 = vadd.f32 1.4214138, %v6021_v25 }
 0x977   : > { %v5906_v0 = vmul.f32 %v12568_v21, %v12545_v13  ;;  %v12580_v55 = vpop.eup %7574  ;;  %v6020_v33 = vmul.f32 %v6004_v30, %v12576_v26  ;;  %vm5911_vm15 = vweird.f32 %v12568_v21  ;;  %v5916_v30 = vand.u32 2147483648, %v12545_v13 }
 0x978   : > { %v5891_v11 = vmul.f32 %v12580_v55, %v12551_v19  ;;  %7576 = vrcp.f32 %v12602_v14  ;;  %vm12643_vm4 = vmor %vm5910_vm3, %vm5911_vm15  ;;  %vm5896_vm5 = vweird.f32 %v12580_v55  ;;  %vm5915_vm6 = vcmp.eq.f32.partialorder %v5914_v47, 8.507059e+37 }
 0x979   : > { %v5907_v28 = vsub.f32 1.0, %v5906_v0  ;;  %v5849_v0 = vadd.f32 %v12549_v5, %v5848_v8  ;;  %v12617_v8 = vmul.f32 0.70710677, %v12608_v6  ;;  %vm12663_vm7 = vmor %vm5895_vm1, %vm5896_vm5  ;;  %vm5669_vm5 = vcmp.ge.f32.partialorder %v12484_v45, 0.0 }
 0x97a   : > { %v5892_v62 = vsub.f32 1.0, %v5891_v11  ;;  %vm5668_vm1 = vcmp.ge.f32.partialorder %v12487_v49, 0.0 }
 0x97b   : > { %v5908_v54 = vmul.f32 %v12568_v21, %v5907_v28  ;;  %v5853_v11 = vsel %vm12619_vm14, %v12549_v5, %v5849_v0  ;;  %v5986_v28 = vmul.f32 1.0614054, %v12610_v37  ;;  %v12637_v5 = vand.u32 2147483647, %v12617_v8 }
 0x97c   : > { %v5893_v44 = vmul.f32 %v12580_v55, %v5892_v62  ;;  %v12639_v39 = vsel %vm5855_vm2, %v5857_v35, %v5853_v11  ;;  %v6036_v62 = vadd.f32 1.4214138, %v6020_v33  ;;  %v6053_v33 = vmul.f32 %v6037_v43, %v12571_v17 }
 0x97d   : > { %v5909_v29 = vadd.f32 %v12568_v21, %v5908_v54  ;;  %v6002_v54 = vadd.f32 -1.4531521, %v5986_v28  ;;  %v5721_v4 = vmul.f32 0.3275911, %v12637_v5  ;;  %v5901_v11 = vand.u32 2147483648, %v12551_v19 }
 0x97e   : > { %v5894_v25 = vadd.f32 %v12580_v55, %v5893_v44  ;;  %v12653_v52 = vpop.eup %7576  ;;  %v5917_v35 = vor.u32 1.1754944e-38, %v5916_v30  ;;  %v5987_v41 = vmul.f32 1.0614054, %v12639_v39  ;;  %v5899_v28 = vand.u32 2147483647, %v12551_v19 }
 0x97f   : > { %v5913_v13 = vsel %vm12643_vm4, %v12568_v21, %v5909_v29  ;;  %v12660_v44 = vadd.f32 1.0, %v5721_v4  ;;  %v6168_v0 = vmul.f32 1.442695, %v6146_v32  ;;  %v6147_v21 = vmul.f32 %v6131_v63, %v12517_v38 }
 0x980   : > { %v12667_v43 = vsel %vm5915_vm6, %v5917_v35, %v5913_v13  ;;  %v6148_v30 = vmul.f32 %v6132_v15, %v12496_v50  ;;  %v5898_v46 = vsel %vm12663_vm7, %v12580_v55, %v5894_v25  ;;  %v5921_v19 = vmul.f32 %v12653_v52, %v12602_v14 }
 0x981   : > { %7578 = vrcp.f32 %v12660_v44  ;;  %v6052_v32 = vmul.f32 %v6036_v62, %v12576_v26  ;;  %v6069_v38 = vadd.f32 -0.28449672, %v6053_v33  ;;  %v6149_v63 = vmul.f32 %v6133_v10, %v12490_v3 }
 0x982   : > { %v5902_v47 = vor.u32 1.1754944e-38, %v5901_v11  ;;  %vm5900_vm8 = vcmp.eq.f32.partialorder %v5899_v28, 8.507059e+37  ;;  %v5991_v13 = vmul.f32 1.0614054, %v12667_v43  ;;  %v6003_v4 = vadd.f32 -1.4531521, %v5987_v41 }
 0x983   : > { %v6018_v50 = vmul.f32 %v6002_v54, %v12610_v37  ;;  %v6170_v15 = vmul.f32 1.442695, %v6147_v21  ;;  %v6172_v55 = vmul.f32 1.442695, %v6148_v30  ;;  %v5922_v25 = vsub.f32 1.0, %v5921_v19 }
 0x984   : > { %v12680_v35 = vsel %vm5900_vm8, %v5902_v47, %v5898_v46  ;;  %7580 = vpow2.f32 %v6168_v0  ;;  %v6068_v29 = vadd.f32 -0.28449672, %v6052_v32  ;;  %v6085_v20 = vmul.f32 %v6069_v38, %v12571_v17 }
 0x985   : > { %v6174_v62 = vmul.f32 1.442695, %v6149_v63  ;;  %v5990_v3 = vmul.f32 1.0614054, %v12680_v35  ;;  %v6007_v10 = vadd.f32 -1.4531521, %v5991_v13  ;;  %v6019_v11 = vmul.f32 %v6003_v4, %v12639_v39 }
 0x986   : > { %v6034_v28 = vadd.f32 1.4214138, %v6018_v50  ;;  %7582 = vpow2.f32 %v6170_v15  ;;  %v5923_v46 = vmul.f32 %v12653_v52, %v5922_v25  ;;  %v6084_v21 = vmul.f32 %v6068_v29, %v12576_v26 }
 0x987   : > { %v7579_v33 = vpop.eup %7578  ;;  %7584 = vpow2.f32 %v6172_v55  ;;  %v6035_v54 = vadd.f32 1.4214138, %v6019_v11  ;;  %v6101_v30 = vadd.f32 0.2548296, %v6085_v20  ;;  %v6006_v32 = vadd.f32 -1.4531521, %v5990_v3  ;;  %v6285_v55 = vpop.f32.mrf.mxu3 }
 0x988   : > { %v5936_v41 = vmul.f32 %v7579_v33, %v12660_v44  ;;  %v6050_v0 = vmul.f32 %v6034_v28, %v12610_v37  ;;  %7586 = vpow2.f32 %v6174_v62  ;;  %v6023_v38 = vmul.f32 %v6007_v10, %v12667_v43  ;;  %v12703_v11 = vld [vmem:[%s13787_s12 + $0x1] ss:$0 sm:$0xff] }
 0x989   : > { %v6051_v63 = vmul.f32 %v6035_v54, %v12639_v39  ;;  %v5931_v4 = vand.u32 2147483648, %v12602_v14  ;;  %vm5941_vm12 = vweird.f32 %v7579_v33  ;;  %v5946_v15 = vand.u32 2147483648, %v12660_v44 }
 0x98a   : > { %v5937_v19 = vsub.f32 1.0, %v5936_v41  ;;  %v6066_v47 = vadd.f32 -0.28449672, %v6050_v0  ;;  %v7581_v13 = vpop.eup %7580  ;;  %v5924_v20 = vadd.f32 %v12653_v52, %v5923_v46  ;;  %vm5926_vm9 = vweird.f32 %v12653_v52 }
 0x98b   : > { %v5944_v25 = vand.u32 2147483647, %v12660_v44  ;;  %v6067_v29 = vadd.f32 -0.28449672, %v6051_v63  ;;  %vm5940_vm13 = vweird.f32 %v12660_v44  ;;  %v6286_v28 = vadd.f32 %v12703_v11, %v6285_v55 }
 0x98c   : > { %v5938_v50 = vmul.f32 %v7579_v33, %v5937_v19  ;;  %v7583_v62 = vpop.eup %7582  ;;  %v6082_v10 = vmul.f32 %v6066_v47, %v12610_v37  ;;  %v6022_v46 = vmul.f32 %v6006_v32, %v12680_v35  ;;  %vm5925_vm14 = vweird.f32 %v12602_v14  ;;  %vm5942_vm15 = vmor %vm5940_vm13, %vm5941_vm12 }
 0x98d   : > { %v7585_v41 = vpop.eup %7584  ;;  %v5929_v54 = vand.u32 2147483647, %v12602_v14  ;;  %v6083_v44 = vmul.f32 %v6067_v29, %v12639_v39  ;;  %v6039_v19 = vadd.f32 1.4214138, %v6023_v38  ;;  %vm12713_vm2 = vmor %vm5925_vm14, %vm5926_vm9  ;;  %vm5945_vm3 = vcmp.eq.f32.partialorder %v5944_v25, 8.507059e+37 }
 0x98e   : > { %v5939_v3 = vadd.f32 %v7579_v33, %v5938_v50  ;;  %v7587_v0 = vpop.eup %7586  ;;  %v5947_v50 = vor.u32 1.1754944e-38, %v5946_v15  ;;  %v6098_v55 = vadd.f32 0.2548296, %v6082_v10  ;;  %v5928_v32 = vsel %vm12713_vm2, %v12653_v52, %v5924_v20 }
 0x98f   : > { %v6099_v14 = vadd.f32 0.2548296, %v6083_v44  ;;  %v12721_v59 = vadd.f32 %v6286_v28, %v14326_v18  ;;  %v6100_v29 = vadd.f32 0.2548296, %v6084_v21  ;;  %v5932_v38 = vor.u32 1.1754944e-38, %v5931_v4  ;;  %v6287_v21 = vpop.f32.mrf.mxu3 }
 0x990   : > { %v5943_v47 = vsel %vm5942_vm15, %v7579_v33, %v5939_v3  ;;  %v6114_v27 = vmul.f32 %v6098_v55, %v12610_v37  ;;  %v6038_v2 = vadd.f32 1.4214138, %v6022_v46  ;;  %vm5930_vm4 = vcmp.eq.f32.partialorder %v5929_v54, 8.507059e+37  ;;  %v14327_v46 = vld [vmem:[#allocation51_spill] sm:$0xff] }
 0x991   : > { %v12723_v7 = vsel %vm5945_vm3, %v5947_v50, %v5943_v47  ;;  %v6115_v33 = vmul.f32 %v6099_v14, %v12639_v39  ;;  %v6341_v15 = vsel %vm1021_vm0, %v12721_v59, 0.0  ;;  %v6117_v52 = vmul.f32 %v6101_v30, %v12571_v17 }
 0x992   : > { %v6055_v20 = vmul.f32 %v6039_v19, %v12667_v43  ;;  %v12731_v25 = vsel %vm5930_vm4, %v5932_v38, %v5928_v32  ;;  %v6194_v18 = vmul.f32 %v7581_v13, %v6114_v27  ;;  %6342 = vadd.xlane.f32.xlu0 %v6341_v15  ;;  %v5682_v37 = vsel %vm5666_vm10, 1.0, %v13999_v42 }
 0x993   : > { %v5993_v4 = vmul.f32 1.0614054, %v12723_v7  ;;  %v6195_v3 = vmul.f32 %v7583_v62, %v6115_v33  ;;  %v6288_v39 = vadd.f32 %v12703_v11, %v6287_v21  ;;  %v5683_v17 = vsel %vm5667_vm11, 1.0, %v13999_v42 }
 0x994   : > { %v6116_v30 = vmul.f32 %v6100_v29, %v12576_v26  ;;  %v6135_v10 = vsub.f32 0.0, %v12533_v56  ;;  %v6210_v27 = vsub.f32 1.0, %v6194_v18  ;;  %v6054_v13 = vmul.f32 %v6038_v2, %v12680_v35 }
 0x995   : > { %v5992_v28 = vmul.f32 1.0614054, %v12731_v25  ;;  %v6211_v1 = vsub.f32 1.0, %v6195_v3  ;;  %v12746_v54 = vadd.f32 %v6288_v39, %v14327_v46  ;;  %v6197_v62 = vmul.f32 %v7587_v0, %v6117_v52  ;;  %v14328_v39 = vld [vmem:[#allocation52_spill] sm:$0xff] }
 0x996   : > { %v6134_v44 = vsub.f32 0.0, %v12538_v40  ;;  %v6071_v19 = vadd.f32 -0.28449672, %v6055_v20  ;;  %v6226_v63 = vmul.f32 %v6210_v27, %v5682_v37  ;;  %v6009_v51 = vadd.f32 -1.4531521, %v5993_v4 }
 0x997   : > { %v6227_v47 = vmul.f32 %v6211_v1, %v5683_v17  ;;  %v6344_v26 = vsel %vm1021_vm0, %v12746_v54, 0.0  ;;  %v5634_v50 = vmul.f32 0.5, %v12493_v53  ;;  %v6196_v55 = vmul.f32 %v7585_v41, %v6116_v30 }
 0x998   : > { %v6151_v2 = vmul.f32 %v6135_v10, %v12533_v56  ;;  %v6242_v32 = vadd.f32 1.0, %v6226_v63  ;;  %6345 = vadd.xlane.f32.xlu1 %v6344_v26  ;;  %v5635_v14 = vmul.f32 0.5, %v12504_v48  ;;  %v6070_v29 = vadd.f32 -0.28449672, %v6054_v13 }
 0x999   : > { %v6008_v0 = vadd.f32 -1.4531521, %v5992_v28  ;;  %v6243_v38 = vadd.f32 1.0, %v6227_v47  ;;  %v6213_v33 = vsub.f32 1.0, %v6197_v62  ;;  %v6150_v15 = vmul.f32 %v6134_v44, %v12538_v40 }
 0x99a   : > { %v6087_v52 = vmul.f32 %v6071_v19, %v12667_v43  ;;  %v6025_v53 = vmul.f32 %v6009_v51, %v12723_v7  ;;  %v6258_v41 = vmul.f32 %v6242_v32, %v5634_v50  ;;  %v6212_v48 = vsub.f32 1.0, %v6196_v55  ;;  %v14329_v32 = vld [vmem:[#allocation56_spill] sm:$0xff] }
 0x99b   : > { %v6259_v18 = vmul.f32 %v6243_v38, %v5635_v14  ;;  %v6178_v21 = vmul.f32 1.442695, %v6151_v2  ;;  %v6086_v37 = vmul.f32 %v6070_v29, %v12680_v35  ;;  %v6024_v4 = vmul.f32 %v6008_v0, %v12731_v25 }
 0x99c   : > { %v5685_v17 = vsel %vm5669_vm5, 1.0, %v13999_v42  ;;  %v6176_v30 = vmul.f32 1.442695, %v6150_v15  ;;  %v6103_v27 = vadd.f32 0.2548296, %v6087_v52  ;;  %v5684_v28 = vsel %vm5668_vm1, 1.0, %v13999_v42 }
 0x99d   : > { %v6271_v3 = vpack.c.bf16 %v6259_v18, %v6258_v41  ;;  %v6229_v10 = vmul.f32 %v6213_v33, %v5685_v17  ;;  %v6041_v13 = vadd.f32 1.4214138, %v6025_v53  ;;  %7588 = vpow2.f32 %v6178_v21 }
 0x99e   : > { %v6290_v20 = vpop.f32.mrf.mxu3  ;;  %v6228_v1 = vmul.f32 %v6212_v48, %v5684_v28  ;;  %v6102_v46 = vadd.f32 0.2548296, %v6086_v37  ;;  %v6040_v62 = vadd.f32 1.4214138, %v6024_v4  ;;  %7590 = vpow2.f32 %v6176_v30 }
 0x99f   : > { %v6291_v56 = vadd.f32 %v12703_v11, %v6290_v20  ;;  %6299 = vmatmul.bf16.gmra.mxu3 %v6271_v3  ;;  %v6245_v19 = vadd.f32 1.0, %v6229_v10  ;;  %v6119_v45 = vmul.f32 %v6103_v27, %v12667_v43  ;;  %v6057_v63 = vmul.f32 %v6041_v13, %v12723_v7 }
 0x9a0   : > { %v5637_v47 = vmul.f32 0.5, %v12477_v57  ;;  %v6137_v26 = vsub.f32 0.0, %v12637_v5  ;;  %v6244_v50 = vadd.f32 1.0, %v6228_v1  ;;  %v6118_v55 = vmul.f32 %v6102_v46, %v12680_v35 }
 0x9a1   : > { %v12763_v40 = vadd.f32 %v6291_v56, %v14328_v39  ;;  %v6056_v2 = vmul.f32 %v6040_v62, %v12731_v25  ;;  %v5636_v0 = vmul.f32 0.5, %v12481_v31  ;;  %v6136_v43 = vsub.f32 0.0, %v12574_v34  ;;  %v14330_v39 = vld [vmem:[#allocation53_spill] sm:$0xff] }
 0x9a2   : > { %v6261_v38 = vmul.f32 %v6245_v19, %v5637_v47  ;;  %v6073_v15 = vadd.f32 -0.28449672, %v6057_v63  ;;  %v6153_v20 = vmul.f32 %v6137_v26, %v12637_v5  ;;  %vm5671_vm6 = vcmp.ge.f32.partialorder %v12525_v60, 0.0  ;;  %v14331_v63 = vld [vmem:[#allocation48_spill] sm:$0xff] }
 0x9a3   : > { %v6347_v49 = vsel %vm1021_vm0, %v12763_v40, 0.0  ;;  %v7589_v29 = vpop.eup %7588  ;;  %v6260_v35 = vmul.f32 %v6244_v50, %v5636_v0  ;;  %v6072_v41 = vadd.f32 -0.28449672, %v6056_v2  ;;  %v6152_v18 = vmul.f32 %v6136_v43, %v12574_v34 }
 0x9a4   : > { %6348 = vadd.xlane.f32.xlu2 %v6347_v49  ;;  %v6199_v33 = vmul.f32 %v7589_v29, %v6119_v45  ;;  %v7591_v52 = vpop.eup %7590  ;;  %v6089_v48 = vmul.f32 %v6073_v15, %v12723_v7  ;;  %v6182_v4 = vmul.f32 1.442695, %v6153_v20  ;;  %vm5670_vm7 = vcmp.ge.f32.partialorder %v12530_v58, 0.0 }
 0x9a5   : > { %v6198_v53 = vmul.f32 %v7591_v52, %v6118_v55  ;;  %v6272_v21 = vpack.c.bf16 %v6261_v38, %v6260_v35  ;;  %v6088_v5 = vmul.f32 %v6072_v41, %v12731_v25  ;;  %v5687_v60 = vsel %vm5671_vm6, 1.0, %v13999_v42 }
 0x9a6   : > { %v6292_v44 = vpop.f32.mrf.mxu3  ;;  %v6215_v56 = vsub.f32 1.0, %v6199_v33  ;;  %v6180_v30 = vmul.f32 1.442695, %v6152_v18  ;;  %v6105_v10 = vadd.f32 0.2548296, %v6089_v48  ;;  %v5686_v13 = vsel %vm5670_vm7, 1.0, %v13999_v42 }
 0x9a7   : > { %v6293_v51 = vadd.f32 %v12703_v11, %v6292_v44  ;;  %v6214_v3 = vsub.f32 1.0, %v6198_v53  ;;  %7592 = vpow2.f32 %v6182_v4  ;;  %v6104_v49 = vadd.f32 0.2548296, %v6088_v5 }
 0x9a8   : > { %v6231_v34 = vmul.f32 %v6215_v56, %v5687_v60  ;;  %7594 = vpow2.f32 %v6180_v30  ;;  %v6121_v46 = vmul.f32 %v6105_v10, %v12723_v7  ;;  %v5639_v19 = vmul.f32 0.5, %v12514_v22 }
 0x9a9   : > { %v12779_v14 = vadd.f32 %v6293_v51, %v14329_v32  ;;  %v6230_v58 = vmul.f32 %v6214_v3, %v5686_v13  ;;  %v6120_v45 = vmul.f32 %v6104_v49, %v12731_v25  ;;  %v5638_v26 = vmul.f32 0.5, %v12522_v16 }
 0x9aa   : > { %v6247_v1 = vadd.f32 1.0, %v6231_v34  ;;  %vm5673_vm8 = vcmp.ge.f32.partialorder %v12617_v8, 0.0  ;;  %vm5672_vm10 = vcmp.ge.f32.partialorder %v12566_v23, 0.0  ;;  %v5641_v18 = vmul.f32 0.5, %v12608_v6 }
 0x9ab   : > { %v6350_v57 = vsel %vm1021_vm0, %v12779_v14, 0.0  ;;  %v6246_v44 = vadd.f32 1.0, %v6230_v58  ;;  %v5688_v35 = vsel %vm5672_vm10, 1.0, %v13999_v42  ;;  %v5640_v56 = vmul.f32 0.5, %v12560_v36 }
 0x9ac   : > { %6351 = vadd.xlane.f32.xlu0 %v6350_v57  ;;  %v6263_v55 = vmul.f32 %v6247_v1, %v5639_v19  ;;  %v5689_v57 = vsel %vm5673_vm8, 1.0, %v13999_v42 }
 0x9ad   : > { %v7593_v47 = vpop.eup %7592  ;;  %v6262_v22 = vmul.f32 %v6246_v44, %v5638_v26 }
 0x9ae   : > { %v6295_v31 = vpop.f32.mrf.mxu3  ;;  %v6201_v2 = vmul.f32 %v7593_v47, %v6121_v46  ;;  %v7595_v29 = vpop.eup %7594 }
 0x9af   : > { %v6296_v37 = vadd.f32 %v12703_v11, %v6295_v31  ;;  %6304 = vmatmul.bf16.gmra.mxu3 %v6272_v21  ;;  %v6200_v0 = vmul.f32 %v7595_v29, %v6120_v45  ;;  %v6273_v16 = vpack.c.bf16 %v6263_v55, %v6262_v22 }
 0x9b0   : > { %v6217_v43 = vsub.f32 1.0, %v6201_v2 }
 0x9b1   : > { %v12793_v17 = vadd.f32 %v6296_v37, %v14330_v39  ;;  %v6216_v33 = vsub.f32 1.0, %v6200_v0 }
 0x9b2   : > { %v6233_v52 = vmul.f32 %v6217_v43, %v5689_v57 }
 0x9b3   : > { %v6353_v27 = vsel %vm1021_vm0, %v12793_v17, 0.0  ;;  %v6232_v53 = vmul.f32 %v6216_v33, %v5688_v35 }
 0x9b4   : > { %6354 = vadd.xlane.f32.xlu1 %v6353_v27  ;;  %v6249_v8 = vadd.f32 1.0, %v6233_v52 }
 0x9b5   : > { %v6248_v41 = vadd.f32 1.0, %v6232_v53 }
 0x9b6   : > { %v6297_v28 = vpop.f32.mrf.mxu3  ;;  %v6265_v23 = vmul.f32 %v6249_v8, %v5641_v18 }
 0x9b7   : > { %v6298_v62 = vadd.f32 %v12703_v11, %v6297_v28  ;;  %v6264_v21 = vmul.f32 %v6248_v41, %v5640_v56 }
 0x9b9   : > { %v12804_v51 = vadd.f32 %v6298_v62, %v14331_v63  ;;  %v6274_v4 = vpack.c.bf16 %v6265_v23, %v6264_v21 }
 0x9bb   : > { %v6356_v32 = vsel %vm1021_vm0, %v12804_v51, 0.0 }
 0x9bc   : > { %v5623_v50 = vpop.f32.mrf.mxu1  ;;  %6357 = vadd.xlane.f32.xlu2 %v6356_v32 }
 0x9bd   : > { %v12810_v7 = vadd.f32 %v12557_v9, %v5623_v50 }
 0x9bf   : > { %v12813_v25 = vmul.f32 0.70710677, %v12810_v7  ;;  %6309 = vmatmul.bf16.gmra.mxu3 %v6273_v16 }
 0x9c1   : > { %v12817_v38 = vand.u32 2147483647, %v12813_v25  ;;  %vm5674_vm5 = vcmp.ge.f32.partialorder %v12813_v25, 0.0 }
 0x9c3   : > { %v5722_v15 = vmul.f32 0.3275911, %v12817_v38  ;;  %v6138_v2 = vsub.f32 0.0, %v12817_v38 }
 0x9c4   : > { %v5625_v5 = vpop.f32.mrf.mxu1 }
 0x9c5   : > { %v5738_v20 = vadd.f32 1.0, %v5722_v15  ;;  %v12826_v39 = vadd.f32 %v12557_v9, %v5625_v5  ;;  %v6154_v16 = vmul.f32 %v6138_v2, %v12817_v38 }
 0x9c7   : > { %7596 = vrcp.f32 %v5738_v20  ;;  %v5961_v30 = vand.u32 2147483648, %v5738_v20  ;;  %vm5955_vm12 = vweird.f32 %v5738_v20  ;;  %v5959_v34 = vand.u32 2147483647, %v5738_v20 }
 0x9c8   : > { %v5659_v6 = vmul.f32 0.70710677, %v12826_v39 }
 0x9c9   : > { %v5962_v10 = vor.u32 1.1754944e-38, %v5961_v30  ;;  %vm5960_vm13 = vcmp.eq.f32.partialorder %v5959_v34, 8.507059e+37  ;;  %v5690_v34 = vsel %vm5674_vm5, 1.0, %v13999_v42 }
 0x9ca   : > { %v5707_v27 = vand.u32 2147483647, %v5659_v6  ;;  %vm5675_vm4 = vcmp.ge.f32.partialorder %v5659_v6, 0.0 }
 0x9cc   : > { %v5723_v58 = vmul.f32 0.3275911, %v5707_v27  ;;  %v6139_v22 = vsub.f32 0.0, %v5707_v27 }
 0x9cd   : > { %v7597_v31 = vpop.eup %7596 }
 0x9ce   : > { %v5951_v48 = vmul.f32 %v7597_v31, %v5738_v20  ;;  %vm5956_vm11 = vweird.f32 %v7597_v31  ;;  %v5739_v49 = vadd.f32 1.0, %v5723_v58  ;;  %v6155_v15 = vmul.f32 %v6139_v22, %v5707_v27 }
 0x9cf   : > { %6314 = vmatmul.bf16.gmra.mxu3 %v6274_v4  ;;  %vm5957_vm9 = vmor %vm5955_vm12, %vm5956_vm11  ;;  %v6184_v20 = vmul.f32 1.442695, %v6154_v16  ;;  %v5642_v58 = vmul.f32 0.5, %v12810_v7 }
 0x9d0   : > { %v5952_v37 = vsub.f32 1.0, %v5951_v48  ;;  %7598 = vrcp.f32 %v5739_v49  ;;  %v5976_v19 = vand.u32 2147483648, %v5739_v49  ;;  %v5974_v47 = vand.u32 2147483647, %v5739_v49 }
 0x9d1   : > { %vm5970_vm15 = vweird.f32 %v5739_v49  ;;  %v6186_v53 = vmul.f32 1.442695, %v6155_v15  ;;  %7600 = vpow2.f32 %v6184_v20 }
 0x9d2   : > { %v5953_v3 = vmul.f32 %v7597_v31, %v5952_v37  ;;  %v5977_v50 = vor.u32 1.1754944e-38, %v5976_v19  ;;  %vm5975_vm3 = vcmp.eq.f32.partialorder %v5974_v47, 8.507059e+37  ;;  %v14333_v19 = vld [vmem:[#allocation62_spill] sm:$0xff] }
 0x9d3   : > { %7602 = vpow2.f32 %v6186_v53 }
 0x9d4   : > { %v5954_v60 = vadd.f32 %v7597_v31, %v5953_v3 }
 0x9d6   : > { %v5958_v36 = vsel %vm5957_vm9, %v7597_v31, %v5954_v60  ;;  %v7599_v9 = vpop.eup %7598  ;;  %v5691_v60 = vsel %vm5675_vm4, 1.0, %v13999_v42 }
 0x9d7   : > { %v5963_v13 = vsel %vm5960_vm13, %v5962_v10, %v5958_v36  ;;  %v5966_v62 = vmul.f32 %v7599_v9, %v5739_v49  ;;  %vm5971_vm14 = vweird.f32 %v7599_v9  ;;  %v7601_v48 = vpop.eup %7600 }
 0x9d8   : > { %v5994_v28 = vmul.f32 1.0614054, %v5963_v13  ;;  %vm5972_vm2 = vmor %vm5970_vm15, %vm5971_vm14 }
 0x9d9   : > { %v5967_v44 = vsub.f32 1.0, %v5966_v62  ;;  %v7603_v37 = vpop.eup %7602  ;;  %v3610_v62 = vpop.xlane.xlu2 %3609 }
 0x9da   : > { %v6010_v1 = vadd.f32 -1.4531521, %v5994_v28 }
 0x9db   : > { %v5968_v63 = vmul.f32 %v7599_v9, %v5967_v44 }
 0x9dc   : > { %v6026_v46 = vmul.f32 %v6010_v1, %v5963_v13 }
 0x9dd   : > { %v5969_v26 = vadd.f32 %v7599_v9, %v5968_v63 }
 0x9de   : > { %v6042_v45 = vadd.f32 1.4214138, %v6026_v46 }
 0x9df   : > { %v5973_v32 = vsel %vm5972_vm2, %v7599_v9, %v5969_v26  ;;  %v14332_v9 = vld [vmem:[#allocation37_spill] sm:$0xff] }
 0x9e0   : > { %v6058_v55 = vmul.f32 %v6042_v45, %v5963_v13  ;;  %v5978_v29 = vsel %vm5975_vm3, %v5977_v50, %v5973_v32  ;;  %v14334_v50 = vld [vmem:[#allocation54_spill] sm:$0xff] }
 0x9e1   : > { %v5995_v0 = vmul.f32 1.0614054, %v5978_v29  ;;  %v12848_v63 = vpop.xlane.xlu2 %3663 }
 0x9e2   : > { %v6074_v43 = vadd.f32 -0.28449672, %v6058_v55 }
 0x9e3   : > { %v6011_v33 = vadd.f32 -1.4531521, %v5995_v0  ;;  %v14335_v0 = vld [vmem:[#allocation61_spill] sm:$0xff] }
 0x9e4   : > { %v6090_v52 = vmul.f32 %v6074_v43, %v5963_v13 }
 0x9e5   : > { %v6027_v57 = vmul.f32 %v6011_v33, %v5978_v29 }
 0x9e6   : > { %v6106_v41 = vadd.f32 0.2548296, %v6090_v52  ;;  %v14336_v52 = vld [vmem:[#allocation44_spill] sm:$0xff] }
 0x9e7   : > { %v6043_v35 = vadd.f32 1.4214138, %v6027_v57 }
 0x9e8   : > { %v6122_v56 = vmul.f32 %v6106_v41, %v5963_v13  ;;  %v5643_v13 = vmul.f32 0.5, %v12826_v39  ;;  %v14337_v41 = vld [vmem:[#allocation45_spill] sm:$0xff] }
 0x9e9   : > { %v6059_v8 = vmul.f32 %v6043_v35, %v5978_v29  ;;  %v12856_v32 = vpop.xlane.xlu2 %3672 }
 0x9ea   : > { %v6202_v4 = vmul.f32 %v7601_v48, %v6122_v56 }
 0x9eb   : > { %v6075_v18 = vadd.f32 -0.28449672, %v6059_v8 }
 0x9ec   : > { %v6218_v5 = vsub.f32 1.0, %v6202_v4 }
 0x9ed   : > { %v6091_v31 = vmul.f32 %v6075_v18, %v5978_v29 }
 0x9ee   : > { %v6234_v36 = vmul.f32 %v6218_v5, %v5690_v34  ;;  %v3626_v5 = vmul.f32 %v3610_v62, %v8012_v24 }
 0x9ef   : > { %v6107_v23 = vadd.f32 0.2548296, %v6091_v31 }
 0x9f0   : > { %v6250_v27 = vadd.f32 1.0, %v6234_v36  ;;  %v14340_v36 = vld [vmem:[#allocation55_spill] sm:$0xff] }
 0x9f1   : > { %v6123_v21 = vmul.f32 %v6107_v23, %v5978_v29  ;;  %v12865_v57 = vpop.xlane.xlu2 %3681 }
 0x9f2   : > { %v6266_v28 = vmul.f32 %v6250_v27, %v5642_v58 }
 0x9f3   : > { %v6203_v38 = vmul.f32 %v7603_v37, %v6123_v21  ;;  %v14338_v21 = vld [vmem:[#allocation38_spill] sm:$0xff] }
 0x9f5   : > { %v6219_v3 = vsub.f32 1.0, %v6203_v38 }
 0x9f7   : > { %v6235_v30 = vmul.f32 %v6219_v3, %v5691_v60 }
 0x9f9   : > { %v6251_v10 = vadd.f32 1.0, %v6235_v30  ;;  %v12876_v31 = vpop.xlane.xlu2 %3690  ;;  %v14339_v30 = vld [vmem:[#allocation39_spill] sm:$0xff] }
 0x9fb   : > { %v6267_v49 = vmul.f32 %v6251_v10, %v5643_v13  ;;  %v12894_v10 = vsub.f32 %v14340_v36, %v3626_v5  ;;  %v12898_v13 = vpop.xlane.xlu0 %3666  ;;  %v14343_v5 = vld [vmem:[#allocation60_spill] sm:$0xff] }
 0x9fd   : > { %v6275_v1 = vpack.c.bf16 %v6267_v49, %v6266_v28  ;;  %14341 = vst [vmem:[#allocation15_spill] sm:$0xff] %v12894_v10  ;;  %v3658_v28 = vmul.f32 %v12894_v10, %v12894_v10 }
 0x9ff   : > { %6319 = vmatmul.bf16.gmra.mxu3 %v6275_v1 }
 0xa01   : > { %v12886_v38 = vpop.xlane.xlu2 %3699 }
 0xa17   : > { %v6349_v58 = vpop.xlane.xlu2 %6348 }
 0xa18   : > { %v6391_v49 = vmul.f32 %v6349_v58, %v8012_v24 }
 0xa1a   : > { %v12904_v1 = vsub.f32 %v12763_v40, %v6391_v49 }
 0xa22   : > { %v6300_v6 = vpop.f32.mrf.mxu3 }
 0xa23   : > { %v6301_v25 = vadd.f32 %v12703_v11, %v6300_v6  ;;  %v3704_v6 = vsel %vm1021_vm0, %v3658_v28, 0.0 }
 0xa25   : > { %v12838_v46 = vadd.f32 %v6301_v25, %v14332_v9  ;;  %v12907_v25 = vpop.xlane.xlu1 %3660 }
 0xa27   : > { %v6359_v42 = vsel %vm1021_vm0, %v12838_v46, 0.0 }
 0xa28   : > { %6360 = vadd.xlane.f32.xlu0 %v6359_v42  ;;  %v12909_v42 = vpop.xlane.xlu0 %3675 }
 0xa2a   : > { %v6302_v44 = vpop.f32.mrf.mxu3 }
 0xa2b   : > { %v6303_v39 = vadd.f32 %v12703_v11, %v6302_v44  ;;  %v6423_v44 = vmul.f32 %v12904_v1, %v12904_v1 }
 0xa2d   : > { %v12844_v7 = vadd.f32 %v6303_v39, %v14333_v19  ;;  %v6443_v19 = vsel %vm1021_vm0, %v6423_v44, 0.0  ;;  %v12918_v40 = vpop.xlane.xlu1 %3669 }
 0xa2f   : > { %v6362_v45 = vsel %vm1021_vm0, %v12844_v7, 0.0  ;;  %v6358_v9 = vpop.xlane.xlu2 %6357 }
 0xa30   : > { %6363 = vadd.xlane.f32.xlu1 %v6362_v45  ;;  %v6394_v62 = vmul.f32 %v6358_v9, %v8012_v24 }
 0xa32   : > { %v6305_v47 = vpop.f32.mrf.mxu3  ;;  %v12915_v39 = vsub.f32 %v12804_v51, %v6394_v62 }
 0xa33   : > { %v6306_v26 = vadd.f32 %v12703_v11, %v6305_v47  ;;  %v12922_v47 = vpop.xlane.xlu0 %3684 }
 0xa34   : > { %v6426_v45 = vmul.f32 %v12915_v39, %v12915_v39 }
 0xa35   : > { %v12852_v55 = vadd.f32 %v6306_v26, %v14334_v50  ;;  %v12925_v50 = vpop.xlane.xlu1 %3678 }
 0xa36   : > { %v6452_v26 = vsel %vm1021_vm0, %v6426_v45, 0.0 }
 0xa37   : > { %v6365_v2 = vsel %vm1021_vm0, %v12852_v55, 0.0 }
 0xa38   : > { %6366 = vadd.xlane.f32.xlu2 %v6365_v2 }
 0xa3a   : > { %v6307_v29 = vpop.f32.mrf.mxu3 }
 0xa3b   : > { %v6308_v22 = vadd.f32 %v12703_v11, %v6307_v29  ;;  %v12927_v2 = vpop.xlane.xlu0 %3693 }
 0xa3d   : > { %v12860_v43 = vadd.f32 %v6308_v22, %v14335_v0  ;;  %v12929_v29 = vpop.xlane.xlu1 %3687 }
 0xa3f   : > { %v6368_v16 = vsel %vm1021_vm0, %v12860_v43, 0.0 }
 0xa40   : > { %6369 = vadd.xlane.f32.xlu0 %v6368_v16 }
 0xa42   : > { %v6310_v33 = vpop.f32.mrf.mxu3 }
 0xa43   : > { %v6311_v15 = vadd.f32 %v12703_v11, %v6310_v33  ;;  %v12931_v51 = vpop.xlane.xlu0 %3702 }
 0xa45   : > { %v12868_v20 = vadd.f32 %v6311_v15, %v14336_v52  ;;  %v12933_v22 = vpop.xlane.xlu1 %3696  ;;  %v14342_v52 = vld [vmem:[#allocation57_spill] sm:$0xff] }
 0xa47   : > { %v6371_v35 = vsel %vm1021_vm0, %v12868_v20, 0.0 }
 0xa48   : > { %6372 = vadd.xlane.f32.xlu1 %v6371_v35 }
 0xa4a   : > { %v6312_v53 = vpop.f32.mrf.mxu3 }
 0xa4b   : > { %v6313_v8 = vadd.f32 %v12703_v11, %v6312_v53  ;;  %v6343_v0 = vpop.xlane.xlu0 %6342 }
 0xa4c   : > { %v6389_v33 = vmul.f32 %v6343_v0, %v8012_v24 }
 0xa4d   : > { %v12874_v18 = vadd.f32 %v6313_v8, %v14337_v41  ;;  %v6346_v41 = vpop.xlane.xlu1 %6345 }
 0xa4e   : > { %v12941_v53 = vsub.f32 %v12721_v59, %v6389_v33 }
 0xa4f   : > { %v6374_v56 = vsel %vm1021_vm0, %v12874_v18, 0.0 }
 0xa50   : > { %6375 = vadd.xlane.f32.xlu2 %v6374_v56 }
 0xa52   : > { %v6315_v23 = vpop.f32.mrf.mxu3 }
 0xa53   : > { %v6316_v48 = vadd.f32 %v12703_v11, %v6315_v23  ;;  %v6352_v56 = vpop.xlane.xlu0 %6351 }
 0xa55   : > { %v12882_v37 = vadd.f32 %v6316_v48, %v14338_v21  ;;  %v6390_v48 = vmul.f32 %v6346_v41, %v8012_v24  ;;  %v6392_v21 = vmul.f32 %v6352_v56, %v8012_v24  ;;  %v6355_v58 = vpop.xlane.xlu1 %6354 }
 0xa57   : > { %v6377_v4 = vsel %vm1021_vm0, %v12882_v37, 0.0  ;;  %v12954_v59 = vsub.f32 %v12746_v54, %v6390_v48 }
 0xa58   : > { %6378 = vadd.xlane.f32.xlu0 %v6377_v4 }
 0xa5a   : > { %v6317_v3 = vpop.f32.mrf.mxu3 }
 0xa5b   : > { %v6318_v60 = vadd.f32 %v12703_v11, %v6317_v3  ;;  %v6421_v3 = vmul.f32 %v12941_v53, %v12941_v53 }
 0xa5d   : > { %v12891_v34 = vadd.f32 %v6318_v60, %v14339_v30  ;;  %v12957_v30 = vsub.f32 %v12779_v14, %v6392_v21  ;;  %v6422_v14 = vmul.f32 %v12954_v59, %v12954_v59 }
 0xa5f   : > { %v6380_v27 = vsel %vm1021_vm0, %v12891_v34, 0.0  ;;  %v6424_v54 = vmul.f32 %v12957_v30, %v12957_v30  ;;  %v6440_v44 = vsel %vm1021_vm0, %v6422_v14, 0.0 }
 0xa60   : > { %6381 = vadd.xlane.f32.xlu1 %v6380_v27  ;;  %v6437_v27 = vsel %vm1021_vm0, %v6421_v3, 0.0 }
 0xa61   : > { %v6446_v62 = vsel %vm1021_vm0, %v6424_v54, 0.0 }
 0xa68   : > { %3705 = vadd.xlane.f32.xlu1 %v3704_v6 }
 0xa70   : > { %6444 = vadd.xlane.f32.xlu1 %v6443_v19 }
 0xa78   : > { %6453 = vadd.xlane.f32.xlu1 %v6452_v26 }
 0xa82   : > { %v6320_v16 = vpop.f32.mrf.mxu3 }
 0xa83   : > { %v6321_v15 = vadd.f32 %v12703_v11, %v6320_v16 }
 0xa85   : > { %v12938_v35 = vadd.f32 %v6321_v15, %v14342_v52 }
 0xa87   : > { %v6383_v8 = vsel %vm1021_vm0, %v12938_v35, 0.0 }
 0xa88   : > { %6384 = vadd.xlane.f32.xlu2 %v6383_v8 }
 0xa8a   : > { %v6322_v23 = vpop.f32.mrf.mxu3 }
 0xa8b   : > { %v6323_v4 = vadd.f32 %v12703_v11, %v6322_v23  ;;  %v6393_v11 = vmul.f32 %v6355_v58, %v8012_v24 }
 0xa8d   : > { %v12951_v60 = vadd.f32 %v6323_v4, %v14343_v5  ;;  %v12969_v6 = vsub.f32 %v12793_v17, %v6393_v11 }
 0xa8f   : > { %v6386_v36 = vsel %vm1021_vm0, %v12951_v60, 0.0  ;;  %v6425_v17 = vmul.f32 %v12969_v6, %v12969_v6 }
 0xa90   : > { %6387 = vadd.xlane.f32.xlu0 %v6386_v36  ;;  %6438 = vadd.xlane.f32.xlu2 %v6437_v27 }
 0xa91   : > { %v6449_v52 = vsel %vm1021_vm0, %v6425_v17, 0.0 }
 0xa98   : > { %6447 = vadd.xlane.f32.xlu2 %v6446_v62  ;;  %6441 = vadd.xlane.f32.xlu0 %v6440_v44 }
 0xa9b   : > { %v6361_v49 = vpop.xlane.xlu0 %6360 }
 0xa9c   : > { %v6395_v28 = vmul.f32 %v6361_v49, %v8012_v24 }
 0xa9e   : > { %v12972_v9 = vsub.f32 %v12838_v46, %v6395_v28 }
 0xaa0   : > { %v6427_v0 = vmul.f32 %v12972_v9, %v12972_v9  ;;  %6450 = vadd.xlane.f32.xlu0 %v6449_v52  ;;  %v3711_v52 = vmul.f32 %v12856_v32, %v8012_v24  ;;  %v3709_v32 = vmul.f32 %v12898_v13, %v8012_v24 }
 0xaa2   : > { %v6455_v15 = vsel %vm1021_vm0, %v6427_v0, 0.0 }
 0xaa3   : > { %v6364_v19 = vpop.xlane.xlu1 %6363  ;;  %6456 = vadd.xlane.f32.xlu2 %v6455_v15  ;;  %v3707_v15 = vmul.f32 %v12907_v25, %v8012_v24 }
 0xaa4   : > { %v6396_v45 = vmul.f32 %v6364_v19, %v8012_v24 }
 0xaa6   : > { %v12986_v33 = vsub.f32 %v12844_v7, %v6396_v45 }
 0xaab   : > { %v6367_v26 = vpop.xlane.xlu2 %6366 }
 0xaac   : > { %v6397_v16 = vmul.f32 %v6367_v26, %v8012_v24 }
 0xaae   : > { %v12983_v46 = vsub.f32 %v12852_v55, %v6397_v16  ;;  %v6428_v55 = vmul.f32 %v12986_v33, %v12986_v33 }
 0xab0   : > { %v6429_v8 = vmul.f32 %v12983_v46, %v12983_v46  ;;  %v6458_v48 = vsel %vm1021_vm0, %v6428_v55, 0.0  ;;  %v13045_v55 = vadd.f32 1e-05, %v3711_v52 }
 0xab1   : > { %6459 = vadd.xlane.f32.xlu0 %v6458_v48 }
 0xab2   : > { %v6461_v41 = vsel %vm1021_vm0, %v6429_v8, 0.0  ;;  %vm3785_vm9 = vweird.f32 %v13045_v55 }
 0xab3   : > { %6462 = vadd.xlane.f32.xlu1 %v6461_v41  ;;  %v6370_v56 = vpop.xlane.xlu0 %6369  ;;  %v13041_v41 = vadd.f32 1e-05, %v3707_v15 }
 0xab4   : > { %v6398_v23 = vmul.f32 %v6370_v56, %v8012_v24  ;;  %v3710_v56 = vmul.f32 %v12918_v40, %v8012_v24  ;;  %v3714_v40 = vmul.f32 %v12865_v57, %v8012_v24 }
 0xab5   : > { %vm3745_vm8 = vweird.f32 %v13041_v41 }
 0xab6   : > { %v12997_v7 = vsub.f32 %v12860_v43, %v6398_v23  ;;  %v13050_v25 = vadd.f32 1e-05, %v3710_v56 }
 0xab8   : > { %v6430_v21 = vmul.f32 %v12997_v7, %v12997_v7  ;;  %vm3775_vm15 = vweird.f32 %v13050_v25 }
 0xaba   : > { %v6464_v4 = vsel %vm1021_vm0, %v6430_v21, 0.0 }
 0xabb   : > { %v6373_v3 = vpop.xlane.xlu1 %6372  ;;  %6465 = vadd.xlane.f32.xlu2 %v6464_v4 }
 0xabc   : > { %v6399_v5 = vmul.f32 %v6373_v3, %v8012_v24  ;;  %v13064_v3 = vadd.f32 1e-05, %v3709_v32 }
 0xabe   : > { %v13005_v36 = vsub.f32 %v12868_v20, %v6399_v5  ;;  %v3713_v5 = vmul.f32 %v12925_v50, %v8012_v24 }
 0xac0   : > { %v6431_v27 = vmul.f32 %v13005_v36, %v13005_v36 }
 0xac2   : > { %v6467_v43 = vsel %vm1021_vm0, %v6431_v27, 0.0 }
 0xac3   : > { %v6376_v58 = vpop.xlane.xlu2 %6375  ;;  %6468 = vadd.xlane.f32.xlu0 %v6467_v43 }
 0xac4   : > { %v6400_v49 = vmul.f32 %v6376_v58, %v8012_v24  ;;  %v13076_v58 = vadd.f32 1e-05, %v3714_v40 }
 0xac6   : > { %v13012_v11 = vsub.f32 %v12874_v18, %v6400_v49  ;;  %v3712_v49 = vmul.f32 %v12909_v42, %v8012_v24  ;;  %vm3815_vm4 = vweird.f32 %v13076_v58 }
 0xac8   : > { %v6432_v28 = vmul.f32 %v13012_v11, %v13012_v11 }
 0xaca   : > { %v6470_v54 = vsel %vm1021_vm0, %v6432_v28, 0.0 }
 0xacb   : > { %6471 = vadd.xlane.f32.xlu1 %v6470_v54  ;;  %v6379_v20 = vpop.xlane.xlu0 %6378  ;;  %v13085_v54 = vadd.f32 1e-05, %v3713_v5 }
 0xacc   : > { %v6401_v14 = vmul.f32 %v6379_v20, %v8012_v24  ;;  %v3717_v20 = vmul.f32 %v12876_v31, %v8012_v24 }
 0xace   : > { %v13019_v62 = vsub.f32 %v12882_v37, %v6401_v14  ;;  %v3708_v37 = vmul.f32 %v12848_v63, %v8012_v24  ;;  %v13102_v31 = vadd.f32 1e-05, %v3717_v20  ;;  %v3715_v20 = vmul.f32 %v12922_v47, %v8012_v24 }
 0xad0   : > { %v6433_v44 = vmul.f32 %v13019_v62, %v13019_v62  ;;  %v13039_v8 = vadd.f32 1e-05, %v3708_v37  ;;  %v3716_v37 = vmul.f32 %v12929_v29, %v8012_v24 }
 0xad2   : > { %v6473_v19 = vsel %vm1021_vm0, %v6433_v44, 0.0  ;;  %7604 = vrsqrt.f32 %v13039_v8  ;;  %v13118_v29 = vadd.f32 1e-05, %v3716_v37  ;;  %vm3755_vm1 = vweird.f32 %v13039_v8 }
 0xad3   : > { %v6382_v45 = vpop.xlane.xlu1 %6381  ;;  %6474 = vadd.xlane.f32.xlu2 %v6473_v19  ;;  %7606 = vrsqrt.f32 %v13041_v41 }
 0xad4   : > { %v6402_v18 = vmul.f32 %v6382_v45, %v8012_v24  ;;  %7608 = vrsqrt.f32 %v13045_v55 }
 0xad5   : > { %7610 = vrsqrt.f32 %v13050_v25 }
 0xad6   : > { %v13026_v26 = vsub.f32 %v12891_v34, %v6402_v18  ;;  %v13098_v18 = vadd.f32 1e-05, %v3712_v49 }
 0xad8   : > { %v6434_v0 = vmul.f32 %v13026_v26, %v13026_v26  ;;  %v13057_v48 = vpop.eup %7604 }
 0xad9   : > { %v13062_v4 = vpop.eup %7606  ;;  %v3750_v43 = vmul.f32 %v13057_v48, %v13039_v8  ;;  %vm3756_vm6 = vweird.f32 %v13057_v48 }
 0xada   : > { %v6476_v17 = vsel %vm1021_vm0, %v6434_v0, 0.0  ;;  %v13068_v27 = vpop.eup %7608  ;;  %v3740_v57 = vmul.f32 %v13062_v4, %v13041_v41  ;;  %vm3746_vm7 = vweird.f32 %v13062_v4  ;;  %vm13150_vm10 = vmor %vm3755_vm1, %vm3756_vm6  ;;  %v3720_v41 = vmul.f32 %v12886_v38, %v8012_v24 }
 0xadb   : > { %v13031_v16 = vpop.xlane.xlu1 %3705  ;;  %6477 = vadd.xlane.f32.xlu0 %v6476_v17  ;;  %v13081_v50 = vpop.eup %7610  ;;  %v3780_v28 = vmul.f32 %v13068_v27, %v13045_v55  ;;  %v3751_v44 = vmul.f32 %v13057_v48, %v3750_v43  ;;  %vm3786_vm11 = vweird.f32 %v13068_v27  ;;  %vm13160_vm12 = vmor %vm3745_vm8, %vm3746_vm7  ;;  %v3719_v55 = vmul.f32 %v12933_v22, %v8012_v24 }
 0xadc   : > { %14344 = vst [vmem:[#allocation19_spill] sm:$0xff] %v13031_v16  ;;  %v3741_v19 = vmul.f32 %v13062_v4, %v3740_v57  ;;  %v3770_v42 = vmul.f32 %v13081_v50, %v13050_v25  ;;  %vm13177_vm13 = vmor %vm3785_vm9, %vm3786_vm11  ;;  %vm3776_vm14 = vweird.f32 %v13081_v50  ;;  %vm3765_vm7 = vweird.f32 %v13064_v3 }
 0xadd   : > { %v3781_v0 = vmul.f32 %v13068_v27, %v3780_v28  ;;  %v3752_v15 = vmul.f32 0.5, %v3751_v44  ;;  %vm13198_vm2 = vmor %vm3775_vm15, %vm3776_vm14  ;;  %v13237_v22 = vadd.f32 1e-05, %v3720_v41 }
 0xade   : > { %v3742_v52 = vmul.f32 0.5, %v3741_v19  ;;  %v3771_v56 = vmul.f32 %v13081_v50, %v3770_v42 }
 0xadf   : > { %v3782_v32 = vmul.f32 0.5, %v3781_v0  ;;  %v3753_v5 = vsub.f32 1.5, %v3752_v15 }
 0xae0   : > { %v3772_v49 = vmul.f32 0.5, %v3771_v56 }
 0xae1   : > { %v3783_v44 = vsub.f32 1.5, %v3782_v32  ;;  %v3754_v47 = vmul.f32 %v13057_v48, %v3753_v5 }
 0xae2   : > { %v3773_v56 = vsub.f32 1.5, %v3772_v49 }
 0xae3   : > { %v6445_v34 = vpop.xlane.xlu1 %6444  ;;  %v3784_v5 = vmul.f32 %v13068_v27, %v3783_v44 }
 0xae4   : > { %v6487_v63 = vmul.f32 %v6445_v34, %v8012_v24 }
 0xae6   : > { %v13055_v23 = vadd.f32 1e-05, %v6487_v63 }
 0xae8   : > { %7612 = vrsqrt.f32 %v13055_v23  ;;  %vm6543_vm1 = vweird.f32 %v13055_v23 }
 0xae9   : > { %7614 = vrsqrt.f32 %v13064_v3 }
 0xaea   : > { %7616 = vrsqrt.f32 %v13076_v58 }
 0xaeb   : > { %v6454_v21 = vpop.xlane.xlu1 %6453  ;;  %7618 = vrsqrt.f32 %v13085_v54 }
 0xaec   : > { %v6490_v13 = vmul.f32 %v6454_v21, %v8012_v24 }
 0xaee   : > { %v13089_v14 = vadd.f32 1e-05, %v6490_v13  ;;  %v13094_v45 = vpop.eup %7612  ;;  %v3743_v13 = vsub.f32 1.5, %v3742_v52 }
 0xaef   : > { %v13104_v17 = vpop.eup %7614  ;;  %v6538_v34 = vmul.f32 %v13094_v45, %v13055_v23  ;;  %vm6544_vm3 = vweird.f32 %v13094_v45 }
 0xaf0   : > { %7620 = vrsqrt.f32 %v13089_v14  ;;  %v13113_v63 = vpop.eup %7616  ;;  %v3760_v40 = vmul.f32 %v13104_v17, %v13064_v3  ;;  %v3744_v15 = vmul.f32 %v13062_v4, %v3743_v13  ;;  %vm3766_vm5 = vweird.f32 %v13104_v17  ;;  %vm13225_vm6 = vmor %vm6543_vm1, %vm6544_vm3 }
 0xaf1   : > { %7622 = vrsqrt.f32 %v13098_v18  ;;  %v13120_v21 = vpop.eup %7618  ;;  %v6539_v43 = vmul.f32 %v13094_v45, %v6538_v34  ;;  %v3810_v28 = vmul.f32 %v13113_v63, %v13076_v58  ;;  %vm3816_vm8 = vweird.f32 %v13113_v63  ;;  %vm13241_vm11 = vmor %vm3765_vm7, %vm3766_vm5 }
 0xaf2   : > { %7624 = vrsqrt.f32 %v13102_v31  ;;  %v3761_v19 = vmul.f32 %v13104_v17, %v3760_v40  ;;  %v3800_v0 = vmul.f32 %v13120_v21, %v13085_v54  ;;  %v13146_v40 = vadd.f32 1e-05, %v3715_v20  ;;  %vm13270_vm14 = vmor %vm3815_vm4, %vm3816_vm8 }
 0xaf3   : > { %7626 = vrsqrt.f32 %v13118_v29  ;;  %v6540_v52 = vmul.f32 0.5, %v6539_v43  ;;  %v3811_v32 = vmul.f32 %v13113_v63, %v3810_v28  ;;  %v3758_v28 = vsel %vm13150_vm10, %v13057_v48, %v3754_v47 }
 0xaf4   : > { %v3762_v13 = vmul.f32 0.5, %v3761_v19  ;;  %v3801_v8 = vmul.f32 %v13120_v21, %v3800_v0  ;;  %v3748_v20 = vsel %vm13160_vm12, %v13062_v4, %v3744_v15  ;;  %v13182_v0 = vmul.f32 %v13081_v50, %v3773_v56 }
 0xaf5   : > { %v6541_v44 = vsub.f32 1.5, %v6540_v52  ;;  %v3812_v10 = vmul.f32 0.5, %v3811_v32  ;;  %7628 = vrsqrt.f32 %v13146_v40  ;;  %v3788_v48 = vsel %vm13177_vm13, %v13068_v27, %v3784_v5 }
 0xaf6   : > { %v13123_v57 = vpop.eup %7620  ;;  %v3763_v4 = vsub.f32 1.5, %v3762_v13  ;;  %v13192_v15 = vmul.f32 %v3758_v28, %v12175_v61  ;;  %v13195_v52 = vmul.f32 %v3748_v20, %v12185_v12  ;;  %v14353_v61 = vld [vmem:[#allocation10_spill] sm:$0xff]  ;;  %v3778_v12 = vsel %vm13198_vm2, %v13081_v50, %v13182_v0 }
 0xaf7   : > { %v13131_v42 = vpop.eup %7622  ;;  %v6568_v34 = vmul.f32 %v13123_v57, %v13089_v14  ;;  %v6542_v25 = vmul.f32 %v13094_v45, %v6541_v44  ;;  %v13207_v13 = vmul.f32 %v3788_v48, %v14353_v61  ;;  %vm3805_vm10 = vweird.f32 %v13085_v54 }
 0xaf8   : > { %v13138_v37 = vpop.eup %7624  ;;  %v3790_v43 = vmul.f32 %v13131_v42, %v13098_v18  ;;  %vm3806_vm12 = vweird.f32 %v13120_v21  ;;  %vm6574_vm9 = vweird.f32 %v13123_v57  ;;  %7630 = vrsqrt.f32 %v13237_v22 }
 0xaf9   : > { %v3840_v49 = vmul.f32 %v13138_v37, %v13102_v31  ;;  %v6569_v19 = vmul.f32 %v13123_v57, %v6568_v34  ;;  %v13175_v16 = vpop.eup %7626  ;;  %v3802_v34 = vmul.f32 0.5, %v3801_v8  ;;  %v3764_v8 = vmul.f32 %v13104_v17, %v3763_v4  ;;  %vm13295_vm4 = vmor %vm3805_vm10, %vm3806_vm12 }
 0xafa   : > { %v3791_v47 = vmul.f32 %v13131_v42, %v3790_v43  ;;  %v3830_v27 = vmul.f32 %v13175_v16, %v13118_v29  ;;  %v3813_v43 = vsub.f32 1.5, %v3812_v10  ;;  %v6546_v23 = vsel %vm13225_vm6, %v13094_v45, %v6542_v25  ;;  %v13288_v10 = vld [vmem:[%s13780_s5] ss:$0 sm:$0xff] }
 0xafb   : > { %v3841_v56 = vmul.f32 %v13138_v37, %v3840_v49  ;;  %v6570_v5 = vmul.f32 0.5, %v6569_v19  ;;  %v6385_v28 = vpop.xlane.xlu2 %6384  ;;  %v13219_v20 = vpop.eup %7628  ;;  %v3803_v44 = vsub.f32 1.5, %v3802_v34  ;;  %v3768_v45 = vsel %vm13241_vm11, %v13104_v17, %v3764_v8  ;;  %v14358_v17 = vld [vmem:[#allocation28_spill] sm:$0xff] }
 0xafc   : > { %v3792_v49 = vmul.f32 0.5, %v3791_v47  ;;  %v6403_v38 = vmul.f32 %v6385_v28, %v8012_v24  ;;  %v3831_v48 = vmul.f32 %v13175_v16, %v3830_v27  ;;  %v3814_v3 = vmul.f32 %v13113_v63, %v3813_v43 }
 0xafd   : > { %v3842_v19 = vmul.f32 0.5, %v3841_v56  ;;  %v6571_v4 = vsub.f32 1.5, %v6570_v5  ;;  %v3820_v27 = vmul.f32 %v13219_v20, %v13146_v40  ;;  %v13255_v5 = vadd.f32 1e-05, %v3719_v55  ;;  %v14371_v55 = vld [vmem:[#allocation14_spill] sm:$0xff] }
 0xafe   : > { %v13246_v34 = vsub.f32 %v12938_v35, %v6403_v38  ;;  %v3793_v56 = vsub.f32 1.5, %v3792_v49  ;;  %v6679_v61 = vmul.f32 %v6546_v23, %v12904_v1  ;;  %v3804_v35 = vmul.f32 %v13120_v21, %v3803_v44  ;;  %v14363_v38 = vld [vmem:[#allocation41_spill] sm:$0xff]  ;;  %v14370_v1 = vld [vmem:[#allocation26_spill] sm:$0xff] }
 0xaff   : > { %v3843_v25 = vsub.f32 1.5, %v3842_v19  ;;  %v3832_v41 = vmul.f32 0.5, %v3831_v48  ;;  %v6572_v43 = vmul.f32 %v13123_v57, %v6571_v4  ;;  %vm3846_vm13 = vweird.f32 %v13138_v37 }
 0xb00   : > { %v3901_v8 = vmul.f32 %v3768_v45, %v14358_v17  ;;  %v6435_v49 = vmul.f32 %v13246_v34, %v13246_v34  ;;  %v3794_v28 = vmul.f32 %v13131_v42, %v3793_v56  ;;  %vm3796_vm15 = vweird.f32 %v13131_v42 }
 0xb01   : > { %v3821_v44 = vmul.f32 %v13219_v20, %v3820_v27  ;;  %vm6573_vm3 = vweird.f32 %v13089_v14  ;;  %v3844_v19 = vmul.f32 %v13138_v37, %v3843_v25  ;;  %7632 = vrsqrt.f32 %v13255_v5 }
 0xb02   : > { %vm13280_vm5 = vmor %vm6573_vm3, %vm6574_vm9  ;;  %v6479_v58 = vsel %vm1021_vm0, %v6435_v49, 0.0  ;;  %v6711_v48 = vadd.f32 %v6679_v61, %v14363_v38  ;;  %v3833_v23 = vsub.f32 1.5, %v3832_v41  ;;  %vm3795_vm1 = vweird.f32 %v13098_v18  ;;  %v13324_v61 = vpop.eup %7630 }
 0xb03   : > { %v3718_v4 = vmul.f32 %v12927_v2, %v8012_v24  ;;  %v6576_v47 = vsel %vm13280_vm5, %v13123_v57, %v6572_v43  ;;  %6480 = vadd.xlane.f32.xlu1 %v6479_v58  ;;  %v6439_v45 = vpop.xlane.xlu2 %6438  ;;  %v6388_v56 = vpop.xlane.xlu0 %6387  ;;  %v3818_v54 = vsel %vm13270_vm14, %v13113_v63, %v3814_v3  ;;  %vm13310_vm6 = vmor %vm3795_vm1, %vm3796_vm15  ;;  %v3920_v25 = vmul.f32 %v13288_v10, %v3901_v8 }
 0xb04   : > { %v6485_v18 = vmul.f32 %v6439_v45, %v8012_v24  ;;  %v6404_v2 = vmul.f32 %v6388_v56, %v8012_v24  ;;  %v3808_v57 = vsel %vm13295_vm4, %v13120_v21, %v3804_v35  ;;  %vm3845_vm7 = vweird.f32 %v13102_v31  ;;  %v13340_v31 = vld [vmem:[%s13781_s6] ss:$0 sm:$0xff] }
 0xb05   : > { %v3798_v63 = vsel %vm13310_vm6, %v13131_v42, %v3794_v28  ;;  %v3822_v3 = vmul.f32 0.5, %v3821_v44  ;;  %vm13328_vm8 = vmor %vm3845_vm7, %vm3846_vm13  ;;  %v6727_v21 = vmul.f32 0.5, %v6711_v48  ;;  %v6682_v42 = vmul.f32 %v6576_v47, %v12915_v39  ;;  %v14373_v48 = vld [vmem:[#allocation16_spill] sm:$0xff]  ;;  %v14374_v47 = vld [vmem:[#allocation43_spill] sm:$0xff] }
 0xb06   : > { %v13332_v43 = vadd.f32 1e-05, %v6485_v18  ;;  %v13335_v17 = vsub.f32 %v12951_v60, %v6404_v2  ;;  %v3848_v35 = vsel %vm13328_vm8, %v13138_v37, %v3844_v19  ;;  %v3834_v8 = vmul.f32 %v13175_v16, %v3833_v23  ;;  %v14372_v19 = vld [vmem:[#allocation17_spill] sm:$0xff]  ;;  %v14375_v56 = vld [vmem:[#allocation18_spill] sm:$0xff] }
 0xb07   : > { %vm3836_vm10 = vweird.f32 %v13175_v16  ;;  %v13348_v49 = vadd.f32 1e-05, %v3718_v4  ;;  %v13350_v60 = vpop.eup %7632  ;;  %v3904_v28 = vmul.f32 %v3798_v63, %v14370_v1  ;;  %v3939_v39 = vadd.f32 %v13340_v31, %v3920_v25 }
 0xb08   : > { %7634 = vrsqrt.f32 %v13332_v43  ;;  %v6436_v44 = vmul.f32 %v13335_v17, %v13335_v17  ;;  %v3902_v37 = vmul.f32 %v3778_v12, %v14371_v55  ;;  %v3906_v58 = vmul.f32 %v3818_v54, %v14372_v19 }
 0xb09   : > { %vm3835_vm11 = vweird.f32 %v13118_v29  ;;  %v3823_v38 = vsub.f32 1.5, %v3822_v3  ;;  %v3905_v14 = vmul.f32 %v3808_v57, %v14373_v48  ;;  %v6743_v4 = vsub.f32 %v3939_v39, %v6727_v21 }
 0xb0a   : > { %v6482_v23 = vsel %vm1021_vm0, %v6436_v44, 0.0  ;;  %v6714_v45 = vadd.f32 %v6682_v42, %v14374_v47  ;;  %v13369_v27 = vmul.f32 %v3848_v35, %v14375_v56  ;;  %vm13373_vm12 = vmor %vm3835_vm11, %vm3836_vm10  ;;  %v3870_v29 = vmul.f32 %v13324_v61, %v13237_v22 }
 0xb0b   : > { %v3860_v0 = vmul.f32 %v13350_v60, %v13255_v5  ;;  %7636 = vrsqrt.f32 %v13348_v49  ;;  %v6448_v32 = vpop.xlane.xlu2 %6447  ;;  %6483 = vadd.xlane.f32.xlu2 %v6482_v23  ;;  %v6442_v12 = vpop.xlane.xlu0 %6441  ;;  %v3838_v54 = vsel %vm13373_vm12, %v13175_v16, %v3834_v8  ;;  %v3923_v25 = vmul.f32 %v13288_v10, %v3904_v28  ;;  %v14378_v8 = vld [vmem:[#allocation22_spill] sm:$0xff] }
 0xb0c   : > { %v6488_v18 = vmul.f32 %v6448_v32, %v8012_v24  ;;  %v6486_v2 = vmul.f32 %v6442_v12, %v8012_v24  ;;  %v3824_v57 = vmul.f32 %v13219_v20, %v3823_v38  ;;  %vm3826_vm2 = vweird.f32 %v13219_v20 }
 0xb0d   : > { %v3918_v63 = vmul.f32 %v13288_v10, %v13195_v52  ;;  %v3919_v3 = vmul.f32 %v13288_v10, %v13192_v15  ;;  %v6759_v42 = vmul.f32 %v6743_v4, %v6743_v4  ;;  %v6730_v35 = vmul.f32 0.5, %v6714_v45 }
 0xb0e   : > { %v7635_v41 = vpop.eup %7634  ;;  %v13394_v21 = vadd.f32 1e-05, %v6488_v18  ;;  %v13396_v16 = vadd.f32 1e-05, %v6486_v2  ;;  %v3908_v1 = vmul.f32 %v3838_v54, %v14378_v8  ;;  %v3861_v28 = vmul.f32 %v13350_v60, %v3860_v0  ;;  %v14381_v2 = vld [vmem:[#allocation9_spill] sm:$0xff] }
 0xb0f   : > { %v6518_v44 = vmul.f32 %v7635_v41, %v13332_v43  ;;  %v3921_v39 = vmul.f32 %v13288_v10, %v3902_v37  ;;  %v13403_v52 = vmul.f32 %v13324_v61, %v3870_v29  ;;  %vm3825_vm9 = vweird.f32 %v13146_v40 }
 0xb10   : > { %7638 = vrsqrt.f32 %v13394_v21  ;;  %v3942_v15 = vadd.f32 %v13340_v31, %v3923_v25  ;;  %vm13412_vm13 = vmor %vm3825_vm9, %vm3826_vm2  ;;  %v13418_v37 = vadd.f32 %v13340_v31, %v3918_v63  ;;  %v3922_v40 = vmul.f32 %v13288_v10, %v13207_v13 }
 0xb11   : > { %v13408_v55 = vpop.eup %7636  ;;  %v6519_v38 = vmul.f32 %v7635_v41, %v6518_v44  ;;  %7640 = vrsqrt.f32 %v13396_v16  ;;  %v3828_v48 = vsel %vm13412_vm13, %v13219_v20, %v3824_v57  ;;  %v6779_v23 = vsel %vm1021_vm0, %v6759_v42, 0.0 }
 0xb12   : > { %v6746_v4 = vsub.f32 %v3942_v15, %v6730_v35  ;;  %v13427_v47 = vadd.f32 %v13340_v31, %v3919_v3  ;;  %v13429_v45 = vmul.f32 0.5, %v3861_v28  ;;  %v13432_v0 = vadd.f32 %v13340_v31, %v3921_v39 }
 0xb13   : > { %v6520_v56 = vmul.f32 0.5, %v6519_v38  ;;  %v6451_v29 = vpop.xlane.xlu0 %6450  ;;  %6780 = vadd.xlane.f32.xlu2 %v6779_v23  ;;  %v3924_v13 = vmul.f32 %v13288_v10, %v3905_v14  ;;  %v3850_v20 = vmul.f32 %v13408_v55, %v13348_v49  ;;  %v3925_v18 = vmul.f32 %v13288_v10, %v3906_v58 }
 0xb14   : > { %v6489_v54 = vmul.f32 %v6451_v29, %v8012_v24  ;;  %v3907_v25 = vmul.f32 %v3828_v48, %v14381_v2  ;;  %vm6524_vm14 = vweird.f32 %v7635_v41  ;;  %v6762_v35 = vmul.f32 %v6746_v4, %v6746_v4 }
 0xb15   : > { %v6521_v63 = vsub.f32 1.5, %v6520_v56  ;;  %v3927_v8 = vmul.f32 %v13288_v10, %v3908_v1  ;;  %vm6523_vm15 = vweird.f32 %v13332_v43  ;;  %v3851_v15 = vmul.f32 %v13408_v55, %v3850_v20 }
 0xb16   : > { %v6457_v50 = vpop.xlane.xlu2 %6456  ;;  %v13442_v3 = vpop.eup %7638  ;;  %v13446_v14 = vadd.f32 1e-05, %v6489_v54  ;;  %vm6525_vm3 = vmor %vm6523_vm15, %vm6524_vm14  ;;  %v13461_v1 = vadd.f32 %v13340_v31, %v3922_v40  ;;  %v3926_v43 = vmul.f32 %v13288_v10, %v3907_v25  ;;  %v6788_v4 = vsel %vm1021_vm0, %v6762_v35, 0.0  ;;  %v14382_v25 = vld [vmem:[#allocation36_spill] sm:$0xff] }
 0xb17   : > { %v6491_v12 = vmul.f32 %v6457_v50, %v8012_v24  ;;  %v13449_v28 = vpop.eup %7640  ;;  %v6522_v58 = vmul.f32 %v7635_v41, %v6521_v63  ;;  %v6548_v39 = vmul.f32 %v13442_v3, %v13394_v21  ;;  %v13471_v40 = vadd.f32 %v13340_v31, %v3924_v13 }
 0xb18   : > { %v6528_v19 = vmul.f32 %v13449_v28, %v13396_v16  ;;  %v13477_v20 = vadd.f32 %v13340_v31, %v3927_v8  ;;  %vm6554_vm5 = vweird.f32 %v13442_v3  ;;  %v13486_v63 = vadd.f32 %v13340_v31, %v3926_v43 }
 0xb19   : > { %v13444_v42 = vadd.f32 1e-05, %v6491_v12  ;;  %v6526_v38 = vsel %vm6525_vm3, %v7635_v41, %v6522_v58  ;;  %v6549_v48 = vmul.f32 %v13442_v3, %v6548_v39  ;;  %v13474_v41 = vadd.f32 %v13340_v31, %v3925_v18 }
 0xb1a   : > { %v6529_v23 = vmul.f32 %v13449_v28, %v6528_v19  ;;  %v6677_v56 = vmul.f32 %v6526_v38, %v12941_v53  ;;  %vm6553_vm4 = vweird.f32 %v13394_v21  ;;  %vm6534_vm1 = vweird.f32 %v13449_v28 }
 0xb1b   : > { %7642 = vrsqrt.f32 %v13444_v42  ;;  %v6550_v50 = vmul.f32 0.5, %v6549_v48  ;;  %6789 = vadd.xlane.f32.xlu2 %v6788_v4  ;;  %vm13507_vm6 = vmor %vm6553_vm4, %vm6554_vm5  ;;  %vm6533_vm7 = vweird.f32 %v13396_v16  ;;  %vm6583_vm10 = vweird.f32 %v13444_v42 }
 0xb1c   : > { %v6530_v12 = vmul.f32 0.5, %v6529_v23  ;;  %v6709_v53 = vadd.f32 %v6677_v56, %v14382_v25  ;;  %vm6535_vm8 = vmor %vm6533_vm7, %vm6534_vm1  ;;  %vm6563_vm12 = vweird.f32 %v13446_v14 }
 0xb1e   : > { %v6531_v35 = vsub.f32 1.5, %v6530_v12  ;;  %v6725_v38 = vmul.f32 0.5, %v6709_v53 }
 0xb20   : > { %v6532_v23 = vmul.f32 %v13449_v28, %v6531_v35 }
 0xb21   : > { %v13488_v18 = vpop.eup %7642 }
 0xb22   : > { %v6536_v16 = vsel %vm6535_vm8, %v13449_v28, %v6532_v23  ;;  %vm6584_vm2 = vweird.f32 %v13488_v18 }
 0xb23   : > { %v6678_v53 = vmul.f32 %v6536_v16, %v12954_v59  ;;  %vm13548_vm14 = vmor %vm6583_vm10, %vm6584_vm2 }
 0xb24   : > { %v6460_v29 = vpop.xlane.xlu0 %6459 }
 0xb25   : > { %v6492_v2 = vmul.f32 %v6460_v29, %v8012_v24 }
 0xb26   : > { %v6463_v32 = vpop.xlane.xlu1 %6462 }
 0xb27   : > { %v6493_v57 = vmul.f32 %v6463_v32, %v8012_v24  ;;  %v13479_v32 = vmul.f32 0.5, %v3851_v15  ;;  %v13492_v8 = vadd.f32 1e-05, %v6492_v2  ;;  %v6578_v15 = vmul.f32 %v13488_v18, %v13444_v42 }
 0xb29   : > { %v13451_v44 = vadd.f32 1e-05, %v6493_v57  ;;  %v6551_v57 = vsub.f32 1.5, %v6550_v50  ;;  %v6579_v56 = vmul.f32 %v13488_v18, %v6578_v15  ;;  %vm6593_vm15 = vweird.f32 %v13492_v8 }
 0xb2b   : > { %7644 = vrsqrt.f32 %v13451_v44  ;;  %v6552_v39 = vmul.f32 %v13442_v3, %v6551_v57  ;;  %vm6603_vm11 = vweird.f32 %v13451_v44  ;;  %v6580_v12 = vmul.f32 0.5, %v6579_v56 }
 0xb2c   : > { %7646 = vrsqrt.f32 %v13446_v14 }
 0xb2d   : > { %7648 = vrsqrt.f32 %v13492_v8  ;;  %v6556_v4 = vsel %vm13507_vm6, %v13442_v3, %v6552_v39  ;;  %v6741_v3 = vsub.f32 %v13418_v37, %v6725_v38  ;;  %v14385_v37 = vld [vmem:[#allocation49_spill] sm:$0xff]  ;;  %vm3855_vm6 = vweird.f32 %v13348_v49 }
 0xb2e   : > { %v6466_v54 = vpop.xlane.xlu2 %6465  ;;  %v6680_v57 = vmul.f32 %v6556_v4, %v12957_v30  ;;  %v6710_v38 = vadd.f32 %v6678_v53, %v14385_v37  ;;  %v14386_v30 = vld [vmem:[#allocation59_spill] sm:$0xff] }
 0xb2f   : > { %v6494_v13 = vmul.f32 %v6466_v54, %v8012_v24  ;;  %v6757_v39 = vmul.f32 %v6741_v3, %v6741_v3 }
 0xb30   : > { %v6712_v4 = vadd.f32 %v6680_v57, %v14386_v30  ;;  %v14390_v30 = vld [vmem:[#allocation35_spill] sm:$0xff] }
 0xb31   : > { %v13494_v58 = vpop.eup %7644  ;;  %v13499_v19 = vadd.f32 1e-05, %v6494_v13  ;;  %v6581_v13 = vsub.f32 1.5, %v6580_v12  ;;  %v6773_v12 = vsel %vm1021_vm0, %v6757_v39, 0.0 }
 0xb32   : > { %v13501_v48 = vpop.eup %7646  ;;  %v6598_v21 = vmul.f32 %v13494_v58, %v13451_v44  ;;  %vm6604_vm9 = vweird.f32 %v13494_v58  ;;  %6774 = vadd.xlane.f32.xlu0 %v6773_v12 }
 0xb33   : > { %v6558_v50 = vmul.f32 %v13501_v48, %v13446_v14  ;;  %7650 = vrsqrt.f32 %v13499_v19  ;;  %v13532_v15 = vpop.eup %7648  ;;  %vm6564_vm13 = vweird.f32 %v13501_v48  ;;  %v6582_v43 = vmul.f32 %v13488_v18, %v6581_v13  ;;  %vm6605_vm3 = vmor %vm6603_vm11, %vm6604_vm9 }
 0xb34   : > { %v6599_v29 = vmul.f32 %v13494_v58, %v6598_v21  ;;  %v6588_v59 = vmul.f32 %v13532_v15, %v13492_v8  ;;  %vm6594_vm5 = vweird.f32 %v13532_v15  ;;  %vm6565_vm4 = vmor %vm6563_vm12, %vm6564_vm13  ;;  %vm6613_vm7 = vweird.f32 %v13499_v19 }
 0xb35   : > { %v6559_v54 = vmul.f32 %v13501_v48, %v6558_v50  ;;  %v6586_v3 = vsel %vm13548_vm14, %v13488_v18, %v6582_v43  ;;  %vm6595_vm8 = vmor %vm6593_vm15, %vm6594_vm5  ;;  %vm3856_vm11 = vweird.f32 %v13408_v55  ;;  %vm3866_vm14 = vweird.f32 %v13350_v60 }
 0xb36   : > { %v6600_v2 = vmul.f32 0.5, %v6599_v29  ;;  %v6469_v25 = vpop.xlane.xlu0 %6468  ;;  %v6589_v44 = vmul.f32 %v13532_v15, %v6588_v59  ;;  %v6683_v39 = vmul.f32 %v6586_v3, %v12972_v9  ;;  %vm13629_vm2 = vmor %vm3855_vm6, %vm3856_vm11  ;;  %vm3875_vm11 = vweird.f32 %v13237_v22 }
 0xb37   : > { %v6560_v35 = vmul.f32 0.5, %v6559_v54  ;;  %v6495_v28 = vmul.f32 %v6469_v25, %v8012_v24  ;;  %v6726_v54 = vmul.f32 0.5, %v6710_v38  ;;  %v14389_v38 = vld [vmem:[#allocation42_spill] sm:$0xff] }
 0xb38   : > { %v6601_v21 = vsub.f32 1.5, %v6600_v2 }
 0xb39   : > { %v6561_v23 = vsub.f32 1.5, %v6560_v35  ;;  %v13541_v56 = vpop.eup %7650  ;;  %v13553_v16 = vadd.f32 1e-05, %v6495_v28  ;;  %v6742_v13 = vsub.f32 %v13427_v47, %v6726_v54  ;;  %v6590_v35 = vmul.f32 0.5, %v6589_v44 }
 0xb3a   : > { %v6602_v50 = vmul.f32 %v13494_v58, %v6601_v21  ;;  %v6608_v2 = vmul.f32 %v13541_v56, %v13499_v19  ;;  %vm6614_vm1 = vweird.f32 %v13541_v56  ;;  %v6728_v28 = vmul.f32 0.5, %v6712_v4 }
 0xb3b   : > { %v6562_v42 = vmul.f32 %v13501_v48, %v6561_v23  ;;  %7652 = vrsqrt.f32 %v13553_v16  ;;  %v6758_v23 = vmul.f32 %v6742_v13, %v6742_v13  ;;  %v3853_v44 = vsub.f32 1.5, %v13479_v32  ;;  %vm6615_vm10 = vmor %vm6613_vm7, %vm6614_vm1 }
 0xb3c   : > { %v6606_v25 = vsel %vm6605_vm3, %v13494_v58, %v6602_v50  ;;  %v6609_v53 = vmul.f32 %v13541_v56, %v6608_v2  ;;  %v6744_v59 = vsub.f32 %v13432_v0, %v6728_v28  ;;  %v14391_v50 = vld [vmem:[#allocation34_spill] sm:$0xff]  ;;  %vm6623_vm9 = vweird.f32 %v13553_v16 }
 0xb3d   : > { %v6566_v18 = vsel %vm6565_vm4, %v13501_v48, %v6562_v42  ;;  %v6685_v57 = vmul.f32 %v6606_v25, %v12983_v46  ;;  %v6591_v48 = vsub.f32 1.5, %v6590_v35  ;;  %v6715_v47 = vadd.f32 %v6683_v39, %v14391_v50 }
 0xb3e   : > { %v6472_v58 = vpop.xlane.xlu1 %6471  ;;  %v6681_v14 = vmul.f32 %v6566_v18, %v12969_v6  ;;  %v6610_v37 = vmul.f32 0.5, %v6609_v53  ;;  %v6776_v6 = vsel %vm1021_vm0, %v6758_v23, 0.0  ;;  %v6760_v3 = vmul.f32 %v6744_v59, %v6744_v59 }
 0xb3f   : > { %v6496_v21 = vmul.f32 %v6472_v58, %v8012_v24  ;;  %v6717_v43 = vadd.f32 %v6685_v57, %v14389_v38  ;;  %v6592_v54 = vmul.f32 %v13532_v15, %v6591_v48  ;;  %6777 = vadd.xlane.f32.xlu1 %v6776_v6  ;;  %v6731_v0 = vmul.f32 0.5, %v6715_v47 }
 0xb40   : > { %v6713_v46 = vadd.f32 %v6681_v14, %v14390_v30  ;;  %v6611_v4 = vsub.f32 1.5, %v6610_v37  ;;  %v6782_v57 = vsel %vm1021_vm0, %v6760_v3, 0.0  ;;  %v3863_v47 = vsub.f32 1.5, %v13429_v45 }
 0xb41   : > { %v13584_v29 = vadd.f32 1e-05, %v6496_v21  ;;  %v6733_v12 = vmul.f32 0.5, %v6717_v43  ;;  %v13587_v9 = vpop.eup %7652  ;;  %v6596_v18 = vsel %vm6595_vm8, %v13532_v15, %v6592_v54  ;;  %6783 = vadd.xlane.f32.xlu0 %v6782_v57  ;;  %v6747_v58 = vsub.f32 %v13471_v40, %v6731_v0  ;;  %v14393_v40 = vld [vmem:[#allocation47_spill] sm:$0xff] }
 0xb42   : > { %v6729_v42 = vmul.f32 0.5, %v6713_v46  ;;  %v6612_v2 = vmul.f32 %v13541_v56, %v6611_v4  ;;  %v6618_v25 = vmul.f32 %v13587_v9, %v13553_v16  ;;  %v6684_v28 = vmul.f32 %v6596_v18, %v12986_v33 }
 0xb43   : > { %7654 = vrsqrt.f32 %v13584_v29  ;;  %v6749_v53 = vsub.f32 %v13486_v63, %v6733_v12  ;;  %v3854_v21 = vmul.f32 %v13408_v55, %v3853_v44  ;;  %vm6624_vm12 = vweird.f32 %v13587_v9 }
 0xb44   : > { %v6616_v19 = vsel %vm6615_vm10, %v13541_v56, %v6612_v2  ;;  %v6619_v13 = vmul.f32 %v13587_v9, %v6618_v25  ;;  %v6745_v8 = vsub.f32 %v13461_v1, %v6729_v42  ;;  %v6763_v56 = vmul.f32 %v6747_v58, %v6747_v58  ;;  %v14392_v1 = vld [vmem:[#allocation40_spill] sm:$0xff]  ;;  %vm6625_vm13 = vmor %vm6623_vm9, %vm6624_vm12 }
 0xb45   : > { %v6765_v35 = vmul.f32 %v6749_v53, %v6749_v53  ;;  %v6686_v15 = vmul.f32 %v6616_v19, %v12997_v7  ;;  %v6716_v38 = vadd.f32 %v6684_v28, %v14392_v1  ;;  %v3858_v49 = vsel %vm13629_vm2, %v13408_v55, %v3854_v21  ;;  %v14396_v53 = vld [vmem:[#allocation2_spill] sm:$0xff]  ;;  %v14397_v19 = vld [vmem:[#allocation3_spill] sm:$0xff] }
 0xb46   : > { %v6475_v32 = vpop.xlane.xlu2 %6474  ;;  %v6620_v14 = vmul.f32 0.5, %v6619_v13  ;;  %v6761_v39 = vmul.f32 %v6745_v8, %v6745_v8  ;;  %v6791_v30 = vsel %vm1021_vm0, %v6763_v56, 0.0  ;;  %v3928_v42 = vmul.f32 %v13288_v10, %v13369_v27  ;;  %v14398_v1 = vld [vmem:[#allocation6_spill] sm:$0xff] }
 0xb47   : > { %v6497_v63 = vmul.f32 %v6475_v32, %v8012_v24  ;;  %v6797_v37 = vsel %vm1021_vm0, %v6765_v35, 0.0  ;;  %v6718_v43 = vadd.f32 %v6686_v15, %v14393_v40  ;;  %v6732_v46 = vmul.f32 0.5, %v6716_v38 }
 0xb48   : > { %v6621_v59 = vsub.f32 1.5, %v6620_v14  ;;  %6798 = vadd.xlane.f32.xlu2 %v6797_v37  ;;  %v6785_v33 = vsel %vm1021_vm0, %v6761_v39, 0.0  ;;  %v3910_v13 = vmul.f32 %v3858_v49, %v14397_v19  ;;  %vm6633_vm3 = vweird.f32 %v13584_v29 }
 0xb49   : > { %v7655_v23 = vpop.eup %7654  ;;  %v13618_v48 = vadd.f32 1e-05, %v6497_v63  ;;  %6786 = vadd.xlane.f32.xlu1 %v6785_v33  ;;  %v6734_v50 = vmul.f32 0.5, %v6718_v43  ;;  %v6748_v54 = vsub.f32 %v13474_v41, %v6732_v46  ;;  %6792 = vadd.xlane.f32.xlu0 %v6791_v30  ;;  %v3872_v41 = vmul.f32 0.5, %v13403_v52 }
 0xb4a   : > { %v6628_v7 = vmul.f32 %v7655_v23, %v13584_v29  ;;  %v6622_v12 = vmul.f32 %v13587_v9, %v6621_v59  ;;  %vm6634_vm15 = vweird.f32 %v7655_v23  ;;  %v3947_v52 = vadd.f32 %v13340_v31, %v3928_v42 }
 0xb4b   : > { %7656 = vrsqrt.f32 %v13618_v48  ;;  %v6750_v45 = vsub.f32 %v13477_v20, %v6734_v50  ;;  %v6764_v25 = vmul.f32 %v6748_v54, %v6748_v54  ;;  %v3864_v20 = vmul.f32 %v13350_v60, %v3863_v47  ;;  %vm6635_vm5 = vmor %vm6633_vm3, %vm6634_vm15 }
 0xb4c   : > { %v6629_v6 = vmul.f32 %v7655_v23, %v6628_v7  ;;  %v6626_v3 = vsel %vm6625_vm13, %v13587_v9, %v6622_v12  ;;  %vm3865_vm4 = vweird.f32 %v13255_v5  ;;  %v3929_v29 = vmul.f32 %v13288_v10, %v3910_v13 }
 0xb4d   : > { %v6766_v16 = vmul.f32 %v6750_v45, %v6750_v45  ;;  %v6687_v44 = vmul.f32 %v6626_v3, %v13005_v36  ;;  %v6794_v9 = vsel %vm1021_vm0, %v6764_v25, 0.0  ;;  %vm3867_vm1 = vmor %vm3865_vm4, %vm3866_vm14  ;;  %v3873_v39 = vsub.f32 1.5, %v3872_v41 }
 0xb4e   : > { %v6630_v0 = vmul.f32 0.5, %v6629_v6  ;;  %v6478_v2 = vpop.xlane.xlu0 %6477  ;;  %v3868_v56 = vsel %vm3867_vm1, %v13350_v60, %v3864_v20  ;;  %vm3876_vm7 = vweird.f32 %v13324_v61  ;;  %v3948_v33 = vadd.f32 %v13340_v31, %v3929_v29 }
 0xb4f   : > { %v6498_v55 = vmul.f32 %v6478_v2, %v8012_v24  ;;  %v6719_v27 = vadd.f32 %v6687_v44, %v14396_v53  ;;  %v6800_v32 = vsel %vm1021_vm0, %v6766_v16, 0.0  ;;  %v3874_v7 = vmul.f32 %v13324_v61, %v3873_v39  ;;  %vm3877_vm12 = vmor %vm3875_vm11, %vm3876_vm7 }
 0xb50   : > { %v6631_v18 = vsub.f32 1.5, %v6630_v0  ;;  %vm6643_vm8 = vweird.f32 %v13618_v48  ;;  %v14401_v0 = vld [vmem:[#allocation24_spill] sm:$0xff] }
 0xb51   : > { %v7657_v57 = vpop.eup %7656  ;;  %v6514_v36 = vadd.f32 1e-05, %v6498_v55  ;;  %6795 = vadd.xlane.f32.xlu1 %v6794_v9  ;;  %v6735_v35 = vmul.f32 0.5, %v6719_v27  ;;  %6801 = vadd.xlane.f32.xlu0 %v6800_v32  ;;  %v3878_v54 = vsel %vm3877_vm12, %v13324_v61, %v3874_v7 }
 0xb52   : > { %v6632_v8 = vmul.f32 %v7655_v23, %v6631_v18  ;;  %v6638_v58 = vmul.f32 %v7657_v57, %v13618_v48  ;;  %vm6644_vm6 = vweird.f32 %v7657_v57  ;;  %v14400_v48 = vld [vmem:[#allocation8_spill] sm:$0xff]  ;;  %v3912_v22 = vmul.f32 %v3878_v54, %v14401_v0 }
 0xb53   : > { %7658 = vrsqrt.f32 %v6514_v36  ;;  %v6751_v63 = vsub.f32 %v3947_v52, %v6735_v35  ;;  %vm6645_vm10 = vmor %vm6643_vm8, %vm6644_vm6  ;;  %vm6653_vm9 = vweird.f32 %v6514_v36  ;;  %v14402_v18 = vld [vmem:[#allocation12_spill] sm:$0xff] }
 0xb54   : > { %v6636_v28 = vsel %vm6635_vm5, %v7655_v23, %v6632_v8  ;;  %v6639_v15 = vmul.f32 %v7657_v57, %v6638_v58  ;;  %v14399_v23 = vld [vmem:[#allocation20_spill] sm:$0xff]  ;;  %v3931_v61 = vmul.f32 %v13288_v10, %v3912_v22  ;;  %v14406_v22 = vld [vmem:[#allocation15_spill] sm:$0xff] }
 0xb55   : > { %v6688_v14 = vmul.f32 %v6636_v28, %v13012_v11  ;;  %v6767_v37 = vmul.f32 %v6751_v63, %v6751_v63  ;;  %v3911_v59 = vmul.f32 %v3868_v56, %v14399_v23 }
 0xb56   : > { %v6640_v21 = vmul.f32 0.5, %v6639_v15  ;;  %v3950_v53 = vadd.f32 %v13340_v31, %v3931_v61 }
 0xb57   : > { %v6720_v38 = vadd.f32 %v6688_v14, %v14398_v1  ;;  %v6803_v5 = vsel %vm1021_vm0, %v6767_v37, 0.0  ;;  %v3930_v12 = vmul.f32 %v13288_v10, %v3911_v59 }
 0xb58   : > { %v6641_v40 = vsub.f32 1.5, %v6640_v21 }
 0xb59   : > { %v7659_v43 = vpop.eup %7658  ;;  %v6736_v11 = vmul.f32 0.5, %v6720_v38  ;;  %6804 = vadd.xlane.f32.xlu1 %v6803_v5  ;;  %v3949_v2 = vadd.f32 %v13340_v31, %v3930_v12 }
 0xb5a   : > { %v6642_v30 = vmul.f32 %v7657_v57, %v6641_v40  ;;  %v6648_v60 = vmul.f32 %v7659_v43, %v6514_v36  ;;  %vm6654_vm2 = vweird.f32 %v7659_v43  ;;  %v3721_v36 = vmul.f32 %v12931_v51, %v8012_v24 }
 0xb5b   : > { %v6752_v46 = vsub.f32 %v3948_v33, %v6736_v11  ;;  %vm6655_vm13 = vmor %vm6653_vm9, %vm6654_vm2 }
 0xb5c   : > { %v6646_v50 = vsel %vm6645_vm10, %v7657_v57, %v6642_v30  ;;  %v6649_v47 = vmul.f32 %v7659_v43, %v6648_v60  ;;  %v3737_v52 = vadd.f32 1e-05, %v3721_v36 }
 0xb5d   : > { %v6768_v4 = vmul.f32 %v6752_v46, %v6752_v46  ;;  %v6689_v6 = vmul.f32 %v6646_v50, %v13019_v62  ;;  %v14404_v46 = vld [vmem:[#allocation13_spill] sm:$0xff] }
 0xb5e   : > { %v6650_v45 = vmul.f32 0.5, %v6649_v47  ;;  %7660 = vrsqrt.f32 %v3737_v52  ;;  %vm3885_vm15 = vweird.f32 %v3737_v52 }
 0xb5f   : > { %v6806_v49 = vsel %vm1021_vm0, %v6768_v4, 0.0  ;;  %v6721_v3 = vadd.f32 %v6689_v6, %v14400_v48 }
 0xb60   : > { %v6651_v42 = vsub.f32 1.5, %v6650_v45  ;;  %6807 = vadd.xlane.f32.xlu2 %v6806_v49 }
 0xb61   : > { %v6737_v25 = vmul.f32 0.5, %v6721_v3  ;;  %v14405_v3 = vld [vmem:[#allocation30_spill] sm:$0xff] }
 0xb62   : > { %v6652_v16 = vmul.f32 %v7659_v43, %v6651_v42 }
 0xb63   : > { %v6753_v44 = vsub.f32 %v3949_v2, %v6737_v25 }
 0xb64   : > { %v6656_v62 = vsel %vm6655_vm13, %v7659_v43, %v6652_v16  ;;  %v7661_v32 = vpop.eup %7660 }
 0xb65   : > { %v6769_v41 = vmul.f32 %v6753_v44, %v6753_v44  ;;  %v6690_v20 = vmul.f32 %v6656_v62, %v13026_v26  ;;  %v14403_v26 = vld [vmem:[#allocation19_spill] sm:$0xff]  ;;  %v3880_v35 = vmul.f32 %v7661_v32, %v3737_v52  ;;  %vm3886_vm14 = vweird.f32 %v7661_v32  ;;  %v7706_v52 = vld [vmem:[%s7826_s14] sm:$0xff] }
 0xb66   : > { %v3722_v8 = vmul.f32 %v14403_v26, %v8012_v24  ;;  %vm3887_vm3 = vmor %vm3885_vm15, %vm3886_vm14 }
 0xb67   : > { %v6809_v55 = vsel %vm1021_vm0, %v6769_v41, 0.0  ;;  %v6722_v9 = vadd.f32 %v6690_v20, %v14402_v18  ;;  %v3881_v28 = vmul.f32 %v7661_v32, %v3880_v35  ;;  %v14407_v18 = vld [vmem:[#allocation5_spill] sm:$0xff] }
 0xb68   : > { %6810 = vadd.xlane.f32.xlu0 %v6809_v55  ;;  %v3738_v58 = vadd.f32 1e-05, %v3722_v8 }
 0xb69   : > { %v6738_v27 = vmul.f32 0.5, %v6722_v9  ;;  %v3882_v39 = vmul.f32 0.5, %v3881_v28 }
 0xb6a   : > { %7662 = vrsqrt.f32 %v3738_v58  ;;  %vm3895_vm7 = vweird.f32 %v3738_v58 }
 0xb6b   : > { %v6754_v57 = vsub.f32 %v3950_v53, %v6738_v27  ;;  %v3883_v21 = vsub.f32 1.5, %v3882_v39 }
 0xb6d   : > { %v6770_v19 = vmul.f32 %v6754_v57, %v6754_v57  ;;  %v3884_v5 = vmul.f32 %v7661_v32, %v3883_v21 }
 0xb6f   : > { %v6812_v13 = vsel %vm1021_vm0, %v6770_v19, 0.0  ;;  %v3888_v33 = vsel %vm3887_vm3, %v7661_v32, %v3884_v5 }
 0xb70   : > { %6813 = vadd.xlane.f32.xlu1 %v6812_v13  ;;  %v7663_v63 = vpop.eup %7662  ;;  %v3913_v50 = vmul.f32 %v3888_v33, %v14404_v46 }
 0xb71   : > { %v3890_v56 = vmul.f32 %v7663_v63, %v3738_v58  ;;  %vm3896_vm4 = vweird.f32 %v7663_v63 }
 0xb72   : > { %vm3897_vm8 = vmor %vm3895_vm7, %vm3896_vm4  ;;  %v3932_v54 = vmul.f32 %v13288_v10, %v3913_v50  ;;  %v7713_v50 = vld [vmem:[%s7826_s14 + $0x40] sm:$0xff] }
 0xb73   : > { %v3891_v51 = vmul.f32 %v7663_v63, %v3890_v56  ;;  %v7709_v56 = vld [vmem:[%s7826_s14 + $0x10] sm:$0xff] }
 0xb74   : > { %v3951_v25 = vadd.f32 %v13340_v31, %v3932_v54 }
 0xb75   : > { %v3892_v43 = vmul.f32 0.5, %v3891_v51 }
 0xb76   : > { %v6481_v15 = vpop.xlane.xlu1 %6480 }
 0xb77   : > { %v6499_v29 = vmul.f32 %v6481_v15, %v8012_v24  ;;  %v3893_v11 = vsub.f32 1.5, %v3892_v43  ;;  %v7711_v43 = vld [vmem:[%s7826_s14 + $0x38] sm:$0xff] }
 0xb79   : > { %v6515_v14 = vadd.f32 1e-05, %v6499_v29 }
 0xb7b   : > { %7664 = vrsqrt.f32 %v6515_v14  ;;  %vm6663_vm1 = vweird.f32 %v6515_v14 }
 0xb7e   : > { %v6484_v37 = vpop.xlane.xlu2 %6483 }
 0xb7f   : > { %v6500_v1 = vmul.f32 %v6484_v37, %v8012_v24  ;;  %v3894_v24 = vmul.f32 %v7663_v63, %v3893_v11 }
 0xb81   : > { %v7665_v38 = vpop.eup %7664  ;;  %v6516_v40 = vadd.f32 1e-05, %v6500_v1  ;;  %v3898_v49 = vsel %vm3897_vm8, %v7663_v63, %v3894_v24  ;;  %v7707_v63 = vld [vmem:[%s7826_s14 + $0x8] sm:$0xff] }
 0xb82   : > { %v6658_v23 = vmul.f32 %v7665_v38, %v6515_v14  ;;  %vm6664_vm5 = vweird.f32 %v7665_v38  ;;  %v3914_v2 = vmul.f32 %v3898_v49, %v14406_v22  ;;  %v7708_v14 = vld [vmem:[%s7826_s14 + $0x20] sm:$0xff]  ;;  %v7717_v22 = vld [vmem:[%s7826_s14 + $0x48] sm:$0xff] }
 0xb83   : > { %7666 = vrsqrt.f32 %v6516_v40  ;;  %vm6665_vm6 = vmor %vm6663_vm1, %vm6664_vm5  ;;  %vm6673_vm11 = vweird.f32 %v6516_v40 }
 0xb84   : > { %v6659_v59 = vmul.f32 %v7665_v38, %v6658_v23 }
 0xb86   : > { %v6660_v7 = vmul.f32 0.5, %v6659_v59 }
 0xb88   : > { %v6661_v30 = vsub.f32 1.5, %v6660_v7  ;;  %v7712_v7 = vld [vmem:[%s7826_s14 + $0x18] sm:$0xff] }
 0xb89   : > { %v7667_v60 = vpop.eup %7666 }
 0xb8a   : > { %v6662_v47 = vmul.f32 %v7665_v38, %v6661_v30  ;;  %v6668_v4 = vmul.f32 %v7667_v60, %v6516_v40  ;;  %vm6674_vm10 = vweird.f32 %v7667_v60 }
 0xb8b   : > { %vm6675_vm12 = vmor %vm6673_vm11, %vm6674_vm10 }
 0xb8c   : > { %v6666_v12 = vsel %vm6665_vm6, %v7665_v38, %v6662_v47  ;;  %v6669_v6 = vmul.f32 %v7667_v60, %v6668_v4  ;;  %v7710_v38 = vld [vmem:[%s7826_s14 + $0x28] sm:$0xff]  ;;  %v7714_v4 = vld [vmem:[%s7826_s14 + $0x50] sm:$0xff] }
 0xb8d   : > { %v6691_v45 = vmul.f32 %v6666_v12, %v13246_v34  ;;  %v3933_v34 = vmul.f32 %v13288_v10, %v3914_v2 }
 0xb8e   : > { %v6670_v48 = vmul.f32 0.5, %v6669_v6 }
 0xb8f   : > { %v6723_v42 = vadd.f32 %v6691_v45, %v14405_v3  ;;  %v3952_v53 = vadd.f32 %v13340_v31, %v3933_v34  ;;  %v7715_v45 = vld [vmem:[%s7826_s14 + $0x30] sm:$0xff]  ;;  %v7716_v3 = vld [vmem:[%s7826_s14 + $0x58] sm:$0xff]  ;;  %v7719_v34 = vld [vmem:[%s7826_s14 + $0x68] sm:$0xff] }
 0xb90   : > { %v6671_v0 = vsub.f32 1.5, %v6670_v48 }
 0xb91   : > { %v6739_v16 = vmul.f32 0.5, %v6723_v42 }
 0xb92   : > { %v6672_v44 = vmul.f32 %v7667_v60, %v6671_v0 }
 0xb93   : > { %v6755_v62 = vsub.f32 %v3951_v25, %v6739_v16 }
 0xb94   : > { %v6676_v41 = vsel %vm6675_vm12, %v7667_v60, %v6672_v44 }
 0xb95   : > { %v6771_v61 = vmul.f32 %v6755_v62, %v6755_v62  ;;  %v6692_v20 = vmul.f32 %v6676_v41, %v13335_v17  ;;  %v6781_v17 = vpop.xlane.xlu2 %6780  ;;  %v7718_v62 = vld [vmem:[%s7826_s14 + $0x60] sm:$0xff] }
 0xb96   : > { %v6823_v15 = vmul.f32 0.17677669, %v6781_v17 }
 0xb97   : > { %v6815_v55 = vsel %vm1021_vm0, %v6771_v61, 0.0  ;;  %v6724_v9 = vadd.f32 %v6692_v20, %v14407_v18 }
 0xb98   : > { %6816 = vadd.xlane.f32.xlu2 %v6815_v55  ;;  %v6839_v21 = vmul.f32 %v7709_v56, %v6823_v15 }
 0xb99   : > { %v6740_v27 = vmul.f32 0.5, %v6724_v9  ;;  %v7720_v9 = vld [vmem:[%s7826_s14 + $0x70] sm:$0xff] }
 0xb9b   : > { %v6756_v57 = vsub.f32 %v3952_v53, %v6740_v27 }
 0xb9d   : > { %v6772_v36 = vmul.f32 %v6756_v57, %v6756_v57  ;;  %v6790_v35 = vpop.xlane.xlu2 %6789 }
 0xb9e   : > { %v6826_v51 = vmul.f32 0.17677669, %v6790_v35 }
 0xb9f   : > { %v6818_v10 = vsel %vm1021_vm0, %v6772_v36, 0.0  ;;  %vm6917_vm0 = vcmask 7168   ;;  %v7721_v36 = vld [vmem:[%s7826_s14 + $0x78] sm:$0xff] }
 0xba0   : > { %6819 = vadd.xlane.f32.xlu0 %v6818_v10  ;;  %v6842_v40 = vmul.f32 %v7710_v38, %v6826_v51 }
 0xba5   : > { %v6775_v19 = vpop.xlane.xlu0 %6774 }
 0xba6   : > { %v6821_v13 = vmul.f32 0.17677669, %v6775_v19 }
 0xba8   : > { %v6837_v26 = vmul.f32 %v7706_v52, %v6821_v13 }
 0xbaa   : > { %6869 = vrot.lane.b32.xlu1 %v6837_v26, %s7736_s24 }
 0xbb2   : > { %v6778_v8 = vpop.xlane.xlu1 %6777 }
 0xbb3   : > { %v6822_v58 = vmul.f32 0.17677669, %v6778_v8 }
 0xbb4   : > { %v6784_v28 = vpop.xlane.xlu0 %6783  ;;  %6873 = vrot.lane.b32.xlu0 %v6839_v21, %s7736_s24 }
 0xbb5   : > { %v6838_v29 = vmul.f32 %v7707_v63, %v6822_v58  ;;  %v6824_v5 = vmul.f32 0.17677669, %v6784_v28 }
 0xbb7   : > { %6871 = vrot.lane.b32.xlu2 %v6838_v29, %s7736_s24  ;;  %v6840_v30 = vmul.f32 %v7712_v7, %v6824_v5 }
 0xbbb   : > { %v6799_v59 = vpop.xlane.xlu2 %6798 }
 0xbbc   : > { %v6787_v31 = vpop.xlane.xlu1 %6786  ;;  %v6793_v33 = vpop.xlane.xlu0 %6792  ;;  %v6829_v11 = vmul.f32 0.17677669, %v6799_v59  ;;  %6875 = vrot.lane.b32.xlu0 %v6840_v30, %s7736_s24 }
 0xbbd   : > { %v6825_v32 = vmul.f32 0.17677669, %v6787_v31  ;;  %v6827_v47 = vmul.f32 0.17677669, %v6793_v33 }
 0xbbe   : > { %v6845_v24 = vmul.f32 %v7713_v50, %v6829_v11 }
 0xbbf   : > { %v6841_v39 = vmul.f32 %v7708_v14, %v6825_v32  ;;  %6879 = vrot.lane.b32.xlu2 %v6842_v40, %s7736_s24  ;;  %v6843_v49 = vmul.f32 %v7715_v45, %v6827_v47 }
 0xbc1   : > { %6877 = vrot.lane.b32.xlu1 %v6841_v39, %s7736_s24 }
 0xbc4   : > { %v6796_v37 = vpop.xlane.xlu1 %6795  ;;  %v6802_v54 = vpop.xlane.xlu0 %6801  ;;  %6881 = vrot.lane.b32.xlu0 %v6843_v49, %s7736_s24 }
 0xbc5   : > { %v6828_v1 = vmul.f32 0.17677669, %v6796_v37  ;;  %v6830_v0 = vmul.f32 0.17677669, %v6802_v54 }
 0xbc7   : > { %v6844_v23 = vmul.f32 %v7711_v43, %v6828_v1  ;;  %6885 = vrot.lane.b32.xlu2 %v6845_v24, %s7736_s24  ;;  %v6846_v2 = vmul.f32 %v7717_v22, %v6830_v0 }
 0xbc9   : > { %6883 = vrot.lane.b32.xlu1 %v6844_v23, %s7736_s24 }
 0xbcc   : > { %v6805_v60 = vpop.xlane.xlu1 %6804  ;;  %6887 = vrot.lane.b32.xlu0 %v6846_v2, %s7736_s24 }
 0xbcd   : > { %v6831_v46 = vmul.f32 0.17677669, %v6805_v60 }
 0xbcf   : > { %v6847_v12 = vmul.f32 %v7714_v4, %v6831_v46 }
 0xbd1   : > { %6889 = vrot.lane.b32.xlu1 %v6847_v12, %s7736_s24 }
 0xbd3   : > { %v6808_v6 = vpop.xlane.xlu2 %6807 }
 0xbd4   : > { %v6832_v48 = vmul.f32 0.17677669, %v6808_v6 }
 0xbd6   : > { %v6848_v42 = vmul.f32 %v7716_v3, %v6832_v48 }
 0xbd8   : > { %6891 = vrot.lane.b32.xlu2 %v6848_v42, %s7736_s24 }
 0xbdb   : > { %v6811_v25 = vpop.xlane.xlu0 %6810 }
 0xbdc   : > { %v6833_v16 = vmul.f32 0.17677669, %v6811_v25 }
 0xbde   : > { %v6849_v41 = vmul.f32 %v7718_v62, %v6833_v16 }
 0xbe0   : > { %6893 = vrot.lane.b32.xlu0 %v6849_v41, %s7736_s24 }
 0xbe3   : > { %v6814_v44 = vpop.xlane.xlu1 %6813 }
 0xbe4   : > { %v6834_v61 = vmul.f32 0.17677669, %v6814_v44 }
 0xbe6   : > { %v6850_v20 = vmul.f32 %v7719_v34, %v6834_v61 }
 0xbe8   : > { %6895 = vrot.lane.b32.xlu1 %v6850_v20, %s7736_s24 }
 0xc0b   : > { %v6817_v55 = vpop.xlane.xlu2 %6816 }
 0xc0c   : > { %v6835_v18 = vmul.f32 0.17677669, %v6817_v55 }
 0xc0e   : > { %v6851_v53 = vmul.f32 %v7720_v9, %v6835_v18 }
 0xc10   : > { %6897 = vrot.lane.b32.xlu2 %v6851_v53, %s7736_s24 }
 0xc13   : > { %v6820_v57 = vpop.xlane.xlu0 %6819  ;;  %v6872_v13 = vpop.permute.xlu2 %6871 }
 0xc14   : > { %v6836_v19 = vmul.f32 0.17677669, %v6820_v57  ;;  %6919 = vst.msk [vmem:[%s13736_s30 + $0x8] sm:$0xff] %vm6917_vm0, %v6872_v13 }
 0xc16   : > { %v6852_v52 = vmul.f32 %v7721_v36, %v6836_v19 }
 0xc18   : > { %6899 = vrot.lane.b32.xlu0 %v6852_v52, %s7736_s24 }
 0xc1b   : > { %v6880_v26 = vpop.permute.xlu2 %6879 }
 0xc1c   : > { %v6870_v27 = vpop.permute.xlu1 %6869  ;;  %6923 = vst.msk [vmem:[%s13736_s30 + $0x28] sm:$0xff] %vm6917_vm0, %v6880_v26 }
 0xc1d   : > { %6918 = vst.msk [vmem:[%s13736_s30] sm:$0xff] %vm6917_vm0, %v6870_v27 }
 0xc23   : > { %v6886_v17 = vpop.permute.xlu2 %6885 }
 0xc24   : > { %6926 = vst.msk [vmem:[%s13736_s30 + $0x40] sm:$0xff] %vm6917_vm0, %v6886_v17 }
 0xc26   : > { %v6874_v8 = vpop.permute.xlu0 %6873 }
 0xc27   : > { %6920 = vst.msk [vmem:[%s13736_s30 + $0x10] sm:$0xff] %vm6917_vm0, %v6874_v8 }
 0xc2e   : > { %v6876_v32 = vpop.permute.xlu0 %6875 }
 0xc2f   : > { %6921 = vst.msk [vmem:[%s13736_s30 + $0x18] sm:$0xff] %vm6917_vm0, %v6876_v32 }
 0xc32   : > { %v6892_v31 = vpop.permute.xlu2 %6891 }
 0xc33   : > { %v6878_v10 = vpop.permute.xlu1 %6877  ;;  %6929 = vst.msk [vmem:[%s13736_s30 + $0x58] sm:$0xff] %vm6917_vm0, %v6892_v31 }
 0xc34   : > { %6922 = vst.msk [vmem:[%s13736_s30 + $0x20] sm:$0xff] %vm6917_vm0, %v6878_v10 }
 0xc36   : > { %v6882_v28 = vpop.permute.xlu0 %6881 }
 0xc37   : > { %6924 = vst.msk [vmem:[%s13736_s30 + $0x30] sm:$0xff] %vm6917_vm0, %v6882_v28 }
 0xc3b   : > { %v6884_v58 = vpop.permute.xlu1 %6883 }
 0xc3c   : > { %6925 = vst.msk [vmem:[%s13736_s30 + $0x38] sm:$0xff] %vm6917_vm0, %v6884_v58 }
 0xc3e   : > { %v6888_v15 = vpop.permute.xlu0 %6887 }
 0xc3f   : > { %6927 = vst.msk [vmem:[%s13736_s30 + $0x48] sm:$0xff] %vm6917_vm0, %v6888_v15 }
 0xc43   : > { %v6890_v35 = vpop.permute.xlu1 %6889 }
 0xc44   : > { %6928 = vst.msk [vmem:[%s13736_s30 + $0x50] sm:$0xff] %vm6917_vm0, %v6890_v35 }
 0xc52   : > { %v6894_v63 = vpop.permute.xlu0 %6893 }
 0xc53   : > { %6930 = vst.msk [vmem:[%s13736_s30 + $0x60] sm:$0xff] %vm6917_vm0, %v6894_v63 }
 0xc5a   : > { %v6896_v29 = vpop.permute.xlu1 %6895 }
 0xc5b   : > { %6931 = vst.msk [vmem:[%s13736_s30 + $0x68] sm:$0xff] %vm6917_vm0, %v6896_v29 }
 0xc6a   : > { %v6898_v14 = vpop.permute.xlu2 %6897 }
 0xc6b   : > { %6932 = vst.msk [vmem:[%s13736_s30 + $0x70] sm:$0xff] %vm6917_vm0, %v6898_v14 }
 0xc8a   : > { %v6900_v39 = vpop.permute.xlu0 %6899 }
 0xc8b   : > { %6933 = vst.msk [vmem:[%s13736_s30 + $0x78] sm:$0xff] %vm6917_vm0, %v6900_v39 }
 0xc8c PF: > { %s23_s25 = sadd.s32 1, %s7728_s25  }
 0xc8d   : > { %p20_p4 = scmp.ge.s32.totalorder %s23_s25, 4  }
 0xc8f   :  { %22 = sbr.rel (!%p20_p4) target bundleno = 1 (0x1), region = 104 }

</bundles_post_ra>
